<compile_context>
chip_gen: v5e
topology: v5e:2x2
jax: 0.10.0
libtpu: 0.0.40
codegen_flags: <defaults>
</compile_context>

<pallas_src>
import functools

import jax
import jax.numpy as jnp
import numpy as np
from jax.experimental import pallas as pl
from jax.experimental.pallas import tpu as pltpu  # noqa: F401  (scaling escape hatch, see notes)

_SELU_ALPHA = 1.6732632423543772848170429916717
_SELU_SCALE = 1.0507009873554804934193349852946
_LN_EPS = 1e-5
_HIGHEST = jax.lax.Precision.HIGHEST


# ----------------------------- in-kernel math helpers -----------------------------

def _selu(x):
    return _SELU_SCALE * jnp.where(x > 0, x, _SELU_ALPHA * (jnp.exp(x) - 1.0))


def _layernorm(x, g, b):
    mu = jnp.mean(x, axis=-1, keepdims=True)
    var = jnp.mean((x - mu) ** 2, axis=-1, keepdims=True)
    return (x - mu) / jnp.sqrt(var + _LN_EPS) * g + b


def _softmax(x):
    m = jnp.max(x, axis=-1, keepdims=True)
    e = jnp.exp(x - m)
    return e / jnp.sum(e, axis=-1, keepdims=True)       # exact denominator


def _mm(a, b):
    return jnp.dot(a, b, precision=_HIGHEST, preferred_element_type=jnp.float32)


# ------------------------------ parameter packing -----------------------------------

def pack_params(params):
    """Pack all weight matrices into one row-stacked (Rw, WMAX) slab and all
    bias / gamma / beta / positional-embedding row vectors into one (Rv, WMAX)
    slab.  Returns (w_slab, v_slab, w_meta, v_meta); the meta dicts map
    name -> (row_offset, n_rows, n_cols) as static Python ints, so the kernel
    carves tensors out with zero-cost static slices.  18 operands -> 3."""
    w_entries, v_entries = [], []
    for i, lyr in enumerate(params["fe"]):
        w_entries.append((f"fe_w{i}", lyr["w"]))
        v_entries += [(f"fe_b{i}", lyr["b"]), (f"fe_g{i}", lyr["g"]), (f"fe_be{i}", lyr["be"])]
    v_entries.append(("pos", params["pos"]))
    for l, lyr in enumerate(params["layers"]):
        w_entries += [(f"wqkv{l}", lyr["wqkv"]), (f"wo{l}", lyr["wo"]),
                      (f"wf1{l}", lyr["wf1"]), (f"wf2{l}", lyr["wf2"])]
        v_entries += [(f"bqkv{l}", lyr["bqkv"]), (f"bo{l}", lyr["bo"]),
                      (f"bf1{l}", lyr["bf1"]), (f"bf2{l}", lyr["bf2"]),
                      (f"g1{l}", lyr["g1"]), (f"be1{l}", lyr["be1"]),
                      (f"g2{l}", lyr["g2"]), (f"be2{l}", lyr["be2"])]
    fd = params["fd"]
    w_entries += [("fd_w1", fd["w1"]), ("fd_w2", fd["w2"])]
    v_entries += [("fd_b1", fd["b1"]), ("fd_g", fd["g"]), ("fd_be", fd["be"]),
                  ("fd_b2", fd["b2"])]

    wmax = max(int(a.shape[-1]) for _, a in (w_entries + v_entries))

    def pack(entries):
        meta, rows, off = {}, [], 0
        for name, arr in entries:
            a = jnp.asarray(arr, jnp.float32)
            if a.ndim == 1:
                a = a[None, :]
            r, c = a.shape
            rows.append(jnp.pad(a, ((0, 0), (0, wmax - c))))
            meta[name] = (off, r, c)
            off += r
        slab = jnp.concatenate(rows, axis=0)
        pad_r = (-slab.shape[0]) % 8                      # round up to a sublane tile
        if pad_r:
            slab = jnp.pad(slab, ((0, pad_r), (0, 0)))
        return slab, meta

    w_slab, w_meta = pack(w_entries)
    v_slab, v_meta = pack(v_entries)
    return w_slab, v_slab, w_meta, v_meta


# --------------------------------- fused kernel ------------------------------------

def fused_forward_kernel(x_ref, w_ref, v_ref, enc_ref, dec_ref, *,
                         batch, seq, num_heads, num_layers, w_meta, v_meta):
    B, T, H, L = batch, seq, num_heads, num_layers

    def W(name):                                         # static slice: zero runtime cost
        r, n, c = w_meta[name]
        return w_ref[r:r + n, 0:c]

    def V(name):                                         # (n_rows, c); n_rows==1 for biases
        r, n, c = v_meta[name]
        return v_ref[r:r + n, 0:c]

    D = w_meta["fe_w0"][2]
    dh = D // H
    scale = 1.0 / float(np.sqrt(dh))

    # ---- frame encoder on flattened (B*T, Din) rows ----
    h = x_ref[...]
    for i in range(3):
        h = _selu(_layernorm(_mm(h, W(f"fe_w{i}")) + V(f"fe_b{i}"),
                             V(f"fe_g{i}"), V(f"fe_be{i}")))

    # ---- encode: per-sample sum over time (one reshape + one reduce) ----
    enc = jnp.sum(h.reshape(B, T, D), axis=1)            # (B, D)
    enc_ref[...] = enc

    # ---- decode glue: broadcast enc over context + output positional embedding ----
    dec = (enc[:, None, :] + V("pos")[None, :, :]).reshape(B * T, D)   # (B*T, D)

    # ---- post-norm transformer encoder layers (PyTorch default, ReLU FF) ----
    for l in range(L):
        qkv = _mm(dec, W(f"wqkv{l}")) + V(f"bqkv{l}")    # (B*T, 3D) — one wide matmul

        def heads(col0):                                 # -> (H*B, T, dh) head-batched layout
            return jnp.concatenate(
                [qkv[:, col0 + hh * dh: col0 + (hh + 1) * dh].reshape(B, T, dh)
                 for hh in range(H)], axis=0)

        q_hb, k_hb, v_hb = heads(0), heads(D), heads(2 * D)
        # ONE batched QK^T, ONE softmax, ONE batched PV over all B*H (flash pattern).
        s = jnp.einsum("btd,bsd->bts", q_hb, k_hb, precision=_HIGHEST) * scale
        p = _softmax(s)                                  # (H*B, T, T)
        o_hb = jnp.einsum("bts,bsd->btd", p, v_hb, precision=_HIGHEST)
        attn = jnp.concatenate(
            [o_hb[hh * B:(hh + 1) * B].reshape(B * T, dh) for hh in range(H)], axis=-1)
        attn = _mm(attn, W(f"wo{l}")) + V(f"bo{l}")      # fused output projection

        x1 = _layernorm(dec + attn, V(f"g1{l}"), V(f"be1{l}"))
        ff = _mm(jnp.maximum(_mm(x1, W(f"wf1{l}")) + V(f"bf1{l}"), 0.0),
                 W(f"wf2{l}")) + V(f"bf2{l}")
        dec = _layernorm(x1 + ff, V(f"g2{l}"), V(f"be2{l}"))

    # ---- frame decoder ----
    h2 = _selu(_layernorm(_mm(dec, W("fd_w1")) + V("fd_b1"), V("fd_g"), V("fd_be")))
    dec_ref[...] = _mm(h2, W("fd_w2")) + V("fd_b2")      # one (B*T, Dout) slab store


# --------------------------------- pallas wrapper -----------------------------------

def motion_chunk_vae_forward(motion_chunk, motion_mask, params, *, num_heads, num_layers):
    # motion_mask is dead code in the reference encode() (early return before mask use).
    del motion_mask
    B, T, Din = motion_chunk.shape
    D = params["fe"][0]["w"].shape[1]
    F = params["layers"][0]["wf1"].shape[1] if params["layers"] else 0
    Dout = params["fd"]["w2"].shape[1]
    dh = D // num_heads

    w_slab, v_slab, w_meta, v_meta = pack_params(params)

    kernel = functools.partial(fused_forward_kernel, batch=B, seq=T,
                               num_heads=num_heads, num_layers=num_layers,
                               w_meta=w_meta, v_meta=v_meta)

    BT = B * T
    flops = 2 * BT * (Din * D + 2 * D * D + D * D + D * Dout)
    flops += num_layers * 2 * BT * (3 * D * D + D * D + 2 * D * F)
    flops += num_layers * 2 * B * num_heads * T * T * dh * 2
    transcendentals = 4 * BT * D + num_layers * num_heads * B * T * T
    bytes_accessed = 4 * (BT * Din + int(w_slab.size) + int(v_slab.size) + B * D + BT * Dout)

    # Single launch, no grid, no BlockSpecs: 3 inputs / 2 outputs, each one whole-array
    # VMEM block (total footprint ~0.3 MiB << VMEM on v5e/v6e/v7x).
    enc, dec2d = pl.pallas_call(
        kernel,
        out_shape=(jax.ShapeDtypeStruct((B, D), jnp.float32),
                   jax.ShapeDtypeStruct((BT, Dout), jnp.float32)),
        cost_estimate=pl.CostEstimate(flops=int(flops),
                                      transcendentals=int(transcendentals),
                                      bytes_accessed=int(bytes_accessed)),
    )(motion_chunk.reshape(BT, Din), w_slab, v_slab)
    return enc, dec2d.reshape(B, T, Dout)                # wrapper reshape is metadata-only


# ------------------------------- parameter init -------------------------------------

def init_params(key, *, input_dim, enc_dim, dim_ff, num_layers, context_len):
    keys = iter(jax.random.split(key, 128))

    def lin_w(fi, fo):
        return jax.random.normal(next(keys), (fi, fo), jnp.float32) / np.sqrt(fi)

    def vec(fo, scale=0.01):
        return scale * jax.random.normal(next(keys), (fo,), jnp.float32)

    def gamma(fo):
        return 1.0 + 0.1 * jax.random.normal(next(keys), (fo,), jnp.float32)

    p = {"fe": [], "layers": [], "fd": {}}
    for fi, fo in [(input_dim, enc_dim), (enc_dim, enc_dim), (enc_dim, enc_dim)]:
        p["fe"].append({"w": lin_w(fi, fo), "b": vec(fo), "g": gamma(fo), "be": vec(fo)})
    p["pos"] = 0.02 * jax.random.normal(next(keys), (context_len, enc_dim), jnp.float32)
    for _ in range(num_layers):
        p["layers"].append({
            "wqkv": jnp.concatenate([lin_w(enc_dim, enc_dim) for _ in range(3)], axis=1),
            "bqkv": vec(3 * enc_dim),
            "wo": lin_w(enc_dim, enc_dim), "bo": vec(enc_dim),
            "wf1": lin_w(enc_dim, dim_ff), "bf1": vec(dim_ff),
            "wf2": lin_w(dim_ff, enc_dim), "bf2": vec(enc_dim),
            "g1": gamma(enc_dim), "be1": vec(enc_dim),
            "g2": gamma(enc_dim), "be2": vec(enc_dim)})
    p["fd"] = {"w1": lin_w(enc_dim, enc_dim), "b1": vec(enc_dim),
               "g": gamma(enc_dim), "be": vec(enc_dim),
               "w2": lin_w(enc_dim, input_dim), "b2": vec(input_dim)}
    return p


# ------------------------------ pure-JAX reference ----------------------------------

def ref_forward(motion_chunk, p, *, num_heads, num_layers):
    hp = _HIGHEST

    def ln(v, g, b):
        mu = jnp.mean(v, -1, keepdims=True)
        var = jnp.mean((v - mu) ** 2, -1, keepdims=True)
        return (v - mu) / jnp.sqrt(var + _LN_EPS) * g + b

    def selu(v):
        return _SELU_SCALE * jnp.where(v > 0, v, _SELU_ALPHA * (jnp.exp(v) - 1.0))

    D = p["fe"][0]["w"].shape[1]
    dh = D // num_heads

    h = motion_chunk
    for lyr in p["fe"]:
        h = selu(ln(jnp.dot(h, lyr["w"], precision=hp) + lyr["b"], lyr["g"], lyr["be"]))
    enc = jnp.sum(h, axis=1)

    dec = enc[:, None, :] + p["pos"][None]
    for lyr in p["layers"]:
        qkv = jnp.dot(dec, lyr["wqkv"], precision=hp) + lyr["bqkv"]
        q, k, v = qkv[..., :D], qkv[..., D:2 * D], qkv[..., 2 * D:]
        heads = []
        for hh in range(num_heads):
            sl = slice(hh * dh, (hh + 1) * dh)
            s = jnp.einsum("btd,bsd->bts", q[..., sl], k[..., sl], precision=hp) / np.sqrt(dh)
            heads.append(jnp.einsum("bts,bsd->btd", jax.nn.softmax(s, -1), v[..., sl],
                                    precision=hp))
        attn = jnp.dot(jnp.concatenate(heads, -1), lyr["wo"], precision=hp) + lyr["bo"]
        x1 = ln(dec + attn, lyr["g1"], lyr["be1"])
        ff = jnp.dot(jnp.maximum(jnp.dot(x1, lyr["wf1"], precision=hp) + lyr["bf1"], 0.0),
                     lyr["wf2"], precision=hp) + lyr["bf2"]
        dec = ln(x1 + ff, lyr["g2"], lyr["be2"])

    fd = p["fd"]
    h2 = selu(ln(jnp.dot(dec, fd["w1"], precision=hp) + fd["b1"], fd["g"], fd["be"]))
    return enc, jnp.dot(h2, fd["w2"], precision=hp) + fd["b2"]


# ------------------------------------- main -----------------------------------------

if __name__ == "__main__":
    num_heads, num_layers = 4, 2
    enc_dim, input_dim, dim_ff = 32, 24, 64
    context_len, B = 8, 2

    key = jax.random.PRNGKey(0)
    kx, km, kp = jax.random.split(key, 3)
    motion_chunk = jax.random.normal(kx, (B, context_len, input_dim), jnp.float32)
    motion_mask = (jax.random.uniform(km, (B, context_len)) > 0.2).astype(jnp.float32)  # unused (dead code)

    params = init_params(kp, input_dim=input_dim, enc_dim=enc_dim, dim_ff=dim_ff,
                         num_layers=num_layers, context_len=context_len)

    fwd = jax.jit(functools.partial(motion_chunk_vae_forward,
                                    num_heads=num_heads, num_layers=num_layers))
    enc, dec = fwd(motion_chunk, motion_mask, params)
    jax.block_until_ready((enc, dec))

    enc_ref, dec_ref = ref_forward(motion_chunk, params,
                                   num_heads=num_heads, num_layers=num_layers)
    np.testing.assert_allclose(np.asarray(enc), np.asarray(enc_ref), rtol=1e-3, atol=1e-3)
    np.testing.assert_allclose(np.asarray(dec), np.asarray(dec_ref), rtol=1e-3, atol=1e-3)

    print("KERNEL_OK")
</pallas_src>

<mosaic_0001>
module attributes {stable_mosaic.version = 11 : i64} {
  func.func @fused_forward_kernel(%arg0: memref<16x24xf32, #tpu.memory_space<vmem>>, %arg1: memref<472x96xf32, #tpu.memory_space<vmem>>, %arg2: memref<40x96xf32, #tpu.memory_space<vmem>>, %arg3: memref<2x32xf32, #tpu.memory_space<vmem>>, %arg4: memref<16x24xf32, #tpu.memory_space<vmem>>) attributes {dimension_semantics = [], scalar_prefetch = 0 : i64, scratch_operands = 0 : i64, tpu.core_type = #tpu.core_type<tc>} {
    %c0 = arith.constant 0 : index
    %c0_0 = arith.constant 0 : index
    %0 = vector.load %arg0[%c0, %c0_0] : memref<16x24xf32, #tpu.memory_space<vmem>>, vector<16x24xf32>
    %c0_1 = arith.constant 0 : index
    %c0_2 = arith.constant 0 : index
    %1 = vector.load %arg1[%c0_1, %c0_2] : memref<472x96xf32, #tpu.memory_space<vmem>>, vector<24x32xf32>
    %cst = arith.constant dense<0.000000e+00> : vector<16x32xf32>
    %2 = tpu.matmul %0, %1, %cst {dimension_numbers = #tpu.dot_dimension_numbers<[1], [0], [0], [1], [0, 0, 1, 1], [], []>, precision = #tpu.contract_precision<fp32>} : vector<16x24xf32>, vector<24x32xf32>, vector<16x32xf32> -> vector<16x32xf32>
    %c0_3 = arith.constant 0 : index
    %c0_4 = arith.constant 0 : index
    %3 = vector.load %arg2[%c0_3, %c0_4] : memref<40x96xf32, #tpu.memory_space<vmem>>, vector<1x32xf32>
    %4 = vector.broadcast %3 : vector<1x32xf32> to vector<16x32xf32>
    %5 = arith.addf %2, %4 : vector<16x32xf32>
    %c1 = arith.constant 1 : index
    %c0_5 = arith.constant 0 : index
    %6 = vector.load %arg2[%c1, %c0_5] : memref<40x96xf32, #tpu.memory_space<vmem>>, vector<1x32xf32>
    %c2 = arith.constant 2 : index
    %c0_6 = arith.constant 0 : index
    %7 = vector.load %arg2[%c2, %c0_6] : memref<40x96xf32, #tpu.memory_space<vmem>>, vector<1x32xf32>
    %cst_7 = arith.constant dense<0.000000e+00> : vector<16xf32>
    %8 = vector.multi_reduction <add>, %5, %cst_7 [1] : vector<16x32xf32> to vector<16xf32>
    %9 = vector.shape_cast %8 : vector<16xf32> to vector<16x1xf32>
    %cst_8 = arith.constant 3.200000e+01 : f32
    %10 = vector.broadcast %cst_8 : f32 to vector<16x1xf32>
    %11 = arith.divf %9, %10 : vector<16x1xf32>
    %12 = vector.broadcast %11 : vector<16x1xf32> to vector<16x32xf32>
    %13 = arith.subf %5, %12 : vector<16x32xf32>
    %14 = arith.mulf %13, %13 : vector<16x32xf32>
    %cst_9 = arith.constant dense<0.000000e+00> : vector<16xf32>
    %15 = vector.multi_reduction <add>, %14, %cst_9 [1] : vector<16x32xf32> to vector<16xf32>
    %16 = vector.shape_cast %15 : vector<16xf32> to vector<16x1xf32>
    %cst_10 = arith.constant 3.200000e+01 : f32
    %17 = vector.broadcast %cst_10 : f32 to vector<16x1xf32>
    %18 = arith.divf %16, %17 : vector<16x1xf32>
    %19 = vector.broadcast %11 : vector<16x1xf32> to vector<16x32xf32>
    %20 = arith.subf %5, %19 : vector<16x32xf32>
    %cst_11 = arith.constant 9.99999974E-6 : f32
    %21 = vector.broadcast %cst_11 : f32 to vector<16x1xf32>
    %22 = arith.addf %18, %21 : vector<16x1xf32>
    %23 = math.sqrt %22 : vector<16x1xf32>
    %24 = vector.broadcast %23 : vector<16x1xf32> to vector<16x32xf32>
    %25 = arith.divf %20, %24 : vector<16x32xf32>
    %26 = vector.broadcast %6 : vector<1x32xf32> to vector<16x32xf32>
    %27 = arith.mulf %25, %26 : vector<16x32xf32>
    %28 = vector.broadcast %7 : vector<1x32xf32> to vector<16x32xf32>
    %29 = arith.addf %27, %28 : vector<16x32xf32>
    %cst_12 = arith.constant 0.000000e+00 : f32
    %30 = vector.broadcast %cst_12 : f32 to vector<16x32xf32>
    %31 = arith.cmpf ogt, %29, %30 : vector<16x32xf32>
    %32 = math.exp %29 : vector<16x32xf32>
    %cst_13 = arith.constant 1.000000e+00 : f32
    %33 = vector.broadcast %cst_13 : f32 to vector<16x32xf32>
    %34 = arith.subf %32, %33 : vector<16x32xf32>
    %cst_14 = arith.constant 1.67326319 : f32
    %35 = vector.broadcast %cst_14 : f32 to vector<16x32xf32>
    %36 = arith.mulf %35, %34 : vector<16x32xf32>
    %37 = arith.select %31, %29, %36 : vector<16x32xi1>, vector<16x32xf32>
    %cst_15 = arith.constant 1.05070102 : f32
    %38 = vector.broadcast %cst_15 : f32 to vector<16x32xf32>
    %39 = arith.mulf %38, %37 : vector<16x32xf32>
    %c24 = arith.constant 24 : index
    %c0_16 = arith.constant 0 : index
    %40 = vector.load %arg1[%c24, %c0_16] : memref<472x96xf32, #tpu.memory_space<vmem>>, vector<32x32xf32>
    %cst_17 = arith.constant dense<0.000000e+00> : vector<16x32xf32>
    %41 = tpu.matmul %39, %40, %cst_17 {dimension_numbers = #tpu.dot_dimension_numbers<[1], [0], [0], [1], [0, 0, 1, 1], [], []>, precision = #tpu.contract_precision<fp32>} : vector<16x32xf32>, vector<32x32xf32>, vector<16x32xf32> -> vector<16x32xf32>
    %c3 = arith.constant 3 : index
    %c0_18 = arith.constant 0 : index
    %42 = vector.load %arg2[%c3, %c0_18] : memref<40x96xf32, #tpu.memory_space<vmem>>, vector<1x32xf32>
    %43 = vector.broadcast %42 : vector<1x32xf32> to vector<16x32xf32>
    %44 = arith.addf %41, %43 : vector<16x32xf32>
    %c4 = arith.constant 4 : index
    %c0_19 = arith.constant 0 : index
    %45 = vector.load %arg2[%c4, %c0_19] : memref<40x96xf32, #tpu.memory_space<vmem>>, vector<1x32xf32>
    %c5 = arith.constant 5 : index
    %c0_20 = arith.constant 0 : index
    %46 = vector.load %arg2[%c5, %c0_20] : memref<40x96xf32, #tpu.memory_space<vmem>>, vector<1x32xf32>
    %cst_21 = arith.constant dense<0.000000e+00> : vector<16xf32>
    %47 = vector.multi_reduction <add>, %44, %cst_21 [1] : vector<16x32xf32> to vector<16xf32>
    %48 = vector.shape_cast %47 : vector<16xf32> to vector<16x1xf32>
    %cst_22 = arith.constant 3.200000e+01 : f32
    %49 = vector.broadcast %cst_22 : f32 to vector<16x1xf32>
    %50 = arith.divf %48, %49 : vector<16x1xf32>
    %51 = vector.broadcast %50 : vector<16x1xf32> to vector<16x32xf32>
    %52 = arith.subf %44, %51 : vector<16x32xf32>
    %53 = arith.mulf %52, %52 : vector<16x32xf32>
    %cst_23 = arith.constant dense<0.000000e+00> : vector<16xf32>
    %54 = vector.multi_reduction <add>, %53, %cst_23 [1] : vector<16x32xf32> to vector<16xf32>
    %55 = vector.shape_cast %54 : vector<16xf32> to vector<16x1xf32>
    %cst_24 = arith.constant 3.200000e+01 : f32
    %56 = vector.broadcast %cst_24 : f32 to vector<16x1xf32>
    %57 = arith.divf %55, %56 : vector<16x1xf32>
    %58 = vector.broadcast %50 : vector<16x1xf32> to vector<16x32xf32>
    %59 = arith.subf %44, %58 : vector<16x32xf32>
    %cst_25 = arith.constant 9.99999974E-6 : f32
    %60 = vector.broadcast %cst_25 : f32 to vector<16x1xf32>
    %61 = arith.addf %57, %60 : vector<16x1xf32>
    %62 = math.sqrt %61 : vector<16x1xf32>
    %63 = vector.broadcast %62 : vector<16x1xf32> to vector<16x32xf32>
    %64 = arith.divf %59, %63 : vector<16x32xf32>
    %65 = vector.broadcast %45 : vector<1x32xf32> to vector<16x32xf32>
    %66 = arith.mulf %64, %65 : vector<16x32xf32>
    %67 = vector.broadcast %46 : vector<1x32xf32> to vector<16x32xf32>
    %68 = arith.addf %66, %67 : vector<16x32xf32>
    %cst_26 = arith.constant 0.000000e+00 : f32
    %69 = vector.broadcast %cst_26 : f32 to vector<16x32xf32>
    %70 = arith.cmpf ogt, %68, %69 : vector<16x32xf32>
    %71 = math.exp %68 : vector<16x32xf32>
    %cst_27 = arith.constant 1.000000e+00 : f32
    %72 = vector.broadcast %cst_27 : f32 to vector<16x32xf32>
    %73 = arith.subf %71, %72 : vector<16x32xf32>
    %cst_28 = arith.constant 1.67326319 : f32
    %74 = vector.broadcast %cst_28 : f32 to vector<16x32xf32>
    %75 = arith.mulf %74, %73 : vector<16x32xf32>
    %76 = arith.select %70, %68, %75 : vector<16x32xi1>, vector<16x32xf32>
    %cst_29 = arith.constant 1.05070102 : f32
    %77 = vector.broadcast %cst_29 : f32 to vector<16x32xf32>
    %78 = arith.mulf %77, %76 : vector<16x32xf32>
    %c56 = arith.constant 56 : index
    %c0_30 = arith.constant 0 : index
    %79 = vector.load %arg1[%c56, %c0_30] : memref<472x96xf32, #tpu.memory_space<vmem>>, vector<32x32xf32>
    %cst_31 = arith.constant dense<0.000000e+00> : vector<16x32xf32>
    %80 = tpu.matmul %78, %79, %cst_31 {dimension_numbers = #tpu.dot_dimension_numbers<[1], [0], [0], [1], [0, 0, 1, 1], [], []>, precision = #tpu.contract_precision<fp32>} : vector<16x32xf32>, vector<32x32xf32>, vector<16x32xf32> -> vector<16x32xf32>
    %c6 = arith.constant 6 : index
    %c0_32 = arith.constant 0 : index
    %81 = vector.load %arg2[%c6, %c0_32] : memref<40x96xf32, #tpu.memory_space<vmem>>, vector<1x32xf32>
    %82 = vector.broadcast %81 : vector<1x32xf32> to vector<16x32xf32>
    %83 = arith.addf %80, %82 : vector<16x32xf32>
    %c7 = arith.constant 7 : index
    %c0_33 = arith.constant 0 : index
    %84 = vector.load %arg2[%c7, %c0_33] : memref<40x96xf32, #tpu.memory_space<vmem>>, vector<1x32xf32>
    %c8 = arith.constant 8 : index
    %c0_34 = arith.constant 0 : index
    %85 = vector.load %arg2[%c8, %c0_34] : memref<40x96xf32, #tpu.memory_space<vmem>>, vector<1x32xf32>
    %cst_35 = arith.constant dense<0.000000e+00> : vector<16xf32>
    %86 = vector.multi_reduction <add>, %83, %cst_35 [1] : vector<16x32xf32> to vector<16xf32>
    %87 = vector.shape_cast %86 : vector<16xf32> to vector<16x1xf32>
    %cst_36 = arith.constant 3.200000e+01 : f32
    %88 = vector.broadcast %cst_36 : f32 to vector<16x1xf32>
    %89 = arith.divf %87, %88 : vector<16x1xf32>
    %90 = vector.broadcast %89 : vector<16x1xf32> to vector<16x32xf32>
    %91 = arith.subf %83, %90 : vector<16x32xf32>
    %92 = arith.mulf %91, %91 : vector<16x32xf32>
    %cst_37 = arith.constant dense<0.000000e+00> : vector<16xf32>
    %93 = vector.multi_reduction <add>, %92, %cst_37 [1] : vector<16x32xf32> to vector<16xf32>
    %94 = vector.shape_cast %93 : vector<16xf32> to vector<16x1xf32>
    %cst_38 = arith.constant 3.200000e+01 : f32
    %95 = vector.broadcast %cst_38 : f32 to vector<16x1xf32>
    %96 = arith.divf %94, %95 : vector<16x1xf32>
    %97 = vector.broadcast %89 : vector<16x1xf32> to vector<16x32xf32>
    %98 = arith.subf %83, %97 : vector<16x32xf32>
    %cst_39 = arith.constant 9.99999974E-6 : f32
    %99 = vector.broadcast %cst_39 : f32 to vector<16x1xf32>
    %100 = arith.addf %96, %99 : vector<16x1xf32>
    %101 = math.sqrt %100 : vector<16x1xf32>
    %102 = vector.broadcast %101 : vector<16x1xf32> to vector<16x32xf32>
    %103 = arith.divf %98, %102 : vector<16x32xf32>
    %104 = vector.broadcast %84 : vector<1x32xf32> to vector<16x32xf32>
    %105 = arith.mulf %103, %104 : vector<16x32xf32>
    %106 = vector.broadcast %85 : vector<1x32xf32> to vector<16x32xf32>
    %107 = arith.addf %105, %106 : vector<16x32xf32>
    %cst_40 = arith.constant 0.000000e+00 : f32
    %108 = vector.broadcast %cst_40 : f32 to vector<16x32xf32>
    %109 = arith.cmpf ogt, %107, %108 : vector<16x32xf32>
    %110 = math.exp %107 : vector<16x32xf32>
    %cst_41 = arith.constant 1.000000e+00 : f32
    %111 = vector.broadcast %cst_41 : f32 to vector<16x32xf32>
    %112 = arith.subf %110, %111 : vector<16x32xf32>
    %cst_42 = arith.constant 1.67326319 : f32
    %113 = vector.broadcast %cst_42 : f32 to vector<16x32xf32>
    %114 = arith.mulf %113, %112 : vector<16x32xf32>
    %115 = arith.select %109, %107, %114 : vector<16x32xi1>, vector<16x32xf32>
    %cst_43 = arith.constant 1.05070102 : f32
    %116 = vector.broadcast %cst_43 : f32 to vector<16x32xf32>
    %117 = arith.mulf %116, %115 : vector<16x32xf32>
    %118 = vector.shape_cast %117 : vector<16x32xf32> to vector<2x8x32xf32>
    %cst_44 = arith.constant dense<0.000000e+00> : vector<2x32xf32>
    %119 = vector.multi_reduction <add>, %118, %cst_44 [1] : vector<2x8x32xf32> to vector<2x32xf32>
    %c0_45 = arith.constant 0 : index
    %c0_46 = arith.constant 0 : index
    %120 = vector.load %arg3[%c0_45, %c0_46] : memref<2x32xf32, #tpu.memory_space<vmem>>, vector<2x32xf32>
    tpu.vector_store %arg3[%c0_45, %c0_46], %119 {strides = array<i32>} : memref<2x32xf32, #tpu.memory_space<vmem>>, vector<2x32xf32>,
    %121 = vector.shape_cast %119 : vector<2x32xf32> to vector<2x1x32xf32>
    %c9 = arith.constant 9 : index
    %c0_47 = arith.constant 0 : index
    %122 = vector.load %arg2[%c9, %c0_47] : memref<40x96xf32, #tpu.memory_space<vmem>>, vector<8x32xf32>
    %123 = vector.shape_cast %122 : vector<8x32xf32> to vector<1x8x32xf32>
    %124 = vector.broadcast %121 : vector<2x1x32xf32> to vector<2x8x32xf32>
    %125 = vector.broadcast %123 : vector<1x8x32xf32> to vector<2x8x32xf32>
    %126 = arith.addf %124, %125 : vector<2x8x32xf32>
    %127 = vector.shape_cast %126 : vector<2x8x32xf32> to vector<16x32xf32>
    %c88 = arith.constant 88 : index
    %c0_48 = arith.constant 0 : index
    %128 = vector.load %arg1[%c88, %c0_48] : memref<472x96xf32, #tpu.memory_space<vmem>>, vector<32x96xf32>
    %cst_49 = arith.constant dense<0.000000e+00> : vector<16x96xf32>
    %129 = tpu.matmul %127, %128, %cst_49 {dimension_numbers = #tpu.dot_dimension_numbers<[1], [0], [0], [1], [0, 0, 1, 1], [], []>, precision = #tpu.contract_precision<fp32>} : vector<16x32xf32>, vector<32x96xf32>, vector<16x96xf32> -> vector<16x96xf32>
    %c17 = arith.constant 17 : index
    %c0_50 = arith.constant 0 : index
    %130 = vector.load %arg2[%c17, %c0_50] : memref<40x96xf32, #tpu.memory_space<vmem>>, vector<1x96xf32>
    %131 = vector.broadcast %130 : vector<1x96xf32> to vector<16x96xf32>
    %132 = arith.addf %129, %131 : vector<16x96xf32>
    %133 = vector.extract_strided_slice %132 {offsets = [0, 0], sizes = [16, 8], strides = [1, 1]} : vector<16x96xf32> to vector<16x8xf32>
    %134 = vector.shape_cast %133 : vector<16x8xf32> to vector<2x8x8xf32>
    %135 = vector.extract_strided_slice %132 {offsets = [0, 8], sizes = [16, 8], strides = [1, 1]} : vector<16x96xf32> to vector<16x8xf32>
    %136 = vector.shape_cast %135 : vector<16x8xf32> to vector<2x8x8xf32>
    %137 = vector.extract_strided_slice %132 {offsets = [0, 16], sizes = [16, 8], strides = [1, 1]} : vector<16x96xf32> to vector<16x8xf32>
    %138 = vector.shape_cast %137 : vector<16x8xf32> to vector<2x8x8xf32>
    %139 = vector.extract_strided_slice %132 {offsets = [0, 24], sizes = [16, 8], strides = [1, 1]} : vector<16x96xf32> to vector<16x8xf32>
    %140 = vector.shape_cast %139 : vector<16x8xf32> to vector<2x8x8xf32>
    %141 = tpu.concatenate %134, %136, %138, %140 in 0 : vector<2x8x8xf32>, vector<2x8x8xf32>, vector<2x8x8xf32>, vector<2x8x8xf32> -> vector<8x8x8xf32>
    %142 = vector.extract_strided_slice %132 {offsets = [0, 32], sizes = [16, 8], strides = [1, 1]} : vector<16x96xf32> to vector<16x8xf32>
    %143 = vector.shape_cast %142 : vector<16x8xf32> to vector<2x8x8xf32>
    %144 = vector.extract_strided_slice %132 {offsets = [0, 40], sizes = [16, 8], strides = [1, 1]} : vector<16x96xf32> to vector<16x8xf32>
    %145 = vector.shape_cast %144 : vector<16x8xf32> to vector<2x8x8xf32>
    %146 = vector.extract_strided_slice %132 {offsets = [0, 48], sizes = [16, 8], strides = [1, 1]} : vector<16x96xf32> to vector<16x8xf32>
    %147 = vector.shape_cast %146 : vector<16x8xf32> to vector<2x8x8xf32>
    %148 = vector.extract_strided_slice %132 {offsets = [0, 56], sizes = [16, 8], strides = [1, 1]} : vector<16x96xf32> to vector<16x8xf32>
    %149 = vector.shape_cast %148 : vector<16x8xf32> to vector<2x8x8xf32>
    %150 = tpu.concatenate %143, %145, %147, %149 in 0 : vector<2x8x8xf32>, vector<2x8x8xf32>, vector<2x8x8xf32>, vector<2x8x8xf32> -> vector<8x8x8xf32>
    %151 = vector.extract_strided_slice %132 {offsets = [0, 64], sizes = [16, 8], strides = [1, 1]} : vector<16x96xf32> to vector<16x8xf32>
    %152 = vector.shape_cast %151 : vector<16x8xf32> to vector<2x8x8xf32>
    %153 = vector.extract_strided_slice %132 {offsets = [0, 72], sizes = [16, 8], strides = [1, 1]} : vector<16x96xf32> to vector<16x8xf32>
    %154 = vector.shape_cast %153 : vector<16x8xf32> to vector<2x8x8xf32>
    %155 = vector.extract_strided_slice %132 {offsets = [0, 80], sizes = [16, 8], strides = [1, 1]} : vector<16x96xf32> to vector<16x8xf32>
    %156 = vector.shape_cast %155 : vector<16x8xf32> to vector<2x8x8xf32>
    %157 = vector.extract_strided_slice %132 {offsets = [0, 88], sizes = [16, 8], strides = [1, 1]} : vector<16x96xf32> to vector<16x8xf32>
    %158 = vector.shape_cast %157 : vector<16x8xf32> to vector<2x8x8xf32>
    %159 = tpu.concatenate %152, %154, %156, %158 in 0 : vector<2x8x8xf32>, vector<2x8x8xf32>, vector<2x8x8xf32>, vector<2x8x8xf32> -> vector<8x8x8xf32>
    "tpu.trace_start"() <{level = 10 : i32, message = "btd,bsd->bts"}> : () -> ()
    %cst_51 = arith.constant dense<0.000000e+00> : vector<8x8x8xf32>
    %160 = tpu.matmul %141, %150, %cst_51 {dimension_numbers = #tpu.dot_dimension_numbers<[2], [2], [1], [1], [0, 0, 0, 1, 1, 1], [0], [0]>, precision = #tpu.contract_precision<fp32>} : vector<8x8x8xf32>, vector<8x8x8xf32>, vector<8x8x8xf32> -> vector<8x8x8xf32>
    "tpu.trace_stop"() : () -> ()
    %cst_52 = arith.constant 0.353553385 : f32
    %161 = vector.broadcast %cst_52 : f32 to vector<8x8x8xf32>
    %162 = arith.mulf %160, %161 : vector<8x8x8xf32>
    %cst_53 = arith.constant dense<0xFF800000> : vector<8x8xf32>
    %163 = vector.multi_reduction <maximumf>, %162, %cst_53 [2] : vector<8x8x8xf32> to vector<8x8xf32>
    %164 = vector.shape_cast %163 : vector<8x8xf32> to vector<8x8x1xf32>
    %165 = vector.broadcast %164 : vector<8x8x1xf32> to vector<8x8x8xf32>
    %166 = arith.subf %162, %165 : vector<8x8x8xf32>
    %167 = math.exp %166 : vector<8x8x8xf32>
    %cst_54 = arith.constant dense<0.000000e+00> : vector<8x8xf32>
    %168 = vector.multi_reduction <add>, %167, %cst_54 [2] : vector<8x8x8xf32> to vector<8x8xf32>
    %169 = vector.shape_cast %168 : vector<8x8xf32> to vector<8x8x1xf32>
    %170 = vector.broadcast %169 : vector<8x8x1xf32> to vector<8x8x8xf32>
    %171 = arith.divf %167, %170 : vector<8x8x8xf32>
    "tpu.trace_start"() <{level = 10 : i32, message = "bts,bsd->btd"}> : () -> ()
    %cst_55 = arith.constant dense<0.000000e+00> : vector<8x8x8xf32>
    %172 = tpu.matmul %171, %159, %cst_55 {dimension_numbers = #tpu.dot_dimension_numbers<[2], [1], [1], [2], [0, 0, 0, 1, 1, 2], [0], [0]>, precision = #tpu.contract_precision<fp32>} : vector<8x8x8xf32>, vector<8x8x8xf32>, vector<8x8x8xf32> -> vector<8x8x8xf32>
    "tpu.trace_stop"() : () -> ()
    %173 = vector.extract_strided_slice %172 {offsets = [0, 0, 0], sizes = [2, 8, 8], strides = [1, 1, 1]} : vector<8x8x8xf32> to vector<2x8x8xf32>
    %174 = vector.shape_cast %173 : vector<2x8x8xf32> to vector<16x8xf32>
    %175 = vector.extract_strided_slice %172 {offsets = [2, 0, 0], sizes = [2, 8, 8], strides = [1, 1, 1]} : vector<8x8x8xf32> to vector<2x8x8xf32>
    %176 = vector.shape_cast %175 : vector<2x8x8xf32> to vector<16x8xf32>
    %177 = vector.extract_strided_slice %172 {offsets = [4, 0, 0], sizes = [2, 8, 8], strides = [1, 1, 1]} : vector<8x8x8xf32> to vector<2x8x8xf32>
    %178 = vector.shape_cast %177 : vector<2x8x8xf32> to vector<16x8xf32>
    %179 = vector.extract_strided_slice %172 {offsets = [6, 0, 0], sizes = [2, 8, 8], strides = [1, 1, 1]} : vector<8x8x8xf32> to vector<2x8x8xf32>
    %180 = vector.shape_cast %179 : vector<2x8x8xf32> to vector<16x8xf32>
    %181 = tpu.concatenate %174, %176, %178, %180 in 1 : vector<16x8xf32>, vector<16x8xf32>, vector<16x8xf32>, vector<16x8xf32> -> vector<16x32xf32>
    %c120 = arith.constant 120 : index
    %c0_56 = arith.constant 0 : index
    %182 = vector.load %arg1[%c120, %c0_56] : memref<472x96xf32, #tpu.memory_space<vmem>>, vector<32x32xf32>
    %cst_57 = arith.constant dense<0.000000e+00> : vector<16x32xf32>
    %183 = tpu.matmul %181, %182, %cst_57 {dimension_numbers = #tpu.dot_dimension_numbers<[1], [0], [0], [1], [0, 0, 1, 1], [], []>, precision = #tpu.contract_precision<fp32>} : vector<16x32xf32>, vector<32x32xf32>, vector<16x32xf32> -> vector<16x32xf32>
    %c18 = arith.constant 18 : index
    %c0_58 = arith.constant 0 : index
    %184 = vector.load %arg2[%c18, %c0_58] : memref<40x96xf32, #tpu.memory_space<vmem>>, vector<1x32xf32>
    %185 = vector.broadcast %184 : vector<1x32xf32> to vector<16x32xf32>
    %186 = arith.addf %183, %185 : vector<16x32xf32>
    %187 = arith.addf %127, %186 : vector<16x32xf32>
    %c21 = arith.constant 21 : index
    %c0_59 = arith.constant 0 : index
    %188 = vector.load %arg2[%c21, %c0_59] : memref<40x96xf32, #tpu.memory_space<vmem>>, vector<1x32xf32>
    %c22 = arith.constant 22 : index
    %c0_60 = arith.constant 0 : index
    %189 = vector.load %arg2[%c22, %c0_60] : memref<40x96xf32, #tpu.memory_space<vmem>>, vector<1x32xf32>
    %cst_61 = arith.constant dense<0.000000e+00> : vector<16xf32>
    %190 = vector.multi_reduction <add>, %187, %cst_61 [1] : vector<16x32xf32> to vector<16xf32>
    %191 = vector.shape_cast %190 : vector<16xf32> to vector<16x1xf32>
    %cst_62 = arith.constant 3.200000e+01 : f32
    %192 = vector.broadcast %cst_62 : f32 to vector<16x1xf32>
    %193 = arith.divf %191, %192 : vector<16x1xf32>
    %194 = vector.broadcast %193 : vector<16x1xf32> to vector<16x32xf32>
    %195 = arith.subf %187, %194 : vector<16x32xf32>
    %196 = arith.mulf %195, %195 : vector<16x32xf32>
    %cst_63 = arith.constant dense<0.000000e+00> : vector<16xf32>
    %197 = vector.multi_reduction <add>, %196, %cst_63 [1] : vector<16x32xf32> to vector<16xf32>
    %198 = vector.shape_cast %197 : vector<16xf32> to vector<16x1xf32>
    %cst_64 = arith.constant 3.200000e+01 : f32
    %199 = vector.broadcast %cst_64 : f32 to vector<16x1xf32>
    %200 = arith.divf %198, %199 : vector<16x1xf32>
    %201 = vector.broadcast %193 : vector<16x1xf32> to vector<16x32xf32>
    %202 = arith.subf %187, %201 : vector<16x32xf32>
    %cst_65 = arith.constant 9.99999974E-6 : f32
    %203 = vector.broadcast %cst_65 : f32 to vector<16x1xf32>
    %204 = arith.addf %200, %203 : vector<16x1xf32>
    %205 = math.sqrt %204 : vector<16x1xf32>
    %206 = vector.broadcast %205 : vector<16x1xf32> to vector<16x32xf32>
    %207 = arith.divf %202, %206 : vector<16x32xf32>
    %208 = vector.broadcast %188 : vector<1x32xf32> to vector<16x32xf32>
    %209 = arith.mulf %207, %208 : vector<16x32xf32>
    %210 = vector.broadcast %189 : vector<1x32xf32> to vector<16x32xf32>
    %211 = arith.addf %209, %210 : vector<16x32xf32>
    %c152 = arith.constant 152 : index
    %c0_66 = arith.constant 0 : index
    %212 = vector.load %arg1[%c152, %c0_66] : memref<472x96xf32, #tpu.memory_space<vmem>>, vector<32x64xf32>
    %cst_67 = arith.constant dense<0.000000e+00> : vector<16x64xf32>
    %213 = tpu.matmul %211, %212, %cst_67 {dimension_numbers = #tpu.dot_dimension_numbers<[1], [0], [0], [1], [0, 0, 1, 1], [], []>, precision = #tpu.contract_precision<fp32>} : vector<16x32xf32>, vector<32x64xf32>, vector<16x64xf32> -> vector<16x64xf32>
    %c19 = arith.constant 19 : index
    %c0_68 = arith.constant 0 : index
    %214 = vector.load %arg2[%c19, %c0_68] : memref<40x96xf32, #tpu.memory_space<vmem>>, vector<1x64xf32>
    %215 = vector.broadcast %214 : vector<1x64xf32> to vector<16x64xf32>
    %216 = arith.addf %213, %215 : vector<16x64xf32>
    %cst_69 = arith.constant 0.000000e+00 : f32
    %217 = vector.broadcast %cst_69 : f32 to vector<16x64xf32>
    %218 = arith.maximumf %216, %217 : vector<16x64xf32>
    %c184 = arith.constant 184 : index
    %c0_70 = arith.constant 0 : index
    %219 = vector.load %arg1[%c184, %c0_70] : memref<472x96xf32, #tpu.memory_space<vmem>>, vector<64x32xf32>
    %cst_71 = arith.constant dense<0.000000e+00> : vector<16x32xf32>
    %220 = tpu.matmul %218, %219, %cst_71 {dimension_numbers = #tpu.dot_dimension_numbers<[1], [0], [0], [1], [0, 0, 1, 1], [], []>, precision = #tpu.contract_precision<fp32>} : vector<16x64xf32>, vector<64x32xf32>, vector<16x32xf32> -> vector<16x32xf32>
    %c20 = arith.constant 20 : index
    %c0_72 = arith.constant 0 : index
    %221 = vector.load %arg2[%c20, %c0_72] : memref<40x96xf32, #tpu.memory_space<vmem>>, vector<1x32xf32>
    %222 = vector.broadcast %221 : vector<1x32xf32> to vector<16x32xf32>
    %223 = arith.addf %220, %222 : vector<16x32xf32>
    %224 = arith.addf %211, %223 : vector<16x32xf32>
    %c23 = arith.constant 23 : index
    %c0_73 = arith.constant 0 : index
    %225 = vector.load %arg2[%c23, %c0_73] : memref<40x96xf32, #tpu.memory_space<vmem>>, vector<1x32xf32>
    %c24_74 = arith.constant 24 : index
    %c0_75 = arith.constant 0 : index
    %226 = vector.load %arg2[%c24_74, %c0_75] : memref<40x96xf32, #tpu.memory_space<vmem>>, vector<1x32xf32>
    %cst_76 = arith.constant dense<0.000000e+00> : vector<16xf32>
    %227 = vector.multi_reduction <add>, %224, %cst_76 [1] : vector<16x32xf32> to vector<16xf32>
    %228 = vector.shape_cast %227 : vector<16xf32> to vector<16x1xf32>
    %cst_77 = arith.constant 3.200000e+01 : f32
    %229 = vector.broadcast %cst_77 : f32 to vector<16x1xf32>
    %230 = arith.divf %228, %229 : vector<16x1xf32>
    %231 = vector.broadcast %230 : vector<16x1xf32> to vector<16x32xf32>
    %232 = arith.subf %224, %231 : vector<16x32xf32>
    %233 = arith.mulf %232, %232 : vector<16x32xf32>
    %cst_78 = arith.constant dense<0.000000e+00> : vector<16xf32>
    %234 = vector.multi_reduction <add>, %233, %cst_78 [1] : vector<16x32xf32> to vector<16xf32>
    %235 = vector.shape_cast %234 : vector<16xf32> to vector<16x1xf32>
    %cst_79 = arith.constant 3.200000e+01 : f32
    %236 = vector.broadcast %cst_79 : f32 to vector<16x1xf32>
    %237 = arith.divf %235, %236 : vector<16x1xf32>
    %238 = vector.broadcast %230 : vector<16x1xf32> to vector<16x32xf32>
    %239 = arith.subf %224, %238 : vector<16x32xf32>
    %cst_80 = arith.constant 9.99999974E-6 : f32
    %240 = vector.broadcast %cst_80 : f32 to vector<16x1xf32>
    %241 = arith.addf %237, %240 : vector<16x1xf32>
    %242 = math.sqrt %241 : vector<16x1xf32>
    %243 = vector.broadcast %242 : vector<16x1xf32> to vector<16x32xf32>
    %244 = arith.divf %239, %243 : vector<16x32xf32>
    %245 = vector.broadcast %225 : vector<1x32xf32> to vector<16x32xf32>
    %246 = arith.mulf %244, %245 : vector<16x32xf32>
    %247 = vector.broadcast %226 : vector<1x32xf32> to vector<16x32xf32>
    %248 = arith.addf %246, %247 : vector<16x32xf32>
    %c248 = arith.constant 248 : index
    %c0_81 = arith.constant 0 : index
    %249 = vector.load %arg1[%c248, %c0_81] : memref<472x96xf32, #tpu.memory_space<vmem>>, vector<32x96xf32>
    %cst_82 = arith.constant dense<0.000000e+00> : vector<16x96xf32>
    %250 = tpu.matmul %248, %249, %cst_82 {dimension_numbers = #tpu.dot_dimension_numbers<[1], [0], [0], [1], [0, 0, 1, 1], [], []>, precision = #tpu.contract_precision<fp32>} : vector<16x32xf32>, vector<32x96xf32>, vector<16x96xf32> -> vector<16x96xf32>
    %c25 = arith.constant 25 : index
    %c0_83 = arith.constant 0 : index
    %251 = vector.load %arg2[%c25, %c0_83] : memref<40x96xf32, #tpu.memory_space<vmem>>, vector<1x96xf32>
    %252 = vector.broadcast %251 : vector<1x96xf32> to vector<16x96xf32>
    %253 = arith.addf %250, %252 : vector<16x96xf32>
    %254 = vector.extract_strided_slice %253 {offsets = [0, 0], sizes = [16, 8], strides = [1, 1]} : vector<16x96xf32> to vector<16x8xf32>
    %255 = vector.shape_cast %254 : vector<16x8xf32> to vector<2x8x8xf32>
    %256 = vector.extract_strided_slice %253 {offsets = [0, 8], sizes = [16, 8], strides = [1, 1]} : vector<16x96xf32> to vector<16x8xf32>
    %257 = vector.shape_cast %256 : vector<16x8xf32> to vector<2x8x8xf32>
    %258 = vector.extract_strided_slice %253 {offsets = [0, 16], sizes = [16, 8], strides = [1, 1]} : vector<16x96xf32> to vector<16x8xf32>
    %259 = vector.shape_cast %258 : vector<16x8xf32> to vector<2x8x8xf32>
    %260 = vector.extract_strided_slice %253 {offsets = [0, 24], sizes = [16, 8], strides = [1, 1]} : vector<16x96xf32> to vector<16x8xf32>
    %261 = vector.shape_cast %260 : vector<16x8xf32> to vector<2x8x8xf32>
    %262 = tpu.concatenate %255, %257, %259, %261 in 0 : vector<2x8x8xf32>, vector<2x8x8xf32>, vector<2x8x8xf32>, vector<2x8x8xf32> -> vector<8x8x8xf32>
    %263 = vector.extract_strided_slice %253 {offsets = [0, 32], sizes = [16, 8], strides = [1, 1]} : vector<16x96xf32> to vector<16x8xf32>
    %264 = vector.shape_cast %263 : vector<16x8xf32> to vector<2x8x8xf32>
    %265 = vector.extract_strided_slice %253 {offsets = [0, 40], sizes = [16, 8], strides = [1, 1]} : vector<16x96xf32> to vector<16x8xf32>
    %266 = vector.shape_cast %265 : vector<16x8xf32> to vector<2x8x8xf32>
    %267 = vector.extract_strided_slice %253 {offsets = [0, 48], sizes = [16, 8], strides = [1, 1]} : vector<16x96xf32> to vector<16x8xf32>
    %268 = vector.shape_cast %267 : vector<16x8xf32> to vector<2x8x8xf32>
    %269 = vector.extract_strided_slice %253 {offsets = [0, 56], sizes = [16, 8], strides = [1, 1]} : vector<16x96xf32> to vector<16x8xf32>
    %270 = vector.shape_cast %269 : vector<16x8xf32> to vector<2x8x8xf32>
    %271 = tpu.concatenate %264, %266, %268, %270 in 0 : vector<2x8x8xf32>, vector<2x8x8xf32>, vector<2x8x8xf32>, vector<2x8x8xf32> -> vector<8x8x8xf32>
    %272 = vector.extract_strided_slice %253 {offsets = [0, 64], sizes = [16, 8], strides = [1, 1]} : vector<16x96xf32> to vector<16x8xf32>
    %273 = vector.shape_cast %272 : vector<16x8xf32> to vector<2x8x8xf32>
    %274 = vector.extract_strided_slice %253 {offsets = [0, 72], sizes = [16, 8], strides = [1, 1]} : vector<16x96xf32> to vector<16x8xf32>
    %275 = vector.shape_cast %274 : vector<16x8xf32> to vector<2x8x8xf32>
    %276 = vector.extract_strided_slice %253 {offsets = [0, 80], sizes = [16, 8], strides = [1, 1]} : vector<16x96xf32> to vector<16x8xf32>
    %277 = vector.shape_cast %276 : vector<16x8xf32> to vector<2x8x8xf32>
    %278 = vector.extract_strided_slice %253 {offsets = [0, 88], sizes = [16, 8], strides = [1, 1]} : vector<16x96xf32> to vector<16x8xf32>
    %279 = vector.shape_cast %278 : vector<16x8xf32> to vector<2x8x8xf32>
    %280 = tpu.concatenate %273, %275, %277, %279 in 0 : vector<2x8x8xf32>, vector<2x8x8xf32>, vector<2x8x8xf32>, vector<2x8x8xf32> -> vector<8x8x8xf32>
    "tpu.trace_start"() <{level = 10 : i32, message = "btd,bsd->bts"}> : () -> ()
    %cst_84 = arith.constant dense<0.000000e+00> : vector<8x8x8xf32>
    %281 = tpu.matmul %262, %271, %cst_84 {dimension_numbers = #tpu.dot_dimension_numbers<[2], [2], [1], [1], [0, 0, 0, 1, 1, 1], [0], [0]>, precision = #tpu.contract_precision<fp32>} : vector<8x8x8xf32>, vector<8x8x8xf32>, vector<8x8x8xf32> -> vector<8x8x8xf32>
    "tpu.trace_stop"() : () -> ()
    %cst_85 = arith.constant 0.353553385 : f32
    %282 = vector.broadcast %cst_85 : f32 to vector<8x8x8xf32>
    %283 = arith.mulf %281, %282 : vector<8x8x8xf32>
    %cst_86 = arith.constant dense<0xFF800000> : vector<8x8xf32>
    %284 = vector.multi_reduction <maximumf>, %283, %cst_86 [2] : vector<8x8x8xf32> to vector<8x8xf32>
    %285 = vector.shape_cast %284 : vector<8x8xf32> to vector<8x8x1xf32>
    %286 = vector.broadcast %285 : vector<8x8x1xf32> to vector<8x8x8xf32>
    %287 = arith.subf %283, %286 : vector<8x8x8xf32>
    %288 = math.exp %287 : vector<8x8x8xf32>
    %cst_87 = arith.constant dense<0.000000e+00> : vector<8x8xf32>
    %289 = vector.multi_reduction <add>, %288, %cst_87 [2] : vector<8x8x8xf32> to vector<8x8xf32>
    %290 = vector.shape_cast %289 : vector<8x8xf32> to vector<8x8x1xf32>
    %291 = vector.broadcast %290 : vector<8x8x1xf32> to vector<8x8x8xf32>
    %292 = arith.divf %288, %291 : vector<8x8x8xf32>
    "tpu.trace_start"() <{level = 10 : i32, message = "bts,bsd->btd"}> : () -> ()
    %cst_88 = arith.constant dense<0.000000e+00> : vector<8x8x8xf32>
    %293 = tpu.matmul %292, %280, %cst_88 {dimension_numbers = #tpu.dot_dimension_numbers<[2], [1], [1], [2], [0, 0, 0, 1, 1, 2], [0], [0]>, precision = #tpu.contract_precision<fp32>} : vector<8x8x8xf32>, vector<8x8x8xf32>, vector<8x8x8xf32> -> vector<8x8x8xf32>
    "tpu.trace_stop"() : () -> ()
    %294 = vector.extract_strided_slice %293 {offsets = [0, 0, 0], sizes = [2, 8, 8], strides = [1, 1, 1]} : vector<8x8x8xf32> to vector<2x8x8xf32>
    %295 = vector.shape_cast %294 : vector<2x8x8xf32> to vector<16x8xf32>
    %296 = vector.extract_strided_slice %293 {offsets = [2, 0, 0], sizes = [2, 8, 8], strides = [1, 1, 1]} : vector<8x8x8xf32> to vector<2x8x8xf32>
    %297 = vector.shape_cast %296 : vector<2x8x8xf32> to vector<16x8xf32>
    %298 = vector.extract_strided_slice %293 {offsets = [4, 0, 0], sizes = [2, 8, 8], strides = [1, 1, 1]} : vector<8x8x8xf32> to vector<2x8x8xf32>
    %299 = vector.shape_cast %298 : vector<2x8x8xf32> to vector<16x8xf32>
    %300 = vector.extract_strided_slice %293 {offsets = [6, 0, 0], sizes = [2, 8, 8], strides = [1, 1, 1]} : vector<8x8x8xf32> to vector<2x8x8xf32>
    %301 = vector.shape_cast %300 : vector<2x8x8xf32> to vector<16x8xf32>
    %302 = tpu.concatenate %295, %297, %299, %301 in 1 : vector<16x8xf32>, vector<16x8xf32>, vector<16x8xf32>, vector<16x8xf32> -> vector<16x32xf32>
    %c280 = arith.constant 280 : index
    %c0_89 = arith.constant 0 : index
    %303 = vector.load %arg1[%c280, %c0_89] : memref<472x96xf32, #tpu.memory_space<vmem>>, vector<32x32xf32>
    %cst_90 = arith.constant dense<0.000000e+00> : vector<16x32xf32>
    %304 = tpu.matmul %302, %303, %cst_90 {dimension_numbers = #tpu.dot_dimension_numbers<[1], [0], [0], [1], [0, 0, 1, 1], [], []>, precision = #tpu.contract_precision<fp32>} : vector<16x32xf32>, vector<32x32xf32>, vector<16x32xf32> -> vector<16x32xf32>
    %c26 = arith.constant 26 : index
    %c0_91 = arith.constant 0 : index
    %305 = vector.load %arg2[%c26, %c0_91] : memref<40x96xf32, #tpu.memory_space<vmem>>, vector<1x32xf32>
    %306 = vector.broadcast %305 : vector<1x32xf32> to vector<16x32xf32>
    %307 = arith.addf %304, %306 : vector<16x32xf32>
    %308 = arith.addf %248, %307 : vector<16x32xf32>
    %c29 = arith.constant 29 : index
    %c0_92 = arith.constant 0 : index
    %309 = vector.load %arg2[%c29, %c0_92] : memref<40x96xf32, #tpu.memory_space<vmem>>, vector<1x32xf32>
    %c30 = arith.constant 30 : index
    %c0_93 = arith.constant 0 : index
    %310 = vector.load %arg2[%c30, %c0_93] : memref<40x96xf32, #tpu.memory_space<vmem>>, vector<1x32xf32>
    %cst_94 = arith.constant dense<0.000000e+00> : vector<16xf32>
    %311 = vector.multi_reduction <add>, %308, %cst_94 [1] : vector<16x32xf32> to vector<16xf32>
    %312 = vector.shape_cast %311 : vector<16xf32> to vector<16x1xf32>
    %cst_95 = arith.constant 3.200000e+01 : f32
    %313 = vector.broadcast %cst_95 : f32 to vector<16x1xf32>
    %314 = arith.divf %312, %313 : vector<16x1xf32>
    %315 = vector.broadcast %314 : vector<16x1xf32> to vector<16x32xf32>
    %316 = arith.subf %308, %315 : vector<16x32xf32>
    %317 = arith.mulf %316, %316 : vector<16x32xf32>
    %cst_96 = arith.constant dense<0.000000e+00> : vector<16xf32>
    %318 = vector.multi_reduction <add>, %317, %cst_96 [1] : vector<16x32xf32> to vector<16xf32>
    %319 = vector.shape_cast %318 : vector<16xf32> to vector<16x1xf32>
    %cst_97 = arith.constant 3.200000e+01 : f32
    %320 = vector.broadcast %cst_97 : f32 to vector<16x1xf32>
    %321 = arith.divf %319, %320 : vector<16x1xf32>
    %322 = vector.broadcast %314 : vector<16x1xf32> to vector<16x32xf32>
    %323 = arith.subf %308, %322 : vector<16x32xf32>
    %cst_98 = arith.constant 9.99999974E-6 : f32
    %324 = vector.broadcast %cst_98 : f32 to vector<16x1xf32>
    %325 = arith.addf %321, %324 : vector<16x1xf32>
    %326 = math.sqrt %325 : vector<16x1xf32>
    %327 = vector.broadcast %326 : vector<16x1xf32> to vector<16x32xf32>
    %328 = arith.divf %323, %327 : vector<16x32xf32>
    %329 = vector.broadcast %309 : vector<1x32xf32> to vector<16x32xf32>
    %330 = arith.mulf %328, %329 : vector<16x32xf32>
    %331 = vector.broadcast %310 : vector<1x32xf32> to vector<16x32xf32>
    %332 = arith.addf %330, %331 : vector<16x32xf32>
    %c312 = arith.constant 312 : index
    %c0_99 = arith.constant 0 : index
    %333 = vector.load %arg1[%c312, %c0_99] : memref<472x96xf32, #tpu.memory_space<vmem>>, vector<32x64xf32>
    %cst_100 = arith.constant dense<0.000000e+00> : vector<16x64xf32>
    %334 = tpu.matmul %332, %333, %cst_100 {dimension_numbers = #tpu.dot_dimension_numbers<[1], [0], [0], [1], [0, 0, 1, 1], [], []>, precision = #tpu.contract_precision<fp32>} : vector<16x32xf32>, vector<32x64xf32>, vector<16x64xf32> -> vector<16x64xf32>
    %c27 = arith.constant 27 : index
    %c0_101 = arith.constant 0 : index
    %335 = vector.load %arg2[%c27, %c0_101] : memref<40x96xf32, #tpu.memory_space<vmem>>, vector<1x64xf32>
    %336 = vector.broadcast %335 : vector<1x64xf32> to vector<16x64xf32>
    %337 = arith.addf %334, %336 : vector<16x64xf32>
    %cst_102 = arith.constant 0.000000e+00 : f32
    %338 = vector.broadcast %cst_102 : f32 to vector<16x64xf32>
    %339 = arith.maximumf %337, %338 : vector<16x64xf32>
    %c344 = arith.constant 344 : index
    %c0_103 = arith.constant 0 : index
    %340 = vector.load %arg1[%c344, %c0_103] : memref<472x96xf32, #tpu.memory_space<vmem>>, vector<64x32xf32>
    %cst_104 = arith.constant dense<0.000000e+00> : vector<16x32xf32>
    %341 = tpu.matmul %339, %340, %cst_104 {dimension_numbers = #tpu.dot_dimension_numbers<[1], [0], [0], [1], [0, 0, 1, 1], [], []>, precision = #tpu.contract_precision<fp32>} : vector<16x64xf32>, vector<64x32xf32>, vector<16x32xf32> -> vector<16x32xf32>
    %c28 = arith.constant 28 : index
    %c0_105 = arith.constant 0 : index
    %342 = vector.load %arg2[%c28, %c0_105] : memref<40x96xf32, #tpu.memory_space<vmem>>, vector<1x32xf32>
    %343 = vector.broadcast %342 : vector<1x32xf32> to vector<16x32xf32>
    %344 = arith.addf %341, %343 : vector<16x32xf32>
    %345 = arith.addf %332, %344 : vector<16x32xf32>
    %c31 = arith.constant 31 : index
    %c0_106 = arith.constant 0 : index
    %346 = vector.load %arg2[%c31, %c0_106] : memref<40x96xf32, #tpu.memory_space<vmem>>, vector<1x32xf32>
    %c32 = arith.constant 32 : index
    %c0_107 = arith.constant 0 : index
    %347 = vector.load %arg2[%c32, %c0_107] : memref<40x96xf32, #tpu.memory_space<vmem>>, vector<1x32xf32>
    %cst_108 = arith.constant dense<0.000000e+00> : vector<16xf32>
    %348 = vector.multi_reduction <add>, %345, %cst_108 [1] : vector<16x32xf32> to vector<16xf32>
    %349 = vector.shape_cast %348 : vector<16xf32> to vector<16x1xf32>
    %cst_109 = arith.constant 3.200000e+01 : f32
    %350 = vector.broadcast %cst_109 : f32 to vector<16x1xf32>
    %351 = arith.divf %349, %350 : vector<16x1xf32>
    %352 = vector.broadcast %351 : vector<16x1xf32> to vector<16x32xf32>
    %353 = arith.subf %345, %352 : vector<16x32xf32>
    %354 = arith.mulf %353, %353 : vector<16x32xf32>
    %cst_110 = arith.constant dense<0.000000e+00> : vector<16xf32>
    %355 = vector.multi_reduction <add>, %354, %cst_110 [1] : vector<16x32xf32> to vector<16xf32>
    %356 = vector.shape_cast %355 : vector<16xf32> to vector<16x1xf32>
    %cst_111 = arith.constant 3.200000e+01 : f32
    %357 = vector.broadcast %cst_111 : f32 to vector<16x1xf32>
    %358 = arith.divf %356, %357 : vector<16x1xf32>
    %359 = vector.broadcast %351 : vector<16x1xf32> to vector<16x32xf32>
    %360 = arith.subf %345, %359 : vector<16x32xf32>
    %cst_112 = arith.constant 9.99999974E-6 : f32
    %361 = vector.broadcast %cst_112 : f32 to vector<16x1xf32>
    %362 = arith.addf %358, %361 : vector<16x1xf32>
    %363 = math.sqrt %362 : vector<16x1xf32>
    %364 = vector.broadcast %363 : vector<16x1xf32> to vector<16x32xf32>
    %365 = arith.divf %360, %364 : vector<16x32xf32>
    %366 = vector.broadcast %346 : vector<1x32xf32> to vector<16x32xf32>
    %367 = arith.mulf %365, %366 : vector<16x32xf32>
    %368 = vector.broadcast %347 : vector<1x32xf32> to vector<16x32xf32>
    %369 = arith.addf %367, %368 : vector<16x32xf32>
    %c408 = arith.constant 408 : index
    %c0_113 = arith.constant 0 : index
    %370 = vector.load %arg1[%c408, %c0_113] : memref<472x96xf32, #tpu.memory_space<vmem>>, vector<32x32xf32>
    %cst_114 = arith.constant dense<0.000000e+00> : vector<16x32xf32>
    %371 = tpu.matmul %369, %370, %cst_114 {dimension_numbers = #tpu.dot_dimension_numbers<[1], [0], [0], [1], [0, 0, 1, 1], [], []>, precision = #tpu.contract_precision<fp32>} : vector<16x32xf32>, vector<32x32xf32>, vector<16x32xf32> -> vector<16x32xf32>
    %c33 = arith.constant 33 : index
    %c0_115 = arith.constant 0 : index
    %372 = vector.load %arg2[%c33, %c0_115] : memref<40x96xf32, #tpu.memory_space<vmem>>, vector<1x32xf32>
    %373 = vector.broadcast %372 : vector<1x32xf32> to vector<16x32xf32>
    %374 = arith.addf %371, %373 : vector<16x32xf32>
    %c34 = arith.constant 34 : index
    %c0_116 = arith.constant 0 : index
    %375 = vector.load %arg2[%c34, %c0_116] : memref<40x96xf32, #tpu.memory_space<vmem>>, vector<1x32xf32>
    %c35 = arith.constant 35 : index
    %c0_117 = arith.constant 0 : index
    %376 = vector.load %arg2[%c35, %c0_117] : memref<40x96xf32, #tpu.memory_space<vmem>>, vector<1x32xf32>
    %cst_118 = arith.constant dense<0.000000e+00> : vector<16xf32>
    %377 = vector.multi_reduction <add>, %374, %cst_118 [1] : vector<16x32xf32> to vector<16xf32>
    %378 = vector.shape_cast %377 : vector<16xf32> to vector<16x1xf32>
    %cst_119 = arith.constant 3.200000e+01 : f32
    %379 = vector.broadcast %cst_119 : f32 to vector<16x1xf32>
    %380 = arith.divf %378, %379 : vector<16x1xf32>
    %381 = vector.broadcast %380 : vector<16x1xf32> to vector<16x32xf32>
    %382 = arith.subf %374, %381 : vector<16x32xf32>
    %383 = arith.mulf %382, %382 : vector<16x32xf32>
    %cst_120 = arith.constant dense<0.000000e+00> : vector<16xf32>
    %384 = vector.multi_reduction <add>, %383, %cst_120 [1] : vector<16x32xf32> to vector<16xf32>
    %385 = vector.shape_cast %384 : vector<16xf32> to vector<16x1xf32>
    %cst_121 = arith.constant 3.200000e+01 : f32
    %386 = vector.broadcast %cst_121 : f32 to vector<16x1xf32>
    %387 = arith.divf %385, %386 : vector<16x1xf32>
    %388 = vector.broadcast %380 : vector<16x1xf32> to vector<16x32xf32>
    %389 = arith.subf %374, %388 : vector<16x32xf32>
    %cst_122 = arith.constant 9.99999974E-6 : f32
    %390 = vector.broadcast %cst_122 : f32 to vector<16x1xf32>
    %391 = arith.addf %387, %390 : vector<16x1xf32>
    %392 = math.sqrt %391 : vector<16x1xf32>
    %393 = vector.broadcast %392 : vector<16x1xf32> to vector<16x32xf32>
    %394 = arith.divf %389, %393 : vector<16x32xf32>
    %395 = vector.broadcast %375 : vector<1x32xf32> to vector<16x32xf32>
    %396 = arith.mulf %394, %395 : vector<16x32xf32>
    %397 = vector.broadcast %376 : vector<1x32xf32> to vector<16x32xf32>
    %398 = arith.addf %396, %397 : vector<16x32xf32>
    %cst_123 = arith.constant 0.000000e+00 : f32
    %399 = vector.broadcast %cst_123 : f32 to vector<16x32xf32>
    %400 = arith.cmpf ogt, %398, %399 : vector<16x32xf32>
    %401 = math.exp %398 : vector<16x32xf32>
    %cst_124 = arith.constant 1.000000e+00 : f32
    %402 = vector.broadcast %cst_124 : f32 to vector<16x32xf32>
    %403 = arith.subf %401, %402 : vector<16x32xf32>
    %cst_125 = arith.constant 1.67326319 : f32
    %404 = vector.broadcast %cst_125 : f32 to vector<16x32xf32>
    %405 = arith.mulf %404, %403 : vector<16x32xf32>
    %406 = arith.select %400, %398, %405 : vector<16x32xi1>, vector<16x32xf32>
    %cst_126 = arith.constant 1.05070102 : f32
    %407 = vector.broadcast %cst_126 : f32 to vector<16x32xf32>
    %408 = arith.mulf %407, %406 : vector<16x32xf32>
    %c440 = arith.constant 440 : index
    %c0_127 = arith.constant 0 : index
    %409 = vector.load %arg1[%c440, %c0_127] : memref<472x96xf32, #tpu.memory_space<vmem>>, vector<32x24xf32>
    %cst_128 = arith.constant dense<0.000000e+00> : vector<16x24xf32>
    %410 = tpu.matmul %408, %409, %cst_128 {dimension_numbers = #tpu.dot_dimension_numbers<[1], [0], [0], [1], [0, 0, 1, 1], [], []>, precision = #tpu.contract_precision<fp32>} : vector<16x32xf32>, vector<32x24xf32>, vector<16x24xf32> -> vector<16x24xf32>
    %c36 = arith.constant 36 : index
    %c0_129 = arith.constant 0 : index
    %411 = vector.load %arg2[%c36, %c0_129] : memref<40x96xf32, #tpu.memory_space<vmem>>, vector<1x24xf32>
    %412 = vector.broadcast %411 : vector<1x24xf32> to vector<16x24xf32>
    %413 = arith.addf %410, %412 : vector<16x24xf32>
    %c0_130 = arith.constant 0 : index
    %c0_131 = arith.constant 0 : index
    %414 = vector.load %arg4[%c0_130, %c0_131] : memref<16x24xf32, #tpu.memory_space<vmem>>, vector<16x24xf32>
    tpu.vector_store %arg4[%c0_130, %c0_131], %413 {strides = array<i32>} : memref<16x24xf32, #tpu.memory_space<vmem>>, vector<16x24xf32>,
    return
  }
}

</mosaic_0001>

<bundles_post_ra>
// kernel: motion_chunk_vae_forward.1
= control target key start
LH: loop header
LB: loop body
LE: loop exit
PB: predicated region body
PF: predicated region fallthrough
CT: control target
= control target key end

     0   :  { %10 = vsyncpa [#allocation3], 0  ;;  %vm25_vm0 = vcmask 195584   ;;  %s10812_s0 = inlined_call_operand.vmem [shape: f32[16,24], index: 0, kind: input, shape index: {}]   ;;  %s10813_s1 = inlined_call_operand.vmem [shape: f32[472,96], index: 1, kind: input, shape index: {}]   ;;  %s10814_s2 = inlined_call_operand.vmem [shape: f32[40,96], index: 2, kind: input, shape index: {}]   ;;  %s10815_s3 = inlined_call_operand.hbm [shape: f32[2,32], index: 3, kind: output, shape index: {0}]   ;;  %s10816_s4 = inlined_call_operand.hbm [shape: f32[16,24], index: 4, kind: output, shape index: {1}]  }
   0x1   :  { %v22_v0 = vld [vmem:[%s10813_s1 + $0x10] sm:$0xff]  ;;  %v21_v1 = vld [vmem:[%s10813_s1 + $0x8] sm:$0xff]  ;;  %v20_v2 = vld [vmem:[%s10813_s1] sm:$0xff] }
   0x2   :  { %v45_v3 = vand.u32 4294901760, %v22_v0  ;;  %v47_v4 = vand.u32 4294901760, %v21_v1  ;;  %v49_v5 = vand.u32 4294901760, %v20_v2  ;;  %v19_v6 = vld [vmem:[%s10812_s0 + $0x8] sm:$0xff]  ;;  %v18_v7 = vld [vmem:[%s10812_s0] sm:$0xff] }
   0x3   :  { %v30_v8 = vsel %vm25_vm0, %v19_v6, 0  ;;  %v27_v9 = vsel %vm25_vm0, %v18_v7, 0 }
   0x4   :  { %9254 = vmatpush.msra.mxu2 %v45_v3  ;;  %v82_v10 = vsub.f32 %v22_v0, %v45_v3  ;;  %v59_v11 = vand.u32 4294901760, %v30_v8  ;;  %v88_v12 = vsub.f32 %v21_v1, %v47_v4  ;;  %v94_v13 = vsub.f32 %v20_v2, %v49_v5  ;;  %46 = vmatpush.msra.mxu0 %v45_v3 }
   0x5   :  { %v51_v14 = vand.u32 4294901760, %v27_v9 }
   0x6   :  { %9255 = vmatpush.msra.mxu2 %v47_v4  ;;  %v83_v15 = vand.u32 4294901760, %v82_v10  ;;  %v60_v16 = vsub.f32 %v30_v8, %v59_v11  ;;  %v89_v17 = vand.u32 4294901760, %v88_v12  ;;  %v95_v18 = vand.u32 4294901760, %v94_v13  ;;  %48 = vmatpush.msra.mxu0 %v47_v4 }
   0x7   :  { %v52_v19 = vsub.f32 %v27_v9, %v51_v14 }
   0x8   :  { %9256 = vmatpush.msra.mxu2 %v49_v5  ;;  %v84_v20 = vsub.f32 %v82_v10, %v83_v15  ;;  %v61_v21 = vand.u32 4294901760, %v60_v16  ;;  %v90_v22 = vsub.f32 %v88_v12, %v89_v17  ;;  %v96_v23 = vsub.f32 %v94_v13, %v95_v18  ;;  %50 = vmatpush.msra.mxu0 %v49_v5 }
   0x9   :  { %v53_v24 = vand.u32 4294901760, %v52_v19 }
   0xa   :  { %123 = vmatpush.msrb.mxu2 %v82_v10  ;;  %189 = vmatpush.msrb.mxu0 %v83_v15  ;;  %v85_v25 = vand.u32 4294901760, %v84_v20  ;;  %v62_v26 = vsub.f32 %v60_v16, %v61_v21  ;;  %v91_v27 = vand.u32 4294901760, %v90_v22  ;;  %v97_v30 = vand.u32 4294901760, %v96_v23 }
   0xb   :  { %v54_v28 = vsub.f32 %v52_v19, %v53_v24 }
   0xc   :  { %126 = vmatpush.msrb.mxu2 %v88_v12  ;;  %193 = vmatpush.msrb.mxu0 %v89_v17  ;;  %v63_v29 = vand.u32 4294901760, %v62_v26 }
   0xd   :  { %9257 = vmatpush.msra.mxu3 %v85_v25  ;;  %86 = vmatpush.msra.mxu1 %v85_v25  ;;  %v55_v31 = vand.u32 4294901760, %v54_v28 }
   0xe   :  { %129 = vmatpush.msrb.mxu2 %v94_v13  ;;  %197 = vmatpush.msrb.mxu0 %v95_v18 }
   0xf   :  { %64 = vmatmul.f32.vlgmr.msra.gmra.mxu2 %v63_v29  ;;  %9258 = vmatpush.msra.mxu3 %v91_v27 }
  0x10   :  { %92 = vmatpush.msra.mxu1 %v91_v27  ;;  %56 = vmatmul.f32.vlgmr.msra.gmra.mxu0 %v55_v31 }
  0x11   :  { %9259 = vmatpush.msra.mxu3 %v97_v30 }
  0x12   :  { %11 = vsyncpa [#allocation5], 0  ;;  %104 = vmatmul.f32.vlgmr.msra.gmra.mxu3 %v59_v11  ;;  %98 = vmatpush.msra.mxu1 %v97_v30  ;;  %v9272_v33 = vld [vmem:[%s10814_s2] ss:$0 sm:$0xff]  ;;  %vm237_vm1 = vcmask 261120   ;;  %v9499_v59 = vmov 32.0  }
  0x13   :  { %155 = vmatpush.msrb.mxu3 %v45_v3  ;;  %100 = vmatmul.f32.vlgmr.msra.gmra.mxu1 %v51_v14  ;;  %9301 = vrcp.f32 %v9499_v59  ;;  %v343_v15 = vld [vmem:[%s10813_s1 + $0x28] sm:$0xff]  ;;  %s9500_s17 = smov 96   ;;  %s9501_s18 = smov 120  }
  0x14   :  { %221 = vmatpush.msrb.mxu1 %v45_v3  ;;  %s9502_s19 = smov 112   ;;  %s9503_s20 = smov 104  }
  0x15   :  { %157 = vmatpush.msrb.mxu3 %v47_v4  ;;  %s9504_s21 = smov 64   ;;  %s9505_s22 = smov 8  }
  0x16   :  { %223 = vmatpush.msrb.mxu1 %v47_v4  ;;  %s9506_s23 = smov 16   ;;  %s9507_s24 = smov 24  }
  0x17   :  { %132 = vmatmul.f32.vlgmr.msrb.gmra.mxu2 %v52_v19  ;;  %159 = vmatpush.msrb.mxu3 %v49_v5  ;;  %v367_v19 = vand.u32 4294901760, %v343_v15  ;;  %s9219_s7 = sshll.u32 %s10815_s3, 4  ;;  %s9508_s8 = smov [#allocation2]   ;;  %s9220_s7 = int_to_ptr.hbm [resolvable:$true] %s9219_s7 }
  0x18   :  { %199 = vmatmul.f32.vlgmr.msrb.gmra.mxu0 %v51_v14  ;;  %225 = vmatpush.msrb.mxu1 %v49_v5  ;;  %s9217_s9 = sshll.u32 %s9508_s8, 4  ;;  %s9229_s14 = sshll.u32 %s10816_s4, 4  ;;  %s9218_s9 = int_to_ptr.vmem [resolvable:$true] %s9217_s9  ;;  %s9230_s14 = int_to_ptr.hbm [resolvable:$true] %s9229_s14 }
  0x19   :  { %v9302_v60 = vpop.eup %9301  ;;  %s9510_s15 = smov 128  }
  0x1a   :  { %163 = vmatmul.f32.vlgmr.msrb.gmra.mxu3 %v53_v24  ;;  %v245_v61 = vmul.f32 32.0, %v9302_v60  ;;  %vm249_vm2 = vweird.f32 %v9302_v60  ;;  %v409_v24 = vsub.f32 %v343_v15, %v367_v19  ;;  %v9274_v15 = vld [vmem:[%s10814_s2 + $0x2] ss:$0 sm:$0xff] }
  0x1b   :  { %227 = vmatmul.f32.vlgmr.msrb.gmra.mxu1 %v51_v14  ;;  %v344_v14 = vld [vmem:[%s10813_s1 + $0x30] sm:$0xff] }
  0x1c   :  { %v246_v62 = vsub.f32 1.0, %v245_v61  ;;  %v365_v18 = vand.u32 4294901760, %v344_v14  ;;  %v410_v29 = vand.u32 4294901760, %v409_v24 }
  0x1e   :  { %v247_v63 = vmul.f32 %v9302_v60, %v246_v62  ;;  %483 = vmatpush.msra.mxu1 %v365_v18  ;;  %366 = vmatpush.msra.mxu2 %v365_v18  ;;  %v403_v23 = vsub.f32 %v344_v14, %v365_v18 }
  0x1f   :  { %137 = vmatmul.f32.gmra.mxu2 %v60_v16  ;;  %v342_v16 = vld [vmem:[%s10813_s1 + $0x20] sm:$0xff] }
  0x20   :  { %203 = vmatmul.f32.gmra.mxu0 %v59_v11  ;;  %v248_v0 = vadd.f32 %v9302_v60, %v247_v63  ;;  %v9584_v20 = vand.u32 4294901760, %v342_v16  ;;  %485 = vmatpush.msra.mxu1 %v367_v19  ;;  %v404_v28 = vand.u32 4294901760, %v403_v23 }
  0x21   :  { %368 = vmatpush.msra.mxu2 %v367_v19  ;;  %449 = vmatpush.msra.mxu0 %v403_v23 }
  0x22   :  { %169 = vmatmul.f32.gmra.mxu3 %v61_v21  ;;  %v9558_v1 = vsel %vm249_vm2, %v9302_v60, %v248_v0  ;;  %v341_v21 = vld [vmem:[%s10813_s1 + $0x18] sm:$0xff]  ;;  %v415_v25 = vsub.f32 %v342_v16, %v9584_v20  ;;  %487 = vmatpush.msra.mxu1 %v9584_v20 }
  0x23   :  { %231 = vmatmul.f32.gmra.mxu1 %v59_v11  ;;  %v371_v22 = vand.u32 4294901760, %v341_v21  ;;  %370 = vmatpush.msra.mxu2 %v9584_v20 }
  0x24   :  { %v416_v30 = vand.u32 4294901760, %v415_v25  ;;  %452 = vmatpush.msra.mxu0 %v409_v24 }
  0x25   :  { %v421_v26 = vsub.f32 %v341_v21, %v371_v22  ;;  %489 = vmatpush.msra.mxu1 %v371_v22  ;;  %372 = vmatpush.msra.mxu2 %v371_v22 }
  0x26   :  { %455 = vmatpush.msra.mxu0 %v415_v25 }
  0x27   :  { %v422_v31 = vand.u32 4294901760, %v421_v26  ;;  %518 = vmatpush.msrb.mxu2 %v404_v28 }
  0x28   :  { %458 = vmatpush.msra.mxu0 %v421_v26 }
  0x29   :  { %522 = vmatpush.msrb.mxu2 %v410_v29 }
  0x2b   :  { %526 = vmatpush.msrb.mxu2 %v416_v30 }
  0x2d   :  { %530 = vmatpush.msrb.mxu2 %v422_v31 }
  0x8d   :  { %v57_v32 = vpop.f32.mrf.mxu0 }
  0x8e   :  { %v58_v35 = vadd.f32 %v9272_v33, %v57_v32 }
  0x90   :  { %v101_v36 = vpop.f32.mrf.mxu1 }
  0x91   :  { %v102_v38 = vadd.f32 %v101_v36, %v58_v35  ;;  %v417_v35 = vsub.f32 %v415_v25, %v416_v30 }
  0x92   :  { %v65_v34 = vpop.f32.mrf.mxu2 }
  0x93   :  { %v66_v44 = vadd.f32 %v9272_v33, %v65_v34  ;;  %v405_v33 = vsub.f32 %v403_v23, %v404_v28  ;;  %v411_v34 = vsub.f32 %v409_v24, %v410_v29 }
  0x95   :  { %v105_v37 = vpop.f32.mrf.mxu3  ;;  %v200_v41 = vpop.f32.mrf.mxu0 }
  0x96   :  { %v106_v47 = vadd.f32 %v105_v37, %v66_v44 }
  0x98   :  { %v228_v43 = vpop.f32.mrf.mxu1 }
  0x9a   :  { %v133_v39 = vpop.f32.mrf.mxu2 }
  0x9b   :  { %v134_v40 = vadd.f32 %v133_v39, %v102_v38  ;;  %v406_v39 = vand.u32 4294901760, %v405_v33 }
  0x9d   :  { %v164_v42 = vpop.f32.mrf.mxu3  ;;  %v204_v53 = vpop.f32.mrf.mxu0  ;;  %407 = vmatpush.msra.mxu3 %v406_v39 }
  0x9e   :  { %v165_v45 = vadd.f32 %v164_v42, %v134_v40  ;;  %v412_v40 = vand.u32 4294901760, %v411_v34 }
  0xa0   :  { %v201_v46 = vadd.f32 %v200_v41, %v165_v45  ;;  %v232_v55 = vpop.f32.mrf.mxu1  ;;  %v423_v41 = vsub.f32 %v421_v26, %v422_v31  ;;  %413 = vmatpush.msra.mxu3 %v412_v40 }
  0xa2   :  { %v138_v48 = vpop.f32.mrf.mxu2  ;;  %v229_v49 = vadd.f32 %v228_v43, %v201_v46  ;;  %v418_v43 = vand.u32 4294901760, %v417_v35  ;;  %v424_v45 = vand.u32 4294901760, %v423_v41 }
  0xa3   :  { %v139_v50 = vadd.f32 %v138_v48, %v106_v47 }
  0xa4   :  { %v238_v51 = vsel %vm237_vm1, %v229_v49, 0.0  ;;  %419 = vmatpush.msra.mxu3 %v418_v43 }
  0xa5   :  { %v170_v52 = vpop.f32.mrf.mxu3  ;;  %239 = vadd.xlane.f32.xlu0 %v238_v51 }
  0xa6   :  { %v171_v54 = vadd.f32 %v170_v52, %v139_v50  ;;  %425 = vmatpush.msra.mxu3 %v424_v45 }
  0xa8   :  { %v205_v56 = vadd.f32 %v204_v53, %v171_v54  ;;  %553 = vmatpush.msrb.mxu3 %v365_v18 }
  0xaa   :  { %v233_v57 = vadd.f32 %v232_v55, %v205_v56  ;;  %555 = vmatpush.msrb.mxu3 %v367_v19 }
  0xac   :  { %v241_v58 = vsel %vm237_vm1, %v233_v57, 0.0  ;;  %557 = vmatpush.msrb.mxu3 %v9584_v20 }
  0xad   :  { %242 = vadd.xlane.f32.xlu0 %v241_v58 }
  0xae   :  { %559 = vmatpush.msrb.mxu3 %v371_v22 }
 0x118   :  { %v240_v2 = vpop.xlane.xlu0 %239 }
 0x119   :  { %v251_v3 = vmul.f32 %v9558_v1, %v240_v2 }
 0x11b   :  { %v9561_v4 = vsub.f32 %v229_v49, %v251_v3 }
 0x11d   :  { %v255_v5 = vmul.f32 %v9561_v4, %v9561_v4 }
 0x11f   :  { %v257_v6 = vsel %vm237_vm1, %v255_v5, 0.0 }
 0x120   :  { %258 = vadd.xlane.f32.xlu1 %v257_v6  ;;  %v243_v7 = vpop.xlane.xlu0 %242 }
 0x121   :  { %v252_v8 = vmul.f32 %v9558_v1, %v243_v7 }
 0x123   :  { %v9567_v9 = vsub.f32 %v233_v57, %v252_v8 }
 0x125   :  { %v256_v10 = vmul.f32 %v9567_v9, %v9567_v9 }
 0x127   :  { %v260_v11 = vsel %vm237_vm1, %v256_v10, 0.0 }
 0x128   :  { %261 = vadd.xlane.f32.xlu1 %v260_v11  ;;  %v9273_v11 = vld [vmem:[%s10814_s2 + $0x1] ss:$0 sm:$0xff] }
 0x193   :  { %v259_v12 = vpop.xlane.xlu1 %258 }
 0x194   :  { %v263_v13 = vmul.f32 %v259_v12, %v9558_v1 }
 0x196   :  { %v9582_v17 = vadd.f32 1e-05, %v263_v13 }
 0x198   :  { %9303 = vrsqrt.f32 %v9582_v17  ;;  %vm274_vm3 = vcmp.eq.f32.partialorder %v9582_v17, inf  ;;  %v277_v52 = vand.u32 2147483648, %v9582_v17  ;;  %vm276_vm4 = vcmp.eq.f32.partialorder %v9582_v17, 0.0 }
 0x19b   :  { %v262_v27 = vpop.xlane.xlu1 %261 }
 0x19c   :  { %v264_v32 = vmul.f32 %v262_v27, %v9558_v1 }
 0x19e   :  { %v9304_v36 = vpop.eup %9303  ;;  %v266_v37 = vadd.f32 1e-05, %v264_v32 }
 0x19f   :  { %v268_v38 = vmul.f32 %v9304_v36, %v9582_v17 }
 0x1a0   :  { %9305 = vrsqrt.f32 %v266_v37  ;;  %vm286_vm5 = vcmp.eq.f32.partialorder %v266_v37, inf  ;;  %v289_v59 = vand.u32 2147483648, %v266_v37  ;;  %vm288_vm6 = vcmp.eq.f32.partialorder %v266_v37, 0.0 }
 0x1a1   :  { %v269_v42 = vmul.f32 %v9304_v36, %v268_v38 }
 0x1a3   :  { %v270_v44 = vmul.f32 0.5, %v269_v42 }
 0x1a5   :  { %v271_v46 = vsub.f32 1.5, %v270_v44 }
 0x1a6   :  { %v9306_v47 = vpop.eup %9305 }
 0x1a7   :  { %v272_v48 = vmul.f32 %v9304_v36, %v271_v46  ;;  %v280_v49 = vmul.f32 %v9306_v47, %v266_v37 }
 0x1a9   :  { %v273_v50 = vmul.f32 %v272_v48, %v9582_v17  ;;  %v281_v51 = vmul.f32 %v9306_v47, %v280_v49 }
 0x1ab   :  { %v275_v53 = vsel %vm274_vm3, %v9582_v17, %v273_v50  ;;  %v282_v54 = vmul.f32 0.5, %v281_v51 }
 0x1ac   :  { %v278_v55 = vsel %vm276_vm4, %v277_v52, %v275_v53  ;;  %v9275_v52 = vld [vmem:[%s10814_s2 + $0x3] ss:$0 sm:$0xff] }
 0x1ad   :  { %9307 = vrcp.f32 %v278_v55  ;;  %v283_v56 = vsub.f32 1.5, %v282_v54  ;;  %v302_v2 = vand.u32 2147483648, %v278_v55  ;;  %v300_v5 = vand.u32 2147483647, %v278_v55 }
 0x1ae   :  { %vm296_vm8 = vweird.f32 %v278_v55 }
 0x1af   :  { %v284_v57 = vmul.f32 %v9306_v47, %v283_v56  ;;  %v303_v8 = vor.u32 1.1754944e-38, %v302_v2  ;;  %vm301_vm10 = vcmp.eq.f32.partialorder %v300_v5, 8.507059e+37 }
 0x1b1   :  { %v285_v58 = vmul.f32 %v284_v57, %v266_v37 }
 0x1b3   :  { %v9308_v60 = vpop.eup %9307  ;;  %v287_v61 = vsel %vm286_vm5, %v266_v37, %v285_v58 }
 0x1b4   :  { %v290_v62 = vsel %vm288_vm6, %v289_v59, %v287_v61  ;;  %v292_v63 = vmul.f32 %v9308_v60, %v278_v55  ;;  %vm297_vm7 = vweird.f32 %v9308_v60 }
 0x1b5   :  { %9309 = vrcp.f32 %v290_v62  ;;  %vm298_vm9 = vmor %vm296_vm8, %vm297_vm7  ;;  %v317_v17 = vand.u32 2147483648, %v290_v62  ;;  %v315_v20 = vand.u32 2147483647, %v290_v62  ;;  %vm311_vm12 = vweird.f32 %v290_v62 }
 0x1b6   :  { %v293_v0 = vsub.f32 1.0, %v292_v63 }
 0x1b7   :  { %v318_v23 = vor.u32 1.1754944e-38, %v317_v17  ;;  %vm316_vm14 = vcmp.eq.f32.partialorder %v315_v20, 8.507059e+37 }
 0x1b8   :  { %v294_v3 = vmul.f32 %v9308_v60, %v293_v0 }
 0x1ba   :  { %v295_v6 = vadd.f32 %v9308_v60, %v294_v3 }
 0x1bb   :  { %v9310_v7 = vpop.eup %9309 }
 0x1bc   :  { %v299_v10 = vsel %vm298_vm9, %v9308_v60, %v295_v6  ;;  %v307_v12 = vmul.f32 %v9310_v7, %v290_v62  ;;  %vm312_vm11 = vweird.f32 %v9310_v7 }
 0x1bd   :  { %v304_v13 = vsel %vm301_vm10, %v303_v8, %v299_v10  ;;  %vm313_vm13 = vmor %vm311_vm12, %vm312_vm11 }
 0x1be   :  { %v305_v14 = vmul.f32 %v304_v13, %v9561_v4  ;;  %v308_v16 = vsub.f32 1.0, %v307_v12 }
 0x1c0   :  { %v322_v18 = vmul.f32 %v9273_v11, %v305_v14  ;;  %v309_v19 = vmul.f32 %v9310_v7, %v308_v16 }
 0x1c2   :  { %v325_v21 = vadd.f32 %v9274_v15, %v322_v18  ;;  %v310_v22 = vadd.f32 %v9310_v7, %v309_v19 }
 0x1c4   :  { %v329_v24 = vmul.f32 1.442695, %v325_v21  ;;  %v314_v25 = vsel %vm313_vm13, %v9310_v7, %v310_v22  ;;  %vm327_vm15 = vcmp.gt.f32.partialorder %v325_v21, 0.0 }
 0x1c5   :  { %v319_v26 = vsel %vm316_vm14, %v318_v23, %v314_v25 }
 0x1c6   :  { %9311 = vpow2.f32 %v329_v24  ;;  %v320_v4 = vmul.f32 %v319_v26, %v9567_v9 }
 0x1c8   :  { %v323_v27 = vmul.f32 %v9273_v11, %v320_v4 }
 0x1ca   :  { %v326_v28 = vadd.f32 %v9274_v15, %v323_v27 }
 0x1cc   :  { %v9312_v29 = vpop.eup %9311  ;;  %v331_v30 = vmul.f32 1.442695, %v326_v28  ;;  %vm328_vm2 = vcmp.gt.f32.partialorder %v326_v28, 0.0 }
 0x1cd   :  { %v9246_v31 = vadd.f32 -1.0, %v9312_v29  ;;  %v669_v29 = vld [vmem:[%s10813_s1 + $0x48] sm:$0xff] }
 0x1ce   :  { %9313 = vpow2.f32 %v331_v30  ;;  %v668_v30 = vld [vmem:[%s10813_s1 + $0x40] sm:$0xff] }
 0x1cf   :  { %v335_v32 = vmul.f32 1.6732632, %v9246_v31 }
 0x1d1   :  { %v337_v33 = vsel %vm327_vm15, %v325_v21, %v335_v32 }
 0x1d2   :  { %v339_v34 = vmul.f32 1.050701, %v337_v33  ;;  %v693_v33 = vand.u32 4294901760, %v669_v29 }
 0x1d4   :  { %v9314_v35 = vpop.eup %9313  ;;  %v348_v36 = vsel %vm237_vm1, %v339_v34, 0  ;;  %v9640_v34 = vand.u32 4294901760, %v668_v30 }
 0x1d5   :  { %v373_v37 = vand.u32 4294901760, %v348_v36  ;;  %v9247_v38 = vadd.f32 -1.0, %v9314_v35  ;;  %v667_v35 = vld [vmem:[%s10813_s1 + $0x38] sm:$0xff] }
 0x1d7   :  { %427 = vmatmul.f32.vlgmr.msra.gmra.mxu3 %v373_v37  ;;  %v374_v39 = vsub.f32 %v348_v36, %v373_v37  ;;  %v336_v40 = vmul.f32 1.6732632, %v9247_v38  ;;  %v697_v36 = vand.u32 4294901760, %v667_v35  ;;  %v735_v38 = vsub.f32 %v669_v29, %v693_v33  ;;  %v9277_v29 = vld [vmem:[%s10814_s2 + $0x5] ss:$0 sm:$0xff] }
 0x1d9   :  { %461 = vmatmul.f32.vlgmr.msra.gmra.mxu0 %v374_v39  ;;  %v375_v9 = vand.u32 4294901760, %v374_v39  ;;  %v338_v41 = vsel %vm328_vm2, %v326_v28, %v336_v40  ;;  %v670_v28 = vld [vmem:[%s10813_s1 + $0x50] sm:$0xff]  ;;  %v747_v40 = vsub.f32 %v667_v35, %v697_v36 }
 0x1da   :  { %v340_v42 = vmul.f32 1.050701, %v338_v41  ;;  %v691_v32 = vand.u32 4294901760, %v670_v28 }
 0x1db   :  { %493 = vmatmul.f32.vlgmr.msra.gmra.mxu1 %v375_v9  ;;  %v376_v43 = vsub.f32 %v374_v39, %v375_v9  ;;  %v741_v39 = vsub.f32 %v668_v30, %v9640_v34 }
 0x1dc   :  { %v351_v44 = vsel %vm237_vm1, %v340_v42, 0  ;;  %809 = vmatpush.msra.mxu3 %v691_v32  ;;  %692 = vmatpush.msrb.mxu0 %v691_v32  ;;  %v736_v42 = vand.u32 4294901760, %v735_v38 }
 0x1dd   :  { %v377_v45 = vand.u32 4294901760, %v376_v43  ;;  %v381_v46 = vand.u32 4294901760, %v351_v44  ;;  %v742_v43 = vand.u32 4294901760, %v741_v39 }
 0x1de   :  { %811 = vmatpush.msra.mxu3 %v693_v33  ;;  %694 = vmatpush.msrb.mxu0 %v693_v33 }
 0x1df   :  { %378 = vmatmul.f32.vlgmr.msra.gmra.mxu2 %v377_v45  ;;  %431 = vmatmul.f32.gmra.mxu3 %v381_v46  ;;  %v382_v47 = vsub.f32 %v351_v44, %v381_v46  ;;  %v748_v44 = vand.u32 4294901760, %v747_v40 }
 0x1e0   :  { %813 = vmatpush.msra.mxu3 %v9640_v34  ;;  %696 = vmatpush.msrb.mxu0 %v9640_v34 }
 0x1e1   :  { %466 = vmatmul.f32.gmra.mxu0 %v382_v47  ;;  %v383_v48 = vand.u32 4294901760, %v382_v47 }
 0x1e2   :  { %815 = vmatpush.msra.mxu3 %v697_v36  ;;  %698 = vmatpush.msrb.mxu0 %v697_v36 }
 0x1e3   :  { %499 = vmatmul.f32.gmra.mxu1 %v383_v48  ;;  %v384_v49 = vsub.f32 %v382_v47, %v383_v48  ;;  %v737_v47 = vsub.f32 %v735_v38, %v736_v42  ;;  %v743_v48 = vsub.f32 %v741_v39, %v742_v43 }
 0x1e5   :  { %v385_v50 = vand.u32 4294901760, %v384_v49 }
 0x1e7   :  { %386 = vmatmul.f32.gmra.mxu2 %v385_v50  ;;  %561 = vmatmul.f32.vlgmr.msrb.gmra.mxu3 %v373_v37 }
 0x1ef   :  { %532 = vmatmul.f32.vlgmr.msrb.gmra.mxu2 %v373_v37  ;;  %565 = vmatmul.f32.gmra.mxu3 %v381_v46  ;;  %v729_v37 = vsub.f32 %v670_v28, %v691_v32 }
 0x1f1   :  { %v730_v41 = vand.u32 4294901760, %v729_v37  ;;  %775 = vmatpush.msra.mxu2 %v729_v37 }
 0x1f3   :  { %778 = vmatpush.msra.mxu2 %v735_v38  ;;  %844 = vmatpush.msra.mxu0 %v730_v41 }
 0x1f5   :  { %781 = vmatpush.msra.mxu2 %v741_v39  ;;  %848 = vmatpush.msra.mxu0 %v736_v42 }
 0x1f7   :  { %536 = vmatmul.f32.gmra.mxu2 %v381_v46  ;;  %v731_v46 = vsub.f32 %v729_v37, %v730_v41  ;;  %852 = vmatpush.msra.mxu0 %v742_v43 }
 0x1f8   :  { %784 = vmatpush.msra.mxu2 %v747_v40 }
 0x1f9   :  { %856 = vmatpush.msra.mxu0 %v748_v44 }
 0x256   :  { %v462_v57 = vpop.f32.mrf.mxu0 }
 0x258   :  { %v494_v61 = vpop.f32.mrf.mxu1 }
 0x25a   :  { %v428_v51 = vpop.f32.mrf.mxu3 }
 0x25e   :  { %v467_v5 = vpop.f32.mrf.mxu0 }
 0x260   :  { %v500_v10 = vpop.f32.mrf.mxu1 }
 0x262   :  { %v379_v53 = vpop.f32.mrf.mxu2  ;;  %v432_v55 = vpop.f32.mrf.mxu3 }
 0x263   :  { %v380_v54 = vadd.f32 %v9275_v52, %v379_v53  ;;  %v738_v53 = vand.u32 4294901760, %v737_v47 }
 0x265   :  { %v429_v56 = vadd.f32 %v428_v51, %v380_v54  ;;  %v749_v54 = vsub.f32 %v747_v40, %v748_v44 }
 0x267   :  { %v463_v60 = vadd.f32 %v462_v57, %v429_v56  ;;  %v744_v56 = vand.u32 4294901760, %v743_v48 }
 0x269   :  { %v495_v63 = vadd.f32 %v494_v61, %v463_v60 }
 0x26a   :  { %v387_v58 = vpop.f32.mrf.mxu2  ;;  %v562_v0 = vpop.f32.mrf.mxu3 }
 0x26b   :  { %v388_v59 = vadd.f32 %v9275_v52, %v387_v58  ;;  %v732_v52 = vand.u32 4294901760, %v731_v46  ;;  %v750_v58 = vand.u32 4294901760, %v749_v54 }
 0x26d   :  { %v433_v62 = vadd.f32 %v432_v55, %v388_v59  ;;  %733 = vmatpush.msrb.mxu1 %v732_v52 }
 0x26f   :  { %v468_v7 = vadd.f32 %v467_v5, %v433_v62  ;;  %739 = vmatpush.msrb.mxu1 %v738_v53 }
 0x271   :  { %v501_v11 = vadd.f32 %v500_v10, %v468_v7  ;;  %745 = vmatpush.msrb.mxu1 %v744_v56 }
 0x272   :  { %v533_v2 = vpop.f32.mrf.mxu2  ;;  %v566_v14 = vpop.f32.mrf.mxu3 }
 0x273   :  { %v534_v3 = vadd.f32 %v533_v2, %v495_v63  ;;  %751 = vmatpush.msrb.mxu1 %v750_v58 }
 0x275   :  { %v563_v6 = vadd.f32 %v562_v0, %v534_v3  ;;  %879 = vmatpush.msra.mxu1 %v691_v32 }
 0x277   :  { %v571_v8 = vsel %vm237_vm1, %v563_v6, 0.0  ;;  %881 = vmatpush.msra.mxu1 %v693_v33 }
 0x278   :  { %572 = vadd.xlane.f32.xlu2 %v571_v8 }
 0x279   :  { %883 = vmatpush.msra.mxu1 %v9640_v34 }
 0x27a   :  { %v537_v12 = vpop.f32.mrf.mxu2 }
 0x27b   :  { %v538_v13 = vadd.f32 %v537_v12, %v501_v11  ;;  %885 = vmatpush.msra.mxu1 %v697_v36 }
 0x27d   :  { %v567_v15 = vadd.f32 %v566_v14, %v538_v13 }
 0x27f   :  { %v574_v16 = vsel %vm237_vm1, %v567_v15, 0.0 }
 0x280   :  { %575 = vadd.xlane.f32.xlu2 %v574_v16 }
 0x2eb   :  { %v573_v17 = vpop.xlane.xlu2 %572 }
 0x2ec   :  { %v577_v18 = vmul.f32 %v573_v17, %v9558_v1 }
 0x2ee   :  { %v9617_v19 = vsub.f32 %v563_v6, %v577_v18 }
 0x2f0   :  { %v581_v20 = vmul.f32 %v9617_v19, %v9617_v19 }
 0x2f2   :  { %v583_v21 = vsel %vm237_vm1, %v581_v20, 0.0 }
 0x2f3   :  { %584 = vadd.xlane.f32.xlu0 %v583_v21  ;;  %v576_v22 = vpop.xlane.xlu2 %575 }
 0x2f4   :  { %v578_v23 = vmul.f32 %v576_v22, %v9558_v1 }
 0x2f6   :  { %v9623_v24 = vsub.f32 %v567_v15, %v578_v23 }
 0x2f8   :  { %v582_v25 = vmul.f32 %v9623_v24, %v9623_v24 }
 0x2fa   :  { %v586_v26 = vsel %vm237_vm1, %v582_v25, 0.0 }
 0x2fb   :  { %587 = vadd.xlane.f32.xlu1 %v586_v26  ;;  %v9276_v26 = vld [vmem:[%s10814_s2 + $0x4] ss:$0 sm:$0xff] }
 0x366   :  { %v585_v4 = vpop.xlane.xlu0 %584 }
 0x367   :  { %v589_v27 = vmul.f32 %v585_v4, %v9558_v1 }
 0x369   :  { %v9638_v31 = vadd.f32 1e-05, %v589_v27 }
 0x36b   :  { %9315 = vrsqrt.f32 %v9638_v31  ;;  %vm600_vm3 = vcmp.eq.f32.partialorder %v9638_v31, inf  ;;  %v603_v2 = vand.u32 2147483648, %v9638_v31  ;;  %vm602_vm4 = vcmp.eq.f32.partialorder %v9638_v31, 0.0 }
 0x36e   :  { %v588_v9 = vpop.xlane.xlu1 %587 }
 0x36f   :  { %v590_v45 = vmul.f32 %v588_v9, %v9558_v1 }
 0x371   :  { %v9316_v49 = vpop.eup %9315  ;;  %v592_v50 = vadd.f32 1e-05, %v590_v45 }
 0x372   :  { %v594_v51 = vmul.f32 %v9316_v49, %v9638_v31 }
 0x373   :  { %9317 = vrsqrt.f32 %v592_v50  ;;  %vm612_vm5 = vcmp.eq.f32.partialorder %v592_v50, inf  ;;  %v615_v11 = vand.u32 2147483648, %v592_v50  ;;  %vm614_vm6 = vcmp.eq.f32.partialorder %v592_v50, 0.0 }
 0x374   :  { %v595_v55 = vmul.f32 %v9316_v49, %v594_v51 }
 0x376   :  { %v596_v57 = vmul.f32 0.5, %v595_v55 }
 0x378   :  { %v597_v59 = vsub.f32 1.5, %v596_v57 }
 0x379   :  { %v9318_v60 = vpop.eup %9317 }
 0x37a   :  { %v598_v61 = vmul.f32 %v9316_v49, %v597_v59  ;;  %v606_v62 = vmul.f32 %v9318_v60, %v592_v50 }
 0x37c   :  { %v599_v63 = vmul.f32 %v598_v61, %v9638_v31  ;;  %v607_v0 = vmul.f32 %v9318_v60, %v606_v62 }
 0x37e   :  { %v601_v3 = vsel %vm600_vm3, %v9638_v31, %v599_v63  ;;  %v608_v5 = vmul.f32 0.5, %v607_v0 }
 0x37f   :  { %v604_v6 = vsel %vm602_vm4, %v603_v2, %v601_v3  ;;  %v9278_v2 = vld [vmem:[%s10814_s2 + $0x6] ss:$0 sm:$0xff] }
 0x380   :  { %9319 = vrcp.f32 %v604_v6  ;;  %v609_v7 = vsub.f32 1.5, %v608_v5  ;;  %v628_v17 = vand.u32 2147483648, %v604_v6  ;;  %v626_v20 = vand.u32 2147483647, %v604_v6 }
 0x381   :  { %vm622_vm8 = vweird.f32 %v604_v6 }
 0x382   :  { %v610_v8 = vmul.f32 %v9318_v60, %v609_v7  ;;  %v629_v23 = vor.u32 1.1754944e-38, %v628_v17  ;;  %vm627_vm10 = vcmp.eq.f32.partialorder %v626_v20, 8.507059e+37 }
 0x384   :  { %v611_v10 = vmul.f32 %v610_v8, %v592_v50 }
 0x386   :  { %v9320_v12 = vpop.eup %9319  ;;  %v613_v13 = vsel %vm612_vm5, %v592_v50, %v611_v10 }
 0x387   :  { %v616_v14 = vsel %vm614_vm6, %v615_v11, %v613_v13  ;;  %v618_v15 = vmul.f32 %v9320_v12, %v604_v6  ;;  %vm623_vm7 = vweird.f32 %v9320_v12 }
 0x388   :  { %9321 = vrcp.f32 %v616_v14  ;;  %vm624_vm9 = vmor %vm622_vm8, %vm623_vm7  ;;  %v643_v31 = vand.u32 2147483648, %v616_v14  ;;  %v641_v34 = vand.u32 2147483647, %v616_v14  ;;  %vm637_vm12 = vweird.f32 %v616_v14 }
 0x389   :  { %v619_v16 = vsub.f32 1.0, %v618_v15 }
 0x38a   :  { %v644_v37 = vor.u32 1.1754944e-38, %v643_v31  ;;  %vm642_vm14 = vcmp.eq.f32.partialorder %v641_v34, 8.507059e+37 }
 0x38b   :  { %v620_v18 = vmul.f32 %v9320_v12, %v619_v16 }
 0x38d   :  { %v621_v21 = vadd.f32 %v9320_v12, %v620_v18 }
 0x38e   :  { %v9322_v22 = vpop.eup %9321 }
 0x38f   :  { %v625_v25 = vsel %vm624_vm9, %v9320_v12, %v621_v21  ;;  %v633_v4 = vmul.f32 %v9322_v22, %v616_v14  ;;  %vm638_vm11 = vweird.f32 %v9322_v22 }
 0x390   :  { %v630_v27 = vsel %vm627_vm10, %v629_v23, %v625_v25  ;;  %vm639_vm13 = vmor %vm637_vm12, %vm638_vm11 }
 0x391   :  { %v631_v28 = vmul.f32 %v630_v27, %v9617_v19  ;;  %v634_v30 = vsub.f32 1.0, %v633_v4 }
 0x393   :  { %v648_v32 = vmul.f32 %v9276_v26, %v631_v28  ;;  %v635_v33 = vmul.f32 %v9322_v22, %v634_v30 }
 0x395   :  { %v651_v35 = vadd.f32 %v9277_v29, %v648_v32  ;;  %v636_v36 = vadd.f32 %v9322_v22, %v635_v33 }
 0x397   :  { %v655_v38 = vmul.f32 1.442695, %v651_v35  ;;  %v640_v39 = vsel %vm639_vm13, %v9322_v22, %v636_v36  ;;  %vm653_vm15 = vcmp.gt.f32.partialorder %v651_v35, 0.0 }
 0x398   :  { %v645_v40 = vsel %vm642_vm14, %v644_v37, %v640_v39 }
 0x399   :  { %9323 = vpow2.f32 %v655_v38  ;;  %v646_v19 = vmul.f32 %v645_v40, %v9623_v24 }
 0x39b   :  { %v649_v9 = vmul.f32 %v9276_v26, %v646_v19 }
 0x39d   :  { %v652_v41 = vadd.f32 %v9277_v29, %v649_v9 }
 0x39f   :  { %v9324_v42 = vpop.eup %9323  ;;  %v657_v43 = vmul.f32 1.442695, %v652_v41  ;;  %vm654_vm2 = vcmp.gt.f32.partialorder %v652_v41, 0.0 }
 0x3a0   :  { %v9248_v44 = vadd.f32 -1.0, %v9324_v42 }
 0x3a1   :  { %9325 = vpow2.f32 %v657_v43 }
 0x3a2   :  { %v661_v45 = vmul.f32 1.6732632, %v9248_v44 }
 0x3a4   :  { %v663_v46 = vsel %vm653_vm15, %v651_v35, %v661_v45 }
 0x3a5   :  { %v665_v47 = vmul.f32 1.050701, %v663_v46 }
 0x3a7   :  { %v9326_v48 = vpop.eup %9325  ;;  %v674_v49 = vsel %vm237_vm1, %v665_v47, 0  ;;  %v1020_v47 = vld [vmem:[%s10813_s1 + $0x70] sm:$0xff] }
 0x3a8   :  { %v699_v50 = vand.u32 4294901760, %v674_v49  ;;  %v9249_v51 = vadd.f32 -1.0, %v9326_v48  ;;  %v1019_v48 = vld [vmem:[%s10813_s1 + $0x68] sm:$0xff] }
 0x3aa   :  { %753 = vmatmul.f32.vlgmr.msrb.gmra.mxu1 %v699_v50  ;;  %v700_v52 = vsub.f32 %v674_v49, %v699_v50  ;;  %v662_v53 = vmul.f32 1.6732632, %v9249_v51  ;;  %v1018_v49 = vld [vmem:[%s10813_s1 + $0x60] sm:$0xff]  ;;  %v1041_v51 = vand.u32 4294901760, %v1020_v47 }
 0x3ac   :  { %787 = vmatmul.f32.vlgmr.msra.gmra.mxu2 %v700_v52  ;;  %v701_v24 = vand.u32 4294901760, %v700_v52  ;;  %v664_v54 = vsel %vm654_vm2, %v652_v41, %v662_v53  ;;  %v9700_v53 = vand.u32 4294901760, %v1018_v49  ;;  %1159 = vmatpush.msrb.mxu1 %v1041_v51 }
 0x3ad   :  { %v666_v55 = vmul.f32 1.050701, %v664_v54  ;;  %1042 = vmatpush.msrb.mxu2 %v1041_v51 }
 0x3ae   :  { %819 = vmatmul.f32.vlgmr.msra.gmra.mxu3 %v701_v24  ;;  %v702_v56 = vsub.f32 %v700_v52, %v701_v24  ;;  %v9698_v52 = vand.u32 4294901760, %v1019_v48  ;;  %v1017_v24 = vld [vmem:[%s10813_s1 + $0x58] sm:$0xff] }
 0x3af   :  { %v677_v57 = vsel %vm237_vm1, %v666_v55, 0  ;;  %v9705_v54 = vand.u32 4294901760, %v1017_v24 }
 0x3b0   :  { %v703_v58 = vand.u32 4294901760, %v702_v56  ;;  %v707_v59 = vand.u32 4294901760, %v677_v57  ;;  %v1079_v56 = vsub.f32 %v1020_v47, %v1041_v51  ;;  %1161 = vmatpush.msrb.mxu1 %v9698_v52  ;;  %1044 = vmatpush.msrb.mxu2 %v9698_v52 }
 0x3b2   :  { %704 = vmatmul.f32.vlgmr.msrb.gmra.mxu0 %v703_v58  ;;  %757 = vmatmul.f32.gmra.mxu1 %v707_v59  ;;  %v708_v60 = vsub.f32 %v677_v57, %v707_v59  ;;  %v1085_v57 = vsub.f32 %v1019_v48, %v9698_v52  ;;  %v1091_v58 = vsub.f32 %v1018_v49, %v9700_v53 }
 0x3b3   :  { %1125 = vmatpush.msrb.mxu0 %v1079_v56  ;;  %1163 = vmatpush.msrb.mxu1 %v9700_v53 }
 0x3b4   :  { %792 = vmatmul.f32.gmra.mxu2 %v708_v60  ;;  %v709_v61 = vand.u32 4294901760, %v708_v60 }
 0x3b5   :  { %1128 = vmatpush.msrb.mxu0 %v1085_v57  ;;  %1046 = vmatpush.msrb.mxu2 %v9700_v53 }
 0x3b6   :  { %825 = vmatmul.f32.gmra.mxu3 %v709_v61  ;;  %v710_v62 = vsub.f32 %v708_v60, %v709_v61  ;;  %v1080_v61 = vand.u32 4294901760, %v1079_v56  ;;  %1165 = vmatpush.msrb.mxu1 %v9705_v54 }
 0x3b7   :  { %1131 = vmatpush.msrb.mxu0 %v1091_v58  ;;  %1048 = vmatpush.msrb.mxu2 %v9705_v54 }
 0x3b8   :  { %v711_v63 = vand.u32 4294901760, %v710_v62  ;;  %v1086_v62 = vand.u32 4294901760, %v1085_v57 }
 0x3b9   :  { %1194 = vmatpush.msra.mxu2 %v1080_v61 }
 0x3ba   :  { %712 = vmatmul.f32.gmra.mxu0 %v711_v63  ;;  %887 = vmatmul.f32.vlgmr.msra.gmra.mxu1 %v699_v50  ;;  %v1092_v63 = vand.u32 4294901760, %v1091_v58 }
 0x3bb   :  { %1198 = vmatpush.msra.mxu2 %v1086_v62 }
 0x3bd   :  { %1202 = vmatpush.msra.mxu2 %v1092_v63 }
 0x3c2   :  { %858 = vmatmul.f32.vlgmr.msra.gmra.mxu0 %v699_v50  ;;  %891 = vmatmul.f32.gmra.mxu1 %v707_v59 }
 0x3ca   :  { %862 = vmatmul.f32.gmra.mxu0 %v707_v59  ;;  %v1097_v59 = vsub.f32 %v1017_v24, %v9705_v54 }
 0x3cc   :  { %1134 = vmatpush.msrb.mxu0 %v1097_v59 }
 0x427   :  { %v754_v0 = vpop.f32.mrf.mxu1 }
 0x42f   :  { %v705_v3 = vpop.f32.mrf.mxu0  ;;  %v758_v6 = vpop.f32.mrf.mxu1 }
 0x430   :  { %v706_v5 = vadd.f32 %v9278_v2, %v705_v3  ;;  %v788_v8 = vpop.f32.mrf.mxu2 }
 0x431   :  { %v820_v13 = vpop.f32.mrf.mxu3 }
 0x432   :  { %v755_v7 = vadd.f32 %v754_v0, %v706_v5 }
 0x434   :  { %v789_v11 = vadd.f32 %v788_v8, %v755_v7  ;;  %v1087_v7 = vsub.f32 %v1085_v57, %v1086_v62  ;;  %v1093_v8 = vsub.f32 %v1091_v58, %v1092_v63 }
 0x436   :  { %v821_v14 = vadd.f32 %v820_v13, %v789_v11 }
 0x437   :  { %v713_v10 = vpop.f32.mrf.mxu0  ;;  %v888_v16 = vpop.f32.mrf.mxu1 }
 0x438   :  { %v714_v12 = vadd.f32 %v9278_v2, %v713_v10  ;;  %v793_v20 = vpop.f32.mrf.mxu2  ;;  %v1098_v2 = vand.u32 4294901760, %v1097_v59 }
 0x439   :  { %v826_v25 = vpop.f32.mrf.mxu3 }
 0x43a   :  { %v759_v15 = vadd.f32 %v758_v6, %v714_v12  ;;  %v1081_v6 = vsub.f32 %v1079_v56, %v1080_v61  ;;  %v1099_v10 = vsub.f32 %v1097_v59, %v1098_v2  ;;  %1206 = vmatpush.msra.mxu2 %v1098_v2 }
 0x43c   :  { %v794_v21 = vadd.f32 %v793_v20, %v759_v15  ;;  %v1082_v13 = vand.u32 4294901760, %v1081_v6 }
 0x43e   :  { %v827_v26 = vadd.f32 %v826_v25, %v794_v21  ;;  %1083 = vmatpush.msrb.mxu3 %v1082_v13 }
 0x43f   :  { %v859_v17 = vpop.f32.mrf.mxu0  ;;  %v892_v28 = vpop.f32.mrf.mxu1 }
 0x440   :  { %v860_v18 = vadd.f32 %v859_v17, %v821_v14  ;;  %v1088_v14 = vand.u32 4294901760, %v1087_v7 }
 0x442   :  { %v889_v22 = vadd.f32 %v888_v16, %v860_v18  ;;  %v1094_v18 = vand.u32 4294901760, %v1093_v8  ;;  %1089 = vmatpush.msrb.mxu3 %v1088_v14 }
 0x444   :  { %v897_v23 = vsel %vm237_vm1, %v889_v22, 0.0  ;;  %1095 = vmatpush.msrb.mxu3 %v1094_v18 }
 0x445   :  { %898 = vadd.xlane.f32.xlu2 %v897_v23 }
 0x447   :  { %v863_v4 = vpop.f32.mrf.mxu0 }
 0x448   :  { %v864_v27 = vadd.f32 %v863_v4, %v827_v26 }
 0x44a   :  { %v893_v29 = vadd.f32 %v892_v28, %v864_v27 }
 0x44c   :  { %v900_v30 = vsel %vm237_vm1, %v893_v29, 0.0 }
 0x44d   :  { %901 = vadd.xlane.f32.xlu0 %v900_v30 }
 0x4b8   :  { %v899_v31 = vpop.xlane.xlu2 %898 }
 0x4b9   :  { %v903_v32 = vmul.f32 %v899_v31, %v9558_v1 }
 0x4bb   :  { %v9673_v33 = vsub.f32 %v889_v22, %v903_v32  ;;  %v1100_v22 = vand.u32 4294901760, %v1099_v10 }
 0x4bd   :  { %v907_v34 = vmul.f32 %v9673_v33, %v9673_v33  ;;  %1101 = vmatpush.msrb.mxu3 %v1100_v22 }
 0x4bf   :  { %v909_v35 = vsel %vm237_vm1, %v907_v34, 0.0  ;;  %1229 = vmatpush.msra.mxu3 %v1041_v51 }
 0x4c0   :  { %910 = vadd.xlane.f32.xlu1 %v909_v35  ;;  %v902_v36 = vpop.xlane.xlu0 %901 }
 0x4c1   :  { %v904_v37 = vmul.f32 %v902_v36, %v9558_v1  ;;  %1231 = vmatpush.msra.mxu3 %v9698_v52 }
 0x4c3   :  { %v9679_v38 = vsub.f32 %v893_v29, %v904_v37  ;;  %1233 = vmatpush.msra.mxu3 %v9700_v53 }
 0x4c5   :  { %v908_v39 = vmul.f32 %v9679_v38, %v9679_v38  ;;  %1235 = vmatpush.msra.mxu3 %v9705_v54 }
 0x4c7   :  { %v912_v40 = vsel %vm237_vm1, %v908_v39, 0.0 }
 0x4c8   :  { %913 = vadd.xlane.f32.xlu2 %v912_v40 }
 0x533   :  { %v911_v19 = vpop.xlane.xlu1 %910 }
 0x534   :  { %v915_v9 = vmul.f32 %v911_v19, %v9558_v1  ;;  %v9279_v19 = vld [vmem:[%s10814_s2 + $0x7] ss:$0 sm:$0xff] }
 0x536   :  { %v917_v41 = vadd.f32 1e-05, %v915_v9 }
 0x538   :  { %9327 = vrsqrt.f32 %v917_v41  ;;  %vm926_vm3 = vcmp.eq.f32.partialorder %v917_v41, inf  ;;  %v929_v15 = vand.u32 2147483648, %v917_v41  ;;  %vm928_vm4 = vcmp.eq.f32.partialorder %v917_v41, 0.0 }
 0x53b   :  { %v914_v42 = vpop.xlane.xlu2 %913 }
 0x53c   :  { %v916_v43 = vmul.f32 %v914_v42, %v9558_v1 }
 0x53e   :  { %v9328_v44 = vpop.eup %9327  ;;  %v9686_v45 = vadd.f32 1e-05, %v916_v43  ;;  %v9280_v43 = vld [vmem:[%s10814_s2 + $0x8] ss:$0 sm:$0xff] }
 0x53f   :  { %v920_v46 = vmul.f32 %v9328_v44, %v917_v41 }
 0x540   :  { %9329 = vrsqrt.f32 %v9686_v45  ;;  %vm938_vm5 = vcmp.eq.f32.partialorder %v9686_v45, inf  ;;  %v941_v26 = vand.u32 2147483648, %v9686_v45  ;;  %vm940_vm6 = vcmp.eq.f32.partialorder %v9686_v45, 0.0 }
 0x541   :  { %v921_v50 = vmul.f32 %v9328_v44, %v920_v46 }
 0x543   :  { %v922_v55 = vmul.f32 0.5, %v921_v50 }
 0x545   :  { %v923_v60 = vsub.f32 1.5, %v922_v55 }
 0x546   :  { %v9330_v0 = vpop.eup %9329 }
 0x547   :  { %v924_v3 = vmul.f32 %v9328_v44, %v923_v60  ;;  %v932_v5 = vmul.f32 %v9330_v0, %v9686_v45 }
 0x549   :  { %v925_v11 = vmul.f32 %v924_v3, %v917_v41  ;;  %v933_v12 = vmul.f32 %v9330_v0, %v932_v5 }
 0x54b   :  { %v927_v16 = vsel %vm926_vm3, %v917_v41, %v925_v11  ;;  %v934_v17 = vmul.f32 0.5, %v933_v12  ;;  %v1014_v12 = vld [vmem:[%s10814_s2 + $0x9] sm:$0xff]  ;;  %vm1009_vm3 = vcmask 1041409  }
 0x54c   :  { %v930_v20 = vsel %vm928_vm4, %v929_v15, %v927_v16  ;;  %vm1012_vm4 = vcmask 254976  }
 0x54d   :  { %9331 = vrcp.f32 %v930_v20  ;;  %v935_v21 = vsub.f32 1.5, %v934_v17  ;;  %v954_v31 = vand.u32 2147483648, %v930_v20  ;;  %v952_v34 = vand.u32 2147483647, %v930_v20 }
 0x54e   :  { %vm948_vm8 = vweird.f32 %v930_v20 }
 0x54f   :  { %v936_v23 = vmul.f32 %v9330_v0, %v935_v21  ;;  %v955_v37 = vor.u32 1.1754944e-38, %v954_v31  ;;  %vm953_vm10 = vcmp.eq.f32.partialorder %v952_v34, 8.507059e+37 }
 0x551   :  { %v937_v25 = vmul.f32 %v936_v23, %v9686_v45 }
 0x553   :  { %v9332_v4 = vpop.eup %9331  ;;  %v939_v27 = vsel %vm938_vm5, %v9686_v45, %v937_v25  ;;  %vm1261_vm5 = vcmask 64512  }
 0x554   :  { %v944_v28 = vmul.f32 %v9332_v4, %v930_v20  ;;  %v942_v29 = vsel %vm940_vm6, %v941_v26, %v939_v27  ;;  %vm949_vm7 = vweird.f32 %v9332_v4 }
 0x555   :  { %9333 = vrcp.f32 %v942_v29  ;;  %vm950_vm9 = vmor %vm948_vm8, %vm949_vm7  ;;  %v969_v44 = vand.u32 2147483648, %v942_v29  ;;  %v967_v47 = vand.u32 2147483647, %v942_v29  ;;  %vm963_vm12 = vweird.f32 %v942_v29 }
 0x556   :  { %v945_v30 = vsub.f32 1.0, %v944_v28 }
 0x557   :  { %v970_v50 = vor.u32 1.1754944e-38, %v969_v44  ;;  %vm968_vm14 = vcmp.eq.f32.partialorder %v967_v47, 8.507059e+37 }
 0x558   :  { %v946_v32 = vmul.f32 %v9332_v4, %v945_v30 }
 0x55a   :  { %v947_v35 = vadd.f32 %v9332_v4, %v946_v32 }
 0x55b   :  { %v9334_v36 = vpop.eup %9333 }
 0x55c   :  { %v959_v39 = vmul.f32 %v9334_v36, %v942_v29  ;;  %v951_v40 = vsel %vm950_vm9, %v9332_v4, %v947_v35  ;;  %vm964_vm11 = vweird.f32 %v9334_v36 }
 0x55d   :  { %v956_v9 = vsel %vm953_vm10, %v955_v37, %v951_v40  ;;  %vm965_vm13 = vmor %vm963_vm12, %vm964_vm11  ;;  %v9281_v37 = vld [vmem:[%s10814_s2 + $0x11] ss:$0 sm:$0xff] }
 0x55e   :  { %v960_v41 = vsub.f32 1.0, %v959_v39  ;;  %v957_v42 = vmul.f32 %v956_v9, %v9673_v33 }
 0x560   :  { %v961_v45 = vmul.f32 %v9334_v36, %v960_v41  ;;  %v974_v46 = vmul.f32 %v9279_v19, %v957_v42 }
 0x562   :  { %v977_v48 = vadd.f32 %v9280_v43, %v974_v46  ;;  %v962_v49 = vadd.f32 %v9334_v36, %v961_v45 }
 0x564   :  { %v981_v51 = vmul.f32 1.442695, %v977_v48  ;;  %v966_v52 = vsel %vm965_vm13, %v9334_v36, %v962_v49  ;;  %vm979_vm15 = vcmp.gt.f32.partialorder %v977_v48, 0.0 }
 0x565   :  { %v971_v53 = vsel %vm968_vm14, %v970_v50, %v966_v52 }
 0x566   :  { %9335 = vpow2.f32 %v981_v51  ;;  %v972_v33 = vmul.f32 %v971_v53, %v9679_v38 }
 0x568   :  { %v975_v24 = vmul.f32 %v9279_v19, %v972_v33 }
 0x56a   :  { %v978_v54 = vadd.f32 %v9280_v43, %v975_v24 }
 0x56c   :  { %v9336_v55 = vpop.eup %9335  ;;  %v983_v56 = vmul.f32 1.442695, %v978_v54  ;;  %vm980_vm2 = vcmp.gt.f32.partialorder %v978_v54, 0.0 }
 0x56d   :  { %v9250_v57 = vadd.f32 -1.0, %v9336_v55 }
 0x56e   :  { %9337 = vpow2.f32 %v983_v56 }
 0x56f   :  { %v987_v58 = vmul.f32 1.6732632, %v9250_v57 }
 0x571   :  { %v989_v59 = vsel %vm979_vm15, %v977_v48, %v987_v58 }
 0x572   :  { %v991_v60 = vmul.f32 1.050701, %v989_v59 }
 0x574   :  { %v9338_v61 = vpop.eup %9337  ;;  %v993_v62 = vsel %vm237_vm1, %v991_v60, 0.0 }
 0x575   :  { %v994_v63 = vrot.slane %v993_v62, 4  ;;  %v9251_v0 = vadd.f32 -1.0, %v9338_v61 }
 0x577   :  { %v995_v2 = vadd.f32 %v994_v63, %v993_v62  ;;  %v988_v3 = vmul.f32 1.6732632, %v9251_v0 }
 0x579   :  { %v996_v5 = vrot.slane %v995_v2, 2  ;;  %v990_v38 = vsel %vm980_vm2, %v978_v54, %v988_v3 }
 0x57a   :  { %v992_v6 = vmul.f32 1.050701, %v990_v38 }
 0x57b   :  { %v997_v7 = vadd.f32 %v996_v5, %v995_v2 }
 0x57c   :  { %v1000_v8 = vsel %vm237_vm1, %v992_v6, 0.0 }
 0x57d   :  { %v998_v10 = vrot.slane %v997_v7, 1  ;;  %v1001_v11 = vrot.slane %v1000_v8, 4 }
 0x57f   :  { %v999_v13 = vadd.f32 %v998_v10, %v997_v7  ;;  %v1002_v14 = vadd.f32 %v1001_v11, %v1000_v8 }
 0x581   :  { %v9738_v15 = vadd.f32 %v1014_v12, %v999_v13  ;;  %v1003_v16 = vrot.slane %v1002_v14, 2 }
 0x583   :  { %v1024_v17 = vsel %vm237_vm1, %v9738_v15, 0  ;;  %v1004_v18 = vadd.f32 %v1003_v16, %v1002_v14 }
 0x584   :  { %v1049_v20 = vand.u32 4294901760, %v1024_v17 }
 0x585   :  { %v1005_v21 = vrot.slane %v1004_v18, 1 }
 0x586   :  { %1103 = vmatmul.f32.vlgmr.msrb.gmra.mxu3 %v1049_v20  ;;  %v1050_v22 = vsub.f32 %v1024_v17, %v1049_v20 }
 0x587   :  { %v1006_v23 = vadd.f32 %v1005_v21, %v1004_v18 }
 0x588   :  { %1137 = vmatmul.f32.vlgmr.msrb.gmra.mxu0 %v1050_v22  ;;  %v1051_v25 = vand.u32 4294901760, %v1050_v22 }
 0x589   :  { %v9742_v26 = vadd.f32 %v1014_v12, %v1006_v23  ;;  %v1010_v4 = vsel %vm1009_vm3, %v1006_v23, %v999_v13 }
 0x58a   :  { %1169 = vmatmul.f32.vlgmr.msrb.gmra.mxu1 %v1051_v25  ;;  %v1052_v27 = vsub.f32 %v1050_v22, %v1051_v25  ;;  %1013 = vst.msk [vmem:[#allocation2] sm:$0x3] %vm1012_vm4, %v1010_v4 }
 0x58b   :  { %v1027_v28 = vsel %vm237_vm1, %v9742_v26, 0  ;;  %9222 = dma.vmem_to_hbm [thread:$0]  %s9218_s9, 32, %s9220_s7, [#allocation3]  }
 0x58c   :  { %v1053_v29 = vand.u32 4294901760, %v1052_v27  ;;  %v1057_v30 = vand.u32 4294901760, %v1027_v28 }
 0x58e   :  { %1054 = vmatmul.f32.vlgmr.msrb.gmra.mxu2 %v1053_v29  ;;  %1107 = vmatmul.f32.gmra.mxu3 %v1057_v30  ;;  %v1058_v31 = vsub.f32 %v1027_v28, %v1057_v30 }
 0x590   :  { %1142 = vmatmul.f32.gmra.mxu0 %v1058_v31  ;;  %v1059_v32 = vand.u32 4294901760, %v1058_v31 }
 0x592   :  { %1175 = vmatmul.f32.gmra.mxu1 %v1059_v32  ;;  %v1060_v34 = vsub.f32 %v1058_v31, %v1059_v32 }
 0x594   :  { %v1061_v35 = vand.u32 4294901760, %v1060_v34 }
 0x596   :  { %1062 = vmatmul.f32.gmra.mxu2 %v1061_v35  ;;  %1237 = vmatmul.f32.vlgmr.msra.gmra.mxu3 %v1049_v20 }
 0x59e   :  { %1208 = vmatmul.f32.vlgmr.msra.gmra.mxu2 %v1049_v20  ;;  %1241 = vmatmul.f32.gmra.mxu3 %v1057_v30 }
 0x5a6   :  { %1212 = vmatmul.f32.gmra.mxu2 %v1057_v30 }
 0x605   :  { %v1138_v41 = vpop.f32.mrf.mxu0 }
 0x607   :  { %v1170_v45 = vpop.f32.mrf.mxu1 }
 0x609   :  { %v1104_v36 = vpop.f32.mrf.mxu3 }
 0x60d   :  { %v1143_v51 = vpop.f32.mrf.mxu0 }
 0x60f   :  { %v1176_v33 = vpop.f32.mrf.mxu1 }
 0x611   :  { %v1055_v39 = vpop.f32.mrf.mxu2  ;;  %v1108_v19 = vpop.f32.mrf.mxu3 }
 0x612   :  { %v1056_v40 = vadd.f32 %v9281_v37, %v1055_v39 }
 0x614   :  { %v1105_v9 = vadd.f32 %v1104_v36, %v1056_v40 }
 0x616   :  { %v1139_v44 = vadd.f32 %v1138_v41, %v1105_v9 }
 0x618   :  { %v1171_v47 = vadd.f32 %v1170_v45, %v1139_v44 }
 0x619   :  { %v1063_v42 = vpop.f32.mrf.mxu2  ;;  %v1238_v48 = vpop.f32.mrf.mxu3 }
 0x61a   :  { %v1064_v43 = vadd.f32 %v9281_v37, %v1063_v42 }
 0x61c   :  { %v1109_v46 = vadd.f32 %v1108_v19, %v1064_v43 }
 0x61e   :  { %v1144_v53 = vadd.f32 %v1143_v51, %v1109_v46 }
 0x620   :  { %v1177_v24 = vadd.f32 %v1176_v33, %v1144_v53 }
 0x621   :  { %v1209_v49 = vpop.f32.mrf.mxu2  ;;  %v1242_v56 = vpop.f32.mrf.mxu3 }
 0x622   :  { %v1210_v50 = vadd.f32 %v1209_v49, %v1171_v47 }
 0x624   :  { %v9749_v52 = vadd.f32 %v1238_v48, %v1210_v50 }
 0x626   :  { %1259 = vrot.lane.b32.xlu2 %v9749_v52, %s9500_s17  ;;  %1247 = vrot.lane.b32.xlu0 %v9749_v52, %s9501_s18  ;;  %v1262_v58 = vsel %vm1261_vm5, %v9749_v52, 0 }
 0x627   :  { %v1283_v59 = vand.u32 4294901760, %v1262_v58 }
 0x629   :  { %v1213_v54 = vpop.f32.mrf.mxu2  ;;  %v1284_v60 = vsub.f32 %v1262_v58, %v1283_v59 }
 0x62a   :  { %v1214_v55 = vadd.f32 %v1213_v54, %v1177_v24 }
 0x62b   :  { %v1285_v61 = vand.u32 4294901760, %v1284_v60 }
 0x62c   :  { %v9755_v57 = vadd.f32 %v1242_v56, %v1214_v55 }
 0x62d   :  { %v1286_v0 = vsub.f32 %v1284_v60, %v1285_v61 }
 0x62e   :  { %1251 = vrot.lane.b32.xlu2 %v9749_v52, %s9502_s19  ;;  %1412 = vrot.lane.b32.xlu0 %v9755_v57, %s9500_s17  ;;  %v1414_v8 = vsel %vm1261_vm5, %v9755_v57, 0 }
 0x62f   :  { %1249 = vrot.lane.b32.xlu1 %v9755_v57, %s9501_s18  ;;  %v1287_v5 = vand.u32 4294901760, %v1286_v0  ;;  %v1435_v10 = vand.u32 4294901760, %v1414_v8 }
 0x631   :  { %v1436_v12 = vsub.f32 %v1414_v8, %v1435_v10 }
 0x633   :  { %v1437_v13 = vand.u32 4294901760, %v1436_v12 }
 0x635   :  { %v1438_v18 = vsub.f32 %v1436_v12, %v1437_v13 }
 0x637   :  { %1253 = vrot.lane.b32.xlu1 %v9755_v57, %s9502_s19  ;;  %v1439_v22 = vand.u32 4294901760, %v1438_v18 }
 0x63f   :  { %1255 = vrot.lane.b32.xlu1 %v9749_v52, %s9503_s20 }
 0x680   :  { %v1260_v62 = vpop.permute.xlu2 %1259 }
 0x681   :  { %v1264_v63 = vsel %vm1261_vm5, %v1260_v62, 0 }
 0x682   :  { %v1281_v2 = vand.u32 4294901760, %v1264_v63 }
 0x684   :  { %v1308_v3 = vsub.f32 %v1264_v63, %v1281_v2  ;;  %1282 = vmatpush.xpose.msra.mxu0 %v1281_v2  ;;  %1358 = vmatpush.xpose.msrb.mxu3 %v1281_v2 }
 0x686   :  { %v1309_v38 = vand.u32 4294901760, %v1308_v3  ;;  %1335 = vmatpush.xpose.msrb.mxu2 %v1308_v3 }
 0x687   :  { %1288 = vmatmul.f32.vlgmr.msra.gmra.mxu0 %v1287_v5  ;;  %1362 = vmatmul.f32.vlgmr.msrb.gmra.mxu3 %v1285_v61 }
 0x688   :  { %v1310_v6 = vsub.f32 %v1308_v3, %v1309_v38  ;;  %1384 = vmatpush.xpose.msrb.mxu0 %v1309_v38  ;;  %v9783_v4 = vpop.permute.xlu2 %1251 }
 0x689   :  { %1338 = vmatmul.f32.vlgmr.msrb.gmra.mxu2 %v1284_v60 }
 0x68a   :  { %v1311_v7 = vand.u32 4294901760, %v1310_v6  ;;  %v1870_v6 = vsel %vm1261_vm5, %v9783_v4, 0 }
 0x68c   :  { %1312 = vmatpush.xpose.msra.mxu1 %v1311_v7 }
 0x68f   :  { %1314 = vmatmul.f32.vlgmr.msra.gmra.mxu1 %v1283_v59  ;;  %1386 = vmatmul.f32.vlgmr.msrb.gmra.mxu0 %v1283_v59 }
 0x690   :  { %1406 = vmatpush.xpose.msrb.mxu1 %v1281_v2 }
 0x697   :  { %1408 = vmatmul.f32.vlgmr.msrb.gmra.mxu1 %v1283_v59 }
 0x698   :  { %v9772_v11 = vpop.permute.xlu0 %1247 }
 0x699   :  { %1564 = vrot.lane.b32.xlu0 %v9772_v11, %s9500_s17  ;;  %v1566_v31 = vsel %vm1261_vm5, %v9772_v11, 0 }
 0x69a   :  { %v9800_v35 = vand.u32 4294901760, %v1566_v31 }
 0x69c   :  { %v1588_v37 = vsub.f32 %v1566_v31, %v9800_v35 }
 0x69e   :  { %v1589_v40 = vand.u32 4294901760, %v1588_v37 }
 0x6a0   :  { %v1413_v14 = vpop.permute.xlu0 %1412  ;;  %v1590_v47 = vsub.f32 %v1588_v37, %v1589_v40 }
 0x6a1   :  { %v1416_v16 = vsel %vm1261_vm5, %v1413_v14, 0  ;;  %v9777_v17 = vpop.permute.xlu1 %1249  ;;  %1257 = vrot.lane.b32.xlu0 %v9755_v57, %s9503_s20 }
 0x6a2   :  { %v1433_v20 = vand.u32 4294901760, %v1416_v16  ;;  %1716 = vrot.lane.b32.xlu2 %v9777_v17, %s9500_s17  ;;  %v1718_v19 = vsel %vm1261_vm5, %v9777_v17, 0  ;;  %v1591_v56 = vand.u32 4294901760, %v1590_v47 }
 0x6a3   :  { %v9806_v42 = vand.u32 4294901760, %v1718_v19 }
 0x6a4   :  { %v1460_v21 = vsub.f32 %v1416_v16, %v1433_v20  ;;  %1434 = vmatpush.xpose.msra.mxu2 %v1433_v20  ;;  %1510 = vmatpush.xpose.msra.mxu1 %v1433_v20 }
 0x6a5   :  { %v9810_v53 = vsub.f32 %v1718_v19, %v9806_v42 }
 0x6a6   :  { %v1461_v23 = vand.u32 4294901760, %v1460_v21  ;;  %1487 = vmatpush.xpose.msra.mxu0 %v1460_v21 }
 0x6a7   :  { %1440 = vmatmul.f32.vlgmr.msra.gmra.mxu2 %v1439_v22  ;;  %1514 = vmatmul.f32.vlgmr.msra.gmra.mxu1 %v1437_v13  ;;  %v1741_v62 = vand.u32 4294901760, %v9810_v53 }
 0x6a8   :  { %v1462_v25 = vsub.f32 %v1460_v21, %v1461_v23  ;;  %1536 = vmatpush.xpose.msrb.mxu2 %v1461_v23 }
 0x6a9   :  { %v9785_v27 = vpop.permute.xlu1 %1253  ;;  %1490 = vmatmul.f32.vlgmr.msra.gmra.mxu0 %v1436_v12  ;;  %v9828_v12 = vand.u32 4294901760, %v1870_v6 }
 0x6aa   :  { %v1463_v28 = vand.u32 4294901760, %v1462_v25  ;;  %1868 = vrot.lane.b32.xlu2 %v9783_v4, %s9500_s17  ;;  %2020 = vrot.lane.b32.xlu1 %v9785_v27, %s9500_s17  ;;  %v2022_v25 = vsel %vm1261_vm5, %v9785_v27, 0 }
 0x6ac   :  { %1464 = vmatpush.xpose.msra.mxu3 %v1463_v28 }
 0x6af   :  { %1466 = vmatmul.f32.vlgmr.msra.gmra.mxu3 %v1435_v10  ;;  %1538 = vmatmul.f32.vlgmr.msrb.gmra.mxu2 %v1435_v10 }
 0x6b0   :  { %1558 = vmatpush.xpose.msrb.mxu3 %v1433_v20  ;;  %v1892_v20 = vsub.f32 %v1870_v6, %v9828_v12 }
 0x6b1   :  { %v9791_v29 = vpop.permute.xlu1 %1255 }
 0x6b2   :  { %2172 = vrot.lane.b32.xlu0 %v9791_v29, %s9500_s17 }
 0x6b7   :  { %1560 = vmatmul.f32.vlgmr.msrb.gmra.mxu3 %v1435_v10  ;;  %v1742_v10 = vsub.f32 %v9810_v53, %v1741_v62 }
 0x6b9   :  { %v1743_v16 = vand.u32 4294901760, %v1742_v10 }
 0x6fc   :  { %v1717_v30 = vpop.permute.xlu2 %1716 }
 0x6fd   :  { %v1720_v32 = vsel %vm1261_vm5, %v1717_v30, 0  ;;  %v1893_v30 = vand.u32 4294901760, %v1892_v20 }
 0x6fe   :  { %v9798_v34 = vand.u32 4294901760, %v1720_v32 }
 0x700   :  { %v1764_v36 = vsub.f32 %v1720_v32, %v9798_v34 }
 0x702   :  { %v1765_v39 = vand.u32 4294901760, %v1764_v36 }
 0x704   :  { %v1289_v9 = vpop.f32.mrf.mxu0  ;;  %v1766_v41 = vsub.f32 %v1764_v36, %v1765_v39  ;;  %v1869_v44 = vpop.permute.xlu2 %1868 }
 0x705   :  { %v1872_v33 = vsel %vm1261_vm5, %v1869_v44, 0 }
 0x706   :  { %v1767_v50 = vand.u32 4294901760, %v1766_v41  ;;  %v9813_v60 = vand.u32 4294901760, %v1872_v33 }
 0x708   :  { %v1916_v7 = vsub.f32 %v1872_v33, %v9813_v60 }
 0x70a   :  { %v1363_v55 = vpop.f32.mrf.mxu3  ;;  %v1917_v14 = vand.u32 4294901760, %v1916_v7 }
 0x70b   :  { %v1565_v43 = vpop.permute.xlu0 %1564 }
 0x70c   :  { %v1568_v45 = vsel %vm1261_vm5, %v1565_v43, 0  ;;  %v1315_v46 = vpop.f32.mrf.mxu1  ;;  %v1339_v51 = vpop.f32.mrf.mxu2  ;;  %v1918_v22 = vsub.f32 %v1916_v7, %v1917_v14 }
 0x70d   :  { %v1585_v48 = vand.u32 4294901760, %v1568_v45  ;;  %v1316_v49 = vadd.f32 %v1315_v46, %v1289_v9  ;;  %v1387_v61 = vpop.f32.mrf.mxu0 }
 0x70e   :  { %v1919_v31 = vand.u32 4294901760, %v1918_v22 }
 0x70f   :  { %v1612_v24 = vsub.f32 %v1568_v45, %v1585_v48  ;;  %v1340_v54 = vadd.f32 %v1339_v51, %v1316_v49  ;;  %1586 = vmatpush.xpose.msrb.mxu0 %v1585_v48  ;;  %1662 = vmatpush.xpose.msra.mxu3 %v1585_v48 }
 0x711   :  { %v1613_v58 = vand.u32 4294901760, %v1612_v24  ;;  %v1364_v59 = vadd.f32 %v1363_v55, %v1340_v54  ;;  %1639 = vmatpush.xpose.msra.mxu2 %v1612_v24 }
 0x712   :  { %1592 = vmatmul.f32.vlgmr.msrb.gmra.mxu0 %v1591_v56  ;;  %1666 = vmatmul.f32.vlgmr.msra.gmra.mxu3 %v1589_v40 }
 0x713   :  { %1768 = vmatpush.xpose.msrb.mxu3 %v1767_v50  ;;  %v1614_v63 = vsub.f32 %v1612_v24, %v1613_v58  ;;  %v1388_v0 = vadd.f32 %v1387_v61, %v1364_v59  ;;  %v9817_v2 = vpop.permute.xlu0 %1257  ;;  %1688 = vmatpush.xpose.msra.mxu0 %v1613_v58 }
 0x714   :  { %v1409_v3 = vpop.f32.mrf.mxu1  ;;  %2324 = vrot.lane.b32.xlu2 %v9817_v2, %s9500_s17  ;;  %1642 = vmatmul.f32.vlgmr.msra.gmra.mxu2 %v1588_v37  ;;  %v2326_v6 = vsel %vm1261_vm5, %v9817_v2, 0 }
 0x715   :  { %1738 = vmatpush.xpose.msrb.mxu2 %v9798_v34  ;;  %v1615_v5 = vand.u32 4294901760, %v1614_v63  ;;  %v1410_v38 = vadd.f32 %v1409_v3, %v1388_v0 }
 0x717   :  { %1862 = vmatpush.xpose.msra.mxu3 %v9798_v34  ;;  %1791 = vmatpush.xpose.msrb.mxu0 %v1764_v36  ;;  %v9825_v8 = vmul.f32 0.35355338, %v1410_v38  ;;  %v2043_v36 = vand.u32 4294901760, %v2022_v25 }
 0x718   :  { %1616 = vmatpush.xpose.msrb.mxu1 %v1615_v5 }
 0x719   :  { %1840 = vmatpush.xpose.msra.mxu2 %v1765_v39  ;;  %v2484_v13 = vsel %vm1261_vm5, %v9825_v8, -inf  ;;  %v1894_v39 = vsub.f32 %v1892_v20, %v1893_v30  ;;  %v2044_v19 = vsub.f32 %v2022_v25, %v2043_v36 }
 0x71a   :  { %2485 = vmax.xlane.f32.xlu1 %v2484_v13  ;;  %1690 = vmatmul.f32.vlgmr.msra.gmra.mxu0 %v9800_v35 }
 0x71b   :  { %1618 = vmatmul.f32.vlgmr.msrb.gmra.mxu1 %v9800_v35  ;;  %1770 = vmatmul.f32.vlgmr.msrb.gmra.mxu3 %v9806_v42  ;;  %v1895_v41 = vand.u32 4294901760, %v1894_v39  ;;  %v2045_v43 = vand.u32 4294901760, %v2044_v19 }
 0x71c   :  { %1710 = vmatpush.xpose.msra.mxu1 %v1585_v48  ;;  %1890 = vmatpush.xpose.msra.mxu0 %v9813_v60  ;;  %v2021_v18 = vpop.permute.xlu1 %2020 }
 0x71d   :  { %1966 = vmatpush.xpose.msrb.mxu3 %v9813_v60  ;;  %v2024_v21 = vsel %vm1261_vm5, %v2021_v18, 0  ;;  %1744 = vmatmul.f32.vlgmr.msrb.gmra.mxu2 %v1743_v16  ;;  %v2046_v46 = vsub.f32 %v2044_v19, %v2045_v43 }
 0x71e   :  { %v2041_v23 = vand.u32 4294901760, %v2024_v21  ;;  %1943 = vmatpush.xpose.msrb.mxu2 %v1916_v7  ;;  %v2347_v7 = vand.u32 4294901760, %v2326_v6 }
 0x71f   :  { %v2047_v51 = vand.u32 4294901760, %v2046_v46 }
 0x720   :  { %1814 = vmatpush.xpose.msrb.mxu1 %v9798_v34  ;;  %v2068_v28 = vsub.f32 %v2024_v21, %v2041_v23  ;;  %v2348_v10 = vsub.f32 %v2326_v6, %v2347_v7 }
 0x722   :  { %v2069_v32 = vand.u32 4294901760, %v2068_v28  ;;  %1794 = vmatmul.f32.vlgmr.msrb.gmra.mxu0 %v9810_v53 }
 0x723   :  { %1712 = vmatmul.f32.vlgmr.msra.gmra.mxu1 %v9800_v35  ;;  %1864 = vmatmul.f32.vlgmr.msra.gmra.mxu3 %v9806_v42 }
 0x724   :  { %v2070_v37 = vsub.f32 %v2068_v28, %v2069_v32  ;;  %1920 = vmatpush.xpose.msra.mxu1 %v1919_v31  ;;  %1992 = vmatpush.xpose.msrb.mxu0 %v1917_v14  ;;  %v2173_v34 = vpop.permute.xlu0 %2172  ;;  %v1515_v55 = vpop.f32.mrf.mxu1 }
 0x725   :  { %1842 = vmatmul.f32.vlgmr.msra.gmra.mxu2 %v9806_v42  ;;  %v2176_v9 = vsel %vm1261_vm5, %v2173_v34, 0  ;;  %v2174_v42 = vsel %vm1261_vm5, %v9791_v29, 0 }
 0x726   :  { %v2071_v40 = vand.u32 4294901760, %v2070_v37  ;;  %2042 = vmatpush.xpose.msra.mxu2 %v2041_v23  ;;  %v2193_v35 = vand.u32 4294901760, %v2176_v9  ;;  %v2195_v47 = vand.u32 4294901760, %v2174_v42  ;;  %v1491_v53 = vpop.f32.mrf.mxu0 }
 0x728   :  { %2072 = vmatpush.xpose.msra.mxu3 %v2071_v40  ;;  %v2220_v44 = vsub.f32 %v2176_v9, %v2193_v35  ;;  %v2196_v33 = vsub.f32 %v2174_v42, %v2195_v47 }
 0x72a   :  { %1896 = vmatmul.f32.vlgmr.msra.gmra.mxu0 %v1895_v41  ;;  %v1441_v45 = vpop.f32.mrf.mxu2  ;;  %v2221_v48 = vand.u32 4294901760, %v2220_v44  ;;  %v2197_v59 = vand.u32 4294901760, %v2196_v33 }
 0x72b   :  { %1818 = vmatmul.f32.vlgmr.msrb.gmra.mxu1 %v1741_v62  ;;  %1970 = vmatmul.f32.vlgmr.msrb.gmra.mxu3 %v1893_v30 }
 0x72c   :  { %2014 = vmatpush.xpose.msrb.mxu1 %v9813_v60  ;;  %2095 = vmatpush.xpose.msra.mxu0 %v2068_v28  ;;  %v2222_v54 = vsub.f32 %v2220_v44, %v2221_v48  ;;  %v2198_v3 = vsub.f32 %v2196_v33, %v2197_v59 }
 0x72d   :  { %2166 = vmatpush.xpose.msrb.mxu3 %v2041_v23  ;;  %1946 = vmatmul.f32.vlgmr.msrb.gmra.mxu2 %v1892_v20 }
 0x72e   :  { %2144 = vmatpush.xpose.msrb.mxu2 %v2069_v32  ;;  %v2223_v61 = vand.u32 4294901760, %v2222_v54  ;;  %v2199_v38 = vand.u32 4294901760, %v2198_v3 }
 0x732   :  { %v1467_v49 = vpop.f32.mrf.mxu3  ;;  %1994 = vmatmul.f32.vlgmr.msrb.gmra.mxu0 %v9828_v12  ;;  %v1539_v58 = vpop.f32.mrf.mxu2 }
 0x733   :  { %1922 = vmatmul.f32.vlgmr.msra.gmra.mxu1 %v9828_v12  ;;  %v1468_v50 = vadd.f32 %v1467_v49, %v1441_v45  ;;  %2074 = vmatmul.f32.vlgmr.msra.gmra.mxu3 %v2043_v36 }
 0x734   :  { %2118 = vmatpush.xpose.msra.mxu1 %v2041_v23  ;;  %2194 = vmatpush.xpose.msrb.mxu0 %v2193_v35 }
 0x735   :  { %v1492_v24 = vadd.f32 %v1491_v53, %v1468_v50  ;;  %2270 = vmatpush.xpose.msra.mxu3 %v2193_v35  ;;  %2048 = vmatmul.f32.vlgmr.msra.gmra.mxu2 %v2047_v51 }
 0x736   :  { %2247 = vmatpush.xpose.msra.mxu2 %v2220_v44 }
 0x737   :  { %v1516_v56 = vadd.f32 %v1515_v55, %v1492_v24 }
 0x739   :  { %v1540_v60 = vadd.f32 %v1539_v58, %v1516_v56 }
 0x73a   :  { %v1561_v62 = vpop.f32.mrf.mxu3  ;;  %2098 = vmatmul.f32.vlgmr.msra.gmra.mxu0 %v2044_v19 }
 0x73b   :  { %2016 = vmatmul.f32.vlgmr.msrb.gmra.mxu1 %v9828_v12  ;;  %v1562_v63 = vadd.f32 %v1561_v62, %v1540_v60  ;;  %2168 = vmatmul.f32.vlgmr.msrb.gmra.mxu3 %v2043_v36  ;;  %v2349_v12 = vand.u32 4294901760, %v2348_v10 }
 0x73c   :  { %2224 = vmatpush.xpose.msrb.mxu1 %v2223_v61  ;;  %2296 = vmatpush.xpose.msra.mxu0 %v2221_v48 }
 0x73d   :  { %v9853_v0 = vmul.f32 0.35355338, %v1562_v63  ;;  %2146 = vmatmul.f32.vlgmr.msrb.gmra.mxu2 %v2043_v36  ;;  %v2350_v16 = vsub.f32 %v2348_v10, %v2349_v12 }
 0x73f   :  { %v2487_v5 = vsel %vm1261_vm5, %v9853_v0, -inf  ;;  %v2351_v21 = vand.u32 4294901760, %v2350_v16 }
 0x740   :  { %2488 = vmax.xlane.f32.xlu0 %v2487_v5 }
 0x742   :  { %2200 = vmatmul.f32.vlgmr.msrb.gmra.mxu0 %v2199_v38 }
 0x743   :  { %2122 = vmatmul.f32.vlgmr.msra.gmra.mxu1 %v2045_v43  ;;  %2274 = vmatmul.f32.vlgmr.msra.gmra.mxu3 %v2197_v59 }
 0x744   :  { %2318 = vmatpush.xpose.msra.mxu1 %v2193_v35 }
 0x745   :  { %2250 = vmatmul.f32.vlgmr.msra.gmra.mxu2 %v2196_v33 }
 0x74a   :  { %2298 = vmatmul.f32.vlgmr.msra.gmra.mxu0 %v2195_v47 }
 0x74b   :  { %2226 = vmatmul.f32.vlgmr.msrb.gmra.mxu1 %v2195_v47 }
 0x753   :  { %2320 = vmatmul.f32.vlgmr.msra.gmra.mxu1 %v2195_v47 }
 0x76e   :  { %v2325_v13 = vpop.permute.xlu2 %2324 }
 0x76f   :  { %v2328_v14 = vsel %vm1261_vm5, %v2325_v13, 0 }
 0x770   :  { %v2345_v18 = vand.u32 4294901760, %v2328_v14 }
 0x772   :  { %v2372_v20 = vsub.f32 %v2328_v14, %v2345_v18  ;;  %2346 = vmatpush.xpose.msrb.mxu2 %v2345_v18  ;;  %2422 = vmatpush.xpose.msrb.mxu1 %v2345_v18 }
 0x774   :  { %v2373_v22 = vand.u32 4294901760, %v2372_v20  ;;  %2399 = vmatpush.xpose.msrb.mxu0 %v2372_v20 }
 0x775   :  { %2352 = vmatmul.f32.vlgmr.msrb.gmra.mxu2 %v2351_v21  ;;  %2426 = vmatmul.f32.vlgmr.msrb.gmra.mxu1 %v2349_v12 }
 0x776   :  { %v2374_v23 = vsub.f32 %v2372_v20, %v2373_v22  ;;  %2448 = vmatpush.xpose.msra.mxu2 %v2373_v22 }
 0x777   :  { %2402 = vmatmul.f32.vlgmr.msrb.gmra.mxu0 %v2348_v10 }
 0x778   :  { %v2375_v25 = vand.u32 4294901760, %v2374_v23 }
 0x77a   :  { %2376 = vmatpush.xpose.msrb.mxu3 %v2375_v25 }
 0x77d   :  { %2378 = vmatmul.f32.vlgmr.msrb.gmra.mxu3 %v2347_v7  ;;  %2450 = vmatmul.f32.vlgmr.msra.gmra.mxu2 %v2347_v7 }
 0x77e   :  { %2470 = vmatpush.xpose.msra.mxu3 %v2345_v18 }
 0x785   :  { %2472 = vmatmul.f32.vlgmr.msra.gmra.mxu3 %v2347_v7 }
 0x78d   :  { %v2486_v31 = vpop.xlane.xlu1 %2485 }
 0x78e   :  { %v2508_v40 = vsub.f32 %v9825_v8, %v2486_v31 }
 0x78f   :  { %v1593_v28 = vpop.f32.mrf.mxu0 }
 0x790   :  { %v2516_v35 = vmul.f32 1.442695, %v2508_v40 }
 0x792   :  { %9339 = vpow2.f32 %v2516_v35 }
 0x795   :  { %v1667_v30 = vpop.f32.mrf.mxu3 }
 0x797   :  { %v1643_v37 = vpop.f32.mrf.mxu2  ;;  %v1691_v34 = vpop.f32.mrf.mxu0 }
 0x798   :  { %v1619_v32 = vpop.f32.mrf.mxu1  ;;  %v9865_v33 = vpop.eup %9339 }
 0x799   :  { %v1620_v36 = vadd.f32 %v1619_v32, %v1593_v28  ;;  %v2532_v55 = vsel %vm1261_vm5, %v9865_v33, 0.0 }
 0x79b   :  { %v1644_v39 = vadd.f32 %v1643_v37, %v1620_v36 }
 0x79d   :  { %v1668_v19 = vadd.f32 %v1667_v30, %v1644_v39 }
 0x79e   :  { %v1771_v41 = vpop.f32.mrf.mxu3 }
 0x79f   :  { %v1692_v9 = vadd.f32 %v1691_v34, %v1668_v19  ;;  %v1795_v45 = vpop.f32.mrf.mxu0 }
 0x7a0   :  { %v1713_v43 = vpop.f32.mrf.mxu1  ;;  %v1745_v44 = vpop.f32.mrf.mxu2 }
 0x7a1   :  { %v1714_v42 = vadd.f32 %v1713_v43, %v1692_v9  ;;  %v1772_v47 = vadd.f32 %v1771_v41, %v1745_v44 }
 0x7a3   :  { %v9861_v46 = vmul.f32 0.35355338, %v1714_v42  ;;  %v1796_v49 = vadd.f32 %v1795_v45, %v1772_v47 }
 0x7a5   :  { %v2490_v48 = vsel %vm1261_vm5, %v9861_v46, -inf }
 0x7a6   :  { %2491 = vmax.xlane.f32.xlu2 %v2490_v48  ;;  %v1865_v50 = vpop.f32.mrf.mxu3 }
 0x7a7   :  { %v1897_v24 = vpop.f32.mrf.mxu0 }
 0x7a8   :  { %v1819_v51 = vpop.f32.mrf.mxu1  ;;  %v1843_v53 = vpop.f32.mrf.mxu2 }
 0x7a9   :  { %v1820_v8 = vadd.f32 %v1819_v51, %v1796_v49 }
 0x7ab   :  { %v1844_v54 = vadd.f32 %v1843_v53, %v1820_v8 }
 0x7ad   :  { %v1866_v56 = vadd.f32 %v1865_v50, %v1844_v54 }
 0x7ae   :  { %2533 = vadd.xlane.f32.xlu2 %v2532_v55  ;;  %v1971_v59 = vpop.f32.mrf.mxu3 }
 0x7af   :  { %v9869_v58 = vmul.f32 0.35355338, %v1866_v56  ;;  %v1995_v5 = vpop.f32.mrf.mxu0 }
 0x7b0   :  { %v1923_v60 = vpop.f32.mrf.mxu1  ;;  %v1947_v62 = vpop.f32.mrf.mxu2 }
 0x7b1   :  { %v1924_v61 = vadd.f32 %v1923_v60, %v1897_v24  ;;  %v2493_v63 = vsel %vm1261_vm5, %v9869_v58, -inf }
 0x7b2   :  { %2494 = vmax.xlane.f32.xlu1 %v2493_v63 }
 0x7b3   :  { %v1948_v3 = vadd.f32 %v1947_v62, %v1924_v61  ;;  %v2489_v38 = vpop.xlane.xlu0 %2488 }
 0x7b4   :  { %v2509_v7 = vsub.f32 %v9853_v0, %v2489_v38 }
 0x7b5   :  { %v1972_v6 = vadd.f32 %v1971_v59, %v1948_v3 }
 0x7b6   :  { %v2518_v12 = vmul.f32 1.442695, %v2509_v7  ;;  %v2075_v18 = vpop.f32.mrf.mxu3 }
 0x7b7   :  { %v1996_v10 = vadd.f32 %v1995_v5, %v1972_v6  ;;  %v2099_v23 = vpop.f32.mrf.mxu0 }
 0x7b8   :  { %v2017_v13 = vpop.f32.mrf.mxu1  ;;  %v2049_v16 = vpop.f32.mrf.mxu2  ;;  %9341 = vpow2.f32 %v2518_v12 }
 0x7b9   :  { %v2018_v14 = vadd.f32 %v2017_v13, %v1996_v10  ;;  %v2076_v21 = vadd.f32 %v2075_v18, %v2049_v16 }
 0x7bb   :  { %v9874_v20 = vmul.f32 0.35355338, %v2018_v14  ;;  %v2100_v25 = vadd.f32 %v2099_v23, %v2076_v21 }
 0x7bd   :  { %v2496_v22 = vsel %vm1261_vm5, %v9874_v20, -inf }
 0x7be   :  { %2497 = vmax.xlane.f32.xlu0 %v2496_v22  ;;  %v9878_v31 = vpop.eup %9341  ;;  %v2169_v36 = vpop.f32.mrf.mxu3 }
 0x7bf   :  { %v2535_v37 = vsel %vm1261_vm5, %v9878_v31, 0.0  ;;  %v2201_v9 = vpop.f32.mrf.mxu0 }
 0x7c0   :  { %v2123_v28 = vpop.f32.mrf.mxu1  ;;  %v2147_v0 = vpop.f32.mrf.mxu2 }
 0x7c1   :  { %v2124_v30 = vadd.f32 %v2123_v28, %v2100_v25 }
 0x7c3   :  { %v2148_v32 = vadd.f32 %v2147_v0, %v2124_v30 }
 0x7c5   :  { %v2170_v34 = vadd.f32 %v2169_v36, %v2148_v32 }
 0x7c6   :  { %2980 = vrot.lane.b32.xlu2 %v9772_v11, %s9504_s21  ;;  %2536 = vadd.xlane.f32.xlu0 %v2535_v37  ;;  %v2275_v42 = vpop.f32.mrf.mxu3 }
 0x7c7   :  { %v9884_v39 = vmul.f32 0.35355338, %v2170_v34  ;;  %v2299_v45 = vpop.f32.mrf.mxu0 }
 0x7c8   :  { %v2227_v19 = vpop.f32.mrf.mxu1  ;;  %v2251_v35 = vpop.f32.mrf.mxu2 }
 0x7c9   :  { %v2499_v40 = vsel %vm1261_vm5, %v9884_v39, -inf  ;;  %v2228_v41 = vadd.f32 %v2227_v19, %v2201_v9 }
 0x7ca   :  { %2500 = vmax.xlane.f32.xlu1 %v2499_v40 }
 0x7cb   :  { %v2252_v43 = vadd.f32 %v2251_v35, %v2228_v41 }
 0x7cd   :  { %v2276_v44 = vadd.f32 %v2275_v42, %v2252_v43 }
 0x7cf   :  { %v2300_v47 = vadd.f32 %v2299_v45, %v2276_v44 }
 0x7d0   :  { %v2321_v11 = vpop.f32.mrf.mxu1 }
 0x7d1   :  { %v2322_v48 = vadd.f32 %v2321_v11, %v2300_v47 }
 0x7d3   :  { %v9892_v49 = vmul.f32 0.35355338, %v2322_v48 }
 0x7d5   :  { %v2502_v50 = vsel %vm1261_vm5, %v9892_v49, -inf }
 0x7da   :  { %2828 = vrot.lane.b32.xlu0 %v9755_v57, %s9504_s21 }
 0x7e3   :  { %2676 = vrot.lane.b32.xlu1 %v9749_v52, %s9504_s21 }
 0x7ef   :  { %2503 = vmax.xlane.f32.xlu2 %v2502_v50 }
 0x7f2   :  { %v2427_v54 = vpop.f32.mrf.mxu1 }
 0x7f4   :  { %v2403_v24 = vpop.f32.mrf.mxu0 }
 0x7f8   :  { %v2353_v51 = vpop.f32.mrf.mxu2 }
 0x800   :  { %v2379_v8 = vpop.f32.mrf.mxu3  ;;  %v2451_v56 = vpop.f32.mrf.mxu2 }
 0x801   :  { %v2380_v53 = vadd.f32 %v2379_v8, %v2353_v51 }
 0x803   :  { %v2404_v57 = vadd.f32 %v2403_v24, %v2380_v53 }
 0x805   :  { %v2428_v55 = vadd.f32 %v2427_v54, %v2404_v57 }
 0x807   :  { %v2452_v59 = vadd.f32 %v2451_v56, %v2428_v55 }
 0x808   :  { %v2473_v60 = vpop.f32.mrf.mxu3 }
 0x809   :  { %v2474_v61 = vadd.f32 %v2473_v60, %v2452_v59 }
 0x80b   :  { %v9896_v62 = vmul.f32 0.35355338, %v2474_v61 }
 0x80d   :  { %v2505_v52 = vsel %vm1261_vm5, %v9896_v62, -inf }
 0x80e   :  { %2506 = vmax.xlane.f32.xlu2 %v2505_v52 }
 0x819   :  { %v2492_v63 = vpop.xlane.xlu2 %2491 }
 0x81a   :  { %v2510_v3 = vsub.f32 %v9861_v46, %v2492_v63 }
 0x81c   :  { %v2520_v5 = vmul.f32 1.442695, %v2510_v3 }
 0x81e   :  { %9343 = vpow2.f32 %v2520_v5 }
 0x821   :  { %v2534_v38 = vpop.xlane.xlu2 %2533 }
 0x822   :  { %9345 = vrcp.f32 %v2534_v38  ;;  %vm2561_vm7 = vweird.f32 %v2534_v38  ;;  %v2565_v0 = vand.u32 2147483647, %v2534_v38 }
 0x824   :  { %v9901_v6 = vpop.eup %9343  ;;  %vm2566_vm9 = vcmp.eq.f32.partialorder %v2565_v0, 8.507059e+37 }
 0x825   :  { %v2495_v7 = vpop.xlane.xlu1 %2494  ;;  %v2538_v10 = vsel %vm1261_vm5, %v9901_v6, 0.0 }
 0x826   :  { %v2511_v12 = vsub.f32 %v9869_v58, %v2495_v7  ;;  %2539 = vadd.xlane.f32.xlu0 %v2538_v10  ;;  %v2567_v58 = vand.u32 2147483648, %v2534_v38 }
 0x828   :  { %v9346_v13 = vpop.eup %9345  ;;  %v2522_v14 = vmul.f32 1.442695, %v2511_v12  ;;  %v2568_v37 = vor.u32 1.1754944e-38, %v2567_v58 }
 0x829   :  { %v2557_v16 = vmul.f32 %v9346_v13, %v2534_v38  ;;  %vm2562_vm6 = vweird.f32 %v9346_v13  ;;  %v2981_v63 = vpop.permute.xlu2 %2980 }
 0x82a   :  { %9347 = vpow2.f32 %v2522_v14  ;;  %vm2563_vm8 = vmor %vm2561_vm7, %vm2562_vm6  ;;  %v3001_v7 = vand.u32 4294901760, %v2981_v63 }
 0x82b   :  { %v2558_v18 = vsub.f32 1.0, %v2557_v16 }
 0x82c   :  { %v3028_v14 = vsub.f32 %v2981_v63, %v3001_v7 }
 0x82d   :  { %v2559_v23 = vmul.f32 %v9346_v13, %v2558_v18 }
 0x82f   :  { %v2560_v30 = vadd.f32 %v9346_v13, %v2559_v23 }
 0x830   :  { %v9906_v21 = vpop.eup %9347 }
 0x831   :  { %v2498_v46 = vpop.xlane.xlu0 %2497  ;;  %v2541_v22 = vsel %vm1261_vm5, %v9906_v21, 0.0  ;;  %v2564_v36 = vsel %vm2563_vm8, %v9346_v13, %v2560_v30 }
 0x832   :  { %v2512_v25 = vsub.f32 %v9874_v20, %v2498_v46  ;;  %2542 = vadd.xlane.f32.xlu2 %v2541_v22  ;;  %v2569_v20 = vsel %vm2566_vm9, %v2568_v37, %v2564_v36  ;;  %v3029_v46 = vand.u32 4294901760, %v3028_v14 }
 0x833   :  { %v2570_v9 = vmul.f32 %v9865_v33, %v2569_v20 }
 0x834   :  { %v2524_v28 = vmul.f32 1.442695, %v2512_v25  ;;  %v3030_v30 = vsub.f32 %v3028_v14, %v3029_v46 }
 0x835   :  { %v2680_v42 = vsel %vm1261_vm5, %v2570_v9, 0 }
 0x836   :  { %9349 = vpow2.f32 %v2524_v28  ;;  %v9919_v47 = vand.u32 4294901760, %v2680_v42  ;;  %v3031_v0 = vand.u32 4294901760, %v3030_v30 }
 0x838   :  { %v2700_v51 = vsub.f32 %v2680_v42, %v9919_v47 }
 0x839   :  { %v2537_v32 = vpop.xlane.xlu0 %2536 }
 0x83a   :  { %9351 = vrcp.f32 %v2537_v32  ;;  %3132 = vrot.lane.b32.xlu0 %v9777_v17, %s9504_s21  ;;  %v2582_v43 = vand.u32 2147483648, %v2537_v32  ;;  %v2580_v17 = vand.u32 2147483647, %v2537_v32  ;;  %vm2576_vm11 = vweird.f32 %v2537_v32 }
 0x83b   :  { %v2701_v54 = vand.u32 4294901760, %v2700_v51 }
 0x83c   :  { %v9913_v34 = vpop.eup %9349  ;;  %v2583_v11 = vor.u32 1.1754944e-38, %v2582_v43  ;;  %vm2581_vm13 = vcmp.eq.f32.partialorder %v2580_v17, 8.507059e+37 }
 0x83d   :  { %v2544_v40 = vsel %vm1261_vm5, %v9913_v34, 0.0  ;;  %v2501_v53 = vpop.xlane.xlu1 %2500  ;;  %v2702_v61 = vsub.f32 %v2700_v51, %v2701_v54 }
 0x83e   :  { %2545 = vadd.xlane.f32.xlu1 %v2544_v40  ;;  %v2513_v60 = vsub.f32 %v9884_v39, %v2501_v53 }
 0x83f   :  { %v2703_v38 = vand.u32 4294901760, %v2702_v61 }
 0x840   :  { %v9352_v19 = vpop.eup %9351 }
 0x841   :  { %v2572_v41 = vmul.f32 %v9352_v19, %v2537_v32  ;;  %vm2577_vm10 = vweird.f32 %v9352_v19 }
 0x842   :  { %vm2578_vm12 = vmor %vm2576_vm11, %vm2577_vm10 }
 0x843   :  { %v2573_v35 = vsub.f32 1.0, %v2572_v41 }
 0x845   :  { %v2574_v44 = vmul.f32 %v9352_v19, %v2573_v35 }
 0x847   :  { %v2575_v45 = vadd.f32 %v9352_v19, %v2574_v44 }
 0x849   :  { %v2579_v48 = vsel %vm2578_vm12, %v9352_v19, %v2575_v45 }
 0x84a   :  { %v2584_v50 = vsel %vm2581_vm13, %v2583_v11, %v2579_v48  ;;  %3284 = vrot.lane.b32.xlu2 %v9783_v4, %s9504_s21 }
 0x84b   :  { %v2585_v33 = vmul.f32 %v9878_v31, %v2584_v50  ;;  %v2526_v31 = vmul.f32 1.442695, %v2513_v60 }
 0x84c   :  { %v2829_v8 = vpop.permute.xlu0 %2828 }
 0x84d   :  { %v2849_v24 = vand.u32 4294901760, %v2829_v8  ;;  %v2832_v55 = vsel %vm1261_vm5, %v2585_v33, 0  ;;  %9353 = vpow2.f32 %v2526_v31 }
 0x84e   :  { %v2851_v59 = vand.u32 4294901760, %v2832_v55 }
 0x84f   :  { %v2876_v57 = vsub.f32 %v2829_v8, %v2849_v24 }
 0x850   :  { %v2852_v5 = vsub.f32 %v2832_v55, %v2851_v59 }
 0x851   :  { %v2877_v56 = vand.u32 4294901760, %v2876_v57 }
 0x852   :  { %v2853_v39 = vand.u32 4294901760, %v2852_v5 }
 0x853   :  { %v2878_v52 = vsub.f32 %v2876_v57, %v2877_v56  ;;  %v9931_v22 = vpop.eup %9353 }
 0x854   :  { %v2854_v18 = vsub.f32 %v2852_v5, %v2853_v39 }
 0x855   :  { %v2677_v3 = vpop.permute.xlu1 %2676  ;;  %v2879_v10 = vand.u32 4294901760, %v2878_v52 }
 0x856   :  { %v2697_v4 = vand.u32 4294901760, %v2677_v3  ;;  %v2855_v25 = vand.u32 4294901760, %v2854_v18 }
 0x857   :  { %3436 = vrot.lane.b32.xlu1 %v9785_v27, %s9504_s21 }
 0x858   :  { %v2724_v12 = vsub.f32 %v2677_v3, %v2697_v4  ;;  %2698 = vmatpush.msra.mxu0 %v2697_v4  ;;  %2774 = vmatpush.msrb.mxu3 %v2697_v4 }
 0x859   :  { %2704 = vmatmul.f32.vlgmr.msra.gmra.mxu0 %v2703_v38  ;;  %2778 = vmatmul.f32.vlgmr.msrb.gmra.mxu3 %v2701_v54 }
 0x85a   :  { %v2725_v13 = vand.u32 4294901760, %v2724_v12  ;;  %2880 = vmatpush.msra.mxu3 %v2879_v10  ;;  %2751 = vmatpush.msrb.mxu2 %v2724_v12 }
 0x85b   :  { %2754 = vmatmul.f32.vlgmr.msrb.gmra.mxu2 %v2700_v51 }
 0x85c   :  { %2974 = vmatpush.msrb.mxu3 %v2849_v24  ;;  %v2726_v16 = vsub.f32 %v2724_v12, %v2725_v13  ;;  %2850 = vmatpush.msra.mxu2 %v2849_v24 }
 0x85d   :  { %2800 = vmatpush.msrb.mxu0 %v2725_v13 }
 0x85e   :  { %2952 = vmatpush.msrb.mxu2 %v2877_v56  ;;  %v2727_v27 = vand.u32 4294901760, %v2726_v16 }
 0x85f   :  { %2903 = vmatpush.msra.mxu0 %v2876_v57  ;;  %3740 = vrot.lane.b32.xlu1 %v9817_v2, %s9504_s21  ;;  %v2547_v2 = vsel %vm1261_vm5, %v9931_v22, 0.0 }
 0x860   :  { %2728 = vmatpush.msra.mxu1 %v2727_v27 }
 0x861   :  { %2730 = vmatmul.f32.vlgmr.msra.gmra.mxu1 %v9919_v47  ;;  %2802 = vmatmul.f32.vlgmr.msrb.gmra.mxu0 %v9919_v47 }
 0x862   :  { %2822 = vmatpush.msrb.mxu1 %v2697_v4  ;;  %2882 = vmatmul.f32.vlgmr.msra.gmra.mxu3 %v2851_v59  ;;  %v2504_v23 = vpop.xlane.xlu2 %2503 }
 0x863   :  { %3002 = vmatpush.msrb.mxu0 %v3001_v7  ;;  %3078 = vmatpush.msra.mxu3 %v3001_v7  ;;  %v2514_v28 = vsub.f32 %v9892_v49, %v2504_v23 }
 0x864   :  { %2926 = vmatpush.msra.mxu1 %v2849_v24  ;;  %2856 = vmatmul.f32.vlgmr.msra.gmra.mxu2 %v2855_v25 }
 0x865   :  { %v2528_v58 = vmul.f32 1.442695, %v2514_v28  ;;  %3055 = vmatpush.msra.mxu2 %v3028_v14  ;;  %2548 = vadd.xlane.f32.xlu0 %v2547_v2 }
 0x867   :  { %9355 = vpow2.f32 %v2528_v58 }
 0x869   :  { %2824 = vmatmul.f32.vlgmr.msrb.gmra.mxu1 %v9919_v47  ;;  %2906 = vmatmul.f32.vlgmr.msra.gmra.mxu0 %v2852_v5 }
 0x86a   :  { %2976 = vmatmul.f32.vlgmr.msrb.gmra.mxu3 %v2851_v59  ;;  %3032 = vmatpush.msrb.mxu1 %v3031_v0 }
 0x86b   :  { %3104 = vmatpush.msra.mxu0 %v3029_v46 }
 0x86c   :  { %2954 = vmatmul.f32.vlgmr.msrb.gmra.mxu2 %v2851_v59 }
 0x86d   :  { %v9939_v32 = vpop.eup %9355 }
 0x86e   :  { %v2550_v49 = vsel %vm1261_vm5, %v9939_v32, 0.0 }
 0x871   :  { %2930 = vmatmul.f32.vlgmr.msra.gmra.mxu1 %v2853_v39 }
 0x872   :  { %3126 = vmatpush.msra.mxu1 %v3001_v7 }
 0x873   :  { %2551 = vadd.xlane.f32.xlu2 %v2550_v49 }
 0x881   :  { %v2507_v36 = vpop.xlane.xlu2 %2506 }
 0x882   :  { %v2515_v37 = vsub.f32 %v9896_v62, %v2507_v36 }
 0x884   :  { %v2530_v20 = vmul.f32 1.442695, %v2515_v37 }
 0x886   :  { %9357 = vpow2.f32 %v2530_v20 }
 0x88c   :  { %v9944_v40 = vpop.eup %9357 }
 0x88d   :  { %v2553_v19 = vsel %vm1261_vm5, %v9944_v40, 0.0 }
 0x88e   :  { %2554 = vadd.xlane.f32.xlu0 %v2553_v19 }
 0x899   :  { %v2540_v9 = vpop.xlane.xlu0 %2539 }
 0x89a   :  { %9359 = vrcp.f32 %v2540_v9  ;;  %v2597_v42 = vand.u32 2147483648, %v2540_v9  ;;  %v2595_v62 = vand.u32 2147483647, %v2540_v9  ;;  %vm2591_vm15 = vweird.f32 %v2540_v9 }
 0x89c   :  { %v2598_v47 = vor.u32 1.1754944e-38, %v2597_v42  ;;  %vm2596_vm3 = vcmp.eq.f32.partialorder %v2595_v62, 8.507059e+37 }
 0x8a0   :  { %v9360_v41 = vpop.eup %9359 }
 0x8a1   :  { %v2587_v35 = vmul.f32 %v9360_v41, %v2540_v9  ;;  %vm2592_vm14 = vweird.f32 %v9360_v41 }
 0x8a2   :  { %3588 = vrot.lane.b32.xlu0 %v9791_v29, %s9504_s21  ;;  %vm2593_vm2 = vmor %vm2591_vm15, %vm2592_vm14 }
 0x8a3   :  { %v2588_v43 = vsub.f32 1.0, %v2587_v35 }
 0x8a5   :  { %v2589_v44 = vmul.f32 %v9360_v41, %v2588_v43  ;;  %v2543_v17 = vpop.xlane.xlu2 %2542 }
 0x8a6   :  { %9361 = vrcp.f32 %v2543_v17  ;;  %v2612_v59 = vand.u32 2147483648, %v2543_v17  ;;  %v2610_v52 = vand.u32 2147483647, %v2543_v17  ;;  %vm2606_vm6 = vweird.f32 %v2543_v17 }
 0x8a7   :  { %v2590_v45 = vadd.f32 %v9360_v41, %v2589_v44 }
 0x8a8   :  { %v2613_v7 = vor.u32 1.1754944e-38, %v2612_v59  ;;  %vm2611_vm8 = vcmp.eq.f32.partialorder %v2610_v52, 8.507059e+37 }
 0x8a9   :  { %v2594_v11 = vsel %vm2593_vm2, %v9360_v41, %v2590_v45 }
 0x8aa   :  { %v2599_v48 = vsel %vm2596_vm3, %v2598_v47, %v2594_v11 }
 0x8ab   :  { %v2600_v50 = vmul.f32 %v9901_v6, %v2599_v48 }
 0x8ac   :  { %v9362_v33 = vpop.eup %9361  ;;  %v3133_v51 = vpop.permute.xlu0 %3132 }
 0x8ad   :  { %v2602_v8 = vmul.f32 %v9362_v33, %v2543_v17  ;;  %v3153_v53 = vand.u32 4294901760, %v3133_v51  ;;  %v3285_v29 = vpop.permute.xlu2 %3284  ;;  %v2984_v24 = vsel %vm1261_vm5, %v2600_v50, 0  ;;  %vm2607_vm4 = vweird.f32 %v9362_v33 }
 0x8ae   :  { %v9952_v57 = vand.u32 4294901760, %v3285_v29  ;;  %v3003_v54 = vand.u32 4294901760, %v2984_v24  ;;  %vm2608_vm7 = vmor %vm2606_vm6, %vm2607_vm4 }
 0x8af   :  { %v2603_v55 = vsub.f32 1.0, %v2602_v8  ;;  %v3180_v56 = vsub.f32 %v3133_v51, %v3153_v53  ;;  %3154 = vmatpush.msrb.mxu2 %v3153_v53 }
 0x8b0   :  { %v9955_v60 = vsub.f32 %v3285_v29, %v9952_v57  ;;  %3034 = vmatmul.f32.vlgmr.msrb.gmra.mxu1 %v3003_v54  ;;  %v3004_v61 = vsub.f32 %v2984_v24, %v3003_v54 }
 0x8b1   :  { %v2604_v6 = vmul.f32 %v9362_v33, %v2603_v55  ;;  %v3181_v63 = vand.u32 4294901760, %v3180_v56  ;;  %3230 = vmatpush.msrb.mxu1 %v3153_v53  ;;  %v2546_v3 = vpop.xlane.xlu1 %2545 }
 0x8b2   :  { %v3333_v4 = vand.u32 4294901760, %v9955_v60  ;;  %9363 = vrcp.f32 %v2546_v3  ;;  %3058 = vmatmul.f32.vlgmr.msra.gmra.mxu2 %v3004_v61  ;;  %v3005_v38 = vand.u32 4294901760, %v3004_v61  ;;  %v2627_v2 = vand.u32 2147483648, %v2546_v3 }
 0x8b3   :  { %v2605_v5 = vadd.f32 %v9362_v33, %v2604_v6  ;;  %v3182_v31 = vsub.f32 %v3180_v56, %v3181_v63  ;;  %3256 = vmatpush.msra.mxu2 %v3181_v63  ;;  %v2625_v49 = vand.u32 2147483647, %v2546_v3  ;;  %vm2621_vm10 = vweird.f32 %v2546_v3 }
 0x8b4   :  { %v3334_v10 = vsub.f32 %v9955_v60, %v3333_v4  ;;  %3082 = vmatmul.f32.vlgmr.msra.gmra.mxu3 %v3005_v38  ;;  %v3006_v39 = vsub.f32 %v3004_v61, %v3005_v38  ;;  %v2628_v37 = vor.u32 1.1754944e-38, %v2627_v2 }
 0x8b5   :  { %v2609_v12 = vsel %vm2608_vm7, %v9362_v33, %v2605_v5  ;;  %v3183_v13 = vand.u32 4294901760, %v3182_v31  ;;  %vm2626_vm12 = vcmp.eq.f32.partialorder %v2625_v49, 8.507059e+37 }
 0x8b6   :  { %v2614_v14 = vsel %vm2611_vm8, %v2613_v7, %v2609_v12  ;;  %v3335_v16 = vand.u32 4294901760, %v3334_v10  ;;  %v3007_v18 = vand.u32 4294901760, %v3006_v39 }
 0x8b7   :  { %v2615_v27 = vmul.f32 %v9906_v21, %v2614_v14  ;;  %3184 = vmatpush.msrb.mxu3 %v3183_v13 }
 0x8b8   :  { %v9364_v46 = vpop.eup %9363  ;;  %3128 = vmatmul.f32.vlgmr.msra.gmra.mxu1 %v3003_v54  ;;  %3008 = vmatmul.f32.vlgmr.msrb.gmra.mxu0 %v3007_v18 }
 0x8b9   :  { %3278 = vmatpush.msra.mxu3 %v3153_v53  ;;  %v2617_v23 = vmul.f32 %v9364_v46, %v2546_v3  ;;  %3336 = vmatpush.msra.mxu1 %v3335_v16  ;;  %v3136_v25 = vsel %vm1261_vm5, %v2615_v27, 0  ;;  %vm2622_vm9 = vweird.f32 %v9364_v46 }
 0x8ba   :  { %3207 = vmatpush.msrb.mxu0 %v3180_v56  ;;  %v3155_v28 = vand.u32 4294901760, %v3136_v25  ;;  %vm2623_vm11 = vmor %vm2621_vm10, %vm2622_vm9 }
 0x8bb   :  { %v2618_v30 = vsub.f32 1.0, %v2617_v23 }
 0x8bc   :  { %v3156_v58 = vsub.f32 %v3136_v25, %v3155_v28  ;;  %3186 = vmatmul.f32.vlgmr.msrb.gmra.mxu3 %v3155_v28 }
 0x8bd   :  { %v2619_v0 = vmul.f32 %v9364_v46, %v2618_v30  ;;  %3382 = vmatpush.msrb.mxu3 %v9952_v57 }
 0x8be   :  { %v3157_v21 = vand.u32 4294901760, %v3156_v58 }
 0x8bf   :  { %v2620_v36 = vadd.f32 %v9364_v46, %v2619_v0 }
 0x8c0   :  { %3234 = vmatmul.f32.vlgmr.msrb.gmra.mxu1 %v3157_v21  ;;  %v3158_v20 = vsub.f32 %v3156_v58, %v3157_v21  ;;  %3106 = vmatmul.f32.vlgmr.msra.gmra.mxu0 %v3003_v54 }
 0x8c1   :  { %v2624_v19 = vsel %vm2623_vm11, %v9364_v46, %v2620_v36  ;;  %3430 = vmatpush.msrb.mxu1 %v9952_v57  ;;  %3306 = vmatpush.msra.mxu0 %v9952_v57 }
 0x8c2   :  { %v2629_v9 = vsel %vm2626_vm12, %v2628_v37, %v2624_v19  ;;  %v3159_v41 = vand.u32 4294901760, %v3158_v20  ;;  %vm3918_vm12 = vcmask 130048  }
 0x8c3   :  { %v2630_v35 = vmul.f32 %v9913_v34, %v2629_v9 }
 0x8c4   :  { %3160 = vmatmul.f32.vlgmr.msrb.gmra.mxu2 %v3159_v41  ;;  %3280 = vmatmul.f32.vlgmr.msra.gmra.mxu3 %v3155_v28 }
 0x8c5   :  { %3359 = vmatpush.msrb.mxu2 %v9955_v60  ;;  %v3288_v43 = vsel %vm1261_vm5, %v2630_v35, 0 }
 0x8c6   :  { %v3307_v42 = vand.u32 4294901760, %v3288_v43 }
 0x8c8   :  { %v3308_v44 = vsub.f32 %v3288_v43, %v3307_v42  ;;  %3338 = vmatmul.f32.vlgmr.msra.gmra.mxu1 %v3307_v42  ;;  %3210 = vmatmul.f32.vlgmr.msrb.gmra.mxu0 %v3156_v58 }
 0x8c9   :  { %v3437_v62 = vpop.permute.xlu1 %3436  ;;  %3408 = vmatpush.msrb.mxu0 %v3333_v4 }
 0x8ca   :  { %v3457_v17 = vand.u32 4294901760, %v3437_v62  ;;  %v3309_v45 = vand.u32 4294901760, %v3308_v44 }
 0x8cc   :  { %v3484_v47 = vsub.f32 %v3437_v62, %v3457_v17  ;;  %3258 = vmatmul.f32.vlgmr.msra.gmra.mxu2 %v3155_v28  ;;  %3534 = vmatpush.msra.mxu1 %v3457_v17  ;;  %v3310_v11 = vsub.f32 %v3308_v44, %v3309_v45 }
 0x8cd   :  { %3386 = vmatmul.f32.vlgmr.msrb.gmra.mxu3 %v3309_v45  ;;  %3458 = vmatpush.msra.mxu2 %v3457_v17 }
 0x8ce   :  { %v3485_v34 = vand.u32 4294901760, %v3484_v47  ;;  %v3311_v48 = vand.u32 4294901760, %v3310_v11 }
 0x8d0   :  { %v3486_v50 = vsub.f32 %v3484_v47, %v3485_v34  ;;  %3432 = vmatmul.f32.vlgmr.msrb.gmra.mxu1 %v3307_v42  ;;  %3312 = vmatmul.f32.vlgmr.msra.gmra.mxu0 %v3311_v48 }
 0x8d1   :  { %3511 = vmatpush.msra.mxu0 %v3484_v47  ;;  %v3741_v25 = vpop.permute.xlu1 %3740 }
 0x8d2   :  { %v3487_v33 = vand.u32 4294901760, %v3486_v50  ;;  %v3761_v30 = vand.u32 4294901760, %v3741_v25 }
 0x8d4   :  { %3362 = vmatmul.f32.vlgmr.msrb.gmra.mxu2 %v3308_v44  ;;  %3488 = vmatpush.msra.mxu3 %v3487_v33  ;;  %v3788_v49 = vsub.f32 %v3741_v25, %v3761_v30 }
 0x8d5   :  { %3560 = vmatpush.msrb.mxu2 %v3485_v34 }
 0x8d6   :  { %3582 = vmatpush.msrb.mxu3 %v3457_v17 }
 0x8d8   :  { %v2549_v51 = vpop.xlane.xlu0 %2548  ;;  %3410 = vmatmul.f32.vlgmr.msrb.gmra.mxu0 %v3307_v42 }
 0x8d9   :  { %9365 = vrcp.f32 %v2549_v51  ;;  %v2642_v24 = vand.u32 2147483648, %v2549_v51  ;;  %v2640_v54 = vand.u32 2147483647, %v2549_v51  ;;  %vm2636_vm14 = vweird.f32 %v2549_v51 }
 0x8db   :  { %v2643_v59 = vor.u32 1.1754944e-38, %v2642_v24  ;;  %vm2641_vm2 = vcmp.eq.f32.partialorder %v2640_v54, 8.507059e+37 }
 0x8de   :  { %v9976_v33 = vpop.f32.mrf.mxu1 }
 0x8df   :  { %v9366_v8 = vpop.eup %9365 }
 0x8e0   :  { %v2632_v53 = vmul.f32 %v9366_v8, %v2549_v51  ;;  %vm2637_vm13 = vweird.f32 %v9366_v8 }
 0x8e1   :  { %vm2638_vm15 = vmor %vm2636_vm14, %vm2637_vm13 }
 0x8e2   :  { %v2633_v29 = vsub.f32 1.0, %v2632_v53 }
 0x8e4   :  { %v2634_v57 = vmul.f32 %v9366_v8, %v2633_v29  ;;  %v9980_v29 = vpop.f32.mrf.mxu2 }
 0x8e6   :  { %v2635_v55 = vadd.f32 %v9366_v8, %v2634_v57  ;;  %v2552_v56 = vpop.xlane.xlu2 %2551 }
 0x8e7   :  { %9367 = vrcp.f32 %v2552_v56  ;;  %v2657_v39 = vand.u32 2147483648, %v2552_v56  ;;  %vm2651_vm4 = vweird.f32 %v2552_v56 }
 0x8e8   :  { %v2639_v60 = vsel %vm2638_vm15, %v9366_v8, %v2635_v55  ;;  %v9978_v8 = vpop.f32.mrf.mxu0  ;;  %v9982_v55 = vpop.f32.mrf.mxu3 }
 0x8e9   :  { %v2644_v61 = vsel %vm2641_vm2, %v2643_v59, %v2639_v60  ;;  %v2658_v16 = vor.u32 1.1754944e-38, %v2657_v39  ;;  %v9986_v59 = vpop.f32.mrf.mxu1 }
 0x8ea   :  { %v2645_v6 = vmul.f32 %v9931_v22, %v2644_v61  ;;  %v2655_v22 = vand.u32 2147483647, %v2552_v56 }
 0x8ec   :  { %v3440_v52 = vsel %vm1261_vm5, %v2645_v6, 0  ;;  %vm2656_vm7 = vcmp.eq.f32.partialorder %v2655_v22, 8.507059e+37  ;;  %v9990_v61 = vpop.f32.mrf.mxu2 }
 0x8ed   :  { %v9368_v63 = vpop.eup %9367  ;;  %v3459_v3 = vand.u32 4294901760, %v3440_v52 }
 0x8ee   :  { %v2647_v4 = vmul.f32 %v9368_v63, %v2552_v56  ;;  %vm2652_vm3 = vweird.f32 %v9368_v63 }
 0x8ef   :  { %3490 = vmatmul.f32.vlgmr.msra.gmra.mxu3 %v3459_v3  ;;  %v3460_v5 = vsub.f32 %v3440_v52, %v3459_v3  ;;  %vm2653_vm6 = vmor %vm2651_vm4, %vm2652_vm3 }
 0x8f0   :  { %v2648_v31 = vsub.f32 1.0, %v2647_v4  ;;  %v9988_v60 = vpop.f32.mrf.mxu0  ;;  %v9992_v6 = vpop.f32.mrf.mxu3 }
 0x8f1   :  { %3514 = vmatmul.f32.vlgmr.msra.gmra.mxu0 %v3460_v5  ;;  %v3461_v38 = vand.u32 4294901760, %v3460_v5  ;;  %v9995_v52 = vpop.f32.mrf.mxu1 }
 0x8f2   :  { %v2649_v7 = vmul.f32 %v9368_v63, %v2648_v31 }
 0x8f3   :  { %3538 = vmatmul.f32.vlgmr.msra.gmra.mxu1 %v3461_v38  ;;  %v3462_v10 = vsub.f32 %v3460_v5, %v3461_v38 }
 0x8f4   :  { %v2650_v13 = vadd.f32 %v9368_v63, %v2649_v7 }
 0x8f5   :  { %v3463_v12 = vand.u32 4294901760, %v3462_v10 }
 0x8f6   :  { %v2654_v14 = vsel %vm2653_vm6, %v9368_v63, %v2650_v13 }
 0x8f7   :  { %3464 = vmatmul.f32.vlgmr.msra.gmra.mxu2 %v3463_v12  ;;  %3584 = vmatmul.f32.vlgmr.msrb.gmra.mxu3 %v3459_v3  ;;  %v2659_v27 = vsel %vm2656_vm7, %v2658_v16, %v2654_v14 }
 0x8f8   :  { %v2660_v18 = vmul.f32 %v9939_v32, %v2659_v27  ;;  %v3789_v32 = vand.u32 4294901760, %v3788_v49  ;;  %v9997_v63 = vpop.f32.mrf.mxu0  ;;  %v10001_v4 = vpop.f32.mrf.mxu3 }
 0x8fa   :  { %v3592_v23 = vsel %vm1261_vm5, %v2660_v18, 0  ;;  %v3790_v44 = vsub.f32 %v3788_v49, %v3789_v32 }
 0x8fb   :  { %v9971_v28 = vand.u32 4294901760, %v3592_v23 }
 0x8fc   :  { %v3791_v48 = vand.u32 4294901760, %v3790_v44 }
 0x8fd   :  { %v3612_v0 = vsub.f32 %v3592_v23, %v9971_v28 }
 0x8ff   :  { %3562 = vmatmul.f32.vlgmr.msrb.gmra.mxu2 %v3459_v3  ;;  %v3613_v19 = vand.u32 4294901760, %v3612_v0  ;;  %v9999_v3 = vpop.f32.mrf.mxu2 }
 0x901   :  { %v2555_v46 = vpop.xlane.xlu0 %2554  ;;  %v3614_v42 = vsub.f32 %v3612_v0, %v3613_v19 }
 0x902   :  { %9369 = vrcp.f32 %v2555_v46  ;;  %v2672_v36 = vand.u32 2147483648, %v2555_v46  ;;  %v2670_v20 = vand.u32 2147483647, %v2555_v46  ;;  %vm2666_vm9 = vweird.f32 %v2555_v46 }
 0x903   :  { %v3615_v11 = vand.u32 4294901760, %v3614_v42 }
 0x904   :  { %v2673_v41 = vor.u32 1.1754944e-38, %v2672_v36  ;;  %vm2671_vm11 = vcmp.eq.f32.partialorder %v2670_v20, 8.507059e+37 }
 0x908   :  { %v9370_v2 = vpop.eup %9369 }
 0x909   :  { %v2662_v58 = vmul.f32 %v9370_v2, %v2555_v46  ;;  %vm2667_vm8 = vweird.f32 %v9370_v2 }
 0x90a   :  { %vm2668_vm10 = vmor %vm2666_vm9, %vm2667_vm8 }
 0x90b   :  { %v2663_v21 = vsub.f32 1.0, %v2662_v58 }
 0x90d   :  { %v2664_v37 = vmul.f32 %v9370_v2, %v2663_v21 }
 0x90f   :  { %v2665_v9 = vadd.f32 %v9370_v2, %v2664_v37 }
 0x911   :  { %v2669_v35 = vsel %vm2668_vm10, %v9370_v2, %v2665_v9 }
 0x912   :  { %v2674_v43 = vsel %vm2671_vm11, %v2673_v41, %v2669_v35 }
 0x913   :  { %v2675_v62 = vmul.f32 %v9944_v40, %v2674_v43 }
 0x914   :  { %v3589_v17 = vpop.permute.xlu0 %3588 }
 0x915   :  { %v3609_v45 = vand.u32 4294901760, %v3589_v17  ;;  %v3744_v47 = vsel %vm1261_vm5, %v2675_v62, 0 }
 0x916   :  { %v3763_v34 = vand.u32 4294901760, %v3744_v47 }
 0x917   :  { %v3636_v50 = vsub.f32 %v3589_v17, %v3609_v45  ;;  %3610 = vmatpush.msrb.mxu0 %v3609_v45  ;;  %3686 = vmatpush.msra.mxu3 %v3609_v45 }
 0x918   :  { %3616 = vmatmul.f32.vlgmr.msrb.gmra.mxu0 %v3615_v11  ;;  %3690 = vmatmul.f32.vlgmr.msra.gmra.mxu3 %v3613_v19  ;;  %v3764_v51 = vsub.f32 %v3744_v47, %v3763_v34 }
 0x919   :  { %v3637_v53 = vand.u32 4294901760, %v3636_v50  ;;  %3792 = vmatpush.msrb.mxu3 %v3791_v48  ;;  %3663 = vmatpush.msra.mxu2 %v3636_v50 }
 0x91a   :  { %3666 = vmatmul.f32.vlgmr.msra.gmra.mxu2 %v3612_v0  ;;  %v3765_v40 = vand.u32 4294901760, %v3764_v51 }
 0x91b   :  { %3886 = vmatpush.msra.mxu3 %v3761_v30  ;;  %v3638_v24 = vsub.f32 %v3636_v50, %v3637_v53  ;;  %3762 = vmatpush.msrb.mxu2 %v3761_v30 }
 0x91c   :  { %3712 = vmatpush.msra.mxu0 %v3637_v53  ;;  %v3766_v57 = vsub.f32 %v3764_v51, %v3765_v40 }
 0x91d   :  { %3864 = vmatpush.msra.mxu2 %v3789_v32  ;;  %v3639_v54 = vand.u32 4294901760, %v3638_v24 }
 0x91e   :  { %3815 = vmatpush.msrb.mxu0 %v3788_v49  ;;  %v3767_v56 = vand.u32 4294901760, %v3766_v57 }
 0x91f   :  { %3640 = vmatpush.msrb.mxu1 %v3639_v54 }
 0x920   :  { %3642 = vmatmul.f32.vlgmr.msrb.gmra.mxu1 %v9971_v28  ;;  %3714 = vmatmul.f32.vlgmr.msra.gmra.mxu0 %v9971_v28 }
 0x921   :  { %3734 = vmatpush.msra.mxu1 %v3609_v45  ;;  %3794 = vmatmul.f32.vlgmr.msrb.gmra.mxu3 %v3763_v34 }
 0x922   :  { %3768 = vmatmul.f32.vlgmr.msrb.gmra.mxu2 %v3767_v56 }
 0x923   :  { %3838 = vmatpush.msrb.mxu1 %v3761_v30 }
 0x928   :  { %3736 = vmatmul.f32.vlgmr.msra.gmra.mxu1 %v9971_v28  ;;  %3818 = vmatmul.f32.vlgmr.msrb.gmra.mxu0 %v3764_v51 }
 0x929   :  { %3888 = vmatmul.f32.vlgmr.msra.gmra.mxu3 %v3763_v34 }
 0x92a   :  { %3866 = vmatmul.f32.vlgmr.msra.gmra.mxu2 %v3763_v34 }
 0x92d   :  { %v3035_v5 = vpop.f32.mrf.mxu1 }
 0x930   :  { %3842 = vmatmul.f32.vlgmr.msrb.gmra.mxu1 %v3765_v40 }
 0x935   :  { %v3009_v31 = vpop.f32.mrf.mxu0  ;;  %v3059_v7 = vpop.f32.mrf.mxu2 }
 0x936   :  { %v3036_v38 = vadd.f32 %v3035_v5, %v3009_v31  ;;  %v3129_v22 = vpop.f32.mrf.mxu1 }
 0x937   :  { %v3083_v12 = vpop.f32.mrf.mxu3 }
 0x938   :  { %v3060_v10 = vadd.f32 %v3059_v7, %v3036_v38 }
 0x93a   :  { %v3084_v13 = vadd.f32 %v3083_v12, %v3060_v10 }
 0x93d   :  { %v3107_v39 = vpop.f32.mrf.mxu0 }
 0x93e   :  { %v3108_v14 = vadd.f32 %v3107_v39, %v3084_v13  ;;  %v3235_v25 = vpop.f32.mrf.mxu1 }
 0x93f   :  { %v3187_v27 = vpop.f32.mrf.mxu3 }
 0x940   :  { %v3130_v16 = vadd.f32 %v3129_v22, %v3108_v14 }
 0x942   :  { %3894 = vrot.lane.b32.xlu2 %v3130_v16, %s9505_s22 }
 0x945   :  { %v3211_v18 = vpop.f32.mrf.mxu0 }
 0x946   :  { %v3339_v36 = vpop.f32.mrf.mxu1 }
 0x947   :  { %v3161_v46 = vpop.f32.mrf.mxu2  ;;  %v3281_v2 = vpop.f32.mrf.mxu3 }
 0x948   :  { %v3188_v23 = vadd.f32 %v3187_v27, %v3161_v46 }
 0x94a   :  { %v3212_v28 = vadd.f32 %v3211_v18, %v3188_v23 }
 0x94c   :  { %v3236_v30 = vadd.f32 %v3235_v25, %v3212_v28 }
 0x94d   :  { %v3313_v49 = vpop.f32.mrf.mxu0 }
 0x94e   :  { %v3340_v37 = vadd.f32 %v3339_v36, %v3313_v49  ;;  %v3433_v43 = vpop.f32.mrf.mxu1 }
 0x94f   :  { %v3259_v58 = vpop.f32.mrf.mxu2 }
 0x950   :  { %v3260_v0 = vadd.f32 %v3259_v58, %v3236_v30  ;;  %v3387_v32 = vpop.f32.mrf.mxu3  ;;  %v3926_v30 = vld [vmem:[%s10813_s1 + $0x90] sm:$0xff] }
 0x951   :  { %v3947_v58 = vand.u32 4294901760, %v3926_v30 }
 0x952   :  { %v3282_v21 = vadd.f32 %v3281_v2, %v3260_v0  ;;  %v3925_v2 = vld [vmem:[%s10813_s1 + $0x88] sm:$0xff] }
 0x953   :  { %v3949_v0 = vand.u32 4294901760, %v3925_v2  ;;  %v3985_v49 = vsub.f32 %v3926_v30, %v3947_v58  ;;  %4065 = vmatpush.msrb.mxu3 %v3947_v58  ;;  %3948 = vmatpush.msra.mxu0 %v3947_v58 }
 0x954   :  { %3896 = vrot.lane.b32.xlu0 %v3282_v21, %s9505_s22 }
 0x955   :  { %v3411_v41 = vpop.f32.mrf.mxu0  ;;  %v3991_v21 = vsub.f32 %v3925_v2, %v3949_v0  ;;  %v3986_v36 = vand.u32 4294901760, %v3985_v49  ;;  %4031 = vmatpush.msrb.mxu2 %v3985_v49  ;;  %4067 = vmatpush.msrb.mxu3 %v3949_v0 }
 0x956   :  { %3950 = vmatpush.msra.mxu0 %v3949_v0 }
 0x957   :  { %v3363_v20 = vpop.f32.mrf.mxu2  ;;  %4034 = vmatpush.msrb.mxu2 %v3991_v21 }
 0x958   :  { %v3364_v19 = vadd.f32 %v3363_v20, %v3340_v37  ;;  %v3992_v37 = vand.u32 4294901760, %v3991_v21  ;;  %v3987_v20 = vsub.f32 %v3985_v49, %v3986_v36 }
 0x95a   :  { %v3388_v9 = vadd.f32 %v3387_v32, %v3364_v19  ;;  %v3993_v19 = vsub.f32 %v3991_v21, %v3992_v37  ;;  %v3988_v32 = vand.u32 4294901760, %v3987_v20 }
 0x95c   :  { %v3412_v35 = vadd.f32 %v3411_v41, %v3388_v9  ;;  %v3994_v9 = vand.u32 4294901760, %v3993_v19  ;;  %3989 = vmatpush.msra.mxu1 %v3988_v32  ;;  %v3924_v41 = vld [vmem:[%s10813_s1 + $0x80] sm:$0xff] }
 0x95e   :  { %v3434_v42 = vadd.f32 %v3433_v43, %v3412_v35  ;;  %3995 = vmatpush.msra.mxu1 %v3994_v9  ;;  %v3951_v35 = vand.u32 4294901760, %v3924_v41  ;;  %v3923_v43 = vld [vmem:[%s10813_s1 + $0x78] sm:$0xff] }
 0x960   :  { %3902 = vrot.lane.b32.xlu1 %v3434_v42, %s9506_s23  ;;  %v3997_v42 = vsub.f32 %v3924_v41, %v3951_v35  ;;  %4069 = vmatpush.msrb.mxu3 %v3951_v35 }
 0x961   :  { %3952 = vmatpush.msra.mxu0 %v3951_v35 }
 0x962   :  { %4037 = vmatpush.msrb.mxu2 %v3997_v42 }
 0x96e   :  { %v3515_v17 = vpop.f32.mrf.mxu0 }
 0x970   :  { %v3539_v47 = vpop.f32.mrf.mxu1 }
 0x972   :  { %v3491_v44 = vpop.f32.mrf.mxu3 }
 0x97a   :  { %v3465_v62 = vpop.f32.mrf.mxu2  ;;  %v3585_v45 = vpop.f32.mrf.mxu3 }
 0x97b   :  { %v3492_v40 = vadd.f32 %v3491_v44, %v3465_v62  ;;  %v3953_v44 = vand.u32 4294901760, %v3923_v43  ;;  %v3998_v62 = vand.u32 4294901760, %v3997_v42 }
 0x97d   :  { %v3516_v56 = vadd.f32 %v3515_v17, %v3492_v40  ;;  %v4003_v17 = vsub.f32 %v3923_v43, %v3953_v44  ;;  %4071 = vmatpush.msrb.mxu3 %v3953_v44  ;;  %3954 = vmatpush.msra.mxu0 %v3953_v44 }
 0x97f   :  { %v3540_v12 = vadd.f32 %v3539_v47, %v3516_v56  ;;  %v4004_v47 = vand.u32 4294901760, %v4003_v17  ;;  %4040 = vmatpush.msrb.mxu2 %v4003_v17  ;;  %4100 = vmatpush.msrb.mxu0 %v3986_v36 }
 0x981   :  { %4104 = vmatpush.msrb.mxu0 %v3992_v37 }
 0x982   :  { %v3563_v11 = vpop.f32.mrf.mxu2 }
 0x983   :  { %v3564_v39 = vadd.f32 %v3563_v11, %v3540_v12  ;;  %4108 = vmatpush.msrb.mxu0 %v3998_v62 }
 0x985   :  { %v3586_v27 = vadd.f32 %v3585_v45, %v3564_v39  ;;  %v3999_v45 = vsub.f32 %v3997_v42, %v3998_v62  ;;  %4112 = vmatpush.msrb.mxu0 %v4004_v47 }
 0x987   :  { %v4000_v11 = vand.u32 4294901760, %v3999_v45 }
 0x989   :  { %4001 = vmatpush.msra.mxu1 %v4000_v11 }
 0x995   :  { %v3617_v34 = vpop.f32.mrf.mxu0 }
 0x99b   :  { %v3691_v48 = vpop.f32.mrf.mxu3 }
 0x99d   :  { %v3643_v50 = vpop.f32.mrf.mxu1  ;;  %v3667_v51 = vpop.f32.mrf.mxu2 }
 0x99e   :  { %v3644_v53 = vadd.f32 %v3643_v50, %v3617_v34  ;;  %v3715_v57 = vpop.f32.mrf.mxu0  ;;  %v4005_v34 = vsub.f32 %v4003_v17, %v4004_v47  ;;  %v2732_v50 = vadd.f32 %v9976_v33, %v9978_v8 }
 0x9a0   :  { %v3668_v24 = vadd.f32 %v3667_v51, %v3644_v53  ;;  %v2756_v51 = vadd.f32 %v9980_v29, %v2732_v50 }
 0x9a2   :  { %v3692_v54 = vadd.f32 %v3691_v48, %v3668_v24  ;;  %v4006_v48 = vand.u32 4294901760, %v4005_v34  ;;  %v2780_v53 = vadd.f32 %v9982_v55, %v2756_v51 }
 0x9a4   :  { %v3716_v5 = vadd.f32 %v3715_v57, %v3692_v54  ;;  %v3795_v10 = vpop.f32.mrf.mxu3  ;;  %4007 = vmatpush.msra.mxu1 %v4006_v48  ;;  %v2804_v24 = vadd.f32 %v9988_v60, %v2780_v53  ;;  %v2884_v57 = vadd.f32 %v9992_v6, %v9990_v61  ;;  %v3895_v54 = vpop.permute.xlu2 %3894 }
 0x9a5   :  { %v3737_v31 = vpop.f32.mrf.mxu1  ;;  %v3769_v38 = vpop.f32.mrf.mxu2 }
 0x9a6   :  { %v3738_v7 = vadd.f32 %v3737_v31, %v3716_v5  ;;  %v3796_v13 = vadd.f32 %v3795_v10, %v3769_v38  ;;  %v3819_v22 = vpop.f32.mrf.mxu0  ;;  %4135 = vmatpush.msrb.mxu1 %v3947_v58  ;;  %v2826_v56 = vadd.f32 %v9986_v59, %v2804_v24  ;;  %v2908_v5 = vadd.f32 %v9997_v63, %v2884_v57 }
 0x9a8   :  { %3910 = vrot.lane.b32.xlu1 %v3738_v7, %s9507_s24  ;;  %v3820_v14 = vadd.f32 %v3819_v22, %v3796_v13  ;;  %4137 = vmatpush.msrb.mxu1 %v3949_v0  ;;  %v3916_v31 = vsel %vm1261_vm5, %v2826_v56, %v3895_v54  ;;  %v2932_v29 = vadd.f32 %v9995_v52, %v2908_v5 }
 0x9aa   :  { %4139 = vmatpush.msrb.mxu1 %v3951_v35  ;;  %v2956_v61 = vadd.f32 %v9999_v3, %v2932_v29  ;;  %v4239_v29 = vld [vmem:[%s10813_s1 + $0xa8] sm:$0xff] }
 0x9ac   :  { %v3889_v25 = vpop.f32.mrf.mxu3  ;;  %4141 = vmatpush.msrb.mxu1 %v3953_v44  ;;  %v2978_v63 = vadd.f32 %v10001_v4, %v2956_v61 }
 0x9ad   :  { %v3843_v16 = vpop.f32.mrf.mxu1  ;;  %v3867_v46 = vpop.f32.mrf.mxu2 }
 0x9ae   :  { %v3844_v18 = vadd.f32 %v3843_v16, %v3820_v14 }
 0x9b0   :  { %v3868_v23 = vadd.f32 %v3867_v46, %v3844_v18  ;;  %3904 = vrot.lane.b32.xlu1 %v3586_v27, %s9506_s23 }
 0x9b2   :  { %v3890_v28 = vadd.f32 %v3889_v25, %v3868_v23  ;;  %v9282_v25 = vld [vmem:[%s10814_s2 + $0x12] ss:$0 sm:$0xff] }
 0x9b4   :  { %3912 = vrot.lane.b32.xlu0 %v3890_v28, %s9507_s24 }
 0x9c6   :  { %v3897_v7 = vpop.permute.xlu0 %3896 }
 0x9c7   :  { %v3917_v13 = vsel %vm1261_vm5, %v2978_v63, %v3897_v7  ;;  %v4263_v7 = vand.u32 4294901760, %v4239_v29 }
 0x9d2   :  { %v3903_v40 = vpop.permute.xlu1 %3902 }
 0x9d3   :  { %v3919_v33 = vsel %vm3918_vm12, %v3916_v31, %v3903_v40 }
 0xa1a   :  { %v3911_v8 = vpop.permute.xlu1 %3910 }
 0xa1b   :  { %v3921_v55 = vsel %vm25_vm0, %v3919_v33, %v3911_v8  ;;  %v4240_v8 = vld [vmem:[%s10813_s1 + $0xb0] sm:$0xff] }
 0xa1c   :  { %v3930_v60 = vsel %vm237_vm1, %v3921_v55, 0  ;;  %v4238_v55 = vld [vmem:[%s10813_s1 + $0xa0] sm:$0xff] }
 0xa1d   :  { %v3955_v38 = vand.u32 4294901760, %v3930_v60  ;;  %v4265_v61 = vand.u32 4294901760, %v4238_v55 }
 0xa1f   :  { %v3956_v6 = vsub.f32 %v3930_v60, %v3955_v38  ;;  %4009 = vmatmul.f32.vlgmr.msra.gmra.mxu1 %v3955_v38 }
 0xa21   :  { %v3957_v59 = vand.u32 4294901760, %v3956_v6  ;;  %4043 = vmatmul.f32.vlgmr.msrb.gmra.mxu2 %v3956_v6 }
 0xa22   :  { %v3905_v12 = vpop.permute.xlu1 %3904 }
 0xa23   :  { %v3958_v10 = vsub.f32 %v3956_v6, %v3957_v59  ;;  %4075 = vmatmul.f32.vlgmr.msrb.gmra.mxu3 %v3957_v59  ;;  %v3920_v39 = vsel %vm3918_vm12, %v3917_v13, %v3905_v12  ;;  %v4237_v6 = vld [vmem:[%s10813_s1 + $0x98] sm:$0xff]  ;;  %v4305_v12 = vsub.f32 %v4239_v29, %v4263_v7  ;;  %v4311_v13 = vsub.f32 %v4238_v55, %v4265_v61  ;;  %v9284_v55 = vld [vmem:[%s10814_s2 + $0x16] ss:$0 sm:$0xff] }
 0xa24   :  { %v10073_v59 = vand.u32 4294901760, %v4237_v6 }
 0xa25   :  { %v3959_v52 = vand.u32 4294901760, %v3958_v10 }
 0xa26   :  { %v3913_v22 = vpop.permute.xlu0 %3912 }
 0xa27   :  { %v3922_v14 = vsel %vm25_vm0, %v3920_v39, %v3913_v22  ;;  %3960 = vmatmul.f32.vlgmr.msra.gmra.mxu0 %v3959_v52  ;;  %v4317_v52 = vsub.f32 %v4237_v6, %v10073_v59  ;;  %v4306_v22 = vand.u32 4294901760, %v4305_v12 }
 0xa28   :  { %v3933_v3 = vsel %vm237_vm1, %v3922_v14, 0  ;;  %v4312_v14 = vand.u32 4294901760, %v4311_v13 }
 0xa29   :  { %v3963_v16 = vand.u32 4294901760, %v3933_v3 }
 0xa2b   :  { %v3964_v27 = vsub.f32 %v3933_v3, %v3963_v16  ;;  %4013 = vmatmul.f32.gmra.mxu1 %v3963_v16  ;;  %v4318_v3 = vand.u32 4294901760, %v4317_v52 }
 0xa2d   :  { %4048 = vmatmul.f32.gmra.mxu2 %v3964_v27  ;;  %v3965_v18 = vand.u32 4294901760, %v3964_v27 }
 0xa2f   :  { %4081 = vmatmul.f32.gmra.mxu3 %v3965_v18  ;;  %v3966_v4 = vsub.f32 %v3964_v27, %v3965_v18  ;;  %v4307_v18 = vsub.f32 %v4305_v12, %v4306_v22 }
 0xa31   :  { %v3967_v46 = vand.u32 4294901760, %v3966_v4  ;;  %v4313_v4 = vsub.f32 %v4311_v13, %v4312_v14 }
 0xa33   :  { %3968 = vmatmul.f32.gmra.mxu0 %v3967_v46  ;;  %4143 = vmatmul.f32.vlgmr.msrb.gmra.mxu1 %v3955_v38 }
 0xa3b   :  { %4114 = vmatmul.f32.vlgmr.msrb.gmra.mxu0 %v3955_v38  ;;  %4147 = vmatmul.f32.gmra.mxu1 %v3963_v16  ;;  %v4261_v38 = vand.u32 4294901760, %v4240_v8 }
 0xa3d   :  { %v4299_v10 = vsub.f32 %v4240_v8, %v4261_v38  ;;  %4379 = vmatpush.msra.mxu1 %v4261_v38  ;;  %4262 = vmatpush.msra.mxu2 %v4261_v38 }
 0xa3f   :  { %4345 = vmatpush.msra.mxu0 %v4299_v10  ;;  %4381 = vmatpush.msra.mxu1 %v4263_v7  ;;  %v4300_v39 = vand.u32 4294901760, %v4299_v10 }
 0xa40   :  { %4264 = vmatpush.msra.mxu2 %v4263_v7 }
 0xa41   :  { %4348 = vmatpush.msra.mxu0 %v4305_v12  ;;  %4383 = vmatpush.msra.mxu1 %v4265_v61  ;;  %v4301_v27 = vsub.f32 %v4299_v10, %v4300_v39 }
 0xa42   :  { %4266 = vmatpush.msra.mxu2 %v4265_v61 }
 0xa43   :  { %4118 = vmatmul.f32.gmra.mxu0 %v3963_v16  ;;  %4385 = vmatpush.msra.mxu1 %v10073_v59 }
 0xa44   :  { %4351 = vmatpush.msra.mxu0 %v4311_v13  ;;  %4268 = vmatpush.msra.mxu2 %v10073_v59 }
 0xa46   :  { %4354 = vmatpush.msra.mxu0 %v4317_v52  ;;  %4414 = vmatpush.msrb.mxu2 %v4300_v39 }
 0xa48   :  { %4418 = vmatpush.msrb.mxu2 %v4306_v22 }
 0xa4a   :  { %4422 = vmatpush.msrb.mxu2 %v4312_v14 }
 0xa4c   :  { %4426 = vmatpush.msrb.mxu2 %v4318_v3 }
 0xa9c   :  { %v4010_v23 = vpop.f32.mrf.mxu1 }
 0xaa4   :  { %v3961_v28 = vpop.f32.mrf.mxu0  ;;  %v4044_v49 = vpop.f32.mrf.mxu2 }
 0xaa5   :  { %v3962_v30 = vadd.f32 %v9282_v25, %v3961_v28  ;;  %v4319_v28 = vsub.f32 %v4317_v52, %v4318_v3 }
 0xaa6   :  { %v4076_v37 = vpop.f32.mrf.mxu3 }
 0xaa7   :  { %v4011_v58 = vadd.f32 %v4010_v23, %v3962_v30  ;;  %v4302_v23 = vand.u32 4294901760, %v4301_v27 }
 0xaa8   :  { %v4014_v2 = vpop.f32.mrf.mxu1 }
 0xaa9   :  { %v4045_v21 = vadd.f32 %v4044_v49, %v4011_v58  ;;  %4303 = vmatpush.msra.mxu3 %v4302_v23 }
 0xaab   :  { %v4077_v20 = vadd.f32 %v4076_v37, %v4045_v21  ;;  %v4320_v21 = vand.u32 4294901760, %v4319_v28 }
 0xab0   :  { %v3969_v0 = vpop.f32.mrf.mxu0  ;;  %v4144_v32 = vpop.f32.mrf.mxu1 }
 0xab1   :  { %v3970_v36 = vadd.f32 %v9282_v25, %v3969_v0  ;;  %v4049_v35 = vpop.f32.mrf.mxu2  ;;  %v4308_v25 = vand.u32 4294901760, %v4307_v18  ;;  %v4314_v0 = vand.u32 4294901760, %v4313_v4 }
 0xab2   :  { %v4082_v62 = vpop.f32.mrf.mxu3 }
 0xab3   :  { %v4015_v19 = vadd.f32 %v4014_v2, %v3970_v36  ;;  %4309 = vmatpush.msra.mxu3 %v4308_v25 }
 0xab5   :  { %v4050_v43 = vadd.f32 %v4049_v35, %v4015_v19  ;;  %4315 = vmatpush.msra.mxu3 %v4314_v0 }
 0xab7   :  { %v4083_v17 = vadd.f32 %v4082_v62, %v4050_v43  ;;  %4321 = vmatpush.msra.mxu3 %v4320_v21  ;;  %v4472_v21 = vld [vmem:[%s10813_s1 + $0xe0] sm:$0xff] }
 0xab8   :  { %v4115_v9 = vpop.f32.mrf.mxu0  ;;  %v4148_v34 = vpop.f32.mrf.mxu1 }
 0xab9   :  { %v4116_v41 = vadd.f32 %v4115_v9, %v4077_v20  ;;  %4449 = vmatpush.msrb.mxu3 %v4261_v38 }
 0xabb   :  { %v4145_v42 = vadd.f32 %v4144_v32, %v4116_v41  ;;  %4451 = vmatpush.msrb.mxu3 %v4263_v7 }
 0xabd   :  { %v4151_v44 = vadd.f32 %v4145_v42, %v9738_v15  ;;  %4453 = vmatpush.msrb.mxu3 %v4265_v61 }
 0xabf   :  { %v4155_v45 = vsel %vm237_vm1, %v4151_v44, 0.0  ;;  %4455 = vmatpush.msrb.mxu3 %v10073_v59 }
 0xac0   :  { %v4119_v47 = vpop.f32.mrf.mxu0  ;;  %4156 = vadd.xlane.f32.xlu2 %v4155_v45 }
 0xac1   :  { %v4120_v11 = vadd.f32 %v4119_v47, %v4083_v17 }
 0xac3   :  { %v4149_v48 = vadd.f32 %v4148_v34, %v4120_v11 }
 0xac5   :  { %v4152_v50 = vadd.f32 %v4149_v48, %v9742_v26 }
 0xac7   :  { %v4158_v51 = vsel %vm237_vm1, %v4152_v50, 0.0 }
 0xac8   :  { %4159 = vadd.xlane.f32.xlu1 %v4158_v51 }
 0xb33   :  { %v4157_v53 = vpop.xlane.xlu2 %4156 }
 0xb34   :  { %v4161_v40 = vmul.f32 %v4157_v53, %v9558_v1 }
 0xb36   :  { %v10049_v24 = vsub.f32 %v4151_v44, %v4161_v40 }
 0xb38   :  { %v4165_v15 = vmul.f32 %v10049_v24, %v10049_v24 }
 0xb3a   :  { %v4167_v57 = vsel %vm237_vm1, %v4165_v15, 0.0 }
 0xb3b   :  { %4168 = vadd.xlane.f32.xlu0 %v4167_v57  ;;  %v4160_v54 = vpop.xlane.xlu1 %4159 }
 0xb3c   :  { %v4162_v56 = vmul.f32 %v4160_v54, %v9558_v1 }
 0xb3e   :  { %v10055_v5 = vsub.f32 %v4152_v50, %v4162_v56 }
 0xb40   :  { %v4166_v26 = vmul.f32 %v10055_v5, %v10055_v5 }
 0xb42   :  { %v4170_v31 = vsel %vm237_vm1, %v4166_v26, 0.0 }
 0xb43   :  { %4171 = vadd.xlane.f32.xlu2 %v4170_v31  ;;  %v9283_v31 = vld [vmem:[%s10814_s2 + $0x15] ss:$0 sm:$0xff] }
 0xbae   :  { %v4169_v33 = vpop.xlane.xlu0 %4168 }
 0xbaf   :  { %v4173_v60 = vmul.f32 %v4169_v33, %v9558_v1 }
 0xbb1   :  { %v4175_v63 = vadd.f32 1e-05, %v4173_v60 }
 0xbb3   :  { %9371 = vrsqrt.f32 %v4175_v63  ;;  %vm4184_vm13 = vcmp.eq.f32.partialorder %v4175_v63, inf  ;;  %v4187_v35 = vand.u32 2147483648, %v4175_v63  ;;  %vm4186_vm14 = vcmp.eq.f32.partialorder %v4175_v63, 0.0 }
 0xbb6   :  { %v4172_v16 = vpop.xlane.xlu2 %4171 }
 0xbb7   :  { %v4174_v46 = vmul.f32 %v4172_v16, %v9558_v1 }
 0xbb9   :  { %v9372_v30 = vpop.eup %9371  ;;  %v4176_v2 = vadd.f32 1e-05, %v4174_v46 }
 0xbba   :  { %v4178_v58 = vmul.f32 %v9372_v30, %v4175_v63 }
 0xbbb   :  { %9373 = vrsqrt.f32 %v4176_v2  ;;  %vm4196_vm15 = vcmp.eq.f32.partialorder %v4176_v2, inf  ;;  %v4199_v47 = vand.u32 2147483648, %v4176_v2  ;;  %vm4198_vm2 = vcmp.eq.f32.partialorder %v4176_v2, 0.0 }
 0xbbc   :  { %v4179_v49 = vmul.f32 %v9372_v30, %v4178_v58  ;;  %v4473_v58 = vld [vmem:[%s10813_s1 + $0xe8] sm:$0xff] }
 0xbbe   :  { %v4180_v36 = vmul.f32 0.5, %v4179_v49  ;;  %v10107_v49 = vand.u32 4294901760, %v4473_v58 }
 0xbc0   :  { %v4181_v37 = vsub.f32 1.5, %v4180_v36 }
 0xbc1   :  { %v9374_v20 = vpop.eup %9373 }
 0xbc2   :  { %v4182_v19 = vmul.f32 %v9372_v30, %v4181_v37  ;;  %v4190_v32 = vmul.f32 %v9374_v20, %v4176_v2  ;;  %v4474_v30 = vld [vmem:[%s10813_s1 + $0xf0] sm:$0xff]  ;;  %v10116_v37 = vsub.f32 %v4473_v58, %v10107_v49 }
 0xbc4   :  { %v4183_v9 = vmul.f32 %v4182_v19, %v4175_v63  ;;  %v4191_v41 = vmul.f32 %v9374_v20, %v4190_v32  ;;  %v4471_v19 = vld [vmem:[%s10813_s1 + $0xd8] sm:$0xff] }
 0xbc6   :  { %v4185_v43 = vsel %vm4184_vm13, %v4175_v63, %v4183_v9  ;;  %v4192_v42 = vmul.f32 0.5, %v4191_v41  ;;  %v4541_v9 = vand.u32 4294901760, %v10116_v37  ;;  %vm4477_vm13 = vcmask 523264  }
 0xbc7   :  { %v4188_v44 = vsel %vm4186_vm14, %v4187_v35, %v4185_v43  ;;  %v10134_v35 = vand.u32 4294901760, %v4471_v19  ;;  %v4470_v43 = vld [vmem:[%s10813_s1 + $0xd0] sm:$0xff] }
 0xbc8   :  { %9375 = vrcp.f32 %v4188_v44  ;;  %v4193_v62 = vsub.f32 1.5, %v4192_v42  ;;  %v4212_v53 = vand.u32 2147483648, %v4188_v44  ;;  %v4210_v15 = vand.u32 2147483647, %v4188_v44 }
 0xbc9   :  { %vm4206_vm4 = vweird.f32 %v4188_v44 }
 0xbca   :  { %v4194_v17 = vmul.f32 %v9374_v20, %v4193_v62  ;;  %v4213_v56 = vor.u32 1.1754944e-38, %v4212_v53  ;;  %vm4211_vm7 = vcmp.eq.f32.partialorder %v4210_v15, 8.507059e+37  ;;  %v10119_v20 = vand.u32 4294901760, %v4472_v21  ;;  %v4468_v53 = vld [vmem:[%s10813_s1 + $0xc0] sm:$0xff] }
 0xbcc   :  { %v4195_v45 = vmul.f32 %v4194_v17, %v4176_v2  ;;  %v10131_v41 = vsub.f32 %v4472_v21, %v10119_v20  ;;  %v4552_v17 = vsub.f32 %v4471_v19, %v10134_v35 }
 0xbce   :  { %v9376_v11 = vpop.eup %9375  ;;  %v4197_v34 = vsel %vm4196_vm15, %v4176_v2, %v4195_v45  ;;  %v10099_v2 = vand.u32 4294901760, %v4474_v30  ;;  %v4547_v62 = vand.u32 4294901760, %v10131_v41  ;;  %v10146_v45 = vand.u32 4294901760, %v4470_v43 }
 0xbcf   :  { %v4202_v48 = vmul.f32 %v9376_v11, %v4188_v44  ;;  %v4200_v50 = vsel %vm4198_vm2, %v4199_v47, %v4197_v34  ;;  %vm4207_vm3 = vweird.f32 %v9376_v11  ;;  %v4542_v44 = vsub.f32 %v10116_v37, %v4541_v9  ;;  %v4469_v47 = vld [vmem:[%s10813_s1 + $0xc8] sm:$0xff] }
 0xbd0   :  { %9377 = vrcp.f32 %v4200_v50  ;;  %vm4208_vm6 = vmor %vm4206_vm4, %vm4207_vm3  ;;  %v4227_v38 = vand.u32 2147483648, %v4200_v50  ;;  %v4225_v6 = vand.u32 2147483647, %v4200_v50  ;;  %vm4221_vm9 = vweird.f32 %v4200_v50  ;;  %4493 = vmatpush.msrb.mxu0 %v10099_v2 }
 0xbd1   :  { %v4203_v51 = vsub.f32 1.0, %v4202_v48  ;;  %v10105_v0 = vsub.f32 %v4474_v30, %v10099_v2  ;;  %v4548_v34 = vsub.f32 %v10131_v41, %v4547_v62  ;;  %v4553_v48 = vand.u32 4294901760, %v4552_v17 }
 0xbd2   :  { %v4228_v10 = vor.u32 1.1754944e-38, %v4227_v38  ;;  %vm4226_vm11 = vcmp.eq.f32.partialorder %v4225_v6, 8.507059e+37  ;;  %4495 = vmatpush.msrb.mxu0 %v10107_v49 }
 0xbd3   :  { %v4204_v40 = vmul.f32 %v9376_v11, %v4203_v51  ;;  %v4535_v36 = vand.u32 4294901760, %v10105_v0  ;;  %v4558_v51 = vsub.f32 %v4470_v43, %v10146_v45  ;;  %v4554_v15 = vsub.f32 %v4552_v17, %v4553_v48 }
 0xbd4   :  { %4497 = vmatpush.msrb.mxu0 %v10119_v20 }
 0xbd5   :  { %v4205_v57 = vadd.f32 %v9376_v11, %v4204_v40  ;;  %v4536_v32 = vsub.f32 %v10105_v0, %v4535_v36  ;;  %v4549_v40 = vand.u32 4294901760, %v4548_v34 }
 0xbd6   :  { %v9378_v54 = vpop.eup %9377  ;;  %4499 = vmatpush.msrb.mxu0 %v10134_v35 }
 0xbd7   :  { %v4209_v26 = vsel %vm4208_vm6, %v9376_v11, %v4205_v57  ;;  %v4217_v33 = vmul.f32 %v9378_v54, %v4200_v50  ;;  %vm4222_vm8 = vweird.f32 %v9378_v54  ;;  %v4537_v42 = vand.u32 4294901760, %v4536_v32 }
 0xbd8   :  { %v4214_v8 = vsel %vm4211_vm7, %v4213_v56, %v4209_v26  ;;  %vm4223_vm10 = vmor %vm4221_vm9, %vm4222_vm8  ;;  %v4543_v11 = vand.u32 4294901760, %v4542_v44  ;;  %v10153_v50 = vand.u32 4294901760, %v4469_v47  ;;  %4501 = vmatpush.msrb.mxu0 %v10146_v45  ;;  %v4559_v56 = vand.u32 4294901760, %v4558_v51  ;;  %v4467_v26 = vld [vmem:[%s10813_s1 + $0xb8] sm:$0xff] }
 0xbd9   :  { %v4215_v29 = vmul.f32 %v4214_v8, %v10049_v24  ;;  %v4218_v60 = vsub.f32 1.0, %v4217_v33  ;;  %4538 = vmatpush.msrb.mxu1 %v4537_v42 }
 0xbda   :  { %v4564_v57 = vsub.f32 %v4469_v47, %v10153_v50  ;;  %4503 = vmatpush.msrb.mxu0 %v10153_v50 }
 0xbdb   :  { %v4232_v7 = vmul.f32 %v9283_v31, %v4215_v29  ;;  %v4219_v61 = vmul.f32 %v9378_v54, %v4218_v60  ;;  %4544 = vmatpush.msrb.mxu1 %v4543_v11  ;;  %v4506_v29 = vand.u32 4294901760, %v4467_v26 }
 0xbdc   :  { %v4565_v33 = vand.u32 4294901760, %v4564_v57 }
 0xbdd   :  { %v10087_v59 = vadd.f32 %v9284_v55, %v4232_v7  ;;  %v4220_v63 = vadd.f32 %v9378_v54, %v4219_v61  ;;  %4550 = vmatpush.msrb.mxu1 %v4549_v40  ;;  %v4576_v7 = vsub.f32 %v4467_v26, %v4506_v29  ;;  %v9286_v40 = vld [vmem:[%s10814_s2 + $0x14] ss:$0 sm:$0xff] }
 0xbde   :  { %v4566_v60 = vsub.f32 %v4564_v57, %v4565_v33 }
 0xbdf   :  { %v4244_v12 = vsel %vm237_vm1, %v10087_v59, 0  ;;  %v4224_v24 = vsel %vm4223_vm10, %v9378_v54, %v4220_v63  ;;  %v4504_v54 = vand.u32 4294901760, %v4468_v53 }
 0xbe0   :  { %v4269_v13 = vand.u32 4294901760, %v4244_v12  ;;  %v4229_v52 = vsel %vm4226_vm11, %v4228_v10, %v4224_v24  ;;  %v4567_v6 = vand.u32 4294901760, %v4566_v60  ;;  %v4577_v10 = vand.u32 4294901760, %v4576_v7 }
 0xbe1   :  { %v4230_v39 = vmul.f32 %v4229_v52, %v10055_v5  ;;  %v4570_v8 = vsub.f32 %v4468_v53, %v4504_v54  ;;  %4505 = vmatpush.msrb.mxu0 %v4504_v54 }
 0xbe2   :  { %4323 = vmatmul.f32.vlgmr.msra.gmra.mxu3 %v4269_v13  ;;  %v4270_v22 = vsub.f32 %v4244_v12, %v4269_v13  ;;  %v4578_v24 = vsub.f32 %v4576_v7, %v4577_v10 }
 0xbe3   :  { %v4233_v14 = vmul.f32 %v9283_v31, %v4230_v39  ;;  %4642 = vmatpush.msra.mxu3 %v10099_v2  ;;  %v4555_v31 = vand.u32 4294901760, %v4554_v15  ;;  %v4571_v38 = vand.u32 4294901760, %v4570_v8  ;;  %4507 = vmatpush.msrb.mxu0 %v4506_v29  ;;  %v9285_v39 = vld [vmem:[%s10814_s2 + $0x13] ss:$0 sm:$0xff] }
 0xbe4   :  { %4357 = vmatmul.f32.vlgmr.msra.gmra.mxu0 %v4270_v22  ;;  %v4271_v3 = vand.u32 4294901760, %v4270_v22 }
 0xbe5   :  { %v10092_v16 = vadd.f32 %v9284_v55, %v4233_v14  ;;  %4644 = vmatpush.msra.mxu3 %v10107_v49  ;;  %v4560_v55 = vsub.f32 %v4558_v51, %v4559_v56  ;;  %4556 = vmatpush.msrb.mxu1 %v4555_v31  ;;  %v4572_v63 = vsub.f32 %v4570_v8, %v4571_v38 }
 0xbe6   :  { %4389 = vmatmul.f32.vlgmr.msra.gmra.mxu1 %v4271_v3  ;;  %v4272_v27 = vsub.f32 %v4270_v22, %v4271_v3  ;;  %4681 = vmatpush.msra.mxu0 %v4535_v36 }
 0xbe7   :  { %v4247_v18 = vsel %vm237_vm1, %v10092_v16, 0  ;;  %4646 = vmatpush.msra.mxu3 %v10119_v20  ;;  %v4561_v61 = vand.u32 4294901760, %v4560_v55  ;;  %v4573_v12 = vand.u32 4294901760, %v4572_v63 }
 0xbe8   :  { %v4273_v4 = vand.u32 4294901760, %v4272_v27  ;;  %v4277_v46 = vand.u32 4294901760, %v4247_v18  ;;  %4685 = vmatpush.msra.mxu0 %v4541_v9 }
 0xbe9   :  { %4648 = vmatpush.msra.mxu3 %v10134_v35  ;;  %4562 = vmatpush.msrb.mxu1 %v4561_v61 }
 0xbea   :  { %4274 = vmatmul.f32.vlgmr.msra.gmra.mxu2 %v4273_v4  ;;  %4327 = vmatmul.f32.gmra.mxu3 %v4277_v46  ;;  %v4278_v23 = vsub.f32 %v4247_v18, %v4277_v46 }
 0xbeb   :  { %4600 = vmatpush.msra.mxu2 %v10105_v0  ;;  %4650 = vmatpush.msra.mxu3 %v10146_v45 }
 0xbec   :  { %4362 = vmatmul.f32.gmra.mxu0 %v4278_v23  ;;  %v4279_v25 = vand.u32 4294901760, %v4278_v23  ;;  %4568 = vmatpush.msrb.mxu1 %v4567_v6 }
 0xbed   :  { %4603 = vmatpush.msra.mxu2 %v10116_v37  ;;  %4652 = vmatpush.msra.mxu3 %v10153_v50 }
 0xbee   :  { %4395 = vmatmul.f32.gmra.mxu1 %v4279_v25  ;;  %v4280_v5 = vsub.f32 %v4278_v23, %v4279_v25  ;;  %4689 = vmatpush.msra.mxu0 %v4547_v62 }
 0xbef   :  { %4606 = vmatpush.msra.mxu2 %v10131_v41  ;;  %4654 = vmatpush.msra.mxu3 %v4504_v54 }
 0xbf0   :  { %v4281_v28 = vand.u32 4294901760, %v4280_v5  ;;  %4574 = vmatpush.msrb.mxu1 %v4573_v12  ;;  %4693 = vmatpush.msra.mxu0 %v4553_v48 }
 0xbf1   :  { %4609 = vmatpush.msra.mxu2 %v4552_v17  ;;  %4656 = vmatpush.msra.mxu3 %v4506_v29 }
 0xbf2   :  { %4282 = vmatmul.f32.gmra.mxu2 %v4281_v28  ;;  %4457 = vmatmul.f32.vlgmr.msrb.gmra.mxu3 %v4269_v13 }
 0xbf3   :  { %4612 = vmatpush.msra.mxu2 %v4558_v51  ;;  %4697 = vmatpush.msra.mxu0 %v4559_v56 }
 0xbf5   :  { %4615 = vmatpush.msra.mxu2 %v4564_v57  ;;  %4701 = vmatpush.msra.mxu0 %v4565_v33 }
 0xbf7   :  { %4618 = vmatpush.msra.mxu2 %v4570_v8  ;;  %4705 = vmatpush.msra.mxu0 %v4571_v38 }
 0xbf9   :  { %4621 = vmatpush.msra.mxu2 %v4576_v7  ;;  %4709 = vmatpush.msra.mxu0 %v4577_v10 }
 0xbfa   :  { %4428 = vmatmul.f32.vlgmr.msrb.gmra.mxu2 %v4269_v13  ;;  %4461 = vmatmul.f32.gmra.mxu3 %v4277_v46  ;;  %v4579_v13 = vand.u32 4294901760, %v4578_v24 }
 0xbfc   :  { %4580 = vmatpush.msrb.mxu1 %v4579_v13 }
 0xbfe   :  { %4728 = vmatpush.msra.mxu1 %v10099_v2 }
 0xc00   :  { %4730 = vmatpush.msra.mxu1 %v10107_v49 }
 0xc02   :  { %4432 = vmatmul.f32.gmra.mxu2 %v4277_v46  ;;  %4732 = vmatpush.msra.mxu1 %v10119_v20 }
 0xc04   :  { %4734 = vmatpush.msra.mxu1 %v10134_v35 }
 0xc06   :  { %4736 = vmatpush.msra.mxu1 %v10146_v45 }
 0xc08   :  { %4738 = vmatpush.msra.mxu1 %v10153_v50 }
 0xc0a   :  { %4740 = vmatpush.msra.mxu1 %v4504_v54 }
 0xc0c   :  { %4742 = vmatpush.msra.mxu1 %v4506_v29 }
 0xc61   :  { %v4358_v18 = vpop.f32.mrf.mxu0 }
 0xc63   :  { %v4390_v25 = vpop.f32.mrf.mxu1 }
 0xc65   :  { %v4324_v52 = vpop.f32.mrf.mxu3 }
 0xc69   :  { %v4363_v0 = vpop.f32.mrf.mxu0 }
 0xc6b   :  { %v4396_v37 = vpop.f32.mrf.mxu1 }
 0xc6d   :  { %v4275_v22 = vpop.f32.mrf.mxu2  ;;  %v4328_v3 = vpop.f32.mrf.mxu3 }
 0xc6e   :  { %v4276_v14 = vadd.f32 %v9285_v39, %v4275_v22 }
 0xc70   :  { %v4325_v27 = vadd.f32 %v4324_v52, %v4276_v14 }
 0xc72   :  { %v4359_v23 = vadd.f32 %v4358_v18, %v4325_v27 }
 0xc74   :  { %v4391_v28 = vadd.f32 %v4390_v25, %v4359_v23 }
 0xc75   :  { %v4283_v4 = vpop.f32.mrf.mxu2  ;;  %v4458_v30 = vpop.f32.mrf.mxu3 }
 0xc76   :  { %v4284_v46 = vadd.f32 %v9285_v39, %v4283_v4 }
 0xc78   :  { %v4329_v5 = vadd.f32 %v4328_v3, %v4284_v46 }
 0xc7a   :  { %v4364_v21 = vadd.f32 %v4363_v0, %v4329_v5  ;;  %v4841_v0 = vld [vmem:[%s10813_s1 + $0x110] sm:$0xff] }
 0xc7c   :  { %v4397_v19 = vadd.f32 %v4396_v37, %v4364_v21  ;;  %v4839_v21 = vld [vmem:[%s10813_s1 + $0x100] sm:$0xff]  ;;  %v4862_v37 = vand.u32 4294901760, %v4841_v0 }
 0xc7d   :  { %v4429_v2 = vpop.f32.mrf.mxu2  ;;  %v4462_v43 = vpop.f32.mrf.mxu3 }
 0xc7e   :  { %v4430_v58 = vadd.f32 %v4429_v2, %v4391_v28  ;;  %4863 = vmatpush.msrb.mxu2 %v4862_v37 }
 0xc80   :  { %v4459_v49 = vadd.f32 %v4458_v30, %v4430_v58 }
 0xc82   :  { %v4465_v36 = vmax.f32 %v4459_v49, 0.0  ;;  %v4840_v49 = vld [vmem:[%s10813_s1 + $0x108] sm:$0xff] }
 0xc84   :  { %v4479_v20 = vsel %vm4477_vm13, %v4465_v36, 0 }
 0xc85   :  { %v4508_v32 = vand.u32 4294901760, %v4479_v20  ;;  %v4433_v9 = vpop.f32.mrf.mxu2 }
 0xc86   :  { %v4434_v41 = vadd.f32 %v4433_v9, %v4397_v19  ;;  %v4866_v19 = vand.u32 4294901760, %v4839_v21 }
 0xc87   :  { %v4509_v35 = vsub.f32 %v4479_v20, %v4508_v32  ;;  %4582 = vmatmul.f32.vlgmr.msrb.gmra.mxu1 %v4508_v32  ;;  %v4864_v20 = vand.u32 4294901760, %v4840_v49 }
 0xc88   :  { %v4463_v42 = vadd.f32 %v4462_v43, %v4434_v41  ;;  %4980 = vmatpush.msrb.mxu1 %v4862_v37 }
 0xc89   :  { %v4510_v44 = vand.u32 4294901760, %v4509_v35  ;;  %4624 = vmatmul.f32.vlgmr.msra.gmra.mxu2 %v4509_v35  ;;  %v4906_v43 = vsub.f32 %v4840_v49, %v4864_v20 }
 0xc8a   :  { %v4466_v62 = vmax.f32 %v4463_v42, 0.0  ;;  %v4912_v42 = vsub.f32 %v4839_v21, %v4866_v19  ;;  %4982 = vmatpush.msrb.mxu1 %v4864_v20  ;;  %4865 = vmatpush.msrb.mxu2 %v4864_v20  ;;  %v9288_v21 = vld [vmem:[%s10814_s2 + $0x18] ss:$0 sm:$0xff] }
 0xc8b   :  { %v4511_v17 = vsub.f32 %v4509_v35, %v4510_v44  ;;  %4660 = vmatmul.f32.vlgmr.msra.gmra.mxu3 %v4510_v44  ;;  %v4900_v35 = vsub.f32 %v4841_v0, %v4862_v37 }
 0xc8c   :  { %v4482_v45 = vsel %vm4477_vm13, %v4466_v62, 0  ;;  %4984 = vmatpush.msrb.mxu1 %v4866_v19  ;;  %4867 = vmatpush.msrb.mxu2 %v4866_v19 }
 0xc8d   :  { %v4516_v47 = vand.u32 4294901760, %v4482_v45  ;;  %v4512_v11 = vand.u32 4294901760, %v4511_v17  ;;  %v4901_v62 = vand.u32 4294901760, %v4900_v35  ;;  %v4907_v17 = vand.u32 4294901760, %v4906_v43 }
 0xc8f   :  { %4513 = vmatmul.f32.vlgmr.msrb.gmra.mxu0 %v4512_v11  ;;  %4586 = vmatmul.f32.gmra.mxu1 %v4516_v47  ;;  %v4517_v34 = vsub.f32 %v4482_v45, %v4516_v47  ;;  %v4913_v45 = vand.u32 4294901760, %v4912_v42 }
 0xc90   :  { %4946 = vmatpush.msrb.mxu0 %v4900_v35 }
 0xc91   :  { %4629 = vmatmul.f32.gmra.mxu2 %v4517_v34  ;;  %v4518_v48 = vand.u32 4294901760, %v4517_v34 }
 0xc92   :  { %4949 = vmatpush.msrb.mxu0 %v4906_v43 }
 0xc93   :  { %4666 = vmatmul.f32.gmra.mxu3 %v4518_v48  ;;  %v4519_v50 = vsub.f32 %v4517_v34, %v4518_v48  ;;  %v4902_v34 = vsub.f32 %v4900_v35, %v4901_v62  ;;  %v4908_v48 = vsub.f32 %v4906_v43, %v4907_v17 }
 0xc94   :  { %4952 = vmatpush.msrb.mxu0 %v4912_v42 }
 0xc95   :  { %v4520_v51 = vand.u32 4294901760, %v4519_v50  ;;  %v4914_v50 = vsub.f32 %v4912_v42, %v4913_v45 }
 0xc97   :  { %4521 = vmatmul.f32.gmra.mxu0 %v4520_v51  ;;  %4744 = vmatmul.f32.vlgmr.msra.gmra.mxu1 %v4508_v32 }
 0xc9f   :  { %4711 = vmatmul.f32.vlgmr.msra.gmra.mxu0 %v4508_v32  ;;  %4748 = vmatmul.f32.gmra.mxu1 %v4516_v47  ;;  %v4838_v32 = vld [vmem:[%s10813_s1 + $0xf8] sm:$0xff] }
 0xca0   :  { %v10212_v9 = vand.u32 4294901760, %v4838_v32 }
 0xca2   :  { %v4918_v44 = vsub.f32 %v4838_v32, %v10212_v9  ;;  %4986 = vmatpush.msrb.mxu1 %v10212_v9  ;;  %4869 = vmatpush.msrb.mxu2 %v10212_v9 }
 0xca4   :  { %4955 = vmatpush.msrb.mxu0 %v4918_v44  ;;  %5015 = vmatpush.msra.mxu2 %v4901_v62 }
 0xca6   :  { %5019 = vmatpush.msra.mxu2 %v4907_v17 }
 0xca7   :  { %4715 = vmatmul.f32.gmra.mxu0 %v4516_v47  ;;  %v4919_v47 = vand.u32 4294901760, %v4918_v44 }
 0xca8   :  { %5023 = vmatpush.msra.mxu2 %v4913_v45 }
 0xcaa   :  { %5027 = vmatpush.msra.mxu2 %v4919_v47 }
 0xd04   :  { %v4583_v53 = vpop.f32.mrf.mxu1 }
 0xd0c   :  { %v4514_v15 = vpop.f32.mrf.mxu0  ;;  %v4587_v54 = vpop.f32.mrf.mxu1 }
 0xd0d   :  { %v4515_v57 = vadd.f32 %v9286_v40, %v4514_v15  ;;  %v4625_v26 = vpop.f32.mrf.mxu2  ;;  %v4920_v15 = vsub.f32 %v4918_v44, %v4919_v47 }
 0xd0e   :  { %v4661_v29 = vpop.f32.mrf.mxu3 }
 0xd0f   :  { %v4584_v56 = vadd.f32 %v4583_v53, %v4515_v57  ;;  %v4903_v53 = vand.u32 4294901760, %v4902_v34 }
 0xd11   :  { %v4626_v33 = vadd.f32 %v4625_v26, %v4584_v56  ;;  %4904 = vmatpush.msrb.mxu3 %v4903_v53  ;;  %v4915_v26 = vand.u32 4294901760, %v4914_v50 }
 0xd13   :  { %v4662_v55 = vadd.f32 %v4661_v29, %v4626_v33  ;;  %v4921_v33 = vand.u32 4294901760, %v4920_v15 }
 0xd14   :  { %v4522_v31 = vpop.f32.mrf.mxu0  ;;  %v4745_v38 = vpop.f32.mrf.mxu1 }
 0xd15   :  { %v4523_v8 = vadd.f32 %v9286_v40, %v4522_v31  ;;  %v4630_v6 = vpop.f32.mrf.mxu2  ;;  %v4909_v40 = vand.u32 4294901760, %v4908_v48 }
 0xd16   :  { %v4667_v24 = vpop.f32.mrf.mxu3 }
 0xd17   :  { %v4588_v60 = vadd.f32 %v4587_v54, %v4523_v8  ;;  %4910 = vmatpush.msrb.mxu3 %v4909_v40 }
 0xd19   :  { %v4631_v63 = vadd.f32 %v4630_v6, %v4588_v60  ;;  %4916 = vmatpush.msrb.mxu3 %v4915_v26 }
 0xd1b   :  { %v4668_v13 = vadd.f32 %v4667_v24, %v4631_v63  ;;  %4922 = vmatpush.msrb.mxu3 %v4921_v33 }
 0xd1c   :  { %v4712_v7 = vpop.f32.mrf.mxu0  ;;  %v4749_v14 = vpop.f32.mrf.mxu1 }
 0xd1d   :  { %v4713_v61 = vadd.f32 %v4712_v7, %v4662_v55  ;;  %5050 = vmatpush.msra.mxu3 %v4862_v37 }
 0xd1f   :  { %v4746_v10 = vadd.f32 %v4745_v38, %v4713_v61  ;;  %5052 = vmatpush.msra.mxu3 %v4864_v20 }
 0xd21   :  { %v4752_v12 = vadd.f32 %v4746_v10, %v10087_v59  ;;  %5054 = vmatpush.msra.mxu3 %v4866_v19 }
 0xd23   :  { %v4756_v52 = vsel %vm237_vm1, %v4752_v12, 0.0  ;;  %5056 = vmatpush.msra.mxu3 %v10212_v9 }
 0xd24   :  { %v4716_v39 = vpop.f32.mrf.mxu0  ;;  %4757 = vadd.xlane.f32.xlu1 %v4756_v52 }
 0xd25   :  { %v4717_v22 = vadd.f32 %v4716_v39, %v4668_v13 }
 0xd27   :  { %v4750_v3 = vadd.f32 %v4749_v14, %v4717_v22 }
 0xd29   :  { %v4753_v27 = vadd.f32 %v4750_v3, %v10092_v16 }
 0xd2b   :  { %v4759_v18 = vsel %vm237_vm1, %v4753_v27, 0.0 }
 0xd2c   :  { %4760 = vadd.xlane.f32.xlu0 %v4759_v18 }
 0xd97   :  { %v4758_v4 = vpop.xlane.xlu1 %4757 }
 0xd98   :  { %v4762_v46 = vmul.f32 %v4758_v4, %v9558_v1 }
 0xd9a   :  { %v10188_v23 = vsub.f32 %v4752_v12, %v4762_v46 }
 0xd9c   :  { %v4766_v59 = vmul.f32 %v10188_v23, %v10188_v23 }
 0xd9e   :  { %v4768_v25 = vsel %vm237_vm1, %v4766_v59, 0.0 }
 0xd9f   :  { %4769 = vadd.xlane.f32.xlu2 %v4768_v25  ;;  %v4761_v5 = vpop.xlane.xlu0 %4760 }
 0xda0   :  { %v4763_v28 = vmul.f32 %v4761_v5, %v9558_v1 }
 0xda2   :  { %v10194_v30 = vsub.f32 %v4753_v27, %v4763_v28 }
 0xda4   :  { %v4767_v16 = vmul.f32 %v10194_v30, %v10194_v30 }
 0xda6   :  { %v4771_v2 = vsel %vm237_vm1, %v4767_v16, 0.0 }
 0xda7   :  { %4772 = vadd.xlane.f32.xlu1 %v4771_v2  ;;  %v9287_v2 = vld [vmem:[%s10814_s2 + $0x17] ss:$0 sm:$0xff] }
 0xe12   :  { %v4770_v58 = vpop.xlane.xlu2 %4769 }
 0xe13   :  { %v4774_v36 = vmul.f32 %v4770_v58, %v9558_v1 }
 0xe15   :  { %v4776_v41 = vadd.f32 1e-05, %v4774_v36 }
 0xe17   :  { %9379 = vrsqrt.f32 %v4776_v41  ;;  %vm4785_vm14 = vcmp.eq.f32.partialorder %v4776_v41, inf  ;;  %v4788_v6 = vand.u32 2147483648, %v4776_v41  ;;  %vm4787_vm15 = vcmp.eq.f32.partialorder %v4776_v41, 0.0 }
 0xe1a   :  { %v4773_v11 = vpop.xlane.xlu1 %4772 }
 0xe1b   :  { %v4775_v51 = vmul.f32 %v4773_v11, %v9558_v1 }
 0xe1d   :  { %v9380_v57 = vpop.eup %9379  ;;  %v4777_v54 = vadd.f32 1e-05, %v4775_v51 }
 0xe1e   :  { %v4779_v56 = vmul.f32 %v9380_v57, %v4776_v41 }
 0xe1f   :  { %9381 = vrsqrt.f32 %v4777_v54  ;;  %vm4797_vm2 = vcmp.eq.f32.partialorder %v4777_v54, inf  ;;  %v4800_v39 = vand.u32 2147483648, %v4777_v54  ;;  %vm4799_vm3 = vcmp.eq.f32.partialorder %v4777_v54, 0.0 }
 0xe20   :  { %v4780_v31 = vmul.f32 %v9380_v57, %v4779_v56 }
 0xe22   :  { %v4781_v8 = vmul.f32 0.5, %v4780_v31 }
 0xe24   :  { %v4782_v29 = vsub.f32 1.5, %v4781_v8 }
 0xe25   :  { %v9382_v55 = vpop.eup %9381 }
 0xe26   :  { %v4783_v60 = vmul.f32 %v9380_v57, %v4782_v29  ;;  %v4791_v38 = vmul.f32 %v9382_v55, %v4777_v54 }
 0xe28   :  { %v4784_v7 = vmul.f32 %v4783_v60, %v4776_v41  ;;  %v4792_v61 = vmul.f32 %v9382_v55, %v4791_v38 }
 0xe2a   :  { %v4786_v63 = vsel %vm4785_vm14, %v4776_v41, %v4784_v7  ;;  %v4793_v10 = vmul.f32 0.5, %v4792_v61 }
 0xe2b   :  { %v4789_v12 = vsel %vm4787_vm15, %v4788_v6, %v4786_v63 }
 0xe2c   :  { %9383 = vrcp.f32 %v4789_v12  ;;  %v4794_v24 = vsub.f32 1.5, %v4793_v10  ;;  %v4813_v4 = vand.u32 2147483648, %v4789_v12  ;;  %v4811_v59 = vand.u32 2147483647, %v4789_v12 }
 0xe2d   :  { %vm4807_vm6 = vweird.f32 %v4789_v12 }
 0xe2e   :  { %v4795_v13 = vmul.f32 %v9382_v55, %v4794_v24  ;;  %v4814_v28 = vor.u32 1.1754944e-38, %v4813_v4  ;;  %vm4812_vm8 = vcmp.eq.f32.partialorder %v4811_v59, 8.507059e+37 }
 0xe30   :  { %v4796_v52 = vmul.f32 %v4795_v13, %v4777_v54 }
 0xe32   :  { %v9384_v22 = vpop.eup %9383  ;;  %v4798_v14 = vsel %vm4797_vm2, %v4777_v54, %v4796_v52  ;;  %v9289_v54 = vld [vmem:[%s10814_s2 + $0x19] ss:$0 sm:$0xff] }
 0xe33   :  { %v4803_v3 = vmul.f32 %v9384_v22, %v4789_v12  ;;  %v4801_v27 = vsel %vm4799_vm3, %v4800_v39, %v4798_v14  ;;  %vm4808_vm4 = vweird.f32 %v9384_v22 }
 0xe34   :  { %9385 = vrcp.f32 %v4801_v27  ;;  %vm4809_vm7 = vmor %vm4807_vm6, %vm4808_vm4  ;;  %v4828_v37 = vand.u32 2147483648, %v4801_v27  ;;  %v4826_v32 = vand.u32 2147483647, %v4801_v27  ;;  %vm4822_vm10 = vweird.f32 %v4801_v27 }
 0xe35   :  { %v4804_v18 = vsub.f32 1.0, %v4803_v3 }
 0xe36   :  { %v4829_v35 = vor.u32 1.1754944e-38, %v4828_v37  ;;  %vm4827_vm14 = vcmp.eq.f32.partialorder %v4826_v32, 8.507059e+37 }
 0xe37   :  { %v4805_v46 = vmul.f32 %v9384_v22, %v4804_v18 }
 0xe39   :  { %v4806_v25 = vadd.f32 %v9384_v22, %v4805_v46 }
 0xe3a   :  { %v9386_v5 = vpop.eup %9385 }
 0xe3b   :  { %v4810_v16 = vsel %vm4809_vm7, %v9384_v22, %v4806_v25  ;;  %v4818_v58 = vmul.f32 %v9386_v5, %v4801_v27  ;;  %vm4823_vm9 = vweird.f32 %v9386_v5 }
 0xe3c   :  { %v4815_v0 = vsel %vm4812_vm8, %v4814_v28, %v4810_v16  ;;  %vm4824_vm11 = vmor %vm4822_vm10, %vm4823_vm9 }
 0xe3d   :  { %v4816_v49 = vmul.f32 %v4815_v0, %v10188_v23  ;;  %v4819_v36 = vsub.f32 1.0, %v4818_v58 }
 0xe3f   :  { %v4833_v20 = vmul.f32 %v9287_v2, %v4816_v49  ;;  %v4820_v19 = vmul.f32 %v9386_v5, %v4819_v36 }
 0xe41   :  { %v10226_v9 = vadd.f32 %v9288_v21, %v4833_v20  ;;  %v4821_v41 = vadd.f32 %v9386_v5, %v4820_v19 }
 0xe43   :  { %v4845_v43 = vsel %vm237_vm1, %v10226_v9, 0  ;;  %v4825_v23 = vsel %vm4824_vm11, %v9386_v5, %v4821_v41 }
 0xe44   :  { %v4870_v42 = vand.u32 4294901760, %v4845_v43  ;;  %v4830_v44 = vsel %vm4827_vm14, %v4829_v35, %v4825_v23 }
 0xe45   :  { %v4831_v62 = vmul.f32 %v4830_v44, %v10194_v30 }
 0xe46   :  { %4924 = vmatmul.f32.vlgmr.msrb.gmra.mxu3 %v4870_v42  ;;  %v4871_v17 = vsub.f32 %v4845_v43, %v4870_v42 }
 0xe47   :  { %v4834_v45 = vmul.f32 %v9287_v2, %v4831_v62 }
 0xe48   :  { %4958 = vmatmul.f32.vlgmr.msrb.gmra.mxu0 %v4871_v17  ;;  %v4872_v47 = vand.u32 4294901760, %v4871_v17 }
 0xe49   :  { %v10231_v11 = vadd.f32 %v9288_v21, %v4834_v45 }
 0xe4a   :  { %4990 = vmatmul.f32.vlgmr.msrb.gmra.mxu1 %v4872_v47  ;;  %v4873_v34 = vsub.f32 %v4871_v17, %v4872_v47 }
 0xe4b   :  { %v4848_v48 = vsel %vm237_vm1, %v10231_v11, 0 }
 0xe4c   :  { %v4874_v50 = vand.u32 4294901760, %v4873_v34  ;;  %v4878_v51 = vand.u32 4294901760, %v4848_v48 }
 0xe4e   :  { %4875 = vmatmul.f32.vlgmr.msrb.gmra.mxu2 %v4874_v50  ;;  %4928 = vmatmul.f32.gmra.mxu3 %v4878_v51  ;;  %v4879_v53 = vsub.f32 %v4848_v48, %v4878_v51 }
 0xe50   :  { %4963 = vmatmul.f32.gmra.mxu0 %v4879_v53  ;;  %v4880_v40 = vand.u32 4294901760, %v4879_v53 }
 0xe52   :  { %4996 = vmatmul.f32.gmra.mxu1 %v4880_v40  ;;  %v4881_v30 = vsub.f32 %v4879_v53, %v4880_v40 }
 0xe54   :  { %v4882_v15 = vand.u32 4294901760, %v4881_v30 }
 0xe56   :  { %4883 = vmatmul.f32.gmra.mxu2 %v4882_v15  ;;  %5058 = vmatmul.f32.vlgmr.msra.gmra.mxu3 %v4870_v42 }
 0xe5e   :  { %5029 = vmatmul.f32.vlgmr.msra.gmra.mxu2 %v4870_v42  ;;  %5062 = vmatmul.f32.gmra.mxu3 %v4878_v51 }
 0xe66   :  { %5033 = vmatmul.f32.gmra.mxu2 %v4878_v51 }
 0xec5   :  { %v4959_v8 = vpop.f32.mrf.mxu0 }
 0xec7   :  { %v4991_v38 = vpop.f32.mrf.mxu1 }
 0xec9   :  { %v4925_v57 = vpop.f32.mrf.mxu3 }
 0xecd   :  { %v4964_v12 = vpop.f32.mrf.mxu0 }
 0xecf   :  { %v4997_v52 = vpop.f32.mrf.mxu1 }
 0xed1   :  { %v4876_v56 = vpop.f32.mrf.mxu2  ;;  %v4929_v31 = vpop.f32.mrf.mxu3 }
 0xed2   :  { %v4877_v26 = vadd.f32 %v9289_v54, %v4876_v56 }
 0xed4   :  { %v4926_v33 = vadd.f32 %v4925_v57, %v4877_v26 }
 0xed6   :  { %v4960_v60 = vadd.f32 %v4959_v8, %v4926_v33 }
 0xed8   :  { %v4992_v61 = vadd.f32 %v4991_v38, %v4960_v60 }
 0xed9   :  { %v4884_v29 = vpop.f32.mrf.mxu2  ;;  %v5059_v6 = vpop.f32.mrf.mxu3 }
 0xeda   :  { %v4885_v55 = vadd.f32 %v9289_v54, %v4884_v29 }
 0xedc   :  { %v4930_v7 = vadd.f32 %v4929_v31, %v4885_v55 }
 0xede   :  { %v4965_v13 = vadd.f32 %v4964_v12, %v4930_v7 }
 0xee0   :  { %v4998_v39 = vadd.f32 %v4997_v52, %v4965_v13 }
 0xee1   :  { %v5030_v63 = vpop.f32.mrf.mxu2  ;;  %v5063_v3 = vpop.f32.mrf.mxu3 }
 0xee2   :  { %v5031_v10 = vadd.f32 %v5030_v63, %v4992_v61 }
 0xee4   :  { %v10238_v24 = vadd.f32 %v5059_v6, %v5031_v10 }
 0xee6   :  { %5080 = vrot.lane.b32.xlu1 %v10238_v24, %s9500_s17  ;;  %5068 = vrot.lane.b32.xlu0 %v10238_v24, %s9501_s18  ;;  %v5082_v4 = vsel %vm1261_vm5, %v10238_v24, 0 }
 0xee7   :  { %v5103_v46 = vand.u32 4294901760, %v5082_v4 }
 0xee9   :  { %v5034_v22 = vpop.f32.mrf.mxu2  ;;  %v5104_v25 = vsub.f32 %v5082_v4, %v5103_v46 }
 0xeea   :  { %v5035_v14 = vadd.f32 %v5034_v22, %v4998_v39 }
 0xeeb   :  { %v5105_v28 = vand.u32 4294901760, %v5104_v25 }
 0xeec   :  { %v10244_v27 = vadd.f32 %v5063_v3, %v5035_v14 }
 0xeed   :  { %v5106_v49 = vsub.f32 %v5104_v25, %v5105_v28 }
 0xeee   :  { %5232 = vrot.lane.b32.xlu0 %v10244_v27, %s9500_s17  ;;  %5070 = vrot.lane.b32.xlu2 %v10244_v27, %s9501_s18  ;;  %v5234_v5 = vsel %vm1261_vm5, %v10244_v27, 0 }
 0xeef   :  { %v5255_v16 = vand.u32 4294901760, %v5234_v5  ;;  %v5107_v20 = vand.u32 4294901760, %v5106_v49 }
 0xef1   :  { %v5256_v36 = vsub.f32 %v5234_v5, %v5255_v16 }
 0xef3   :  { %v5257_v32 = vand.u32 4294901760, %v5256_v36 }
 0xef5   :  { %v5258_v44 = vsub.f32 %v5256_v36, %v5257_v32 }
 0xef6   :  { %5074 = vrot.lane.b32.xlu0 %v10244_v27, %s9502_s19  ;;  %5072 = vrot.lane.b32.xlu2 %v10238_v24, %s9502_s19 }
 0xef7   :  { %v5259_v45 = vand.u32 4294901760, %v5258_v44 }
 0xefe   :  { %5076 = vrot.lane.b32.xlu0 %v10238_v24, %s9503_s20 }
 0xf48   :  { %v10256_v18 = vpop.permute.xlu2 %5070 }
 0xf49   :  { %5536 = vrot.lane.b32.xlu2 %v10256_v18, %s9500_s17  ;;  %v5538_v26 = vsel %vm1261_vm5, %v10256_v18, 0 }
 0xf4a   :  { %v10292_v8 = vand.u32 4294901760, %v5538_v26 }
 0xf4c   :  { %v10297_v63 = vsub.f32 %v5538_v26, %v10292_v8 }
 0xf4e   :  { %v5561_v39 = vand.u32 4294901760, %v10297_v63 }
 0xf50   :  { %v10262_v59 = vpop.permute.xlu2 %5072 }
 0xf51   :  { %5688 = vrot.lane.b32.xlu2 %v10262_v59, %s9500_s17  ;;  %v5690_v3 = vsel %vm1261_vm5, %v10262_v59, 0 }
 0xf52   :  { %v10310_v5 = vand.u32 4294901760, %v5690_v3 }
 0xf58   :  { %v5081_v2 = vpop.permute.xlu1 %5080  ;;  %v10268_v58 = vpop.permute.xlu0 %5068 }
 0xf59   :  { %v5084_v0 = vsel %vm1261_vm5, %v5081_v2, 0  ;;  %5384 = vrot.lane.b32.xlu1 %v10268_v58, %s9500_s17  ;;  %v5386_v40 = vsel %vm1261_vm5, %v10268_v58, 0 }
 0xf5a   :  { %v5101_v21 = vand.u32 4294901760, %v5084_v0  ;;  %v10287_v15 = vand.u32 4294901760, %v5386_v40 }
 0xf5c   :  { %v5128_v37 = vsub.f32 %v5084_v0, %v5101_v21  ;;  %5102 = vmatpush.xpose.msra.mxu0 %v5101_v21  ;;  %5178 = vmatpush.xpose.msrb.mxu3 %v5101_v21  ;;  %v5408_v54 = vsub.f32 %v5386_v40, %v10287_v15  ;;  %v5712_v0 = vsub.f32 %v5690_v3, %v10310_v5 }
 0xf5e   :  { %v5129_v19 = vand.u32 4294901760, %v5128_v37  ;;  %5155 = vmatpush.xpose.msrb.mxu2 %v5128_v37  ;;  %v5409_v31 = vand.u32 4294901760, %v5408_v54 }
 0xf5f   :  { %5108 = vmatmul.f32.vlgmr.msra.gmra.mxu0 %v5107_v20  ;;  %5182 = vmatmul.f32.vlgmr.msrb.gmra.mxu3 %v5105_v28  ;;  %v5713_v20 = vand.u32 4294901760, %v5712_v0 }
 0xf60   :  { %v5130_v41 = vsub.f32 %v5128_v37, %v5129_v19  ;;  %5204 = vmatpush.xpose.msrb.mxu0 %v5129_v19  ;;  %v5233_v35 = vpop.permute.xlu0 %5232  ;;  %v5410_v60 = vsub.f32 %v5408_v54, %v5409_v31 }
 0xf61   :  { %v5236_v43 = vsel %vm1261_vm5, %v5233_v35, 0  ;;  %5158 = vmatmul.f32.vlgmr.msrb.gmra.mxu2 %v5104_v25  ;;  %5078 = vrot.lane.b32.xlu1 %v10244_v27, %s9503_s20  ;;  %v5562_v25 = vsub.f32 %v10297_v63, %v5561_v39  ;;  %v5714_v44 = vsub.f32 %v5712_v0, %v5713_v20 }
 0xf62   :  { %v5131_v23 = vand.u32 4294901760, %v5130_v41  ;;  %v5253_v42 = vand.u32 4294901760, %v5236_v43  ;;  %v5411_v12 = vand.u32 4294901760, %v5410_v60 }
 0xf63   :  { %v5715_v40 = vand.u32 4294901760, %v5714_v44 }
 0xf64   :  { %v5280_v62 = vsub.f32 %v5236_v43, %v5253_v42  ;;  %5132 = vmatpush.xpose.msra.mxu1 %v5131_v23  ;;  %5254 = vmatpush.xpose.msra.mxu2 %v5253_v42 }
 0xf66   :  { %v5281_v17 = vand.u32 4294901760, %v5280_v62  ;;  %5307 = vmatpush.xpose.msra.mxu0 %v5280_v62 }
 0xf67   :  { %5134 = vmatmul.f32.vlgmr.msra.gmra.mxu1 %v5103_v46  ;;  %5206 = vmatmul.f32.vlgmr.msrb.gmra.mxu0 %v5103_v46 }
 0xf68   :  { %5226 = vmatpush.xpose.msrb.mxu1 %v5101_v21  ;;  %v5282_v47 = vsub.f32 %v5280_v62, %v5281_v17  ;;  %5356 = vmatpush.xpose.msrb.mxu2 %v5281_v17  ;;  %v10276_v34 = vpop.permute.xlu0 %5074 }
 0xf69   :  { %5840 = vrot.lane.b32.xlu0 %v10276_v34, %s9500_s17  ;;  %5260 = vmatmul.f32.vlgmr.msra.gmra.mxu2 %v5259_v45  ;;  %v5842_v19 = vsel %vm1261_vm5, %v10276_v34, 0 }
 0xf6a   :  { %v5283_v48 = vand.u32 4294901760, %v5282_v47  ;;  %v10323_v43 = vand.u32 4294901760, %v5842_v19 }
 0xf6c   :  { %5330 = vmatpush.xpose.msra.mxu1 %v5253_v42  ;;  %5284 = vmatpush.xpose.msra.mxu3 %v5283_v48  ;;  %v10328_v48 = vsub.f32 %v5842_v19, %v10323_v43 }
 0xf6f   :  { %5228 = vmatmul.f32.vlgmr.msrb.gmra.mxu1 %v5103_v46  ;;  %5286 = vmatmul.f32.vlgmr.msra.gmra.mxu3 %v5255_v16 }
 0xf70   :  { %5378 = vmatpush.xpose.msrb.mxu3 %v5253_v42  ;;  %5310 = vmatmul.f32.vlgmr.msra.gmra.mxu0 %v5256_v36  ;;  %v10280_v50 = vpop.permute.xlu0 %5076 }
 0xf71   :  { %5992 = vrot.lane.b32.xlu1 %v10280_v50, %s9500_s17  ;;  %5358 = vmatmul.f32.vlgmr.msrb.gmra.mxu2 %v5255_v16 }
 0xf77   :  { %5334 = vmatmul.f32.vlgmr.msra.gmra.mxu1 %v5257_v32  ;;  %5380 = vmatmul.f32.vlgmr.msrb.gmra.mxu3 %v5255_v16  ;;  %v5563_v16 = vand.u32 4294901760, %v5562_v25 }
 0xfa3   :  { %v5537_v51 = vpop.permute.xlu2 %5536 }
 0xfa4   :  { %v5540_v53 = vsel %vm1261_vm5, %v5537_v51, 0 }
 0xfa5   :  { %v5557_v30 = vand.u32 4294901760, %v5540_v53 }
 0xfa7   :  { %v5584_v57 = vsub.f32 %v5540_v53, %v5557_v30 }
 0xfa9   :  { %v5585_v56 = vand.u32 4294901760, %v5584_v57 }
 0xfab   :  { %v5586_v33 = vsub.f32 %v5584_v57, %v5585_v56  ;;  %v5689_v29 = vpop.permute.xlu2 %5688 }
 0xfac   :  { %v5692_v6 = vsel %vm1261_vm5, %v5689_v29, 0 }
 0xfad   :  { %v5587_v61 = vand.u32 4294901760, %v5586_v33  ;;  %v10299_v13 = vand.u32 4294901760, %v5692_v6 }
 0xfaf   :  { %v5736_v4 = vsub.f32 %v5692_v6, %v10299_v13 }
 0xfb1   :  { %v5737_v28 = vand.u32 4294901760, %v5736_v4 }
 0xfb3   :  { %v5738_v21 = vsub.f32 %v5736_v4, %v5737_v28 }
 0xfb5   :  { %v5739_v41 = vand.u32 4294901760, %v5738_v21 }
 0xfcb   :  { %v5385_v55 = vpop.permute.xlu1 %5384 }
 0xfcc   :  { %v5388_v38 = vsel %vm1261_vm5, %v5385_v55, 0 }
 0xfcd   :  { %v5405_v7 = vand.u32 4294901760, %v5388_v38 }
 0xfcf   :  { %v5432_v10 = vsub.f32 %v5388_v38, %v5405_v7  ;;  %5406 = vmatpush.xpose.msrb.mxu0 %v5405_v7  ;;  %5482 = vmatpush.xpose.msra.mxu3 %v5405_v7 }
 0xfd1   :  { %v5433_v52 = vand.u32 4294901760, %v5432_v10  ;;  %5459 = vmatpush.xpose.msra.mxu2 %v5432_v10 }
 0xfd2   :  { %5412 = vmatmul.f32.vlgmr.msrb.gmra.mxu0 %v5411_v12  ;;  %5486 = vmatmul.f32.vlgmr.msra.gmra.mxu3 %v5409_v31 }
 0xfd3   :  { %5588 = vmatpush.xpose.msrb.mxu3 %v5587_v61  ;;  %v5434_v22 = vsub.f32 %v5432_v10, %v5433_v52  ;;  %v10302_v14 = vpop.permute.xlu1 %5078  ;;  %5508 = vmatpush.xpose.msra.mxu0 %v5433_v52 }
 0xfd4   :  { %6144 = vrot.lane.b32.xlu2 %v10302_v14, %s9500_s17  ;;  %5462 = vmatmul.f32.vlgmr.msra.gmra.mxu2 %v5408_v54 }
 0xfd5   :  { %5558 = vmatpush.xpose.msrb.mxu2 %v5557_v30  ;;  %v5435_v46 = vand.u32 4294901760, %v5434_v22 }
 0xfd7   :  { %5682 = vmatpush.xpose.msra.mxu3 %v5557_v30  ;;  %5611 = vmatpush.xpose.msrb.mxu0 %v5584_v57 }
 0xfd8   :  { %5436 = vmatpush.xpose.msrb.mxu1 %v5435_v46 }
 0xfd9   :  { %5660 = vmatpush.xpose.msra.mxu2 %v5585_v56  ;;  %v5865_v56 = vand.u32 4294901760, %v10328_v48 }
 0xfda   :  { %5510 = vmatmul.f32.vlgmr.msra.gmra.mxu0 %v10287_v15  ;;  %5590 = vmatmul.f32.vlgmr.msrb.gmra.mxu3 %v10292_v8 }
 0xfdb   :  { %5438 = vmatmul.f32.vlgmr.msrb.gmra.mxu1 %v10287_v15  ;;  %5710 = vmatpush.xpose.msra.mxu0 %v10299_v13  ;;  %v5841_v2 = vpop.permute.xlu0 %5840  ;;  %v5866_v60 = vsub.f32 %v10328_v48, %v5865_v56 }
 0xfdc   :  { %5530 = vmatpush.xpose.msra.mxu1 %v5405_v7  ;;  %5786 = vmatpush.xpose.msrb.mxu3 %v10299_v13  ;;  %v5844_v49 = vsel %vm1261_vm5, %v5841_v2, 0  ;;  %v5109_v32 = vpop.f32.mrf.mxu0 }
 0xfdd   :  { %v5861_v36 = vand.u32 4294901760, %v5844_v49  ;;  %5564 = vmatmul.f32.vlgmr.msrb.gmra.mxu2 %v5563_v16  ;;  %v5867_v10 = vand.u32 4294901760, %v5866_v60 }
 0xfde   :  { %5763 = vmatpush.xpose.msrb.mxu2 %v5736_v4 }
 0xfdf   :  { %v5888_v37 = vsub.f32 %v5844_v49, %v5861_v36 }
 0xfe0   :  { %5634 = vmatpush.xpose.msrb.mxu1 %v5557_v30 }
 0xfe1   :  { %v5889_v35 = vand.u32 4294901760, %v5888_v37 }
 0xfe2   :  { %5614 = vmatmul.f32.vlgmr.msrb.gmra.mxu0 %v10297_v63  ;;  %5684 = vmatmul.f32.vlgmr.msra.gmra.mxu3 %v10292_v8  ;;  %v5183_v30 = vpop.f32.mrf.mxu3 }
 0xfe3   :  { %5532 = vmatmul.f32.vlgmr.msra.gmra.mxu1 %v10287_v15  ;;  %v5890_v23 = vsub.f32 %v5888_v37, %v5889_v35  ;;  %v5993_v42 = vpop.permute.xlu1 %5992  ;;  %5812 = vmatpush.xpose.msrb.mxu0 %v5737_v28 }
 0xfe4   :  { %5740 = vmatpush.xpose.msra.mxu1 %v5739_v41  ;;  %v5135_v62 = vpop.f32.mrf.mxu1  ;;  %v5159_v17 = vpop.f32.mrf.mxu2  ;;  %v5996_v51 = vsel %vm1261_vm5, %v5993_v42, 0 }
 0xfe5   :  { %v5891_v45 = vand.u32 4294901760, %v5890_v23  ;;  %v5136_v47 = vadd.f32 %v5135_v62, %v5109_v32  ;;  %5662 = vmatmul.f32.vlgmr.msra.gmra.mxu2 %v10292_v8  ;;  %v6013_v57 = vand.u32 4294901760, %v5996_v51  ;;  %v5207_v54 = vpop.f32.mrf.mxu0  ;;  %v5994_v8 = vsel %vm1261_vm5, %v10280_v50, 0 }
 0xfe6   :  { %5862 = vmatpush.xpose.msra.mxu2 %v5861_v36  ;;  %v6015_v7 = vand.u32 4294901760, %v5994_v8 }
 0xfe7   :  { %v5160_v53 = vadd.f32 %v5159_v17, %v5136_v47  ;;  %5892 = vmatpush.xpose.msra.mxu3 %v5891_v45  ;;  %v6040_v29 = vsub.f32 %v5996_v51, %v6013_v57 }
 0xfe8   :  { %v6016_v52 = vsub.f32 %v5994_v8, %v6015_v7 }
 0xfe9   :  { %v5184_v15 = vadd.f32 %v5183_v30, %v5160_v53  ;;  %v6041_v6 = vand.u32 4294901760, %v6040_v29 }
 0xfea   :  { %5716 = vmatmul.f32.vlgmr.msra.gmra.mxu0 %v5715_v40  ;;  %5790 = vmatmul.f32.vlgmr.msrb.gmra.mxu3 %v5713_v20  ;;  %v6017_v25 = vand.u32 4294901760, %v6016_v52 }
 0xfeb   :  { %5638 = vmatmul.f32.vlgmr.msrb.gmra.mxu1 %v5561_v39  ;;  %v5208_v26 = vadd.f32 %v5207_v54, %v5184_v15  ;;  %5915 = vmatpush.xpose.msra.mxu0 %v5888_v37  ;;  %v6042_v22 = vsub.f32 %v6040_v29, %v6041_v6 }
 0xfec   :  { %5834 = vmatpush.xpose.msrb.mxu1 %v10299_v13  ;;  %5986 = vmatpush.xpose.msrb.mxu3 %v5861_v36  ;;  %v5229_v31 = vpop.f32.mrf.mxu1  ;;  %v5261_v55 = vpop.f32.mrf.mxu2  ;;  %v6018_v49 = vsub.f32 %v6016_v52, %v6017_v25 }
 0xfed   :  { %v5230_v33 = vadd.f32 %v5229_v31, %v5208_v26  ;;  %5766 = vmatmul.f32.vlgmr.msrb.gmra.mxu2 %v5712_v0  ;;  %v5311_v13 = vpop.f32.mrf.mxu0  ;;  %v6043_v16 = vand.u32 4294901760, %v6042_v22 }
 0xfee   :  { %5964 = vmatpush.xpose.msrb.mxu2 %v5889_v35  ;;  %v6019_v37 = vand.u32 4294901760, %v6018_v49 }
 0xfef   :  { %v10336_v38 = vmul.f32 0.35355338, %v5230_v33 }
 0xff1   :  { %v6304_v61 = vsel %vm1261_vm5, %v10336_v38, -inf }
 0xff2   :  { %6305 = vmax.xlane.f32.xlu0 %v6304_v61  ;;  %v5287_v63 = vpop.f32.mrf.mxu3  ;;  %5814 = vmatmul.f32.vlgmr.msrb.gmra.mxu0 %v10310_v5 }
 0xff3   :  { %5742 = vmatmul.f32.vlgmr.msra.gmra.mxu1 %v10310_v5  ;;  %v5288_v12 = vadd.f32 %v5287_v63, %v5261_v55  ;;  %5894 = vmatmul.f32.vlgmr.msra.gmra.mxu3 %v10323_v43 }
 0xff4   :  { %5938 = vmatpush.xpose.msra.mxu1 %v5861_v36  ;;  %6014 = vmatpush.xpose.msrb.mxu0 %v6013_v57  ;;  %v5335_v3 = vpop.f32.mrf.mxu1  ;;  %v5359_v46 = vpop.f32.mrf.mxu2 }
 0xff5   :  { %6090 = vmatpush.xpose.msra.mxu3 %v6013_v57  ;;  %v5312_v39 = vadd.f32 %v5311_v13, %v5288_v12  ;;  %5868 = vmatmul.f32.vlgmr.msra.gmra.mxu2 %v5867_v10 }
 0xff6   :  { %6067 = vmatpush.xpose.msra.mxu2 %v6040_v29 }
 0xff7   :  { %v5336_v4 = vadd.f32 %v5335_v3, %v5312_v39 }
 0xff9   :  { %v5360_v28 = vadd.f32 %v5359_v46, %v5336_v4 }
 0xffa   :  { %v5381_v2 = vpop.f32.mrf.mxu3  ;;  %5918 = vmatmul.f32.vlgmr.msra.gmra.mxu0 %v10328_v48 }
 0xffb   :  { %5836 = vmatmul.f32.vlgmr.msrb.gmra.mxu1 %v10310_v5  ;;  %v5382_v0 = vadd.f32 %v5381_v2, %v5360_v28  ;;  %5988 = vmatmul.f32.vlgmr.msrb.gmra.mxu3 %v10323_v43  ;;  %v6146_v5 = vsel %vm1261_vm5, %v10302_v14, 0 }
 0xffc   :  { %6044 = vmatpush.xpose.msrb.mxu1 %v6043_v16  ;;  %6116 = vmatpush.xpose.msra.mxu0 %v6041_v6  ;;  %v6167_v20 = vand.u32 4294901760, %v6146_v5 }
 0xffd   :  { %v10346_v21 = vmul.f32 0.35355338, %v5382_v0  ;;  %5966 = vmatmul.f32.vlgmr.msrb.gmra.mxu2 %v10323_v43 }
 0xffe   :  { %v6168_v19 = vsub.f32 %v6146_v5, %v6167_v20 }
 0xfff   :  { %v6307_v36 = vsel %vm1261_vm5, %v10346_v21, -inf }
0x1000   :  { %6308 = vmax.xlane.f32.xlu1 %v6307_v36  ;;  %v6169_v32 = vand.u32 4294901760, %v6168_v19 }
0x1002   :  { %6020 = vmatmul.f32.vlgmr.msrb.gmra.mxu0 %v6019_v37  ;;  %v6170_v35 = vsub.f32 %v6168_v19, %v6169_v32 }
0x1003   :  { %5942 = vmatmul.f32.vlgmr.msra.gmra.mxu1 %v5865_v56  ;;  %6094 = vmatmul.f32.vlgmr.msra.gmra.mxu3 %v6017_v25 }
0x1004   :  { %6138 = vmatpush.xpose.msra.mxu1 %v6013_v57  ;;  %v6171_v44 = vand.u32 4294901760, %v6170_v35 }
0x1005   :  { %6070 = vmatmul.f32.vlgmr.msra.gmra.mxu2 %v6016_v52 }
0x100a   :  { %6118 = vmatmul.f32.vlgmr.msra.gmra.mxu0 %v6015_v7 }
0x100b   :  { %6046 = vmatmul.f32.vlgmr.msrb.gmra.mxu1 %v6015_v7 }
0x1013   :  { %6140 = vmatmul.f32.vlgmr.msra.gmra.mxu1 %v6015_v7 }
0x102e   :  { %v6145_v41 = vpop.permute.xlu2 %6144 }
0x102f   :  { %v6148_v43 = vsel %vm1261_vm5, %v6145_v41, 0 }
0x1030   :  { %v6165_v23 = vand.u32 4294901760, %v6148_v43 }
0x1032   :  { %v6192_v42 = vsub.f32 %v6148_v43, %v6165_v23  ;;  %6166 = vmatpush.xpose.msrb.mxu2 %v6165_v23  ;;  %6242 = vmatpush.xpose.msrb.mxu1 %v6165_v23 }
0x1034   :  { %v6193_v62 = vand.u32 4294901760, %v6192_v42  ;;  %6219 = vmatpush.xpose.msrb.mxu0 %v6192_v42 }
0x1035   :  { %6172 = vmatmul.f32.vlgmr.msrb.gmra.mxu2 %v6171_v44  ;;  %6246 = vmatmul.f32.vlgmr.msrb.gmra.mxu1 %v6169_v32 }
0x1036   :  { %v6194_v17 = vsub.f32 %v6192_v42, %v6193_v62  ;;  %6268 = vmatpush.xpose.msra.mxu2 %v6193_v62 }
0x1037   :  { %6222 = vmatmul.f32.vlgmr.msrb.gmra.mxu0 %v6168_v19 }
0x1038   :  { %v6195_v45 = vand.u32 4294901760, %v6194_v17 }
0x103a   :  { %6196 = vmatpush.xpose.msrb.mxu3 %v6195_v45 }
0x103d   :  { %6198 = vmatmul.f32.vlgmr.msrb.gmra.mxu3 %v6167_v20  ;;  %6270 = vmatmul.f32.vlgmr.msra.gmra.mxu2 %v6167_v20 }
0x103e   :  { %6290 = vmatpush.xpose.msra.mxu3 %v6165_v23 }
0x1045   :  { %6292 = vmatmul.f32.vlgmr.msra.gmra.mxu3 %v6167_v20 }
0x104f   :  { %v5413_v47 = vpop.f32.mrf.mxu0 }
0x1055   :  { %v5487_v48 = vpop.f32.mrf.mxu3 }
0x1057   :  { %v5511_v53 = vpop.f32.mrf.mxu0  ;;  %v5463_v30 = vpop.f32.mrf.mxu2 }
0x1058   :  { %v5439_v51 = vpop.f32.mrf.mxu1 }
0x1059   :  { %v5440_v40 = vadd.f32 %v5439_v51, %v5413_v47 }
0x105b   :  { %v5464_v15 = vadd.f32 %v5463_v30, %v5440_v40 }
0x105d   :  { %v5488_v57 = vadd.f32 %v5487_v48, %v5464_v15  ;;  %v5591_v56 = vpop.f32.mrf.mxu3 }
0x105f   :  { %v5512_v54 = vadd.f32 %v5511_v53, %v5488_v57  ;;  %v5615_v31 = vpop.f32.mrf.mxu0 }
0x1060   :  { %v5533_v26 = vpop.f32.mrf.mxu1  ;;  %v5565_v8 = vpop.f32.mrf.mxu2 }
0x1061   :  { %v5534_v33 = vadd.f32 %v5533_v26, %v5512_v54  ;;  %v5592_v55 = vadd.f32 %v5591_v56, %v5565_v8 }
0x1063   :  { %v10354_v29 = vmul.f32 0.35355338, %v5534_v33  ;;  %v5616_v61 = vadd.f32 %v5615_v31, %v5592_v55 }
0x1065   :  { %v6310_v60 = vsel %vm1261_vm5, %v10354_v29, -inf  ;;  %v6306_v7 = vpop.xlane.xlu0 %6305  ;;  %v5685_v63 = vpop.f32.mrf.mxu3 }
0x1066   :  { %6311 = vmax.xlane.f32.xlu2 %v6310_v60  ;;  %v6328_v6 = vsub.f32 %v10336_v38, %v6306_v7 }
0x1067   :  { %v5717_v12 = vpop.f32.mrf.mxu0 }
0x1068   :  { %v5639_v10 = vpop.f32.mrf.mxu1  ;;  %v6336_v13 = vmul.f32 1.442695, %v6328_v6  ;;  %v5663_v39 = vpop.f32.mrf.mxu2 }
0x1069   :  { %v5640_v52 = vadd.f32 %v5639_v10, %v5616_v61 }
0x106a   :  { %9387 = vpow2.f32 %v6336_v13 }
0x106b   :  { %v5664_v22 = vadd.f32 %v5663_v39, %v5640_v52 }
0x106d   :  { %v5686_v3 = vadd.f32 %v5685_v63, %v5664_v22  ;;  %v5791_v4 = vpop.f32.mrf.mxu3 }
0x106f   :  { %v10359_v46 = vmul.f32 0.35355338, %v5686_v3  ;;  %v5815_v0 = vpop.f32.mrf.mxu0 }
0x1070   :  { %v5743_v25 = vpop.f32.mrf.mxu1  ;;  %v10361_v28 = vpop.eup %9387 }
0x1071   :  { %v5744_v16 = vadd.f32 %v5743_v25, %v5717_v12  ;;  %v5767_v2 = vpop.f32.mrf.mxu2  ;;  %v6313_v38 = vsel %vm1261_vm5, %v10359_v46, -inf  ;;  %v6352_v49 = vsel %vm1261_vm5, %v10361_v28, 0.0 }
0x1072   :  { %6314 = vmax.xlane.f32.xlu0 %v6313_v38  ;;  %6353 = vadd.xlane.f32.xlu2 %v6352_v49 }
0x1073   :  { %v5768_v36 = vadd.f32 %v5767_v2, %v5744_v16  ;;  %v6309_v37 = vpop.xlane.xlu1 %6308 }
0x1074   :  { %v6329_v20 = vsub.f32 %v10346_v21, %v6309_v37 }
0x1075   :  { %v5792_v5 = vadd.f32 %v5791_v4, %v5768_v36 }
0x1076   :  { %v6338_v32 = vmul.f32 1.442695, %v6329_v20  ;;  %v5895_v41 = vpop.f32.mrf.mxu3 }
0x1077   :  { %v5816_v19 = vadd.f32 %v5815_v0, %v5792_v5  ;;  %v5919_v42 = vpop.f32.mrf.mxu0 }
0x1078   :  { %v5837_v35 = vpop.f32.mrf.mxu1  ;;  %9389 = vpow2.f32 %v6338_v32 }
0x1079   :  { %v5838_v43 = vadd.f32 %v5837_v35, %v5816_v19  ;;  %v5869_v23 = vpop.f32.mrf.mxu2 }
0x107a   :  { %v5896_v60 = vadd.f32 %v5895_v41, %v5869_v23 }
0x107b   :  { %v10368_v44 = vmul.f32 0.35355338, %v5838_v43 }
0x107c   :  { %v5920_v7 = vadd.f32 %v5919_v42, %v5896_v60 }
0x107d   :  { %v6316_v62 = vsel %vm1261_vm5, %v10368_v44, -inf }
0x107e   :  { %6317 = vmax.xlane.f32.xlu1 %v6316_v62  ;;  %v10372_v47 = vpop.eup %9389  ;;  %v5989_v48 = vpop.f32.mrf.mxu3 }
0x107f   :  { %v6021_v21 = vpop.f32.mrf.mxu0  ;;  %v6355_v51 = vsel %vm1261_vm5, %v10372_v47, 0.0 }
0x1080   :  { %v5943_v17 = vpop.f32.mrf.mxu1 }
0x1081   :  { %v5967_v45 = vpop.f32.mrf.mxu2 }
0x1086   :  { %6496 = vrot.lane.b32.xlu0 %v10238_v24, %s9504_s21  ;;  %6356 = vadd.xlane.f32.xlu1 %v6355_v51  ;;  %v6095_v57 = vpop.f32.mrf.mxu3  ;;  %v5944_v24 = vadd.f32 %v5943_v17, %v5920_v7 }
0x1087   :  { %v6119_v56 = vpop.f32.mrf.mxu0 }
0x1088   :  { %v6047_v53 = vpop.f32.mrf.mxu1  ;;  %v5968_v61 = vadd.f32 %v5967_v45, %v5944_v24 }
0x1089   :  { %v6048_v40 = vadd.f32 %v6047_v53, %v6021_v21  ;;  %v6071_v30 = vpop.f32.mrf.mxu2 }
0x108a   :  { %v5990_v6 = vadd.f32 %v5989_v48, %v5968_v61 }
0x108b   :  { %v6072_v15 = vadd.f32 %v6071_v30, %v6048_v40 }
0x108c   :  { %v10382_v63 = vmul.f32 0.35355338, %v5990_v6 }
0x108d   :  { %v6096_v54 = vadd.f32 %v6095_v57, %v6072_v15 }
0x108e   :  { %v6319_v10 = vsel %vm1261_vm5, %v10382_v63, -inf }
0x108f   :  { %v6120_v26 = vadd.f32 %v6119_v56, %v6096_v54 }
0x1090   :  { %v6141_v31 = vpop.f32.mrf.mxu1 }
0x1091   :  { %v6142_v33 = vadd.f32 %v6141_v31, %v6120_v26 }
0x1093   :  { %v10378_v8 = vmul.f32 0.35355338, %v6142_v33 }
0x1095   :  { %v6322_v55 = vsel %vm1261_vm5, %v10378_v8, -inf }
0x1096   :  { %6323 = vmax.xlane.f32.xlu2 %v6322_v55 }
0x10b0   :  { %6320 = vmax.xlane.f32.xlu0 %v6319_v10 }
0x10b2   :  { %v6247_v3 = vpop.f32.mrf.mxu1 }
0x10b4   :  { %v6223_v39 = vpop.f32.mrf.mxu0 }
0x10b8   :  { %v6173_v12 = vpop.f32.mrf.mxu2 }
0x10c0   :  { %v6199_v13 = vpop.f32.mrf.mxu3  ;;  %v6271_v25 = vpop.f32.mrf.mxu2 }
0x10c1   :  { %v6200_v52 = vadd.f32 %v6199_v13, %v6173_v12 }
0x10c3   :  { %v6224_v22 = vadd.f32 %v6223_v39, %v6200_v52 }
0x10c4   :  { %6800 = vrot.lane.b32.xlu0 %v10268_v58, %s9504_s21 }
0x10c5   :  { %v6248_v4 = vadd.f32 %v6247_v3, %v6224_v22 }
0x10c7   :  { %v6272_v16 = vadd.f32 %v6271_v25, %v6248_v4 }
0x10c8   :  { %v6293_v2 = vpop.f32.mrf.mxu3 }
0x10c9   :  { %v6294_v0 = vadd.f32 %v6293_v2, %v6272_v16 }
0x10cb   :  { %v10388_v38 = vmul.f32 0.35355338, %v6294_v0 }
0x10cc   :  { %6952 = vrot.lane.b32.xlu0 %v10256_v18, %s9504_s21 }
0x10cd   :  { %v6325_v49 = vsel %vm1261_vm5, %v10388_v38, -inf }
0x10ce   :  { %6326 = vmax.xlane.f32.xlu2 %v6325_v49 }
0x10d4   :  { %7104 = vrot.lane.b32.xlu0 %v10262_v59, %s9504_s21 }
0x10d9   :  { %v6312_v36 = vpop.xlane.xlu2 %6311 }
0x10da   :  { %v6330_v58 = vsub.f32 %v10354_v29, %v6312_v36 }
0x10dc   :  { %v6340_v37 = vmul.f32 1.442695, %v6330_v58 }
0x10de   :  { %9391 = vpow2.f32 %v6340_v37 }
0x10e4   :  { %v10397_v5 = vpop.eup %9391 }
0x10e5   :  { %v6315_v20 = vpop.xlane.xlu0 %6314  ;;  %v6358_v19 = vsel %vm1261_vm5, %v10397_v5, 0.0  ;;  %v6354_v32 = vpop.xlane.xlu2 %6353 }
0x10e6   :  { %v6331_v18 = vsub.f32 %v10359_v46, %v6315_v20  ;;  %6359 = vadd.xlane.f32.xlu1 %v6358_v19  ;;  %9393 = vrcp.f32 %v6354_v32  ;;  %v6387_v23 = vand.u32 2147483648, %v6354_v32  ;;  %v6385_v45 = vand.u32 2147483647, %v6354_v32 }
0x10e7   :  { %vm6381_vm2 = vweird.f32 %v6354_v32 }
0x10e8   :  { %v6342_v41 = vmul.f32 1.442695, %v6331_v18  ;;  %v6388_v51 = vor.u32 1.1754944e-38, %v6387_v23  ;;  %vm6386_vm4 = vcmp.eq.f32.partialorder %v6385_v45, 8.507059e+37 }
0x10ea   :  { %9395 = vpow2.f32 %v6342_v41 }
0x10ec   :  { %v9394_v35 = vpop.eup %9393 }
0x10ed   :  { %v6377_v59 = vmul.f32 %v9394_v35, %v6354_v32  ;;  %vm6382_vm15 = vweird.f32 %v9394_v35 }
0x10ee   :  { %vm6383_vm3 = vmor %vm6381_vm2, %vm6382_vm15 }
0x10ef   :  { %v6378_v29 = vsub.f32 1.0, %v6377_v59 }
0x10f0   :  { %v10402_v43 = vpop.eup %9395 }
0x10f1   :  { %v6318_v42 = vpop.xlane.xlu1 %6317  ;;  %v6361_v62 = vsel %vm1261_vm5, %v10402_v43, 0.0  ;;  %v6379_v17 = vmul.f32 %v9394_v35, %v6378_v29 }
0x10f2   :  { %v6332_v46 = vsub.f32 %v10368_v44, %v6318_v42  ;;  %6362 = vadd.xlane.f32.xlu2 %v6361_v62 }
0x10f3   :  { %v6380_v48 = vadd.f32 %v9394_v35, %v6379_v17 }
0x10f4   :  { %v6344_v21 = vmul.f32 1.442695, %v6332_v46 }
0x10f5   :  { %v6384_v53 = vsel %vm6383_vm3, %v9394_v35, %v6380_v48 }
0x10f6   :  { %9397 = vpow2.f32 %v6344_v21  ;;  %v6389_v40 = vsel %vm6386_vm4, %v6388_v51, %v6384_v53 }
0x10f7   :  { %v6390_v30 = vmul.f32 %v10361_v28, %v6389_v40 }
0x10f8   :  { %v6497_v15 = vpop.permute.xlu0 %6496 }
0x10f9   :  { %v6517_v57 = vand.u32 4294901760, %v6497_v15  ;;  %v6500_v56 = vsel %vm1261_vm5, %v6390_v30, 0  ;;  %v6357_v3 = vpop.xlane.xlu1 %6356 }
0x10fa   :  { %v6519_v26 = vand.u32 4294901760, %v6500_v56  ;;  %v6402_v37 = vand.u32 2147483648, %v6357_v3  ;;  %vm6396_vm7 = vweird.f32 %v6357_v3 }
0x10fb   :  { %v6544_v54 = vsub.f32 %v6497_v15, %v6517_v57  ;;  %6518 = vmatpush.msra.mxu0 %v6517_v57  ;;  %6594 = vmatpush.msrb.mxu3 %v6517_v57 }
0x10fc   :  { %v10409_v44 = vpop.eup %9397  ;;  %v6520_v55 = vsub.f32 %v6500_v56, %v6519_v26  ;;  %v6403_v19 = vor.u32 1.1754944e-38, %v6402_v37 }
0x10fd   :  { %v6545_v31 = vand.u32 4294901760, %v6544_v54  ;;  %6571 = vmatpush.msrb.mxu2 %v6544_v54  ;;  %v6364_v33 = vsel %vm1261_vm5, %v10409_v44, 0.0 }
0x10fe   :  { %6365 = vadd.xlane.f32.xlu2 %v6364_v33  ;;  %6574 = vmatmul.f32.vlgmr.msrb.gmra.mxu2 %v6520_v55  ;;  %v6521_v28 = vand.u32 4294901760, %v6520_v55 }
0x10ff   :  { %v6546_v60 = vsub.f32 %v6544_v54, %v6545_v31  ;;  %6620 = vmatpush.msrb.mxu0 %v6545_v31  ;;  %6648 = vrot.lane.b32.xlu1 %v10244_v27, %s9504_s21 }
0x1100   :  { %6598 = vmatmul.f32.vlgmr.msrb.gmra.mxu3 %v6521_v28  ;;  %v6522_v24 = vsub.f32 %v6520_v55, %v6521_v28 }
0x1101   :  { %v6547_v7 = vand.u32 4294901760, %v6546_v60 }
0x1102   :  { %v6523_v61 = vand.u32 4294901760, %v6522_v24 }
0x1103   :  { %6548 = vmatpush.msra.mxu1 %v6547_v7 }
0x1104   :  { %6550 = vmatmul.f32.vlgmr.msra.gmra.mxu1 %v6519_v26  ;;  %6524 = vmatmul.f32.vlgmr.msra.gmra.mxu0 %v6523_v61 }
0x1105   :  { %6642 = vmatpush.msrb.mxu1 %v6517_v57 }
0x1107   :  { %7256 = vrot.lane.b32.xlu1 %v10276_v34, %s9504_s21 }
0x1109   :  { %v6324_v6 = vpop.xlane.xlu2 %6323 }
0x110a   :  { %v6334_v12 = vsub.f32 %v10378_v8, %v6324_v6 }
0x110c   :  { %6644 = vmatmul.f32.vlgmr.msrb.gmra.mxu1 %v6519_v26  ;;  %6622 = vmatmul.f32.vlgmr.msrb.gmra.mxu0 %v6519_v26  ;;  %v6348_v52 = vmul.f32 1.442695, %v6334_v12 }
0x110f   :  { %7560 = vrot.lane.b32.xlu1 %v10302_v14, %s9504_s21 }
0x1123   :  { %v6321_v27 = vpop.xlane.xlu0 %6320 }
0x1124   :  { %v6333_v10 = vsub.f32 %v10382_v63, %v6321_v27 }
0x1126   :  { %v6346_v13 = vmul.f32 1.442695, %v6333_v10 }
0x1128   :  { %9399 = vpow2.f32 %v6346_v13 }
0x1129   :  { %9401 = vpow2.f32 %v6348_v52 }
0x112a   :  { %9403 = vrcp.f32 %v6357_v3 }
0x112e   :  { %v10421_v39 = vpop.eup %9399 }
0x112f   :  { %v6367_v34 = vsel %vm1261_vm5, %v10421_v39, 0.0  ;;  %v10425_v22 = vpop.eup %9401 }
0x1130   :  { %6368 = vadd.xlane.f32.xlu2 %v6367_v34  ;;  %v6370_v14 = vsel %vm1261_vm5, %v10425_v22, 0.0  ;;  %v9404_v4 = vpop.eup %9403 }
0x1131   :  { %v6392_v16 = vmul.f32 %v9404_v4, %v6357_v3  ;;  %vm6397_vm6 = vweird.f32 %v9404_v4 }
0x1132   :  { %vm6398_vm8 = vmor %vm6396_vm7, %vm6397_vm6 }
0x1133   :  { %v6393_v2 = vsub.f32 1.0, %v6392_v16 }
0x1135   :  { %v6394_v36 = vmul.f32 %v9404_v4, %v6393_v2 }
0x1136   :  { %v6801_v35 = vpop.permute.xlu0 %6800 }
0x1137   :  { %v6395_v58 = vadd.f32 %v9404_v4, %v6394_v36  ;;  %v10440_v62 = vand.u32 4294901760, %v6801_v35 }
0x1138   :  { %6371 = vadd.xlane.f32.xlu2 %v6370_v14 }
0x1139   :  { %v6399_v20 = vsel %vm6398_vm8, %v9404_v4, %v6395_v58  ;;  %v6848_v51 = vsub.f32 %v6801_v35, %v10440_v62 }
0x113b   :  { %v6849_v56 = vand.u32 4294901760, %v6848_v51 }
0x113d   :  { %v6850_v28 = vsub.f32 %v6848_v51, %v6849_v56 }
0x113e   :  { %v6953_v40 = vpop.permute.xlu0 %6952 }
0x113f   :  { %v6851_v34 = vand.u32 4294901760, %v6850_v28 }
0x1141   :  { %v6327_v63 = vpop.xlane.xlu2 %6326 }
0x1142   :  { %v6335_v8 = vsub.f32 %v10388_v38, %v6327_v63  ;;  %v6400_v38 = vand.u32 2147483647, %v6357_v3  ;;  %v10454_v63 = vand.u32 4294901760, %v6953_v40 }
0x1144   :  { %v6350_v25 = vmul.f32 1.442695, %v6335_v8  ;;  %vm6401_vm9 = vcmp.eq.f32.partialorder %v6400_v38, 8.507059e+37  ;;  %v7000_v37 = vsub.f32 %v6953_v40, %v10454_v63 }
0x1145   :  { %v6404_v32 = vsel %vm6401_vm9, %v6403_v19, %v6399_v20 }
0x1146   :  { %9405 = vpow2.f32 %v6350_v25  ;;  %v6405_v41 = vmul.f32 %v10372_v47, %v6404_v32 }
0x1148   :  { %v6652_v29 = vsel %vm1261_vm5, %v6405_v41, 0 }
0x1149   :  { %v10438_v42 = vand.u32 4294901760, %v6652_v29 }
0x114b   :  { %v6672_v47 = vsub.f32 %v6652_v29, %v10438_v42  ;;  %v7001_v29 = vand.u32 4294901760, %v7000_v37 }
0x114c   :  { %v10430_v0 = vpop.eup %9405 }
0x114d   :  { %v6373_v49 = vsel %vm1261_vm5, %v10430_v0, 0.0  ;;  %v6673_v26 = vand.u32 4294901760, %v6672_v47 }
0x114e   :  { %6374 = vadd.xlane.f32.xlu0 %v6373_v49 }
0x114f   :  { %v6674_v24 = vsub.f32 %v6672_v47, %v6673_v26 }
0x1150   :  { %7408 = vrot.lane.b32.xlu2 %v10280_v50, %s9504_s21 }
0x1151   :  { %v6675_v3 = vand.u32 4294901760, %v6674_v24 }
0x1159   :  { %v6360_v18 = vpop.xlane.xlu1 %6359 }
0x115a   :  { %9407 = vrcp.f32 %v6360_v18  ;;  %v6417_v17 = vand.u32 2147483648, %v6360_v18  ;;  %v6415_v46 = vand.u32 2147483647, %v6360_v18  ;;  %vm6411_vm11 = vweird.f32 %v6360_v18 }
0x115c   :  { %v6418_v53 = vor.u32 1.1754944e-38, %v6417_v17  ;;  %vm6416_vm15 = vcmp.eq.f32.partialorder %v6415_v46, 8.507059e+37 }
0x1160   :  { %v9408_v59 = vpop.eup %9407 }
0x1161   :  { %v6407_v23 = vmul.f32 %v9408_v59, %v6360_v18  ;;  %vm6412_vm10 = vweird.f32 %v9408_v59 }
0x1162   :  { %vm6413_vm14 = vmor %vm6411_vm11, %vm6412_vm10 }
0x1163   :  { %v6408_v50 = vsub.f32 1.0, %v6407_v23 }
0x1165   :  { %v6409_v45 = vmul.f32 %v9408_v59, %v6408_v50  ;;  %v6363_v48 = vpop.xlane.xlu2 %6362 }
0x1166   :  { %9409 = vrcp.f32 %v6363_v48  ;;  %v6432_v7 = vand.u32 2147483648, %v6363_v48  ;;  %v6430_v6 = vand.u32 2147483647, %v6363_v48  ;;  %vm6426_vm3 = vweird.f32 %v6363_v48 }
0x1167   :  { %v6410_v21 = vadd.f32 %v9408_v59, %v6409_v45 }
0x1168   :  { %v6433_v14 = vor.u32 1.1754944e-38, %v6432_v7  ;;  %vm6431_vm6 = vcmp.eq.f32.partialorder %v6430_v6, 8.507059e+37 }
0x1169   :  { %v6414_v30 = vsel %vm6413_vm14, %v9408_v59, %v6410_v21 }
0x116a   :  { %v6419_v15 = vsel %vm6416_vm15, %v6418_v53, %v6414_v30 }
0x116b   :  { %v6420_v57 = vmul.f32 %v10397_v5, %v6419_v15  ;;  %v7105_v5 = vpop.permute.xlu0 %7104 }
0x116c   :  { %v9410_v54 = vpop.eup %9409  ;;  %v10456_v25 = vand.u32 4294901760, %v7105_v5 }
0x116d   :  { %v6422_v31 = vmul.f32 %v9410_v54, %v6363_v48  ;;  %v6804_v33 = vsel %vm1261_vm5, %v6420_v57, 0  ;;  %vm6427_vm2 = vweird.f32 %v9410_v54 }
0x116e   :  { %v10446_v60 = vand.u32 4294901760, %v6804_v33  ;;  %vm6428_vm4 = vmor %vm6426_vm3, %vm6427_vm2 }
0x116f   :  { %v6423_v55 = vsub.f32 1.0, %v6422_v31 }
0x1170   :  { %v10452_v52 = vsub.f32 %v6804_v33, %v10446_v60 }
0x1171   :  { %v6424_v61 = vmul.f32 %v9410_v54, %v6423_v55  ;;  %v10448_v27 = vpop.xlane.xlu2 %6365  ;;  %v6649_v10 = vpop.permute.xlu1 %6648 }
0x1172   :  { %9411 = vrcp.f32 %v10448_v27  ;;  %v6669_v13 = vand.u32 4294901760, %v6649_v10  ;;  %v6825_v36 = vand.u32 4294901760, %v10452_v52  ;;  %v6447_v59 = vand.u32 2147483648, %v10448_v27 }
0x1173   :  { %v6425_v12 = vadd.f32 %v9410_v54, %v6424_v61  ;;  %v6445_v50 = vand.u32 2147483647, %v10448_v27  ;;  %vm6441_vm8 = vweird.f32 %v10448_v27 }
0x1174   :  { %v6696_v4 = vsub.f32 %v6649_v10, %v6669_v13  ;;  %6670 = vmatpush.msra.mxu2 %v6669_v13  ;;  %6746 = vmatpush.msra.mxu1 %v6669_v13  ;;  %v6826_v41 = vsub.f32 %v10452_v52, %v6825_v36  ;;  %v6448_v21 = vor.u32 1.1754944e-38, %v6447_v59 }
0x1175   :  { %v6429_v8 = vsel %vm6428_vm4, %v9410_v54, %v6425_v12  ;;  %6676 = vmatmul.f32.vlgmr.msra.gmra.mxu2 %v6675_v3  ;;  %6750 = vmatmul.f32.vlgmr.msra.gmra.mxu1 %v6673_v26  ;;  %vm6446_vm10 = vcmp.eq.f32.partialorder %v6445_v50, 8.507059e+37 }
0x1176   :  { %v6434_v16 = vsel %vm6431_vm6, %v6433_v14, %v6429_v8  ;;  %v6697_v49 = vand.u32 4294901760, %v6696_v4  ;;  %6852 = vmatpush.msrb.mxu1 %v6851_v34  ;;  %6723 = vmatpush.msra.mxu0 %v6696_v4  ;;  %v6827_v46 = vand.u32 4294901760, %v6826_v41 }
0x1177   :  { %v6435_v2 = vmul.f32 %v10402_v43, %v6434_v16  ;;  %6726 = vmatmul.f32.vlgmr.msra.gmra.mxu0 %v6672_v47  ;;  %v7152_v43 = vsub.f32 %v7105_v5, %v10456_v25  ;;  %v7002_v47 = vsub.f32 %v7000_v37, %v7001_v29 }
0x1178   :  { %v9412_v58 = vpop.eup %9411  ;;  %6946 = vmatpush.msra.mxu1 %v10440_v62  ;;  %v6698_v19 = vsub.f32 %v6696_v4, %v6697_v49  ;;  %6822 = vmatpush.msrb.mxu0 %v10440_v62 }
0x1179   :  { %v6956_v38 = vsel %vm1261_vm5, %v6435_v2, 0  ;;  %v6437_v20 = vmul.f32 %v9412_v58, %v10448_v27  ;;  %6772 = vmatpush.msrb.mxu2 %v6697_v49  ;;  %vm6442_vm7 = vweird.f32 %v9412_v58  ;;  %v7153_v17 = vand.u32 4294901760, %v7152_v43  ;;  %v7257_v31 = vpop.permute.xlu1 %7256 }
0x117a   :  { %6924 = vmatpush.msra.mxu0 %v6849_v56  ;;  %v6699_v32 = vand.u32 4294901760, %v6698_v19  ;;  %v10467_v35 = vand.u32 4294901760, %v6956_v38  ;;  %vm6443_vm9 = vmor %vm6441_vm8, %vm6442_vm7  ;;  %v7003_v57 = vand.u32 4294901760, %v7002_v47  ;;  %v7277_v55 = vand.u32 4294901760, %v7257_v31 }
0x117b   :  { %6875 = vmatpush.msra.mxu2 %v6848_v51  ;;  %v6438_v18 = vsub.f32 1.0, %v6437_v20  ;;  %v7154_v53 = vsub.f32 %v7152_v43, %v7153_v17 }
0x117c   :  { %6700 = vmatpush.msra.mxu3 %v6699_v32  ;;  %v6976_v48 = vsub.f32 %v6956_v38, %v10467_v35  ;;  %v7304_v28 = vsub.f32 %v7257_v31, %v7277_v55 }
0x117d   :  { %v6439_v23 = vmul.f32 %v9412_v58, %v6438_v18  ;;  %6702 = vmatmul.f32.vlgmr.msra.gmra.mxu3 %v10438_v42  ;;  %6774 = vmatmul.f32.vlgmr.msrb.gmra.mxu2 %v10438_v42  ;;  %v7155_v56 = vand.u32 4294901760, %v7154_v53 }
0x117e   :  { %6794 = vmatpush.msrb.mxu3 %v6669_v13  ;;  %6854 = vmatmul.f32.vlgmr.msrb.gmra.mxu1 %v10446_v60  ;;  %v6977_v15 = vand.u32 4294901760, %v6976_v48 }
0x117f   :  { %v6440_v45 = vadd.f32 %v9412_v58, %v6439_v23  ;;  %6974 = vmatpush.msrb.mxu2 %v10454_v63  ;;  %7050 = vmatpush.msrb.mxu1 %v10454_v63 }
0x1180   :  { %6898 = vmatpush.msra.mxu3 %v10440_v62  ;;  %6828 = vmatmul.f32.vlgmr.msrb.gmra.mxu0 %v6827_v46  ;;  %v6978_v62 = vsub.f32 %v6976_v48, %v6977_v15 }
0x1181   :  { %v6444_v51 = vsel %vm6443_vm9, %v9412_v58, %v6440_v45  ;;  %7027 = vmatpush.msrb.mxu0 %v7000_v37 }
0x1182   :  { %v6449_v40 = vsel %vm6446_vm10, %v6448_v21, %v6444_v51  ;;  %v6979_v33 = vand.u32 4294901760, %v6978_v62 }
0x1183   :  { %v6450_v30 = vmul.f32 %v10409_v44, %v6449_v40 }
0x1185   :  { %v7108_v54 = vsel %vm1261_vm5, %v6450_v30, 0  ;;  %6796 = vmatmul.f32.vlgmr.msrb.gmra.mxu3 %v10438_v42  ;;  %6878 = vmatmul.f32.vlgmr.msra.gmra.mxu2 %v10452_v52  ;;  %v7561_v52 = vpop.permute.xlu1 %7560 }
0x1186   :  { %6948 = vmatmul.f32.vlgmr.msra.gmra.mxu1 %v10446_v60  ;;  %7004 = vmatpush.msrb.mxu3 %v7003_v57  ;;  %v7127_v26 = vand.u32 4294901760, %v7108_v54 }
0x1187   :  { %7076 = vmatpush.msra.mxu2 %v7001_v29  ;;  %7156 = vmatpush.msra.mxu1 %v7155_v56 }
0x1188   :  { %6926 = vmatmul.f32.vlgmr.msra.gmra.mxu0 %v10446_v60  ;;  %v7128_v44 = vsub.f32 %v7108_v54, %v7127_v26  ;;  %v7305_v60 = vand.u32 4294901760, %v7304_v28 }
0x1189   :  { %7126 = vmatpush.msra.mxu0 %v10456_v25 }
0x118a   :  { %v7129_v42 = vand.u32 4294901760, %v7128_v44  ;;  %v7306_v61 = vsub.f32 %v7304_v28, %v7305_v60 }
0x118c   :  { %v7130_v7 = vsub.f32 %v7128_v44, %v7129_v42  ;;  %v7307_v6 = vand.u32 4294901760, %v7306_v61 }
0x118d   :  { %6902 = vmatmul.f32.vlgmr.msra.gmra.mxu3 %v6825_v36  ;;  %6980 = vmatmul.f32.vlgmr.msrb.gmra.mxu2 %v6979_v33 }
0x118e   :  { %7054 = vmatmul.f32.vlgmr.msrb.gmra.mxu1 %v6977_v15  ;;  %7098 = vmatpush.msra.mxu3 %v10454_v63  ;;  %v7131_v24 = vand.u32 4294901760, %v7130_v7  ;;  %v10492_v63 = vand.u32 4294901760, %v7561_v52 }
0x118f   :  { %7179 = vmatpush.msrb.mxu2 %v7152_v43  ;;  %7250 = vmatpush.msrb.mxu1 %v10456_v25 }
0x1190   :  { %7030 = vmatmul.f32.vlgmr.msrb.gmra.mxu0 %v6976_v48  ;;  %v10495_v37 = vsub.f32 %v7561_v52, %v10492_v63 }
0x1191   :  { %7228 = vmatpush.msrb.mxu0 %v7153_v17 }
0x1192   :  { %v7609_v29 = vand.u32 4294901760, %v10495_v37 }
0x1194   :  { %v7610_v47 = vsub.f32 %v10495_v37, %v7609_v29 }
0x1195   :  { %7006 = vmatmul.f32.vlgmr.msrb.gmra.mxu3 %v10467_v35  ;;  %7078 = vmatmul.f32.vlgmr.msra.gmra.mxu2 %v10467_v35 }
0x1196   :  { %7158 = vmatmul.f32.vlgmr.msra.gmra.mxu1 %v7127_v26  ;;  %7202 = vmatpush.msrb.mxu3 %v10456_v25  ;;  %v7611_v57 = vand.u32 4294901760, %v7610_v47 }
0x1197   :  { %7278 = vmatpush.msra.mxu2 %v7277_v55  ;;  %7354 = vmatpush.msra.mxu1 %v7277_v55 }
0x1198   :  { %7132 = vmatmul.f32.vlgmr.msra.gmra.mxu0 %v7131_v24 }
0x1199   :  { %7331 = vmatpush.msra.mxu0 %v7304_v28 }
0x119d   :  { %7100 = vmatmul.f32.vlgmr.msra.gmra.mxu3 %v10467_v35  ;;  %7182 = vmatmul.f32.vlgmr.msrb.gmra.mxu2 %v7128_v44 }
0x119e   :  { %7252 = vmatmul.f32.vlgmr.msrb.gmra.mxu1 %v7127_v26  ;;  %7308 = vmatpush.msra.mxu3 %v7307_v6 }
0x119f   :  { %7380 = vmatpush.msrb.mxu2 %v7305_v60 }
0x11a0   :  { %7230 = vmatmul.f32.vlgmr.msrb.gmra.mxu0 %v7127_v26 }
0x11a3   :  { %v6369_v27 = vpop.xlane.xlu2 %6368 }
0x11a4   :  { %9413 = vrcp.f32 %v6369_v27  ;;  %v6462_v34 = vand.u32 2147483648, %v6369_v27  ;;  %v6460_v3 = vand.u32 2147483647, %v6369_v27  ;;  %vm6456_vm14 = vweird.f32 %v6369_v27 }
0x11a5   :  { %7206 = vmatmul.f32.vlgmr.msrb.gmra.mxu3 %v7129_v42 }
0x11a6   :  { %7402 = vmatpush.msrb.mxu3 %v7277_v55  ;;  %v6463_v25 = vor.u32 1.1754944e-38, %v6462_v34  ;;  %vm6461_vm2 = vcmp.eq.f32.partialorder %v6460_v3, 8.507059e+37  ;;  %v10509_v34 = vpop.f32.mrf.mxu0  ;;  %v10513_v3 = vpop.f32.mrf.mxu2 }
0x11aa   :  { %v9414_v10 = vpop.eup %9413 }
0x11ab   :  { %v6452_v5 = vmul.f32 %v9414_v10, %v6369_v27  ;;  %v6372_v12 = vpop.xlane.xlu2 %6371  ;;  %vm6457_vm11 = vweird.f32 %v9414_v10 }
0x11ac   :  { %9415 = vrcp.f32 %v6372_v12  ;;  %vm6458_vm15 = vmor %vm6456_vm14, %vm6457_vm11  ;;  %v6477_v19 = vand.u32 2147483648, %v6372_v12  ;;  %v6475_v32 = vand.u32 2147483647, %v6372_v12  ;;  %vm6471_vm4 = vweird.f32 %v6372_v12 }
0x11ad   :  { %v6453_v13 = vsub.f32 1.0, %v6452_v5 }
0x11ae   :  { %v6478_v50 = vor.u32 1.1754944e-38, %v6477_v19  ;;  %vm6476_vm7 = vcmp.eq.f32.partialorder %v6475_v32, 8.507059e+37 }
0x11af   :  { %v6454_v14 = vmul.f32 %v9414_v10, %v6453_v13 }
0x11b1   :  { %v6455_v8 = vadd.f32 %v9414_v10, %v6454_v14  ;;  %v10511_v14 = vpop.f32.mrf.mxu1 }
0x11b2   :  { %v9416_v4 = vpop.eup %9415 }
0x11b3   :  { %v6459_v16 = vsel %vm6458_vm15, %v9414_v10, %v6455_v8  ;;  %v6467_v2 = vmul.f32 %v9416_v4, %v6372_v12  ;;  %v7409_v49 = vpop.permute.xlu2 %7408  ;;  %vm6472_vm3 = vweird.f32 %v9416_v4  ;;  %v10519_v8 = vpop.f32.mrf.mxu3 }
0x11b4   :  { %v6464_v36 = vsel %vm6461_vm2, %v6463_v25, %v6459_v16  ;;  %v7429_v58 = vand.u32 4294901760, %v7409_v49  ;;  %vm6473_vm6 = vmor %vm6471_vm4, %vm6472_vm3 }
0x11b5   :  { %v6465_v38 = vmul.f32 %v10421_v39, %v6464_v36  ;;  %v6468_v20 = vsub.f32 1.0, %v6467_v2 }
0x11b6   :  { %v7456_v43 = vsub.f32 %v7409_v49, %v7429_v58  ;;  %7430 = vmatpush.msrb.mxu0 %v7429_v58 }
0x11b7   :  { %v6469_v18 = vmul.f32 %v9416_v4, %v6468_v20  ;;  %v7260_v41 = vsel %vm1261_vm5, %v6465_v38, 0 }
0x11b8   :  { %v7457_v35 = vand.u32 4294901760, %v7456_v43  ;;  %v7279_v59 = vand.u32 4294901760, %v7260_v41 }
0x11b9   :  { %v6470_v23 = vadd.f32 %v9416_v4, %v6469_v18 }
0x11ba   :  { %v7458_v17 = vsub.f32 %v7456_v43, %v7457_v35  ;;  %7310 = vmatmul.f32.vlgmr.msra.gmra.mxu3 %v7279_v59  ;;  %v7280_v39 = vsub.f32 %v7260_v41, %v7279_v59 }
0x11bb   :  { %v6474_v45 = vsel %vm6473_vm6, %v9416_v4, %v6470_v23  ;;  %7506 = vmatpush.msra.mxu3 %v7429_v58 }
0x11bc   :  { %v6479_v46 = vsel %vm6476_vm7, %v6478_v50, %v6474_v45  ;;  %v7459_v48 = vand.u32 4294901760, %v7458_v17  ;;  %7334 = vmatmul.f32.vlgmr.msra.gmra.mxu0 %v7280_v39  ;;  %v7281_v21 = vand.u32 4294901760, %v7280_v39 }
0x11bd   :  { %v6480_v51 = vmul.f32 %v10425_v22, %v6479_v46  ;;  %7532 = vmatpush.msra.mxu0 %v7457_v35 }
0x11be   :  { %7358 = vmatmul.f32.vlgmr.msra.gmra.mxu1 %v7281_v21  ;;  %v7282_v53 = vsub.f32 %v7280_v39, %v7281_v21 }
0x11bf   :  { %7460 = vmatpush.msrb.mxu1 %v7459_v48  ;;  %v7412_v40 = vsel %vm1261_vm5, %v6480_v51, 0 }
0x11c0   :  { %v7283_v30 = vand.u32 4294901760, %v7282_v53  ;;  %v7431_v15 = vand.u32 4294901760, %v7412_v40 }
0x11c1   :  { %7554 = vmatpush.msra.mxu1 %v7429_v58  ;;  %v6375_v54 = vpop.xlane.xlu0 %6374 }
0x11c2   :  { %7284 = vmatmul.f32.vlgmr.msra.gmra.mxu2 %v7283_v30  ;;  %7404 = vmatmul.f32.vlgmr.msrb.gmra.mxu3 %v7279_v59  ;;  %v7432_v56 = vsub.f32 %v7412_v40, %v7431_v15  ;;  %9417 = vrcp.f32 %v6375_v54  ;;  %v6492_v55 = vand.u32 2147483648, %v6375_v54  ;;  %v6490_v28 = vand.u32 2147483647, %v6375_v54 }
0x11c3   :  { %7483 = vmatpush.msra.mxu2 %v7456_v43  ;;  %7612 = vmatpush.msrb.mxu3 %v7611_v57  ;;  %vm6486_vm9 = vweird.f32 %v6375_v54 }
0x11c4   :  { %v7433_v26 = vand.u32 4294901760, %v7432_v56  ;;  %v6493_v60 = vor.u32 1.1754944e-38, %v6492_v55  ;;  %vm6491_vm11 = vcmp.eq.f32.partialorder %v6490_v28, 8.507059e+37 }
0x11c6   :  { %7462 = vmatmul.f32.vlgmr.msrb.gmra.mxu1 %v7431_v15  ;;  %v7434_v22 = vsub.f32 %v7432_v56, %v7433_v26 }
0x11c7   :  { %7658 = vmatpush.msrb.mxu1 %v10492_v63 }
0x11c8   :  { %v7435_v62 = vand.u32 4294901760, %v7434_v22  ;;  %v9418_v31 = vpop.eup %9417 }
0x11c9   :  { %v6482_v44 = vmul.f32 %v9418_v31, %v6375_v54  ;;  %vm6487_vm8 = vweird.f32 %v9418_v31 }
0x11ca   :  { %7382 = vmatmul.f32.vlgmr.msrb.gmra.mxu2 %v7279_v59  ;;  %7436 = vmatmul.f32.vlgmr.msrb.gmra.mxu0 %v7435_v62  ;;  %vm6488_vm10 = vmor %vm6486_vm9, %vm6487_vm8 }
0x11cb   :  { %7510 = vmatmul.f32.vlgmr.msra.gmra.mxu3 %v7433_v26  ;;  %7582 = vmatpush.msrb.mxu2 %v10492_v63  ;;  %v6483_v33 = vsub.f32 1.0, %v6482_v44 }
0x11cc   :  { %7635 = vmatpush.msrb.mxu0 %v10495_v37  ;;  %7706 = vmatpush.msra.mxu3 %v10492_v63  ;;  %v10517_v63 = vpop.f32.mrf.mxu1 }
0x11cd   :  { %v6484_v42 = vmul.f32 %v9418_v31, %v6483_v33 }
0x11ce   :  { %7556 = vmatmul.f32.vlgmr.msra.gmra.mxu1 %v7431_v15 }
0x11cf   :  { %v6485_v7 = vadd.f32 %v9418_v31, %v6484_v42 }
0x11d1   :  { %v6489_v24 = vsel %vm6488_vm10, %v9418_v31, %v6485_v7 }
0x11d2   :  { %7486 = vmatmul.f32.vlgmr.msra.gmra.mxu2 %v7432_v56  ;;  %7534 = vmatmul.f32.vlgmr.msra.gmra.mxu0 %v7431_v15  ;;  %v6494_v61 = vsel %vm6491_vm11, %v6493_v60, %v6489_v24 }
0x11d3   :  { %7684 = vmatpush.msra.mxu2 %v7609_v29  ;;  %v6495_v6 = vmul.f32 %v10430_v0, %v6494_v61  ;;  %v10515_v0 = vpop.f32.mrf.mxu0 }
0x11d5   :  { %v7564_v27 = vsel %vm1261_vm5, %v6495_v6, 0 }
0x11d6   :  { %v7583_v10 = vand.u32 4294901760, %v7564_v27 }
0x11d8   :  { %7614 = vmatmul.f32.vlgmr.msrb.gmra.mxu3 %v7583_v10  ;;  %v7584_v5 = vsub.f32 %v7564_v27, %v7583_v10 }
0x11da   :  { %7638 = vmatmul.f32.vlgmr.msrb.gmra.mxu0 %v7584_v5  ;;  %v7585_v12 = vand.u32 4294901760, %v7584_v5 }
0x11dc   :  { %7662 = vmatmul.f32.vlgmr.msrb.gmra.mxu1 %v7585_v12  ;;  %v7586_v13 = vsub.f32 %v7584_v5, %v7585_v12 }
0x11de   :  { %v7587_v52 = vand.u32 4294901760, %v7586_v13 }
0x11e0   :  { %7588 = vmatmul.f32.vlgmr.msrb.gmra.mxu2 %v7587_v52  ;;  %7708 = vmatmul.f32.vlgmr.msra.gmra.mxu3 %v7583_v10 }
0x11e8   :  { %7686 = vmatmul.f32.vlgmr.msra.gmra.mxu2 %v7583_v10 }
0x11f2   :  { %v6751_v16 = vpop.f32.mrf.mxu1 }
0x11f4   :  { %v6727_v4 = vpop.f32.mrf.mxu0 }
0x11f8   :  { %v6677_v25 = vpop.f32.mrf.mxu2 }
0x11fb   :  { %v6855_v38 = vpop.f32.mrf.mxu1 }
0x11fd   :  { %v6829_v58 = vpop.f32.mrf.mxu0 }
0x11fe   :  { %v6856_v35 = vadd.f32 %v6855_v38, %v6829_v58 }
0x1200   :  { %v6703_v2 = vpop.f32.mrf.mxu3  ;;  %v6775_v49 = vpop.f32.mrf.mxu2 }
0x1201   :  { %v6704_v36 = vadd.f32 %v6703_v2, %v6677_v25 }
0x1203   :  { %v6728_v37 = vadd.f32 %v6727_v4, %v6704_v36  ;;  %v6949_v59 = vpop.f32.mrf.mxu1 }
0x1205   :  { %v6752_v20 = vadd.f32 %v6751_v16, %v6728_v37  ;;  %v6927_v41 = vpop.f32.mrf.mxu0 }
0x1207   :  { %v6776_v19 = vadd.f32 %v6775_v49, %v6752_v20 }
0x1208   :  { %v6797_v43 = vpop.f32.mrf.mxu3  ;;  %v6879_v18 = vpop.f32.mrf.mxu2 }
0x1209   :  { %v10521_v32 = vadd.f32 %v6797_v43, %v6776_v19  ;;  %v6880_v29 = vadd.f32 %v6879_v18, %v6856_v35 }
0x120b   :  { %v7055_v48 = vpop.f32.mrf.mxu1 }
0x120d   :  { %v7031_v46 = vpop.f32.mrf.mxu0 }
0x1210   :  { %v6903_v23 = vpop.f32.mrf.mxu3  ;;  %v6981_v50 = vpop.f32.mrf.mxu2 }
0x1211   :  { %v6904_v17 = vadd.f32 %v6903_v23, %v6880_v29 }
0x1213   :  { %v6928_v39 = vadd.f32 %v6927_v41, %v6904_v17  ;;  %v7159_v40 = vpop.f32.mrf.mxu1 }
0x1215   :  { %v6950_v45 = vadd.f32 %v6949_v59, %v6928_v39  ;;  %v7133_v51 = vpop.f32.mrf.mxu0 }
0x1216   :  { %v7160_v15 = vadd.f32 %v7159_v40, %v7133_v51  ;;  %v7744_v51 = vld [vmem:[%s10813_s1 + $0x128] sm:$0xff] }
0x1217   :  { %7714 = vrot.lane.b32.xlu1 %v6950_v45, %s9505_s22 }
0x1218   :  { %v7007_v21 = vpop.f32.mrf.mxu3  ;;  %v7079_v47 = vpop.f32.mrf.mxu2 }
0x1219   :  { %v7008_v57 = vadd.f32 %v7007_v21, %v6981_v50 }
0x121b   :  { %v7032_v26 = vadd.f32 %v7031_v46, %v7008_v57  ;;  %v7253_v44 = vpop.f32.mrf.mxu1  ;;  %v7745_v46 = vld [vmem:[%s10813_s1 + $0x130] sm:$0xff] }
0x121d   :  { %v7231_v62 = vpop.f32.mrf.mxu0  ;;  %v7056_v33 = vadd.f32 %v7055_v48, %v7032_v26  ;;  %v7766_v48 = vand.u32 4294901760, %v7745_v46 }
0x121f   :  { %v7080_v42 = vadd.f32 %v7079_v47, %v7056_v33  ;;  %v7804_v21 = vsub.f32 %v7745_v46, %v7766_v48  ;;  %7884 = vmatpush.msrb.mxu3 %v7766_v48  ;;  %7767 = vmatpush.msra.mxu0 %v7766_v48 }
0x1220   :  { %v7101_v53 = vpop.f32.mrf.mxu3  ;;  %v7183_v30 = vpop.f32.mrf.mxu2 }
0x1221   :  { %v7184_v54 = vadd.f32 %v7183_v30, %v7160_v15  ;;  %v7102_v28 = vadd.f32 %v7101_v53, %v7080_v42  ;;  %v7805_v47 = vand.u32 4294901760, %v7804_v21  ;;  %7850 = vmatpush.msrb.mxu2 %v7804_v21  ;;  %v7768_v53 = vand.u32 4294901760, %v7744_v51  ;;  %v7743_v30 = vld [vmem:[%s10813_s1 + $0x120] sm:$0xff] }
0x1222   :  { %v7770_v57 = vand.u32 4294901760, %v7743_v30 }
0x1223   :  { %v7806_v40 = vsub.f32 %v7804_v21, %v7805_v47  ;;  %v7810_v15 = vsub.f32 %v7744_v51, %v7768_v53  ;;  %7886 = vmatpush.msrb.mxu3 %v7768_v53  ;;  %7769 = vmatpush.msra.mxu0 %v7768_v53 }
0x1225   :  { %v7811_v26 = vand.u32 4294901760, %v7810_v15  ;;  %7853 = vmatpush.msrb.mxu2 %v7810_v15  ;;  %7888 = vmatpush.msrb.mxu3 %v7770_v57 }
0x1226   :  { %7771 = vmatpush.msra.mxu0 %v7770_v57 }
0x1228   :  { %v7207_v56 = vpop.f32.mrf.mxu3 }
0x1229   :  { %v7208_v22 = vadd.f32 %v7207_v56, %v7184_v54  ;;  %v7807_v54 = vand.u32 4294901760, %v7806_v40  ;;  %v7742_v56 = vld [vmem:[%s10813_s1 + $0x118] sm:$0xff] }
0x122b   :  { %v7232_v31 = vadd.f32 %v7231_v62, %v7208_v22  ;;  %v7816_v22 = vsub.f32 %v7743_v30, %v7770_v57  ;;  %v7772_v62 = vand.u32 4294901760, %v7742_v56  ;;  %7808 = vmatpush.msra.mxu1 %v7807_v54 }
0x122d   :  { %v7254_v55 = vadd.f32 %v7253_v44, %v7232_v31  ;;  %v7812_v31 = vsub.f32 %v7810_v15, %v7811_v26  ;;  %v7817_v44 = vand.u32 4294901760, %v7816_v22  ;;  %v7822_v33 = vsub.f32 %v7742_v56, %v7772_v62  ;;  %7856 = vmatpush.msrb.mxu2 %v7816_v22  ;;  %7890 = vmatpush.msrb.mxu3 %v7772_v62 }
0x122e   :  { %7773 = vmatpush.msra.mxu0 %v7772_v62 }
0x122f   :  { %7722 = vrot.lane.b32.xlu1 %v7254_v55, %s9506_s23  ;;  %v7813_v55 = vand.u32 4294901760, %v7812_v31  ;;  %v7818_v42 = vsub.f32 %v7816_v22, %v7817_v44  ;;  %7859 = vmatpush.msrb.mxu2 %v7822_v33 }
0x1230   :  { %7919 = vmatpush.msrb.mxu0 %v7805_v47 }
0x1231   :  { %7814 = vmatpush.msra.mxu1 %v7813_v55 }
0x1232   :  { %7923 = vmatpush.msrb.mxu0 %v7811_v26 }
0x1234   :  { %7927 = vmatpush.msrb.mxu0 %v7817_v44 }
0x1237   :  { %7716 = vrot.lane.b32.xlu1 %v7102_v28, %s9505_s22  ;;  %v7823_v28 = vand.u32 4294901760, %v7822_v33 }
0x1239   :  { %v7335_v24 = vpop.f32.mrf.mxu0  ;;  %7931 = vmatpush.msrb.mxu0 %v7823_v28 }
0x123b   :  { %v7359_v61 = vpop.f32.mrf.mxu1 }
0x123d   :  { %v7311_v7 = vpop.f32.mrf.mxu3 }
0x1243   :  { %v7463_v5 = vpop.f32.mrf.mxu1 }
0x1245   :  { %v7285_v60 = vpop.f32.mrf.mxu2  ;;  %v7405_v6 = vpop.f32.mrf.mxu3 }
0x1246   :  { %v7312_v52 = vadd.f32 %v7311_v7, %v7285_v60  ;;  %v7819_v7 = vand.u32 4294901760, %v7818_v42  ;;  %v7824_v60 = vsub.f32 %v7822_v33, %v7823_v28 }
0x1247   :  { %v7437_v10 = vpop.f32.mrf.mxu0 }
0x1248   :  { %v7464_v12 = vadd.f32 %v7463_v5, %v7437_v10  ;;  %v7336_v49 = vadd.f32 %v7335_v24, %v7312_v52  ;;  %7820 = vmatpush.msra.mxu1 %v7819_v7  ;;  %v7825_v24 = vand.u32 4294901760, %v7824_v60 }
0x124a   :  { %v7360_v38 = vadd.f32 %v7359_v61, %v7336_v49  ;;  %7826 = vmatpush.msra.mxu1 %v7825_v24  ;;  %v6552_v61 = vadd.f32 %v10511_v14, %v10509_v34 }
0x124b   :  { %v7557_v58 = vpop.f32.mrf.mxu1 }
0x124c   :  { %7954 = vmatpush.msrb.mxu1 %v7766_v48 }
0x124d   :  { %v7383_v27 = vpop.f32.mrf.mxu2 }
0x124e   :  { %v7511_v25 = vpop.f32.mrf.mxu3  ;;  %v7384_v20 = vadd.f32 %v7383_v27, %v7360_v38  ;;  %7956 = vmatpush.msrb.mxu1 %v7768_v53 }
0x124f   :  { %v7535_v2 = vpop.f32.mrf.mxu0 }
0x1250   :  { %v7406_v19 = vadd.f32 %v7405_v6, %v7384_v20  ;;  %7958 = vmatpush.msrb.mxu1 %v7770_v57  ;;  %v6576_v6 = vadd.f32 %v10513_v3, %v6552_v61 }
0x1252   :  { %7960 = vmatpush.msrb.mxu1 %v7772_v62  ;;  %v6600_v10 = vadd.f32 %v10519_v8, %v6576_v6 }
0x1254   :  { %v6624_v5 = vadd.f32 %v10515_v0, %v6600_v10 }
0x1255   :  { %v7487_v13 = vpop.f32.mrf.mxu2 }
0x1256   :  { %v7488_v4 = vadd.f32 %v7487_v13, %v7464_v12  ;;  %v6646_v12 = vadd.f32 %v10517_v63, %v6624_v5 }
0x1257   :  { %v7639_v35 = vpop.f32.mrf.mxu0 }
0x1258   :  { %v7512_v16 = vadd.f32 %v7511_v25, %v7488_v4 }
0x1259   :  { %v7663_v29 = vpop.f32.mrf.mxu1 }
0x125a   :  { %v7536_v36 = vadd.f32 %v7535_v2, %v7512_v16 }
0x125b   :  { %v7615_v43 = vpop.f32.mrf.mxu3 }
0x125c   :  { %v7558_v37 = vadd.f32 %v7557_v58, %v7536_v36 }
0x125e   :  { %7730 = vrot.lane.b32.xlu2 %v7558_v37, %s9507_s24 }
0x1263   :  { %v7589_v18 = vpop.f32.mrf.mxu2  ;;  %v7709_v39 = vpop.f32.mrf.mxu3 }
0x1264   :  { %v7616_v41 = vadd.f32 %v7615_v43, %v7589_v18 }
0x1266   :  { %7724 = vrot.lane.b32.xlu2 %v7406_v19, %s9506_s23  ;;  %v7640_v59 = vadd.f32 %v7639_v35, %v7616_v41 }
0x1268   :  { %v7664_v23 = vadd.f32 %v7663_v29, %v7640_v59  ;;  %v9290_v59 = vld [vmem:[%s10814_s2 + $0x1a] ss:$0 sm:$0xff] }
0x126b   :  { %v7687_v50 = vpop.f32.mrf.mxu2 }
0x126c   :  { %v7688_v17 = vadd.f32 %v7687_v50, %v7664_v23 }
0x126e   :  { %v7710_v45 = vadd.f32 %v7709_v39, %v7688_v17 }
0x1270   :  { %7732 = vrot.lane.b32.xlu1 %v7710_v45, %s9507_s24 }
0x1289   :  { %v7715_v27 = vpop.permute.xlu1 %7714 }
0x128a   :  { %v7736_v52 = vsel %vm1261_vm5, %v6646_v12, %v7715_v27 }
0x12a1   :  { %v7723_v13 = vpop.permute.xlu1 %7722 }
0x12a2   :  { %v7738_v4 = vsel %vm3918_vm12, %v7736_v52, %v7723_v13  ;;  %v8059_v13 = vld [vmem:[%s10813_s1 + $0x150] sm:$0xff]  ;;  %v8058_v52 = vld [vmem:[%s10813_s1 + $0x148] sm:$0xff] }
0x12a9   :  { %v7717_v63 = vpop.permute.xlu1 %7716 }
0x12aa   :  { %v7737_v36 = vsel %vm1261_vm5, %v10521_v32, %v7717_v63 }
0x12b8   :  { %v7731_v25 = vpop.permute.xlu2 %7730 }
0x12b9   :  { %v7740_v16 = vsel %vm25_vm0, %v7738_v4, %v7731_v25  ;;  %v8057_v4 = vld [vmem:[%s10813_s1 + $0x140] sm:$0xff] }
0x12ba   :  { %v7749_v2 = vsel %vm237_vm1, %v7740_v16, 0  ;;  %v8080_v16 = vand.u32 4294901760, %v8059_v13 }
0x12bb   :  { %v7774_v34 = vand.u32 4294901760, %v7749_v2 }
0x12bc   :  { %8081 = vmatpush.msra.mxu2 %v8080_v16 }
0x12bd   :  { %v7775_v14 = vsub.f32 %v7749_v2, %v7774_v34  ;;  %7828 = vmatmul.f32.vlgmr.msra.gmra.mxu1 %v7774_v34  ;;  %v8082_v2 = vand.u32 4294901760, %v8058_v52 }
0x12be   :  { %8198 = vmatpush.msra.mxu1 %v8080_v16 }
0x12bf   :  { %v7776_v3 = vand.u32 4294901760, %v7775_v14  ;;  %7862 = vmatmul.f32.vlgmr.msrb.gmra.mxu2 %v7775_v14  ;;  %v8124_v63 = vsub.f32 %v8058_v52, %v8082_v2 }
0x12c0   :  { %v7725_v49 = vpop.permute.xlu2 %7724  ;;  %8200 = vmatpush.msra.mxu1 %v8082_v2  ;;  %8083 = vmatpush.msra.mxu2 %v8082_v2 }
0x12c1   :  { %v7777_v8 = vsub.f32 %v7775_v14, %v7776_v3  ;;  %7894 = vmatmul.f32.vlgmr.msrb.gmra.mxu3 %v7776_v3  ;;  %v7739_v58 = vsel %vm3918_vm12, %v7737_v36, %v7725_v49  ;;  %v8056_v14 = vld [vmem:[%s10813_s1 + $0x138] sm:$0xff] }
0x12c2   :  { %v10588_v3 = vand.u32 4294901760, %v8056_v14 }
0x12c3   :  { %v7778_v0 = vand.u32 4294901760, %v7777_v8 }
0x12c4   :  { %v8136_v36 = vsub.f32 %v8056_v14, %v10588_v3 }
0x12c5   :  { %7779 = vmatmul.f32.vlgmr.msra.gmra.mxu0 %v7778_v0  ;;  %v8118_v0 = vsub.f32 %v8059_v13, %v8080_v16 }
0x12c7   :  { %8164 = vmatpush.msra.mxu0 %v8118_v0 }
0x12c9   :  { %8167 = vmatpush.msra.mxu0 %v8124_v63 }
0x12e2   :  { %v7733_v37 = vpop.permute.xlu1 %7732 }
0x12e3   :  { %v7741_v38 = vsel %vm25_vm0, %v7739_v58, %v7733_v37  ;;  %v8119_v58 = vand.u32 4294901760, %v8118_v0  ;;  %v8125_v37 = vand.u32 4294901760, %v8124_v63 }
0x12e4   :  { %v7752_v20 = vsel %vm237_vm1, %v7741_v38, 0 }
0x12e5   :  { %v7782_v19 = vand.u32 4294901760, %v7752_v20 }
0x12e7   :  { %v7783_v43 = vsub.f32 %v7752_v20, %v7782_v19  ;;  %7832 = vmatmul.f32.gmra.mxu1 %v7782_v19  ;;  %v8137_v20 = vand.u32 4294901760, %v8136_v36 }
0x12e9   :  { %7867 = vmatmul.f32.gmra.mxu2 %v7783_v43  ;;  %v7784_v18 = vand.u32 4294901760, %v7783_v43 }
0x12eb   :  { %7900 = vmatmul.f32.gmra.mxu3 %v7784_v18  ;;  %v7785_v41 = vsub.f32 %v7783_v43, %v7784_v18  ;;  %v8120_v43 = vsub.f32 %v8118_v0, %v8119_v58  ;;  %v8126_v18 = vsub.f32 %v8124_v63, %v8125_v37 }
0x12ed   :  { %v7786_v35 = vand.u32 4294901760, %v7785_v41 }
0x12ef   :  { %7787 = vmatmul.f32.gmra.mxu0 %v7786_v35  ;;  %7962 = vmatmul.f32.vlgmr.msrb.gmra.mxu1 %v7774_v34 }
0x12f7   :  { %7933 = vmatmul.f32.vlgmr.msrb.gmra.mxu0 %v7774_v34  ;;  %7966 = vmatmul.f32.gmra.mxu1 %v7782_v19  ;;  %v8084_v34 = vand.u32 4294901760, %v8057_v4 }
0x12f9   :  { %v8130_v49 = vsub.f32 %v8057_v4, %v8084_v34  ;;  %8202 = vmatpush.msra.mxu1 %v8084_v34  ;;  %8085 = vmatpush.msra.mxu2 %v8084_v34  ;;  %v9292_v4 = vld [vmem:[%s10814_s2 + $0x1e] ss:$0 sm:$0xff] }
0x12fb   :  { %v8131_v38 = vand.u32 4294901760, %v8130_v49  ;;  %8170 = vmatpush.msra.mxu0 %v8130_v49  ;;  %8204 = vmatpush.msra.mxu1 %v10588_v3 }
0x12fc   :  { %8087 = vmatpush.msra.mxu2 %v10588_v3 }
0x12fd   :  { %v8132_v41 = vsub.f32 %v8130_v49, %v8131_v38  ;;  %8173 = vmatpush.msra.mxu0 %v8136_v36 }
0x12fe   :  { %8233 = vmatpush.msrb.mxu2 %v8119_v58 }
0x12ff   :  { %7937 = vmatmul.f32.gmra.mxu0 %v7782_v19 }
0x1300   :  { %8237 = vmatpush.msrb.mxu2 %v8125_v37 }
0x1302   :  { %8241 = vmatpush.msrb.mxu2 %v8131_v38 }
0x1304   :  { %8245 = vmatpush.msrb.mxu2 %v8137_v20 }
0x133a   :  { %v7829_v32 = vpop.f32.mrf.mxu1 }
0x1342   :  { %v7780_v29 = vpop.f32.mrf.mxu0  ;;  %v7863_v45 = vpop.f32.mrf.mxu2 }
0x1343   :  { %v7781_v23 = vadd.f32 %v9290_v59, %v7780_v29  ;;  %v8138_v29 = vsub.f32 %v8136_v36, %v8137_v20 }
0x1344   :  { %v7895_v21 = vpop.f32.mrf.mxu3 }
0x1345   :  { %v7830_v17 = vadd.f32 %v7829_v32, %v7781_v23  ;;  %v8121_v32 = vand.u32 4294901760, %v8120_v43 }
0x1347   :  { %v7864_v46 = vadd.f32 %v7863_v45, %v7830_v17  ;;  %8122 = vmatpush.msra.mxu3 %v8121_v32 }
0x1349   :  { %v7896_v47 = vadd.f32 %v7895_v21, %v7864_v46  ;;  %v8139_v46 = vand.u32 4294901760, %v8138_v29 }
0x1364   :  { %v7833_v50 = vpop.f32.mrf.mxu1 }
0x136c   :  { %v7788_v39 = vpop.f32.mrf.mxu0  ;;  %v7963_v53 = vpop.f32.mrf.mxu1 }
0x136d   :  { %v7789_v48 = vadd.f32 %v9290_v59, %v7788_v39  ;;  %v7868_v15 = vpop.f32.mrf.mxu2  ;;  %v8127_v59 = vand.u32 4294901760, %v8126_v18  ;;  %v8133_v39 = vand.u32 4294901760, %v8132_v41 }
0x136e   :  { %v7901_v26 = vpop.f32.mrf.mxu3 }
0x136f   :  { %v7834_v51 = vadd.f32 %v7833_v50, %v7789_v48  ;;  %8128 = vmatpush.msra.mxu3 %v8127_v59 }
0x1371   :  { %v7869_v57 = vadd.f32 %v7868_v15, %v7834_v51  ;;  %8134 = vmatpush.msra.mxu3 %v8133_v39 }
0x1373   :  { %v7902_v22 = vadd.f32 %v7901_v26, %v7869_v57  ;;  %8140 = vmatpush.msra.mxu3 %v8139_v46  ;;  %v8291_v46 = vld [vmem:[%s10813_s1 + $0x180] sm:$0xff] }
0x1374   :  { %v7934_v40 = vpop.f32.mrf.mxu0  ;;  %v7967_v33 = vpop.f32.mrf.mxu1 }
0x1375   :  { %v7935_v30 = vadd.f32 %v7934_v40, %v7896_v47  ;;  %8268 = vmatpush.msrb.mxu3 %v8080_v16 }
0x1377   :  { %v7964_v54 = vadd.f32 %v7963_v53, %v7935_v30  ;;  %8270 = vmatpush.msrb.mxu3 %v8082_v2 }
0x1379   :  { %v7970_v56 = vadd.f32 %v7964_v54, %v10226_v9  ;;  %8272 = vmatpush.msrb.mxu3 %v8084_v34 }
0x137b   :  { %v7974_v62 = vsel %vm237_vm1, %v7970_v56, 0.0  ;;  %8274 = vmatpush.msrb.mxu3 %v10588_v3 }
0x137c   :  { %v7938_v31 = vpop.f32.mrf.mxu0  ;;  %7975 = vadd.xlane.f32.xlu2 %v7974_v62 }
0x137d   :  { %v7939_v44 = vadd.f32 %v7938_v31, %v7902_v22 }
0x137f   :  { %v7968_v55 = vadd.f32 %v7967_v33, %v7939_v44 }
0x1381   :  { %v7971_v42 = vadd.f32 %v7968_v55, %v10231_v11 }
0x1383   :  { %v7977_v28 = vsel %vm237_vm1, %v7971_v42, 0.0 }
0x1384   :  { %7978 = vadd.xlane.f32.xlu1 %v7977_v28 }
0x13ef   :  { %v7976_v7 = vpop.xlane.xlu2 %7975 }
0x13f0   :  { %v7980_v60 = vmul.f32 %v7976_v7, %v9558_v1 }
0x13f2   :  { %v10564_v24 = vsub.f32 %v7970_v56, %v7980_v60 }
0x13f4   :  { %v7984_v9 = vmul.f32 %v10564_v24, %v10564_v24 }
0x13f6   :  { %v7986_v61 = vsel %vm237_vm1, %v7984_v9, 0.0 }
0x13f7   :  { %7987 = vadd.xlane.f32.xlu0 %v7986_v61  ;;  %v7979_v6 = vpop.xlane.xlu1 %7978 }
0x13f8   :  { %v7981_v27 = vmul.f32 %v7979_v6, %v9558_v1 }
0x13fa   :  { %v10570_v10 = vsub.f32 %v7971_v42, %v7981_v27 }
0x13fc   :  { %v7985_v11 = vmul.f32 %v10570_v10, %v10570_v10 }
0x13fe   :  { %v7989_v5 = vsel %vm237_vm1, %v7985_v11, 0.0 }
0x13ff   :  { %7990 = vadd.xlane.f32.xlu0 %v7989_v5  ;;  %v9291_v5 = vld [vmem:[%s10814_s2 + $0x1d] ss:$0 sm:$0xff] }
0x146a   :  { %v7988_v12 = vpop.xlane.xlu0 %7987 }
0x146b   :  { %v7992_v25 = vmul.f32 %v7988_v12, %v9558_v1 }
0x146d   :  { %v7994_v8 = vadd.f32 1e-05, %v7992_v25 }
0x146f   :  { %9419 = vrsqrt.f32 %v7994_v8  ;;  %vm8003_vm5 = vcmp.eq.f32.partialorder %v7994_v8, inf  ;;  %v8006_v15 = vand.u32 2147483648, %v7994_v8  ;;  %vm8005_vm12 = vcmp.eq.f32.partialorder %v7994_v8, 0.0 }
0x1472   :  { %v7991_v19 = vpop.xlane.xlu0 %7990 }
0x1473   :  { %v7993_v35 = vmul.f32 %v7991_v19, %v9558_v1 }
0x1475   :  { %v9420_v23 = vpop.eup %9419  ;;  %v7995_v50 = vadd.f32 1e-05, %v7993_v35 }
0x1476   :  { %v7997_v17 = vmul.f32 %v9420_v23, %v7994_v8 }
0x1477   :  { %9421 = vrsqrt.f32 %v7995_v50  ;;  %vm8015_vm14 = vcmp.eq.f32.partialorder %v7995_v50, inf  ;;  %v8018_v31 = vand.u32 2147483648, %v7995_v50  ;;  %vm8017_vm15 = vcmp.eq.f32.partialorder %v7995_v50, 0.0 }
0x1478   :  { %v7998_v45 = vmul.f32 %v9420_v23, %v7997_v17  ;;  %v8292_v17 = vld [vmem:[%s10813_s1 + $0x188] sm:$0xff] }
0x147a   :  { %v7999_v48 = vmul.f32 0.5, %v7998_v45  ;;  %v10622_v45 = vand.u32 4294901760, %v8292_v17 }
0x147c   :  { %v8000_v21 = vsub.f32 1.5, %v7999_v48 }
0x147d   :  { %v9422_v47 = vpop.eup %9421 }
0x147e   :  { %v8001_v51 = vmul.f32 %v9420_v23, %v8000_v21  ;;  %v8009_v53 = vmul.f32 %v9422_v47, %v7995_v50  ;;  %v8293_v23 = vld [vmem:[%s10813_s1 + $0x190] sm:$0xff]  ;;  %v10631_v21 = vsub.f32 %v8292_v17, %v10622_v45 }
0x1480   :  { %v8002_v40 = vmul.f32 %v8001_v51, %v7994_v8  ;;  %v8010_v30 = vmul.f32 %v9422_v47, %v8009_v53  ;;  %v8290_v51 = vld [vmem:[%s10813_s1 + $0x178] sm:$0xff] }
0x1482   :  { %v8004_v57 = vsel %vm8003_vm5, %v7994_v8, %v8002_v40  ;;  %v8011_v54 = vmul.f32 0.5, %v8010_v30  ;;  %v8359_v40 = vand.u32 4294901760, %v10631_v21 }
0x1483   :  { %v8007_v56 = vsel %vm8005_vm12, %v8006_v15, %v8004_v57  ;;  %v10649_v15 = vand.u32 4294901760, %v8290_v51  ;;  %v8289_v57 = vld [vmem:[%s10813_s1 + $0x170] sm:$0xff] }
0x1484   :  { %9423 = vrcp.f32 %v8007_v56  ;;  %v8012_v26 = vsub.f32 1.5, %v8011_v54  ;;  %v8031_v7 = vand.u32 2147483648, %v8007_v56  ;;  %v8029_v9 = vand.u32 2147483647, %v8007_v56 }
0x1485   :  { %vm8025_vm3 = vweird.f32 %v8007_v56 }
0x1486   :  { %v8013_v22 = vmul.f32 %v9422_v47, %v8012_v26  ;;  %v8032_v27 = vor.u32 1.1754944e-38, %v8031_v7  ;;  %vm8030_vm6 = vcmp.eq.f32.partialorder %v8029_v9, 8.507059e+37  ;;  %v10634_v47 = vand.u32 4294901760, %v8291_v46  ;;  %v8287_v7 = vld [vmem:[%s10813_s1 + $0x160] sm:$0xff] }
0x1488   :  { %v8014_v62 = vmul.f32 %v8013_v22, %v7995_v50  ;;  %v10646_v30 = vsub.f32 %v8291_v46, %v10634_v47  ;;  %v8370_v22 = vsub.f32 %v8290_v51, %v10649_v15 }
0x148a   :  { %v9424_v44 = vpop.eup %9423  ;;  %v8016_v33 = vsel %vm8015_vm14, %v7995_v50, %v8014_v62  ;;  %v10614_v50 = vand.u32 4294901760, %v8293_v23  ;;  %v8365_v26 = vand.u32 4294901760, %v10646_v30  ;;  %v10661_v62 = vand.u32 4294901760, %v8289_v57 }
0x148b   :  { %v8021_v55 = vmul.f32 %v9424_v44, %v8007_v56  ;;  %v8019_v42 = vsel %vm8017_vm15, %v8018_v31, %v8016_v33  ;;  %vm8026_vm2 = vweird.f32 %v9424_v44  ;;  %v8360_v56 = vsub.f32 %v10631_v21, %v8359_v40  ;;  %v8288_v31 = vld [vmem:[%s10813_s1 + $0x168] sm:$0xff] }
0x148c   :  { %9425 = vrcp.f32 %v8019_v42  ;;  %vm8027_vm4 = vmor %vm8025_vm3, %vm8026_vm2  ;;  %v8046_v16 = vand.u32 2147483648, %v8019_v42  ;;  %v8044_v14 = vand.u32 2147483647, %v8019_v42  ;;  %vm8040_vm8 = vweird.f32 %v8019_v42  ;;  %8311 = vmatpush.msrb.mxu0 %v10614_v50 }
0x148d   :  { %v8022_v28 = vsub.f32 1.0, %v8021_v55  ;;  %v10620_v39 = vsub.f32 %v8293_v23, %v10614_v50  ;;  %v8366_v33 = vsub.f32 %v10646_v30, %v8365_v26  ;;  %v8371_v55 = vand.u32 4294901760, %v8370_v22 }
0x148e   :  { %v8047_v0 = vor.u32 1.1754944e-38, %v8046_v16  ;;  %vm8045_vm10 = vcmp.eq.f32.partialorder %v8044_v14, 8.507059e+37  ;;  %8313 = vmatpush.msrb.mxu0 %v10622_v45 }
0x148f   :  { %v8023_v60 = vmul.f32 %v9424_v44, %v8022_v28  ;;  %v8353_v48 = vand.u32 4294901760, %v10620_v39  ;;  %v8376_v28 = vsub.f32 %v8289_v57, %v10661_v62  ;;  %v8372_v9 = vsub.f32 %v8370_v22, %v8371_v55 }
0x1490   :  { %8315 = vmatpush.msrb.mxu0 %v10634_v47 }
0x1491   :  { %v8024_v61 = vadd.f32 %v9424_v44, %v8023_v60  ;;  %v8354_v53 = vsub.f32 %v10620_v39, %v8353_v48  ;;  %v8367_v60 = vand.u32 4294901760, %v8366_v33 }
0x1492   :  { %v9426_v6 = vpop.eup %9425  ;;  %8317 = vmatpush.msrb.mxu0 %v10649_v15 }
0x1493   :  { %v8028_v11 = vsel %vm8027_vm4, %v9424_v44, %v8024_v61  ;;  %v8036_v12 = vmul.f32 %v9426_v6, %v8019_v42  ;;  %vm8041_vm7 = vweird.f32 %v9426_v6  ;;  %v8355_v54 = vand.u32 4294901760, %v8354_v53 }
0x1494   :  { %v8033_v13 = vsel %vm8030_vm6, %v8032_v27, %v8028_v11  ;;  %vm8042_vm9 = vmor %vm8040_vm8, %vm8041_vm7  ;;  %v8361_v44 = vand.u32 4294901760, %v8360_v56  ;;  %v10668_v42 = vand.u32 4294901760, %v8288_v31  ;;  %8319 = vmatpush.msrb.mxu0 %v10661_v62  ;;  %v8377_v27 = vand.u32 4294901760, %v8376_v28  ;;  %v8286_v11 = vld [vmem:[%s10813_s1 + $0x158] sm:$0xff] }
0x1495   :  { %v8034_v52 = vmul.f32 %v8033_v13, %v10564_v24  ;;  %v8037_v25 = vsub.f32 1.0, %v8036_v12  ;;  %8356 = vmatpush.msrb.mxu1 %v8355_v54 }
0x1496   :  { %v8382_v61 = vsub.f32 %v8288_v31, %v10668_v42  ;;  %8321 = vmatpush.msrb.mxu0 %v10668_v42 }
0x1497   :  { %v8051_v2 = vmul.f32 %v9291_v5, %v8034_v52  ;;  %v8038_v34 = vmul.f32 %v9426_v6, %v8037_v25  ;;  %8362 = vmatpush.msrb.mxu1 %v8361_v44  ;;  %v8324_v52 = vand.u32 4294901760, %v8286_v11 }
0x1498   :  { %v8383_v12 = vand.u32 4294901760, %v8382_v61 }
0x1499   :  { %v10602_v3 = vadd.f32 %v9292_v4, %v8051_v2  ;;  %v8039_v8 = vadd.f32 %v9426_v6, %v8038_v34  ;;  %8368 = vmatpush.msrb.mxu1 %v8367_v60  ;;  %v8394_v2 = vsub.f32 %v8286_v11, %v8324_v52  ;;  %v9294_v60 = vld [vmem:[%s10814_s2 + $0x1c] ss:$0 sm:$0xff] }
0x149a   :  { %v8384_v25 = vsub.f32 %v8382_v61, %v8383_v12 }
0x149b   :  { %v8063_v63 = vsel %vm237_vm1, %v10602_v3, 0  ;;  %v8043_v24 = vsel %vm8042_vm9, %v9426_v6, %v8039_v8  ;;  %v8322_v6 = vand.u32 4294901760, %v8287_v7 }
0x149c   :  { %v8088_v49 = vand.u32 4294901760, %v8063_v63  ;;  %v8048_v36 = vsel %vm8045_vm10, %v8047_v0, %v8043_v24  ;;  %v8385_v14 = vand.u32 4294901760, %v8384_v25  ;;  %v8395_v0 = vand.u32 4294901760, %v8394_v2 }
0x149d   :  { %v8049_v58 = vmul.f32 %v8048_v36, %v10570_v10  ;;  %v8388_v13 = vsub.f32 %v8287_v7, %v8322_v6  ;;  %8323 = vmatpush.msrb.mxu0 %v8322_v6 }
0x149e   :  { %8142 = vmatmul.f32.vlgmr.msra.gmra.mxu3 %v8088_v49  ;;  %v8089_v37 = vsub.f32 %v8063_v63, %v8088_v49  ;;  %v8396_v24 = vsub.f32 %v8394_v2, %v8395_v0 }
0x149f   :  { %v8052_v38 = vmul.f32 %v9291_v5, %v8049_v58  ;;  %8460 = vmatpush.msra.mxu3 %v10614_v50  ;;  %v8373_v5 = vand.u32 4294901760, %v8372_v9  ;;  %v8389_v16 = vand.u32 4294901760, %v8388_v13  ;;  %8325 = vmatpush.msrb.mxu0 %v8324_v52  ;;  %v9293_v58 = vld [vmem:[%s10814_s2 + $0x1b] ss:$0 sm:$0xff] }
0x14a0   :  { %8176 = vmatmul.f32.vlgmr.msra.gmra.mxu0 %v8089_v37  ;;  %v8090_v20 = vand.u32 4294901760, %v8089_v37 }
0x14a1   :  { %v10607_v19 = vadd.f32 %v9292_v4, %v8052_v38  ;;  %8462 = vmatpush.msra.mxu3 %v10622_v45  ;;  %v8378_v4 = vsub.f32 %v8376_v28, %v8377_v27  ;;  %8374 = vmatpush.msrb.mxu1 %v8373_v5  ;;  %v8390_v8 = vsub.f32 %v8388_v13, %v8389_v16 }
0x14a2   :  { %8208 = vmatmul.f32.vlgmr.msra.gmra.mxu1 %v8090_v20  ;;  %v8091_v43 = vsub.f32 %v8089_v37, %v8090_v20  ;;  %8499 = vmatpush.msra.mxu0 %v8353_v48 }
0x14a3   :  { %v8066_v18 = vsel %vm237_vm1, %v10607_v19, 0  ;;  %8464 = vmatpush.msra.mxu3 %v10634_v47  ;;  %v8379_v34 = vand.u32 4294901760, %v8378_v4  ;;  %v8391_v63 = vand.u32 4294901760, %v8390_v8 }
0x14a4   :  { %v8092_v41 = vand.u32 4294901760, %v8091_v43  ;;  %v8096_v35 = vand.u32 4294901760, %v8066_v18  ;;  %8503 = vmatpush.msra.mxu0 %v8359_v40 }
0x14a5   :  { %8466 = vmatpush.msra.mxu3 %v10649_v15  ;;  %8380 = vmatpush.msrb.mxu1 %v8379_v34 }
0x14a6   :  { %8093 = vmatmul.f32.vlgmr.msra.gmra.mxu2 %v8092_v41  ;;  %8146 = vmatmul.f32.gmra.mxu3 %v8096_v35  ;;  %v8097_v32 = vsub.f32 %v8066_v18, %v8096_v35 }
0x14a7   :  { %8418 = vmatpush.msra.mxu2 %v10620_v39  ;;  %8468 = vmatpush.msra.mxu3 %v10661_v62 }
0x14a8   :  { %8181 = vmatmul.f32.gmra.mxu0 %v8097_v32  ;;  %v8098_v59 = vand.u32 4294901760, %v8097_v32  ;;  %8386 = vmatpush.msrb.mxu1 %v8385_v14 }
0x14a9   :  { %8421 = vmatpush.msra.mxu2 %v10631_v21  ;;  %8470 = vmatpush.msra.mxu3 %v10668_v42 }
0x14aa   :  { %8214 = vmatmul.f32.gmra.mxu1 %v8098_v59  ;;  %v8099_v10 = vsub.f32 %v8097_v32, %v8098_v59  ;;  %8507 = vmatpush.msra.mxu0 %v8365_v26 }
0x14ab   :  { %8424 = vmatpush.msra.mxu2 %v10646_v30  ;;  %8472 = vmatpush.msra.mxu3 %v8322_v6 }
0x14ac   :  { %v8100_v29 = vand.u32 4294901760, %v8099_v10  ;;  %8392 = vmatpush.msrb.mxu1 %v8391_v63  ;;  %8511 = vmatpush.msra.mxu0 %v8371_v55 }
0x14ad   :  { %8427 = vmatpush.msra.mxu2 %v8370_v22  ;;  %8474 = vmatpush.msra.mxu3 %v8324_v52 }
0x14ae   :  { %8101 = vmatmul.f32.gmra.mxu2 %v8100_v29  ;;  %8276 = vmatmul.f32.vlgmr.msrb.gmra.mxu3 %v8088_v49 }
0x14af   :  { %8430 = vmatpush.msra.mxu2 %v8376_v28  ;;  %8515 = vmatpush.msra.mxu0 %v8377_v27 }
0x14b1   :  { %8433 = vmatpush.msra.mxu2 %v8382_v61  ;;  %8519 = vmatpush.msra.mxu0 %v8383_v12 }
0x14b3   :  { %8436 = vmatpush.msra.mxu2 %v8388_v13  ;;  %8523 = vmatpush.msra.mxu0 %v8389_v16 }
0x14b5   :  { %8439 = vmatpush.msra.mxu2 %v8394_v2  ;;  %8527 = vmatpush.msra.mxu0 %v8395_v0 }
0x14b6   :  { %8247 = vmatmul.f32.vlgmr.msrb.gmra.mxu2 %v8088_v49  ;;  %8280 = vmatmul.f32.gmra.mxu3 %v8096_v35  ;;  %v8397_v49 = vand.u32 4294901760, %v8396_v24 }
0x14b8   :  { %8398 = vmatpush.msrb.mxu1 %v8397_v49 }
0x14ba   :  { %8546 = vmatpush.msra.mxu1 %v10614_v50 }
0x14bc   :  { %8548 = vmatpush.msra.mxu1 %v10622_v45 }
0x14be   :  { %8251 = vmatmul.f32.gmra.mxu2 %v8096_v35  ;;  %8550 = vmatpush.msra.mxu1 %v10634_v47 }
0x14c0   :  { %8552 = vmatpush.msra.mxu1 %v10649_v15 }
0x14c2   :  { %8554 = vmatpush.msra.mxu1 %v10661_v62 }
0x14c4   :  { %8556 = vmatpush.msra.mxu1 %v10668_v42 }
0x14c6   :  { %8558 = vmatpush.msra.mxu1 %v8322_v6 }
0x14c8   :  { %8560 = vmatpush.msra.mxu1 %v8324_v52 }
0x151d   :  { %v8177_v18 = vpop.f32.mrf.mxu0 }
0x151f   :  { %v8209_v59 = vpop.f32.mrf.mxu1 }
0x1521   :  { %v8143_v36 = vpop.f32.mrf.mxu3 }
0x1525   :  { %v8182_v39 = vpop.f32.mrf.mxu0 }
0x1527   :  { %v8215_v21 = vpop.f32.mrf.mxu1 }
0x1529   :  { %v8094_v37 = vpop.f32.mrf.mxu2  ;;  %v8147_v20 = vpop.f32.mrf.mxu3 }
0x152a   :  { %v8095_v38 = vadd.f32 %v9293_v58, %v8094_v37 }
0x152c   :  { %v8144_v43 = vadd.f32 %v8143_v36, %v8095_v38 }
0x152e   :  { %v8178_v32 = vadd.f32 %v8177_v18, %v8144_v43 }
0x1530   :  { %v8210_v29 = vadd.f32 %v8209_v59, %v8178_v32 }
0x1531   :  { %v8102_v41 = vpop.f32.mrf.mxu2  ;;  %v8277_v23 = vpop.f32.mrf.mxu3 }
0x1532   :  { %v8103_v35 = vadd.f32 %v9293_v58, %v8102_v41 }
0x1534   :  { %v8148_v10 = vadd.f32 %v8147_v20, %v8103_v35 }
0x1536   :  { %v8183_v46 = vadd.f32 %v8182_v39, %v8148_v10  ;;  %v8659_v39 = vld [vmem:[%s10813_s1 + $0x1b0] sm:$0xff] }
0x1538   :  { %v8216_v51 = vadd.f32 %v8215_v21, %v8183_v46  ;;  %v8657_v46 = vld [vmem:[%s10813_s1 + $0x1a0] sm:$0xff]  ;;  %v8680_v21 = vand.u32 4294901760, %v8659_v39 }
0x1539   :  { %v8248_v50 = vpop.f32.mrf.mxu2  ;;  %v8281_v57 = vpop.f32.mrf.mxu3 }
0x153a   :  { %v8249_v17 = vadd.f32 %v8248_v50, %v8210_v29  ;;  %8681 = vmatpush.msrb.mxu2 %v8680_v21 }
0x153c   :  { %v8278_v45 = vadd.f32 %v8277_v23, %v8249_v17 }
0x153e   :  { %v8284_v48 = vmax.f32 %v8278_v45, 0.0  ;;  %v8658_v45 = vld [vmem:[%s10813_s1 + $0x1a8] sm:$0xff] }
0x1540   :  { %v8297_v47 = vsel %vm4477_vm13, %v8284_v48, 0 }
0x1541   :  { %v8326_v53 = vand.u32 4294901760, %v8297_v47  ;;  %v8252_v40 = vpop.f32.mrf.mxu2 }
0x1542   :  { %v8253_v30 = vadd.f32 %v8252_v40, %v8216_v51  ;;  %v8684_v51 = vand.u32 4294901760, %v8657_v46 }
0x1543   :  { %v8327_v15 = vsub.f32 %v8297_v47, %v8326_v53  ;;  %8400 = vmatmul.f32.vlgmr.msrb.gmra.mxu1 %v8326_v53  ;;  %v8682_v47 = vand.u32 4294901760, %v8658_v45 }
0x1544   :  { %v8282_v54 = vadd.f32 %v8281_v57, %v8253_v30  ;;  %8798 = vmatpush.msrb.mxu1 %v8680_v21 }
0x1545   :  { %v8328_v56 = vand.u32 4294901760, %v8327_v15  ;;  %8442 = vmatmul.f32.vlgmr.msra.gmra.mxu2 %v8327_v15  ;;  %v8724_v57 = vsub.f32 %v8658_v45, %v8682_v47 }
0x1546   :  { %v8285_v26 = vmax.f32 %v8282_v54, 0.0  ;;  %v8730_v54 = vsub.f32 %v8657_v46, %v8684_v51  ;;  %8800 = vmatpush.msrb.mxu1 %v8682_v47  ;;  %8683 = vmatpush.msrb.mxu2 %v8682_v47  ;;  %v9296_v46 = vld [vmem:[%s10814_s2 + $0x20] ss:$0 sm:$0xff] }
0x1547   :  { %v8329_v22 = vsub.f32 %v8327_v15, %v8328_v56  ;;  %8478 = vmatmul.f32.vlgmr.msra.gmra.mxu3 %v8328_v56  ;;  %v8718_v15 = vsub.f32 %v8659_v39, %v8680_v21 }
0x1548   :  { %v8300_v62 = vsel %vm4477_vm13, %v8285_v26, 0  ;;  %8802 = vmatpush.msrb.mxu1 %v8684_v51  ;;  %8685 = vmatpush.msrb.mxu2 %v8684_v51 }
0x1549   :  { %v8330_v31 = vand.u32 4294901760, %v8329_v22  ;;  %v8334_v44 = vand.u32 4294901760, %v8300_v62  ;;  %v8719_v26 = vand.u32 4294901760, %v8718_v15  ;;  %v8725_v22 = vand.u32 4294901760, %v8724_v57 }
0x154b   :  { %8331 = vmatmul.f32.vlgmr.msrb.gmra.mxu0 %v8330_v31  ;;  %8404 = vmatmul.f32.gmra.mxu1 %v8334_v44  ;;  %v8335_v33 = vsub.f32 %v8300_v62, %v8334_v44  ;;  %v8731_v62 = vand.u32 4294901760, %v8730_v54 }
0x154c   :  { %8764 = vmatpush.msrb.mxu0 %v8718_v15 }
0x154d   :  { %8447 = vmatmul.f32.gmra.mxu2 %v8335_v33  ;;  %v8336_v55 = vand.u32 4294901760, %v8335_v33 }
0x154e   :  { %8767 = vmatpush.msrb.mxu0 %v8724_v57 }
0x154f   :  { %8484 = vmatmul.f32.gmra.mxu3 %v8336_v55  ;;  %v8337_v42 = vsub.f32 %v8335_v33, %v8336_v55  ;;  %v8720_v33 = vsub.f32 %v8718_v15, %v8719_v26  ;;  %v8726_v55 = vsub.f32 %v8724_v57, %v8725_v22 }
0x1550   :  { %8770 = vmatpush.msrb.mxu0 %v8730_v54 }
0x1551   :  { %v8338_v28 = vand.u32 4294901760, %v8337_v42  ;;  %v8732_v42 = vsub.f32 %v8730_v54, %v8731_v62 }
0x1553   :  { %8339 = vmatmul.f32.gmra.mxu0 %v8338_v28  ;;  %8562 = vmatmul.f32.vlgmr.msra.gmra.mxu1 %v8326_v53 }
0x155b   :  { %8529 = vmatmul.f32.vlgmr.msra.gmra.mxu0 %v8326_v53  ;;  %8566 = vmatmul.f32.gmra.mxu1 %v8334_v44  ;;  %v8656_v53 = vld [vmem:[%s10813_s1 + $0x198] sm:$0xff] }
0x155c   :  { %v10727_v40 = vand.u32 4294901760, %v8656_v53 }
0x155e   :  { %v8736_v56 = vsub.f32 %v8656_v53, %v10727_v40  ;;  %8804 = vmatpush.msrb.mxu1 %v10727_v40  ;;  %8687 = vmatpush.msrb.mxu2 %v10727_v40 }
0x1560   :  { %v8737_v31 = vand.u32 4294901760, %v8736_v56  ;;  %8773 = vmatpush.msrb.mxu0 %v8736_v56  ;;  %8833 = vmatpush.msra.mxu2 %v8719_v26 }
0x1562   :  { %8837 = vmatpush.msra.mxu2 %v8725_v22 }
0x1563   :  { %8533 = vmatmul.f32.gmra.mxu0 %v8334_v44 }
0x1564   :  { %8841 = vmatpush.msra.mxu2 %v8731_v62 }
0x1566   :  { %8845 = vmatpush.msra.mxu2 %v8737_v31 }
0x15c0   :  { %v8401_v7 = vpop.f32.mrf.mxu1 }
0x15c8   :  { %v8332_v9 = vpop.f32.mrf.mxu0  ;;  %v8405_v6 = vpop.f32.mrf.mxu1 }
0x15c9   :  { %v8333_v61 = vadd.f32 %v9294_v60, %v8332_v9  ;;  %v8443_v11 = vpop.f32.mrf.mxu2  ;;  %v8738_v9 = vsub.f32 %v8736_v56, %v8737_v31 }
0x15ca   :  { %v8479_v52 = vpop.f32.mrf.mxu3 }
0x15cb   :  { %v8402_v27 = vadd.f32 %v8401_v7, %v8333_v61  ;;  %v8721_v7 = vand.u32 4294901760, %v8720_v33 }
0x15cd   :  { %v8444_v12 = vadd.f32 %v8443_v11, %v8402_v27  ;;  %8722 = vmatpush.msrb.mxu3 %v8721_v7  ;;  %v8733_v11 = vand.u32 4294901760, %v8732_v42 }
0x15cf   :  { %v8480_v4 = vadd.f32 %v8479_v52, %v8444_v12  ;;  %v8739_v12 = vand.u32 4294901760, %v8738_v9 }
0x15d0   :  { %v8340_v5 = vpop.f32.mrf.mxu0  ;;  %v8563_v16 = vpop.f32.mrf.mxu1 }
0x15d1   :  { %v8341_v13 = vadd.f32 %v9294_v60, %v8340_v5  ;;  %v8448_v14 = vpop.f32.mrf.mxu2  ;;  %v8727_v60 = vand.u32 4294901760, %v8726_v55 }
0x15d2   :  { %v8485_v24 = vpop.f32.mrf.mxu3 }
0x15d3   :  { %v8406_v25 = vadd.f32 %v8405_v6, %v8341_v13  ;;  %8728 = vmatpush.msrb.mxu3 %v8727_v60 }
0x15d5   :  { %v8449_v8 = vadd.f32 %v8448_v14, %v8406_v25  ;;  %8734 = vmatpush.msrb.mxu3 %v8733_v11 }
0x15d7   :  { %v8486_v49 = vadd.f32 %v8485_v24, %v8449_v8  ;;  %8740 = vmatpush.msrb.mxu3 %v8739_v12 }
0x15d8   :  { %v8530_v2 = vpop.f32.mrf.mxu0  ;;  %v8567_v38 = vpop.f32.mrf.mxu1 }
0x15d9   :  { %v8531_v34 = vadd.f32 %v8530_v2, %v8480_v4  ;;  %8868 = vmatpush.msra.mxu3 %v8680_v21 }
0x15db   :  { %v8564_v0 = vadd.f32 %v8563_v16, %v8531_v34  ;;  %8870 = vmatpush.msra.mxu3 %v8682_v47 }
0x15dd   :  { %v8570_v63 = vadd.f32 %v8564_v0, %v10602_v3  ;;  %8872 = vmatpush.msra.mxu3 %v8684_v51 }
0x15df   :  { %v8574_v36 = vsel %vm237_vm1, %v8570_v63, 0.0  ;;  %8874 = vmatpush.msra.mxu3 %v10727_v40 }
0x15e0   :  { %v8534_v58 = vpop.f32.mrf.mxu0  ;;  %8575 = vadd.xlane.f32.xlu0 %v8574_v36 }
0x15e1   :  { %v8535_v37 = vadd.f32 %v8534_v58, %v8486_v49 }
0x15e3   :  { %v8568_v20 = vadd.f32 %v8567_v38, %v8535_v37 }
0x15e5   :  { %v8571_v43 = vadd.f32 %v8568_v20, %v10607_v19 }
0x15e7   :  { %v8577_v18 = vsel %vm237_vm1, %v8571_v43, 0.0 }
0x15e8   :  { %8578 = vadd.xlane.f32.xlu0 %v8577_v18 }
0x1653   :  { %v8576_v41 = vpop.xlane.xlu0 %8575 }
0x1654   :  { %v8580_v35 = vmul.f32 %v8576_v41, %v9558_v1 }
0x1656   :  { %v10703_v32 = vsub.f32 %v8570_v63, %v8580_v35 }
0x1658   :  { %v8584_v3 = vmul.f32 %v10703_v32, %v10703_v32 }
0x165a   :  { %v8586_v59 = vsel %vm237_vm1, %v8584_v3, 0.0 }
0x165b   :  { %8587 = vadd.xlane.f32.xlu0 %v8586_v59  ;;  %v8579_v10 = vpop.xlane.xlu0 %8578 }
0x165c   :  { %v8581_v29 = vmul.f32 %v8579_v10, %v9558_v1 }
0x165e   :  { %v10709_v23 = vsub.f32 %v8571_v43, %v8581_v29 }
0x1660   :  { %v8585_v19 = vmul.f32 %v10709_v23, %v10709_v23 }
0x1662   :  { %v8589_v50 = vsel %vm237_vm1, %v8585_v19, 0.0 }
0x1663   :  { %8590 = vadd.xlane.f32.xlu2 %v8589_v50  ;;  %v9295_v50 = vld [vmem:[%s10814_s2 + $0x1f] ss:$0 sm:$0xff] }
0x16ce   :  { %v8588_v17 = vpop.xlane.xlu0 %8587 }
0x16cf   :  { %v8592_v48 = vmul.f32 %v8588_v17, %v9558_v1 }
0x16d1   :  { %v8594_v30 = vadd.f32 1e-05, %v8592_v48 }
0x16d3   :  { %9427 = vrsqrt.f32 %v8594_v30  ;;  %vm8603_vm13 = vcmp.eq.f32.partialorder %v8594_v30, inf  ;;  %v8606_v14 = vand.u32 2147483648, %v8594_v30  ;;  %vm8605_vm11 = vcmp.eq.f32.partialorder %v8594_v30, 0.0 }
0x16d6   :  { %v8591_v44 = vpop.xlane.xlu2 %8590 }
0x16d7   :  { %v8593_v28 = vmul.f32 %v8591_v44, %v9558_v1 }
0x16d9   :  { %v9428_v61 = vpop.eup %9427  ;;  %v8595_v6 = vadd.f32 1e-05, %v8593_v28 }
0x16da   :  { %v8597_v27 = vmul.f32 %v9428_v61, %v8594_v30 }
0x16db   :  { %9429 = vrsqrt.f32 %v8595_v6  ;;  %vm8615_vm5 = vcmp.eq.f32.partialorder %v8595_v6, inf  ;;  %v8618_v58 = vand.u32 2147483648, %v8595_v6  ;;  %vm8617_vm12 = vcmp.eq.f32.partialorder %v8595_v6, 0.0 }
0x16dc   :  { %v8598_v5 = vmul.f32 %v9428_v61, %v8597_v27 }
0x16de   :  { %v8599_v13 = vmul.f32 0.5, %v8598_v5 }
0x16e0   :  { %v8600_v52 = vsub.f32 1.5, %v8599_v13 }
0x16e1   :  { %v9430_v4 = vpop.eup %9429 }
0x16e2   :  { %v8601_v25 = vmul.f32 %v9428_v61, %v8600_v52  ;;  %v8609_v16 = vmul.f32 %v9430_v4, %v8595_v6 }
0x16e4   :  { %v8602_v2 = vmul.f32 %v8601_v25, %v8594_v30  ;;  %v8610_v34 = vmul.f32 %v9430_v4, %v8609_v16 }
0x16e6   :  { %v8604_v8 = vsel %vm8603_vm13, %v8594_v30, %v8602_v2  ;;  %v8611_v0 = vmul.f32 0.5, %v8610_v34 }
0x16e7   :  { %v8607_v63 = vsel %vm8605_vm11, %v8606_v14, %v8604_v8 }
0x16e8   :  { %9431 = vrcp.f32 %v8607_v63  ;;  %v8612_v24 = vsub.f32 1.5, %v8611_v0  ;;  %v8631_v41 = vand.u32 2147483648, %v8607_v63  ;;  %v8629_v3 = vand.u32 2147483647, %v8607_v63 }
0x16e9   :  { %vm8625_vm15 = vweird.f32 %v8607_v63 }
0x16ea   :  { %v8613_v49 = vmul.f32 %v9430_v4, %v8612_v24  ;;  %v8632_v29 = vor.u32 1.1754944e-38, %v8631_v41  ;;  %vm8630_vm3 = vcmp.eq.f32.partialorder %v8629_v3, 8.507059e+37 }
0x16ec   :  { %v8614_v36 = vmul.f32 %v8613_v49, %v8595_v6 }
0x16ee   :  { %v9432_v37 = vpop.eup %9431  ;;  %v8616_v38 = vsel %vm8615_vm5, %v8595_v6, %v8614_v36  ;;  %v9297_v6 = vld [vmem:[%s10814_s2 + $0x21] ss:$0 sm:$0xff] }
0x16ef   :  { %v8621_v20 = vmul.f32 %v9432_v37, %v8607_v63  ;;  %v8619_v43 = vsel %vm8617_vm12, %v8618_v58, %v8616_v38  ;;  %vm8626_vm14 = vweird.f32 %v9432_v37 }
0x16f0   :  { %9433 = vrcp.f32 %v8619_v43  ;;  %vm8627_vm2 = vmor %vm8625_vm15, %vm8626_vm14  ;;  %v8646_v21 = vand.u32 2147483648, %v8619_v43  ;;  %v8644_v53 = vand.u32 2147483647, %v8619_v43  ;;  %vm8640_vm6 = vweird.f32 %v8619_v43 }
0x16f1   :  { %v8622_v18 = vsub.f32 1.0, %v8621_v20 }
0x16f2   :  { %v8647_v15 = vor.u32 1.1754944e-38, %v8646_v21  ;;  %vm8645_vm8 = vcmp.eq.f32.partialorder %v8644_v53, 8.507059e+37  ;;  %v8983_v53 = vld [vmem:[%s10813_s1 + $0x1c0] sm:$0xff] }
0x16f3   :  { %v8623_v35 = vmul.f32 %v9432_v37, %v8622_v18 }
0x16f5   :  { %v8624_v59 = vadd.f32 %v9432_v37, %v8623_v35 }
0x16f6   :  { %v9434_v10 = vpop.eup %9433 }
0x16f7   :  { %v8628_v19 = vsel %vm8627_vm2, %v9432_v37, %v8624_v59  ;;  %v8636_v17 = vmul.f32 %v9434_v10, %v8619_v43  ;;  %vm8641_vm4 = vweird.f32 %v9434_v10 }
0x16f8   :  { %v8633_v39 = vsel %vm8630_vm3, %v8632_v29, %v8628_v19  ;;  %vm8642_vm7 = vmor %vm8640_vm6, %vm8641_vm4 }
0x16f9   :  { %v8634_v45 = vmul.f32 %v8633_v39, %v10703_v32  ;;  %v8637_v48 = vsub.f32 1.0, %v8636_v17 }
0x16fb   :  { %v8651_v47 = vmul.f32 %v9295_v50, %v8634_v45  ;;  %v8638_v51 = vmul.f32 %v9434_v10, %v8637_v48 }
0x16fd   :  { %v8654_v40 = vadd.f32 %v9296_v46, %v8651_v47  ;;  %v8639_v30 = vadd.f32 %v9434_v10, %v8638_v51  ;;  %v8985_v47 = vld [vmem:[%s10813_s1 + $0x1d0] sm:$0xff]  ;;  %v8984_v51 = vld [vmem:[%s10813_s1 + $0x1c8] sm:$0xff] }
0x16ff   :  { %v8663_v57 = vsel %vm237_vm1, %v8654_v40, 0  ;;  %v8643_v54 = vsel %vm8642_vm7, %v9434_v10, %v8639_v30  ;;  %v9006_v40 = vand.u32 4294901760, %v8985_v47  ;;  %v9008_v30 = vand.u32 4294901760, %v8984_v51 }
0x1700   :  { %v8688_v32 = vand.u32 4294901760, %v8663_v57  ;;  %v8648_v56 = vsel %vm8645_vm8, %v8647_v15, %v8643_v54  ;;  %v10773_v15 = vand.u32 4294901760, %v8983_v53 }
0x1701   :  { %v8649_v26 = vmul.f32 %v8648_v56, %v10709_v23  ;;  %v9044_v54 = vsub.f32 %v8985_v47, %v9006_v40  ;;  %9007 = vmatpush.msra.mxu0 %v9006_v40 }
0x1702   :  { %8742 = vmatmul.f32.vlgmr.msrb.gmra.mxu3 %v8688_v32  ;;  %v8689_v22 = vsub.f32 %v8663_v57, %v8688_v32  ;;  %v8982_v57 = vld [vmem:[%s10813_s1 + $0x1b8] sm:$0xff]  ;;  %v9056_v56 = vsub.f32 %v8983_v53, %v10773_v15 }
0x1703   :  { %v8652_v62 = vmul.f32 %v9295_v50, %v8649_v26  ;;  %9124 = vmatpush.msrb.mxu3 %v9006_v40  ;;  %v9012_v26 = vand.u32 4294901760, %v8982_v57  ;;  %9009 = vmatpush.msra.mxu0 %v9008_v30 }
0x1704   :  { %8776 = vmatmul.f32.vlgmr.msrb.gmra.mxu0 %v8689_v22  ;;  %v8690_v31 = vand.u32 4294901760, %v8689_v22 }
0x1705   :  { %v8655_v44 = vadd.f32 %v9296_v46, %v8652_v62  ;;  %v9045_v62 = vand.u32 4294901760, %v9044_v54  ;;  %9126 = vmatpush.msrb.mxu3 %v9008_v30  ;;  %9011 = vmatpush.msra.mxu0 %v10773_v15 }
0x1706   :  { %8808 = vmatmul.f32.vlgmr.msrb.gmra.mxu1 %v8690_v31  ;;  %v8691_v33 = vsub.f32 %v8689_v22, %v8690_v31 }
0x1707   :  { %v8666_v55 = vsel %vm237_vm1, %v8655_v44, 0  ;;  %v9057_v44 = vand.u32 4294901760, %v9056_v56  ;;  %9128 = vmatpush.msrb.mxu3 %v10773_v15  ;;  %9013 = vmatpush.msra.mxu0 %v9012_v26 }
0x1708   :  { %v8692_v42 = vand.u32 4294901760, %v8691_v33  ;;  %v8696_v28 = vand.u32 4294901760, %v8666_v55  ;;  %v9062_v33 = vsub.f32 %v8982_v57, %v9012_v26 }
0x1709   :  { %9130 = vmatpush.msrb.mxu3 %v9012_v26  ;;  %9159 = vmatpush.msrb.mxu0 %v9045_v62 }
0x170a   :  { %8693 = vmatmul.f32.vlgmr.msrb.gmra.mxu2 %v8692_v42  ;;  %8746 = vmatmul.f32.gmra.mxu3 %v8696_v28  ;;  %v8697_v7 = vsub.f32 %v8666_v55, %v8696_v28  ;;  %v9046_v42 = vsub.f32 %v9044_v54, %v9045_v62 }
0x170b   :  { %9090 = vmatpush.msrb.mxu2 %v9044_v54 }
0x170c   :  { %8781 = vmatmul.f32.gmra.mxu0 %v8697_v7  ;;  %v8698_v60 = vand.u32 4294901760, %v8697_v7 }
0x170e   :  { %8814 = vmatmul.f32.gmra.mxu1 %v8698_v60  ;;  %v8699_v9 = vsub.f32 %v8697_v7, %v8698_v60  ;;  %v9058_v7 = vsub.f32 %v9056_v56, %v9057_v44  ;;  %v9063_v60 = vand.u32 4294901760, %v9062_v33 }
0x1710   :  { %v8700_v23 = vand.u32 4294901760, %v8699_v9 }
0x1712   :  { %8701 = vmatmul.f32.gmra.mxu2 %v8700_v23  ;;  %8876 = vmatmul.f32.vlgmr.msra.gmra.mxu3 %v8688_v32 }
0x171a   :  { %8847 = vmatmul.f32.vlgmr.msra.gmra.mxu2 %v8688_v32  ;;  %8880 = vmatmul.f32.gmra.mxu3 %v8696_v28  ;;  %v9050_v32 = vsub.f32 %v8984_v51, %v9008_v30 }
0x171c   :  { %v9051_v31 = vand.u32 4294901760, %v9050_v32  ;;  %9093 = vmatpush.msrb.mxu2 %v9050_v32 }
0x171e   :  { %9096 = vmatpush.msrb.mxu2 %v9056_v56  ;;  %9163 = vmatpush.msrb.mxu0 %v9051_v31 }
0x1720   :  { %9099 = vmatpush.msrb.mxu2 %v9062_v33  ;;  %9167 = vmatpush.msrb.mxu0 %v9057_v44 }
0x1722   :  { %8851 = vmatmul.f32.gmra.mxu2 %v8696_v28  ;;  %v9052_v28 = vsub.f32 %v9050_v32, %v9051_v31  ;;  %9171 = vmatpush.msrb.mxu0 %v9063_v60 }
0x1781   :  { %v8777_v13 = vpop.f32.mrf.mxu0 }
0x1783   :  { %v8809_v16 = vpop.f32.mrf.mxu1 }
0x1785   :  { %v8743_v61 = vpop.f32.mrf.mxu3 }
0x1789   :  { %v8782_v63 = vpop.f32.mrf.mxu0 }
0x178b   :  { %v8815_v58 = vpop.f32.mrf.mxu1 }
0x178d   :  { %v8694_v27 = vpop.f32.mrf.mxu2  ;;  %v8747_v5 = vpop.f32.mrf.mxu3 }
0x178e   :  { %v8695_v11 = vadd.f32 %v9297_v6, %v8694_v27  ;;  %v9053_v27 = vand.u32 4294901760, %v9052_v28 }
0x1790   :  { %v8744_v12 = vadd.f32 %v8743_v61, %v8695_v11  ;;  %v9059_v11 = vand.u32 4294901760, %v9058_v7 }
0x1792   :  { %v8778_v25 = vadd.f32 %v8777_v13, %v8744_v12 }
0x1794   :  { %v8810_v34 = vadd.f32 %v8809_v16, %v8778_v25 }
0x1795   :  { %v8702_v52 = vpop.f32.mrf.mxu2  ;;  %v8877_v14 = vpop.f32.mrf.mxu3 }
0x1796   :  { %v8703_v4 = vadd.f32 %v9297_v6, %v8702_v52  ;;  %v9047_v6 = vand.u32 4294901760, %v9046_v42 }
0x1798   :  { %v8748_v2 = vadd.f32 %v8747_v5, %v8703_v4  ;;  %9048 = vmatpush.msra.mxu1 %v9047_v6  ;;  %v9064_v5 = vsub.f32 %v9062_v33, %v9063_v60 }
0x179a   :  { %v8783_v49 = vadd.f32 %v8782_v63, %v8748_v2  ;;  %9054 = vmatpush.msra.mxu1 %v9053_v27  ;;  %v9065_v13 = vand.u32 4294901760, %v9064_v5 }
0x179c   :  { %v8816_v37 = vadd.f32 %v8815_v58, %v8783_v49  ;;  %9060 = vmatpush.msra.mxu1 %v9059_v11 }
0x179d   :  { %v8848_v8 = vpop.f32.mrf.mxu2  ;;  %v8881_v43 = vpop.f32.mrf.mxu3 }
0x179e   :  { %v8849_v0 = vadd.f32 %v8848_v8, %v8810_v34  ;;  %9066 = vmatpush.msra.mxu1 %v9065_v13 }
0x17a0   :  { %v8878_v24 = vadd.f32 %v8877_v14, %v8849_v0  ;;  %9194 = vmatpush.msrb.mxu1 %v9006_v40 }
0x17a2   :  { %v8886_v36 = vsel %vm237_vm1, %v8878_v24, 0.0  ;;  %9196 = vmatpush.msrb.mxu1 %v9008_v30 }
0x17a3   :  { %8887 = vadd.xlane.f32.xlu0 %v8886_v36 }
0x17a4   :  { %9198 = vmatpush.msrb.mxu1 %v10773_v15 }
0x17a5   :  { %v8852_v38 = vpop.f32.mrf.mxu2 }
0x17a6   :  { %v8853_v20 = vadd.f32 %v8852_v38, %v8816_v37  ;;  %9200 = vmatpush.msrb.mxu1 %v9012_v26 }
0x17a8   :  { %v8882_v18 = vadd.f32 %v8881_v43, %v8853_v20 }
0x17aa   :  { %v8889_v41 = vsel %vm237_vm1, %v8882_v18, 0.0 }
0x17ab   :  { %8890 = vadd.xlane.f32.xlu1 %v8889_v41 }
0x1816   :  { %v8888_v35 = vpop.xlane.xlu0 %8887 }
0x1817   :  { %v8892_v3 = vmul.f32 %v8888_v35, %v9558_v1 }
0x1819   :  { %v10750_v59 = vsub.f32 %v8878_v24, %v8892_v3 }
0x181b   :  { %v8896_v10 = vmul.f32 %v10750_v59, %v10750_v59 }
0x181d   :  { %v8898_v29 = vsel %vm237_vm1, %v8896_v10, 0.0 }
0x181e   :  { %v8891_v19 = vpop.xlane.xlu1 %8890  ;;  %8899 = vadd.xlane.f32.xlu2 %v8898_v29 }
0x181f   :  { %v8893_v50 = vmul.f32 %v8891_v19, %v9558_v1 }
0x1821   :  { %v10756_v17 = vsub.f32 %v8882_v18, %v8893_v50 }
0x1823   :  { %v8897_v39 = vmul.f32 %v10756_v17, %v10756_v17 }
0x1825   :  { %v8901_v45 = vsel %vm237_vm1, %v8897_v39, 0.0  ;;  %v9298_v39 = vld [vmem:[%s10814_s2 + $0x22] ss:$0 sm:$0xff] }
0x1826   :  { %8902 = vadd.xlane.f32.xlu0 %v8901_v45 }
0x1891   :  { %v8900_v46 = vpop.xlane.xlu2 %8899 }
0x1892   :  { %v8904_v48 = vmul.f32 %v8900_v46, %v9558_v1 }
0x1894   :  { %v10762_v21 = vadd.f32 1e-05, %v8904_v48 }
0x1896   :  { %9435 = vrsqrt.f32 %v10762_v21  ;;  %vm8915_vm9 = vcmp.eq.f32.partialorder %v10762_v21, inf  ;;  %v8918_v14 = vand.u32 2147483648, %v10762_v21  ;;  %vm8917_vm10 = vcmp.eq.f32.partialorder %v10762_v21, 0.0 }
0x1899   :  { %v8903_v22 = vpop.xlane.xlu0 %8902 }
0x189a   :  { %v8905_v55 = vmul.f32 %v8903_v22, %v9558_v1 }
0x189c   :  { %v9436_v9 = vpop.eup %9435  ;;  %v8907_v23 = vadd.f32 1e-05, %v8905_v55 }
0x189d   :  { %v8909_v61 = vmul.f32 %v9436_v9, %v10762_v21 }
0x189e   :  { %9437 = vrsqrt.f32 %v8907_v23  ;;  %vm8927_vm13 = vcmp.eq.f32.partialorder %v8907_v23, inf  ;;  %v8930_v58 = vand.u32 2147483648, %v8907_v23  ;;  %vm8929_vm11 = vcmp.eq.f32.partialorder %v8907_v23, 0.0 }
0x189f   :  { %v8910_v1 = vmul.f32 %v9436_v9, %v8909_v61 }
0x18a1   :  { %v8911_v12 = vmul.f32 0.5, %v8910_v1 }
0x18a3   :  { %v8912_v52 = vsub.f32 1.5, %v8911_v12 }
0x18a4   :  { %v9438_v4 = vpop.eup %9437 }
0x18a5   :  { %v8913_v25 = vmul.f32 %v9436_v9, %v8912_v52  ;;  %v8921_v16 = vmul.f32 %v9438_v4, %v8907_v23 }
0x18a7   :  { %v8914_v2 = vmul.f32 %v8913_v25, %v10762_v21  ;;  %v8922_v34 = vmul.f32 %v9438_v4, %v8921_v16 }
0x18a9   :  { %v8916_v8 = vsel %vm8915_vm9, %v10762_v21, %v8914_v2  ;;  %v8923_v0 = vmul.f32 0.5, %v8922_v34  ;;  %v9299_v21 = vld [vmem:[%s10814_s2 + $0x23] ss:$0 sm:$0xff]  ;;  %v9300_v34 = vld [vmem:[%s10814_s2 + $0x24] ss:$0 sm:$0xff]  ;;  %s9509_s2 = smov [#allocation4]  }
0x18aa   :  { %v8919_v63 = vsel %vm8917_vm10, %v8918_v14, %v8916_v8  ;;  %s9227_s3 = sshll.u32 %s9509_s2, 4  ;;  %s9228_s3 = int_to_ptr.vmem [resolvable:$true] %s9227_s3 }
0x18ab   :  { %9439 = vrcp.f32 %v8919_v63  ;;  %v8924_v24 = vsub.f32 1.5, %v8923_v0  ;;  %v8943_v41 = vand.u32 2147483648, %v8919_v63  ;;  %v8941_v3 = vand.u32 2147483647, %v8919_v63 }
0x18ac   :  { %vm8937_vm12 = vweird.f32 %v8919_v63 }
0x18ad   :  { %v8925_v49 = vmul.f32 %v9438_v4, %v8924_v24  ;;  %v8944_v19 = vor.u32 1.1754944e-38, %v8943_v41  ;;  %vm8942_vm15 = vcmp.eq.f32.partialorder %v8941_v3, 8.507059e+37 }
0x18af   :  { %v8926_v36 = vmul.f32 %v8925_v49, %v8907_v23 }
0x18b1   :  { %v9440_v37 = vpop.eup %9439  ;;  %v8928_v38 = vsel %vm8927_vm13, %v8907_v23, %v8926_v36 }
0x18b2   :  { %v8933_v20 = vmul.f32 %v9440_v37, %v8919_v63  ;;  %v8931_v43 = vsel %vm8929_vm11, %v8930_v58, %v8928_v38  ;;  %vm8938_vm5 = vweird.f32 %v9440_v37 }
0x18b3   :  { %9441 = vrcp.f32 %v8931_v43  ;;  %vm8939_vm14 = vmor %vm8937_vm12, %vm8938_vm5  ;;  %v8958_v51 = vand.u32 2147483648, %v8931_v43  ;;  %v8956_v30 = vand.u32 2147483647, %v8931_v43  ;;  %vm8952_vm3 = vweird.f32 %v8931_v43 }
0x18b4   :  { %v8934_v18 = vsub.f32 1.0, %v8933_v20 }
0x18b5   :  { %v8959_v54 = vor.u32 1.1754944e-38, %v8958_v51  ;;  %vm8957_vm6 = vcmp.eq.f32.partialorder %v8956_v30, 8.507059e+37 }
0x18b6   :  { %v8935_v35 = vmul.f32 %v9440_v37, %v8934_v18 }
0x18b8   :  { %v8936_v10 = vadd.f32 %v9440_v37, %v8935_v35 }
0x18b9   :  { %v9442_v29 = vpop.eup %9441 }
0x18ba   :  { %v8940_v50 = vsel %vm8939_vm14, %v9440_v37, %v8936_v10  ;;  %v8948_v45 = vmul.f32 %v9442_v29, %v8931_v43  ;;  %vm8953_vm2 = vweird.f32 %v9442_v29 }
0x18bb   :  { %v8945_v46 = vsel %vm8942_vm15, %v8944_v19, %v8940_v50  ;;  %vm8954_vm4 = vmor %vm8952_vm3, %vm8953_vm2 }
0x18bc   :  { %v8946_v48 = vmul.f32 %v8945_v46, %v10750_v59  ;;  %v8949_v47 = vsub.f32 1.0, %v8948_v45 }
0x18be   :  { %v8963_v53 = vmul.f32 %v9298_v39, %v8946_v48  ;;  %v8950_v40 = vmul.f32 %v9442_v29, %v8949_v47 }
0x18c0   :  { %v8966_v15 = vadd.f32 %v9299_v21, %v8963_v53  ;;  %v8951_v57 = vadd.f32 %v9442_v29, %v8950_v40 }
0x18c2   :  { %v8970_v32 = vmul.f32 1.442695, %v8966_v15  ;;  %v8955_v56 = vsel %vm8954_vm4, %v9442_v29, %v8951_v57  ;;  %vm8968_vm7 = vcmp.gt.f32.partialorder %v8966_v15, 0.0 }
0x18c3   :  { %v8960_v26 = vsel %vm8957_vm6, %v8959_v54, %v8955_v56 }
0x18c4   :  { %9443 = vpow2.f32 %v8970_v32  ;;  %v8961_v59 = vmul.f32 %v8960_v26, %v10756_v17 }
0x18c6   :  { %v8964_v22 = vmul.f32 %v9298_v39, %v8961_v59 }
0x18c8   :  { %v8967_v62 = vadd.f32 %v9299_v21, %v8964_v22 }
0x18ca   :  { %v9444_v31 = vpop.eup %9443  ;;  %v8972_v44 = vmul.f32 1.442695, %v8967_v62  ;;  %vm8969_vm8 = vcmp.gt.f32.partialorder %v8967_v62, 0.0 }
0x18cb   :  { %v9252_v33 = vadd.f32 -1.0, %v9444_v31 }
0x18cc   :  { %9445 = vpow2.f32 %v8972_v44 }
0x18cd   :  { %v8976_v55 = vmul.f32 1.6732632, %v9252_v33 }
0x18cf   :  { %v8978_v42 = vsel %vm8968_vm7, %v8966_v15, %v8976_v55 }
0x18d0   :  { %v8980_v28 = vmul.f32 1.050701, %v8978_v42 }
0x18d2   :  { %v9446_v7 = vpop.eup %9445  ;;  %v8989_v60 = vsel %vm237_vm1, %v8980_v28, 0 }
0x18d3   :  { %v9014_v9 = vand.u32 4294901760, %v8989_v60  ;;  %v9253_v23 = vadd.f32 -1.0, %v9446_v7 }
0x18d5   :  { %9068 = vmatmul.f32.vlgmr.msra.gmra.mxu1 %v9014_v9  ;;  %v9015_v61 = vsub.f32 %v8989_v60, %v9014_v9  ;;  %v8977_v6 = vmul.f32 1.6732632, %v9253_v23 }
0x18d7   :  { %9102 = vmatmul.f32.vlgmr.msrb.gmra.mxu2 %v9015_v61  ;;  %v9016_v17 = vand.u32 4294901760, %v9015_v61  ;;  %v8979_v27 = vsel %vm8969_vm8, %v8967_v62, %v8977_v6 }
0x18d8   :  { %v8981_v1 = vmul.f32 1.050701, %v8979_v27 }
0x18d9   :  { %9134 = vmatmul.f32.vlgmr.msrb.gmra.mxu3 %v9016_v17  ;;  %v9017_v11 = vsub.f32 %v9015_v61, %v9016_v17 }
0x18da   :  { %v8992_v5 = vsel %vm237_vm1, %v8981_v1, 0 }
0x18db   :  { %v9018_v12 = vand.u32 4294901760, %v9017_v11  ;;  %v9022_v13 = vand.u32 4294901760, %v8992_v5 }
0x18dd   :  { %9019 = vmatmul.f32.vlgmr.msra.gmra.mxu0 %v9018_v12  ;;  %9072 = vmatmul.f32.gmra.mxu1 %v9022_v13  ;;  %v9023_v52 = vsub.f32 %v8992_v5, %v9022_v13 }
0x18df   :  { %9107 = vmatmul.f32.gmra.mxu2 %v9023_v52  ;;  %v9024_v4 = vand.u32 4294901760, %v9023_v52 }
0x18e1   :  { %9140 = vmatmul.f32.gmra.mxu3 %v9024_v4  ;;  %v9025_v25 = vsub.f32 %v9023_v52, %v9024_v4 }
0x18e3   :  { %v9026_v16 = vand.u32 4294901760, %v9025_v25 }
0x18e5   :  { %9027 = vmatmul.f32.gmra.mxu0 %v9026_v16  ;;  %9202 = vmatmul.f32.vlgmr.msrb.gmra.mxu1 %v9014_v9 }
0x18ed   :  { %9173 = vmatmul.f32.vlgmr.msrb.gmra.mxu0 %v9014_v9  ;;  %9206 = vmatmul.f32.gmra.mxu1 %v9022_v13 }
0x18f5   :  { %9177 = vmatmul.f32.gmra.mxu0 %v9022_v13 }
0x1952   :  { %v9069_v2 = vpop.f32.mrf.mxu1 }
0x195a   :  { %v9020_v14 = vpop.f32.mrf.mxu0  ;;  %v9073_v0 = vpop.f32.mrf.mxu1 }
0x195b   :  { %v9021_v8 = vadd.f32 %v9300_v34, %v9020_v14  ;;  %v9103_v24 = vpop.f32.mrf.mxu2 }
0x195c   :  { %v9135_v37 = vpop.f32.mrf.mxu3 }
0x195d   :  { %v9070_v63 = vadd.f32 %v9069_v2, %v9021_v8 }
0x195f   :  { %v9104_v36 = vadd.f32 %v9103_v24, %v9070_v63 }
0x1961   :  { %v9136_v38 = vadd.f32 %v9135_v37, %v9104_v36 }
0x1962   :  { %v9028_v49 = vpop.f32.mrf.mxu0  ;;  %v9203_v43 = vpop.f32.mrf.mxu1 }
0x1963   :  { %v9029_v58 = vadd.f32 %v9300_v34, %v9028_v49  ;;  %v9108_v35 = vpop.f32.mrf.mxu2 }
0x1964   :  { %v9141_v29 = vpop.f32.mrf.mxu3 }
0x1965   :  { %v9074_v20 = vadd.f32 %v9073_v0, %v9029_v58 }
0x1967   :  { %v9109_v3 = vadd.f32 %v9108_v35, %v9074_v20 }
0x1969   :  { %v9142_v19 = vadd.f32 %v9141_v29, %v9109_v3 }
0x196a   :  { %v9174_v18 = vpop.f32.mrf.mxu0  ;;  %v9207_v45 = vpop.f32.mrf.mxu1 }
0x196b   :  { %v9175_v41 = vadd.f32 %v9174_v18, %v9136_v38 }
0x196d   :  { %v9204_v10 = vadd.f32 %v9203_v43, %v9175_v41 }
0x196f   :  { %9210 = vst.msk [vmem:[#allocation4] sm:$0xff] %vm25_vm0, %v9204_v10 }
0x1972   :  { %v9178_v50 = vpop.f32.mrf.mxu0 }
0x1973   :  { %v9179_v39 = vadd.f32 %v9178_v50, %v9142_v19 }
0x1975   :  { %v9208_v46 = vadd.f32 %v9207_v45, %v9179_v39 }
0x1977   :  { %9211 = vst.msk [vmem:[#allocation4 + $0x8] sm:$0xff] %vm25_vm0, %v9208_v46 }
0x1978   :  { %9235 = dma.vmem_to_hbm [thread:$0]  %s9228_s3, 256, %s9230_s14, [#allocation5], %s9510_s15, %s9510_s15, %s9505_s22  }
0x1979   :  { %9495 = dma.done.wait [#allocation3], 32  }
0x197a   :  { %9496 = vsyncadd [#allocation3], 4294967264 }
0x197b   :  { %9497 = dma.done.wait [#allocation5], 256  }
0x197c   :  { %9498 = vsyncadd [#allocation5], 4294967040 }
0x197d   :  { %9244 = vsyncpa [#allocation3], 1 }
0x197e   :  { %9245 = vsyncpa [#allocation5], 1 }

</bundles_post_ra>
